<compile_context>
chip_gen: v6e
topology: v6e:2x2x1
jax: 0.10.0
libtpu: 0.0.40
codegen_flags: <defaults>
</compile_context>

<pallas_src>
import jax
import jax.numpy as jnp
from jax.experimental import pallas as pl
from jax.experimental.pallas import tpu as pltpu

NEG_SLOPE = 0.1
BN_EPS = 1e-5
HID = 256                  # hidden width of the res-skip discriminator
L7_K = HID * HID           # contraction length of the layer7 Bilinear (65536)
TI = 32                    # x7 columns handled per grid step
N_STEPS = HID // TI        # 8 grid steps over the layer7 weight (2 MiB int8 per tile)

# row indices into the stacked (13, 256, 256) Linear-weight array
(W_1A, W_1B, W_2A, W_2B, W_3A, W_3B, W_4A, W_4B,
 W_6A, W_6B, W_8A, W_8B, W_9A) = range(13)
# row indices into the stacked (19, 1, 256) bias / BN-affine / b7 / w7-scale array
(B_BB, B_1A, B_BNG, B_BNB, B_1B, B_2A, B_2B, B_3A, B_3B, B_4A, B_4B,
 B_5C, B_6A, B_6B, B_7, B_W7S, B_8A, B_8B, B_9A) = range(19)


# ----------------------------- in-kernel helpers -----------------------------
def _leaky(x):
    return jnp.where(x > 0, x, NEG_SLOPE * x)


def _sigmoid(x):
    # numerically stable logistic: exp() only ever sees non-positive arguments (EUP op).
    e = jnp.exp(-jnp.abs(x))
    return jnp.where(x >= 0, 1.0 / (1.0 + e), e / (1.0 + e))


def _elu(x):
    return jnp.where(x > 0, x, jnp.exp(jnp.minimum(x, 0.0)) - 1.0)


# ------------------------------ fused kernel ---------------------------------
def _disc_kernel(o_in_ref, mask_ref, wb_ref, wstk_ref, bstk_ref,
                 w5a_ref, b5a_ref, w5b_ref, b5b_ref, w5c_ref,
                 w9b_ref, b9b_ref, w7_ref,
                 out_ref,
                 a1bf_s, skip_s, x7g_s, acc_s):
    m = pl.program_id(0)

    def lin(x, kw, kb):
        # Linear through the stacked weight / bias arrays (static leading-dim indices).
        return (jnp.dot(x, wstk_ref[kw], preferred_element_type=jnp.float32)
                + bstk_ref[kb])

    # ------------- front: layer0..layer6 (runs once, on the first grid step) -----------
    @pl.when(m == 0)
    def _front():
        mask = mask_ref[...]                           # (B, 1): 1 = real row, 0 = padding
        nb = jnp.sum(mask)

        # layer0: input Bilinear (flattened outer product @ W) + LeakyReLU
        a1 = _leaky(jnp.dot(o_in_ref[...], wb_ref[...],
                            preferred_element_type=jnp.float32) + bstk_ref[B_BB])

        # layer1: Linear, LeakyReLU, BatchNorm1d (training-mode stats over real rows),
        #         Sigmoid, Linear, Sigmoid
        h = _leaky(lin(a1, W_1A, B_1A))
        mu = jnp.sum(h * mask, axis=0, keepdims=True) / nb
        var = jnp.sum(((h - mu) ** 2) * mask, axis=0, keepdims=True) / nb
        h = (h - mu) * jax.lax.rsqrt(var + BN_EPS) * bstk_ref[B_BNG] + bstk_ref[B_BNB]
        a2 = _sigmoid(lin(_sigmoid(h), W_1B, B_1B))

        # layer2 / layer3 (the second definition in __init__ wins) / layer4
        h = _leaky(lin(a2 + a1, W_2A, B_2A))
        a3 = _leaky(lin(h, W_2B, B_2B))
        h = _leaky(lin(a3 + a2 + a1, W_3A, B_3A))
        a4 = _leaky(lin(h, W_3B, B_3B))
        h = _elu(lin(a4 + a3 + a2 + a1, W_4A, B_4A))
        a5 = _leaky(lin(h, W_4B, B_4B))

        # layer5: 256 -> 4 -> 1024 -> 256, LeakyReLU after each
        h = _leaky(jnp.dot(a5 + a4 + a2 + a1, w5a_ref[...],
                           preferred_element_type=jnp.float32) + b5a_ref[...])
        h = _leaky(jnp.dot(h, w5b_ref[...],
                           preferred_element_type=jnp.float32) + b5b_ref[...])
        a6 = _leaky(jnp.dot(h, w5c_ref[...],
                            preferred_element_type=jnp.float32) + bstk_ref[B_5C])

        # layer6: two Linears, no activation
        a7 = lin(lin(a6 + a5 + a2 + a1, W_6A, B_6A), W_6B, B_6B)

        x7 = a7 + a6 + a2 + a1                  # first operand of layer7's Bilinear
        a1bf_s[...] = a1.astype(jnp.bfloat16)   # second operand (bf16 MXU LHS)
        skip_s[...] = a7 + a2 + a1              # residual added to a8 before layer8
        # Stash x7 as (step, B, TI) column groups: each grid step fetches its slice with
        # a well-supported dynamic leading-dim index (no dynamic lane slicing).
        for s in range(N_STEPS):
            x7g_s[s] = x7[:, s * TI:(s + 1) * TI]
        acc_s[...] = jnp.zeros_like(acc_s)

    # ------- layer7 Bilinear: acc += sum_i x7[:, i] * (a1 @ W7[i]) over this tile ------
    # One int8 (TI, 256, 256) tile streamed per step; TI small MXU dots, no o2 slab.
    x7t = x7g_s[m]                                   # (B, TI) f32, this step's columns
    a1bf = a1bf_s[...]                               # (B, HID) bf16
    acc = acc_s[...]
    for i in range(TI):                              # static unroll; static indices only
        wblk = w7_ref[i].astype(jnp.bfloat16)        # int8 -> bf16 upcast (hides under DMA)
        t = jnp.dot(a1bf, wblk, preferred_element_type=jnp.float32)
        acc = acc + x7t[:, i:i + 1] * t              # fold x7 column into the f32 result
    acc_s[...] = acc

    # ------------- tail: layer8 + layer9 (runs once, on the last grid step) ------------
    @pl.when(m == pl.num_programs(0) - 1)
    def _tail():
        # per-output-column int8 dequant scale, then the layer7 bias
        a8 = acc_s[...] * bstk_ref[B_W7S] + bstk_ref[B_7]
        h = _leaky(a8 + skip_s[...])                 # a8 + a7 + a2 + a1, LeakyReLU
        # layer8: LeakyReLU, Linear, LeakyReLU, Linear, LeakyReLU
        h = _leaky(lin(h, W_8A, B_8A))
        a9 = _leaky(lin(h, W_8B, B_8B))
        # layer9: LeakyReLU, Linear(256,256), LeakyReLU, Linear(256,1), Sigmoid
        h = _leaky(lin(_leaky(a9), W_9A, B_9A))
        out_ref[...] = _sigmoid(jnp.dot(h, w9b_ref[...],
                                        preferred_element_type=jnp.float32) + b9b_ref[...])


# --------------------------------- wrapper -----------------------------------
def discriminator_forward(params, sim_out, sim_in):
    p = params
    B = sim_out.shape[0]
    B_pad = ((B + 7) // 8) * 8

    # tiny glue: flattened outer product feeding the input Bilinear (B x in1*in2),
    # padded to a sublane multiple (padding rows are masked out of the BatchNorm stats).
    o_in = (sim_out[:, :, None] * sim_in[:, None, :]).reshape(B, -1)
    o_in = jnp.pad(o_in, ((0, B_pad - B), (0, 0)))
    mask = (jnp.arange(B_pad) < B).astype(jnp.float32)[:, None]

    const_args = [o_in, mask, p['wb'], p['wstack'], p['bstack'],
                  p['w5a'], p['b5a'], p['w5b'], p['b5b'], p['w5c'],
                  p['w9b'], p['b9b']]

    def const_spec(a):
        nd = a.ndim
        return pl.BlockSpec(a.shape, lambda m: (0,) * nd)   # resident, fetched once

    in_specs = ([const_spec(a) for a in const_args]
                # streamed int8 layer7 weight: one (TI, 256, 256) tile per grid step
                + [pl.BlockSpec((TI, HID, HID), lambda m: (m, 0, 0))])

    out = pl.pallas_call(
        _disc_kernel,
        out_shape=jax.ShapeDtypeStruct((B_pad, 1), jnp.float32),
        grid_spec=pltpu.PrefetchScalarGridSpec(
            num_scalar_prefetch=0,
            grid=(N_STEPS,),
            in_specs=in_specs,
            out_specs=pl.BlockSpec((B_pad, 1), lambda m: (0, 0)),
            scratch_shapes=[
                pltpu.VMEM((B_pad, HID), jnp.bfloat16),          # a1 (layer7 MXU LHS)
                pltpu.VMEM((B_pad, HID), jnp.float32),           # skip = a7 + a2 + a1
                pltpu.VMEM((N_STEPS, B_pad, TI), jnp.float32),   # x7 column groups
                pltpu.VMEM((B_pad, HID), jnp.float32),           # layer7 f32 accumulator
            ],
        ),
        compiler_params=pltpu.CompilerParams(
            dimension_semantics=("arbitrary",),
            # ~9 MiB double-buffered constants + 4 MiB streamed w7 buffers + <0.5 MiB
            # scratch; 48 MiB leaves spill headroom and is safe on v5e/v6e/v7x.
            vmem_limit_bytes=48 * 1024 * 1024,
        ),
    )(*(const_args + [p['w7q']]))
    return out[:B]


# ----------------------------- deterministic init ----------------------------
def init_params(key, num_sim_inputs, num_sim_outputs, reverse=False):
    in1 = num_sim_outputs if not reverse else num_sim_inputs
    in2 = num_sim_inputs if not reverse else num_sim_outputs
    keys = iter(jax.random.split(key, 64))

    def w_init(fan_in, fan_out):
        return (jax.random.normal(next(keys), (fan_in, fan_out), jnp.float32)
                / jnp.sqrt(float(fan_in)))

    def b_init(fan_out):
        return jax.random.normal(next(keys), (1, fan_out), jnp.float32) * 0.01

    p = {}
    # layer0 input Bilinear: torch (out, in1, in2) flattened i-major to (in1*in2, out)
    p['wb'] = w_init(in1 * in2, HID)
    bb = b_init(HID)

    w1a, b1a = w_init(HID, HID), b_init(HID)
    bn_g = jnp.ones((1, HID), jnp.float32)
    bn_b = jnp.zeros((1, HID), jnp.float32)
    w1b, b1b = w_init(HID, HID), b_init(HID)
    w2a, b2a = w_init(HID, HID), b_init(HID)
    w2b, b2b = w_init(HID, HID), b_init(HID)
    w3a, b3a = w_init(HID, HID), b_init(HID)
    w3b, b3b = w_init(HID, HID), b_init(HID)
    w4a, b4a = w_init(HID, HID), b_init(HID)
    w4b, b4b = w_init(HID, HID), b_init(HID)
    p['w5a'], p['b5a'] = w_init(HID, 4), b_init(4)
    p['w5b'], p['b5b'] = w_init(4, 1024), b_init(1024)
    p['w5c'] = w_init(1024, HID)
    b5c = b_init(HID)
    w6a, b6a = w_init(HID, HID), b_init(HID)
    w6b, b6b = w_init(HID, HID), b_init(HID)

    # layer7 Bilinear(256,256,256): torch weight (out, in1, in2) stored here as
    # w7[i, j, n] = W[n, i, j] and quantised to int8 with one f32 scale per output
    # column n (the only bandwidth-relevant tensor: 16 MiB streamed per call).
    w7 = (jax.random.normal(next(keys), (HID, HID, HID), jnp.float32)
          / jnp.sqrt(float(L7_K)))
    b7 = b_init(HID)
    w7_scale = jnp.maximum(jnp.max(jnp.abs(w7), axis=(0, 1)) / 127.0, 1e-12)
    p['w7q'] = jnp.round(w7 / w7_scale[None, None, :]).astype(jnp.int8)
    w7s = w7_scale[None, :]

    w8a, b8a = w_init(HID, HID), b_init(HID)
    w8b, b8b = w_init(HID, HID), b_init(HID)
    w9a, b9a = w_init(HID, HID), b_init(HID)
    p['w9b'], p['b9b'] = w_init(HID, 1), b_init(1)

    # Collapse the thirteen 256x256 Linear weights and all (1,256) rows into two arrays
    # (fewer step-0 DMA descriptors, shorter kernel signature).  Order matches the
    # W_* / B_* index constants above.
    p['wstack'] = jnp.stack([w1a, w1b, w2a, w2b, w3a, w3b, w4a, w4b,
                             w6a, w6b, w8a, w8b, w9a])                  # (13, 256, 256)
    p['bstack'] = jnp.stack([bb, b1a, bn_g, bn_b, b1b, b2a, b2b, b3a, b3b, b4a, b4b,
                             b5c, b6a, b6b, b7, w7s, b8a, b8b, b9a])    # (19, 1, 256)
    return p


if __name__ == "__main__":
    key = jax.random.PRNGKey(0)
    k1, k2, kp = jax.random.split(key, 3)

    B, num_sim_inputs, num_sim_outputs = 2, 4, 8
    sim_out = jax.random.normal(k1, (B, num_sim_outputs), jnp.float32)
    sim_in = jax.random.normal(k2, (B, num_sim_inputs), jnp.float32)

    params = init_params(kp, num_sim_inputs, num_sim_outputs, reverse=False)

    out = discriminator_forward(params, sim_out, sim_in)
    out = jax.block_until_ready(out)
    assert out.shape == (B, 1)
    assert bool(jnp.all(jnp.isfinite(out)))
    print("KERNEL_OK")
</pallas_src>

<mosaic_0001>
module attributes {stable_mosaic.version = 11 : i64} {
  func.func @_disc_kernel(%arg0: i32, %arg1: memref<8x32xf32, #tpu.memory_space<vmem>>, %arg2: memref<8x1xf32, #tpu.memory_space<vmem>>, %arg3: memref<32x256xf32, #tpu.memory_space<vmem>>, %arg4: memref<13x256x256xf32, #tpu.memory_space<vmem>>, %arg5: memref<19x1x256xf32, #tpu.memory_space<vmem>>, %arg6: memref<256x4xf32, #tpu.memory_space<vmem>>, %arg7: memref<1x4xf32, #tpu.memory_space<vmem>>, %arg8: memref<4x1024xf32, #tpu.memory_space<vmem>>, %arg9: memref<1x1024xf32, #tpu.memory_space<vmem>>, %arg10: memref<1024x256xf32, #tpu.memory_space<vmem>>, %arg11: memref<256x1xf32, #tpu.memory_space<vmem>>, %arg12: memref<1x1xf32, #tpu.memory_space<vmem>>, %arg13: memref<32x256x256xi8, #tpu.memory_space<vmem>>, %arg14: memref<8x1xf32, #tpu.memory_space<vmem>>, %arg15: memref<8x256xbf16, #tpu.memory_space<vmem>>, %arg16: memref<8x256xf32, #tpu.memory_space<vmem>>, %arg17: memref<8x8x32xf32, #tpu.memory_space<vmem>>, %arg18: memref<8x256xf32, #tpu.memory_space<vmem>>) attributes {dimension_semantics = [#tpu.dimension_semantics<arbitrary>], iteration_bounds = array<i64: 8>, scalar_prefetch = 0 : i64, scratch_operands = 4 : i64, tpu.core_type = #tpu.core_type<tc>, window_params = [{pipeline_mode = #tpu.pipeline_mode<synchronous>, transform_indices = @transform_0, window_bounds = array<i64: 8, 32>}, {pipeline_mode = #tpu.pipeline_mode<synchronous>, transform_indices = @transform_1, window_bounds = array<i64: 8, 1>}, {pipeline_mode = #tpu.pipeline_mode<synchronous>, transform_indices = @transform_2, window_bounds = array<i64: 32, 256>}, {pipeline_mode = #tpu.pipeline_mode<synchronous>, transform_indices = @transform_3, window_bounds = array<i64: 13, 256, 256>}, {pipeline_mode = #tpu.pipeline_mode<synchronous>, transform_indices = @transform_4, window_bounds = array<i64: 19, 1, 256>}, {pipeline_mode = #tpu.pipeline_mode<synchronous>, transform_indices = @transform_5, window_bounds = array<i64: 256, 4>}, {pipeline_mode = #tpu.pipeline_mode<synchronous>, transform_indices = @transform_6, window_bounds = array<i64: 1, 4>}, {pipeline_mode = #tpu.pipeline_mode<synchronous>, transform_indices = @transform_7, window_bounds = array<i64: 4, 1024>}, {pipeline_mode = #tpu.pipeline_mode<synchronous>, transform_indices = @transform_8, window_bounds = array<i64: 1, 1024>}, {pipeline_mode = #tpu.pipeline_mode<synchronous>, transform_indices = @transform_9, window_bounds = array<i64: 1024, 256>}, {pipeline_mode = #tpu.pipeline_mode<synchronous>, transform_indices = @transform_10, window_bounds = array<i64: 256, 1>}, {pipeline_mode = #tpu.pipeline_mode<synchronous>, transform_indices = @transform_11, window_bounds = array<i64: 1, 1>}, {transform_indices = @transform_12, window_bounds = array<i64: 32, 256, 256>}, {pipeline_mode = #tpu.pipeline_mode<synchronous>, transform_indices = @transform_13, window_bounds = array<i64: 8, 1>}]} {
    %c0_i32 = arith.constant 0 : i32
    %0 = arith.cmpi eq, %arg0, %c0_i32 : i32
    %1 = arith.extui %0 : i1 to i32
    %c0_i32_0 = arith.constant 0 : i32
    %2 = arith.cmpi ne, %1, %c0_i32_0 : i32
    scf.if %2 {
      %c0_105 = arith.constant 0 : index
      %c0_106 = arith.constant 0 : index
      %268 = vector.load %arg2[%c0_105, %c0_106] : memref<8x1xf32, #tpu.memory_space<vmem>>, vector<8x1xf32>
      %269 = vector.shape_cast %268 : vector<8x1xf32> to vector<1x8x1xf32>
      %cst_107 = arith.constant dense<0.000000e+00> : vector<1xf32>
      %270 = vector.multi_reduction <add>, %269, %cst_107 [1, 2] : vector<1x8x1xf32> to vector<1xf32>
      %271 = vector.shape_cast %270 : vector<1xf32> to vector<1x1x1xf32>
      %272 = vector.extract %271[0, 0, 0] : f32 from vector<1x1x1xf32>
      %c0_108 = arith.constant 0 : index
      %c0_109 = arith.constant 0 : index
      %273 = vector.load %arg1[%c0_108, %c0_109] : memref<8x32xf32, #tpu.memory_space<vmem>>, vector<8x32xf32>
      %c0_110 = arith.constant 0 : index
      %c0_111 = arith.constant 0 : index
      %274 = vector.load %arg3[%c0_110, %c0_111] : memref<32x256xf32, #tpu.memory_space<vmem>>, vector<32x256xf32>
      %cst_112 = arith.constant dense<0.000000e+00> : vector<8x256xf32>
      %275 = tpu.matmul %273, %274, %cst_112 {dimension_numbers = #tpu.dot_dimension_numbers<[1], [0], [0], [1], [0, 0, 1, 1], [], []>} : vector<8x32xf32>, vector<32x256xf32>, vector<8x256xf32> -> vector<8x256xf32>
      %c0_113 = arith.constant 0 : index
      %c0_114 = arith.constant 0 : index
      %c0_115 = arith.constant 0 : index
      %276 = vector.load %arg5[%c0_113, %c0_114, %c0_115] : memref<19x1x256xf32, #tpu.memory_space<vmem>>, vector<1x1x256xf32>
      %277 = vector.shape_cast %276 : vector<1x1x256xf32> to vector<1x256xf32>
      %278 = vector.broadcast %277 : vector<1x256xf32> to vector<8x256xf32>
      %279 = arith.addf %275, %278 : vector<8x256xf32>
      %cst_116 = arith.constant 0.000000e+00 : f32
      %280 = vector.broadcast %cst_116 : f32 to vector<8x256xf32>
      %281 = arith.cmpf ogt, %279, %280 : vector<8x256xf32>
      %cst_117 = arith.constant 1.000000e-01 : f32
      %282 = vector.broadcast %cst_117 : f32 to vector<8x256xf32>
      %283 = arith.mulf %282, %279 : vector<8x256xf32>
      %284 = arith.select %281, %279, %283 : vector<8x256xi1>, vector<8x256xf32>
      %c0_118 = arith.constant 0 : index
      %c0_119 = arith.constant 0 : index
      %c0_120 = arith.constant 0 : index
      %285 = vector.load %arg4[%c0_118, %c0_119, %c0_120] : memref<13x256x256xf32, #tpu.memory_space<vmem>>, vector<1x256x256xf32>
      %286 = vector.shape_cast %285 : vector<1x256x256xf32> to vector<256x256xf32>
      %cst_121 = arith.constant dense<0.000000e+00> : vector<8x256xf32>
      %287 = tpu.matmul %284, %286, %cst_121 {dimension_numbers = #tpu.dot_dimension_numbers<[1], [0], [0], [1], [0, 0, 1, 1], [], []>} : vector<8x256xf32>, vector<256x256xf32>, vector<8x256xf32> -> vector<8x256xf32>
      %c1_122 = arith.constant 1 : index
      %c0_123 = arith.constant 0 : index
      %c0_124 = arith.constant 0 : index
      %288 = vector.load %arg5[%c1_122, %c0_123, %c0_124] : memref<19x1x256xf32, #tpu.memory_space<vmem>>, vector<1x1x256xf32>
      %289 = vector.shape_cast %288 : vector<1x1x256xf32> to vector<1x256xf32>
      %290 = vector.broadcast %289 : vector<1x256xf32> to vector<8x256xf32>
      %291 = arith.addf %287, %290 : vector<8x256xf32>
      %cst_125 = arith.constant 0.000000e+00 : f32
      %292 = vector.broadcast %cst_125 : f32 to vector<8x256xf32>
      %293 = arith.cmpf ogt, %291, %292 : vector<8x256xf32>
      %cst_126 = arith.constant 1.000000e-01 : f32
      %294 = vector.broadcast %cst_126 : f32 to vector<8x256xf32>
      %295 = arith.mulf %294, %291 : vector<8x256xf32>
      %296 = arith.select %293, %291, %295 : vector<8x256xi1>, vector<8x256xf32>
      %297 = vector.broadcast %268 : vector<8x1xf32> to vector<8x256xf32>
      %298 = arith.mulf %296, %297 : vector<8x256xf32>
      %cst_127 = arith.constant dense<0.000000e+00> : vector<256xf32>
      %299 = vector.multi_reduction <add>, %298, %cst_127 [0] : vector<8x256xf32> to vector<256xf32>
      %300 = vector.shape_cast %299 : vector<256xf32> to vector<1x256xf32>
      %301 = vector.broadcast %272 : f32 to vector<1x256xf32>
      %302 = arith.divf %300, %301 : vector<1x256xf32>
      %303 = vector.broadcast %302 : vector<1x256xf32> to vector<8x256xf32>
      %304 = arith.subf %296, %303 : vector<8x256xf32>
      %305 = arith.mulf %304, %304 : vector<8x256xf32>
      %306 = vector.broadcast %268 : vector<8x1xf32> to vector<8x256xf32>
      %307 = arith.mulf %305, %306 : vector<8x256xf32>
      %cst_128 = arith.constant dense<0.000000e+00> : vector<256xf32>
      %308 = vector.multi_reduction <add>, %307, %cst_128 [0] : vector<8x256xf32> to vector<256xf32>
      %309 = vector.shape_cast %308 : vector<256xf32> to vector<1x256xf32>
      %310 = vector.broadcast %272 : f32 to vector<1x256xf32>
      %311 = arith.divf %309, %310 : vector<1x256xf32>
      %312 = vector.broadcast %302 : vector<1x256xf32> to vector<8x256xf32>
      %313 = arith.subf %296, %312 : vector<8x256xf32>
      %cst_129 = arith.constant 9.99999974E-6 : f32
      %314 = vector.broadcast %cst_129 : f32 to vector<1x256xf32>
      %315 = arith.addf %311, %314 : vector<1x256xf32>
      %316 = math.rsqrt %315 : vector<1x256xf32>
      %317 = vector.broadcast %316 : vector<1x256xf32> to vector<8x256xf32>
      %318 = arith.mulf %313, %317 : vector<8x256xf32>
      %c2_130 = arith.constant 2 : index
      %c0_131 = arith.constant 0 : index
      %c0_132 = arith.constant 0 : index
      %319 = vector.load %arg5[%c2_130, %c0_131, %c0_132] : memref<19x1x256xf32, #tpu.memory_space<vmem>>, vector<1x1x256xf32>
      %320 = vector.shape_cast %319 : vector<1x1x256xf32> to vector<1x256xf32>
      %321 = vector.broadcast %320 : vector<1x256xf32> to vector<8x256xf32>
      %322 = arith.mulf %318, %321 : vector<8x256xf32>
      %c3_133 = arith.constant 3 : index
      %c0_134 = arith.constant 0 : index
      %c0_135 = arith.constant 0 : index
      %323 = vector.load %arg5[%c3_133, %c0_134, %c0_135] : memref<19x1x256xf32, #tpu.memory_space<vmem>>, vector<1x1x256xf32>
      %324 = vector.shape_cast %323 : vector<1x1x256xf32> to vector<1x256xf32>
      %325 = vector.broadcast %324 : vector<1x256xf32> to vector<8x256xf32>
      %326 = arith.addf %322, %325 : vector<8x256xf32>
      %327 = math.absf %326 : vector<8x256xf32>
      %cst_136 = arith.constant 0.000000e+00 : f32
      %328 = vector.broadcast %cst_136 : f32 to vector<8x256xf32>
      %329 = arith.subf %328, %327 : vector<8x256xf32>
      %330 = math.exp %329 : vector<8x256xf32>
      %cst_137 = arith.constant 0.000000e+00 : f32
      %331 = vector.broadcast %cst_137 : f32 to vector<8x256xf32>
      %332 = arith.cmpf oge, %326, %331 : vector<8x256xf32>
      %cst_138 = arith.constant 1.000000e+00 : f32
      %333 = vector.broadcast %cst_138 : f32 to vector<8x256xf32>
      %334 = arith.addf %333, %330 : vector<8x256xf32>
      %cst_139 = arith.constant 1.000000e+00 : f32
      %335 = vector.broadcast %cst_139 : f32 to vector<8x256xf32>
      %336 = arith.divf %335, %334 : vector<8x256xf32>
      %cst_140 = arith.constant 1.000000e+00 : f32
      %337 = vector.broadcast %cst_140 : f32 to vector<8x256xf32>
      %338 = arith.addf %337, %330 : vector<8x256xf32>
      %339 = arith.divf %330, %338 : vector<8x256xf32>
      %340 = arith.select %332, %336, %339 : vector<8x256xi1>, vector<8x256xf32>
      %c1_141 = arith.constant 1 : index
      %c0_142 = arith.constant 0 : index
      %c0_143 = arith.constant 0 : index
      %341 = vector.load %arg4[%c1_141, %c0_142, %c0_143] : memref<13x256x256xf32, #tpu.memory_space<vmem>>, vector<1x256x256xf32>
      %342 = vector.shape_cast %341 : vector<1x256x256xf32> to vector<256x256xf32>
      %cst_144 = arith.constant dense<0.000000e+00> : vector<8x256xf32>
      %343 = tpu.matmul %340, %342, %cst_144 {dimension_numbers = #tpu.dot_dimension_numbers<[1], [0], [0], [1], [0, 0, 1, 1], [], []>} : vector<8x256xf32>, vector<256x256xf32>, vector<8x256xf32> -> vector<8x256xf32>
      %c4_145 = arith.constant 4 : index
      %c0_146 = arith.constant 0 : index
      %c0_147 = arith.constant 0 : index
      %344 = vector.load %arg5[%c4_145, %c0_146, %c0_147] : memref<19x1x256xf32, #tpu.memory_space<vmem>>, vector<1x1x256xf32>
      %345 = vector.shape_cast %344 : vector<1x1x256xf32> to vector<1x256xf32>
      %346 = vector.broadcast %345 : vector<1x256xf32> to vector<8x256xf32>
      %347 = arith.addf %343, %346 : vector<8x256xf32>
      %348 = math.absf %347 : vector<8x256xf32>
      %cst_148 = arith.constant 0.000000e+00 : f32
      %349 = vector.broadcast %cst_148 : f32 to vector<8x256xf32>
      %350 = arith.subf %349, %348 : vector<8x256xf32>
      %351 = math.exp %350 : vector<8x256xf32>
      %cst_149 = arith.constant 0.000000e+00 : f32
      %352 = vector.broadcast %cst_149 : f32 to vector<8x256xf32>
      %353 = arith.cmpf oge, %347, %352 : vector<8x256xf32>
      %cst_150 = arith.constant 1.000000e+00 : f32
      %354 = vector.broadcast %cst_150 : f32 to vector<8x256xf32>
      %355 = arith.addf %354, %351 : vector<8x256xf32>
      %cst_151 = arith.constant 1.000000e+00 : f32
      %356 = vector.broadcast %cst_151 : f32 to vector<8x256xf32>
      %357 = arith.divf %356, %355 : vector<8x256xf32>
      %cst_152 = arith.constant 1.000000e+00 : f32
      %358 = vector.broadcast %cst_152 : f32 to vector<8x256xf32>
      %359 = arith.addf %358, %351 : vector<8x256xf32>
      %360 = arith.divf %351, %359 : vector<8x256xf32>
      %361 = arith.select %353, %357, %360 : vector<8x256xi1>, vector<8x256xf32>
      %362 = arith.addf %361, %284 : vector<8x256xf32>
      %c2_153 = arith.constant 2 : index
      %c0_154 = arith.constant 0 : index
      %c0_155 = arith.constant 0 : index
      %363 = vector.load %arg4[%c2_153, %c0_154, %c0_155] : memref<13x256x256xf32, #tpu.memory_space<vmem>>, vector<1x256x256xf32>
      %364 = vector.shape_cast %363 : vector<1x256x256xf32> to vector<256x256xf32>
      %cst_156 = arith.constant dense<0.000000e+00> : vector<8x256xf32>
      %365 = tpu.matmul %362, %364, %cst_156 {dimension_numbers = #tpu.dot_dimension_numbers<[1], [0], [0], [1], [0, 0, 1, 1], [], []>} : vector<8x256xf32>, vector<256x256xf32>, vector<8x256xf32> -> vector<8x256xf32>
      %c5_157 = arith.constant 5 : index
      %c0_158 = arith.constant 0 : index
      %c0_159 = arith.constant 0 : index
      %366 = vector.load %arg5[%c5_157, %c0_158, %c0_159] : memref<19x1x256xf32, #tpu.memory_space<vmem>>, vector<1x1x256xf32>
      %367 = vector.shape_cast %366 : vector<1x1x256xf32> to vector<1x256xf32>
      %368 = vector.broadcast %367 : vector<1x256xf32> to vector<8x256xf32>
      %369 = arith.addf %365, %368 : vector<8x256xf32>
      %cst_160 = arith.constant 0.000000e+00 : f32
      %370 = vector.broadcast %cst_160 : f32 to vector<8x256xf32>
      %371 = arith.cmpf ogt, %369, %370 : vector<8x256xf32>
      %cst_161 = arith.constant 1.000000e-01 : f32
      %372 = vector.broadcast %cst_161 : f32 to vector<8x256xf32>
      %373 = arith.mulf %372, %369 : vector<8x256xf32>
      %374 = arith.select %371, %369, %373 : vector<8x256xi1>, vector<8x256xf32>
      %c3_162 = arith.constant 3 : index
      %c0_163 = arith.constant 0 : index
      %c0_164 = arith.constant 0 : index
      %375 = vector.load %arg4[%c3_162, %c0_163, %c0_164] : memref<13x256x256xf32, #tpu.memory_space<vmem>>, vector<1x256x256xf32>
      %376 = vector.shape_cast %375 : vector<1x256x256xf32> to vector<256x256xf32>
      %cst_165 = arith.constant dense<0.000000e+00> : vector<8x256xf32>
      %377 = tpu.matmul %374, %376, %cst_165 {dimension_numbers = #tpu.dot_dimension_numbers<[1], [0], [0], [1], [0, 0, 1, 1], [], []>} : vector<8x256xf32>, vector<256x256xf32>, vector<8x256xf32> -> vector<8x256xf32>
      %c6_166 = arith.constant 6 : index
      %c0_167 = arith.constant 0 : index
      %c0_168 = arith.constant 0 : index
      %378 = vector.load %arg5[%c6_166, %c0_167, %c0_168] : memref<19x1x256xf32, #tpu.memory_space<vmem>>, vector<1x1x256xf32>
      %379 = vector.shape_cast %378 : vector<1x1x256xf32> to vector<1x256xf32>
      %380 = vector.broadcast %379 : vector<1x256xf32> to vector<8x256xf32>
      %381 = arith.addf %377, %380 : vector<8x256xf32>
      %cst_169 = arith.constant 0.000000e+00 : f32
      %382 = vector.broadcast %cst_169 : f32 to vector<8x256xf32>
      %383 = arith.cmpf ogt, %381, %382 : vector<8x256xf32>
      %cst_170 = arith.constant 1.000000e-01 : f32
      %384 = vector.broadcast %cst_170 : f32 to vector<8x256xf32>
      %385 = arith.mulf %384, %381 : vector<8x256xf32>
      %386 = arith.select %383, %381, %385 : vector<8x256xi1>, vector<8x256xf32>
      %387 = arith.addf %386, %361 : vector<8x256xf32>
      %388 = arith.addf %387, %284 : vector<8x256xf32>
      %c4_171 = arith.constant 4 : index
      %c0_172 = arith.constant 0 : index
      %c0_173 = arith.constant 0 : index
      %389 = vector.load %arg4[%c4_171, %c0_172, %c0_173] : memref<13x256x256xf32, #tpu.memory_space<vmem>>, vector<1x256x256xf32>
      %390 = vector.shape_cast %389 : vector<1x256x256xf32> to vector<256x256xf32>
      %cst_174 = arith.constant dense<0.000000e+00> : vector<8x256xf32>
      %391 = tpu.matmul %388, %390, %cst_174 {dimension_numbers = #tpu.dot_dimension_numbers<[1], [0], [0], [1], [0, 0, 1, 1], [], []>} : vector<8x256xf32>, vector<256x256xf32>, vector<8x256xf32> -> vector<8x256xf32>
      %c7_175 = arith.constant 7 : index
      %c0_176 = arith.constant 0 : index
      %c0_177 = arith.constant 0 : index
      %392 = vector.load %arg5[%c7_175, %c0_176, %c0_177] : memref<19x1x256xf32, #tpu.memory_space<vmem>>, vector<1x1x256xf32>
      %393 = vector.shape_cast %392 : vector<1x1x256xf32> to vector<1x256xf32>
      %394 = vector.broadcast %393 : vector<1x256xf32> to vector<8x256xf32>
      %395 = arith.addf %391, %394 : vector<8x256xf32>
      %cst_178 = arith.constant 0.000000e+00 : f32
      %396 = vector.broadcast %cst_178 : f32 to vector<8x256xf32>
      %397 = arith.cmpf ogt, %395, %396 : vector<8x256xf32>
      %cst_179 = arith.constant 1.000000e-01 : f32
      %398 = vector.broadcast %cst_179 : f32 to vector<8x256xf32>
      %399 = arith.mulf %398, %395 : vector<8x256xf32>
      %400 = arith.select %397, %395, %399 : vector<8x256xi1>, vector<8x256xf32>
      %c5_180 = arith.constant 5 : index
      %c0_181 = arith.constant 0 : index
      %c0_182 = arith.constant 0 : index
      %401 = vector.load %arg4[%c5_180, %c0_181, %c0_182] : memref<13x256x256xf32, #tpu.memory_space<vmem>>, vector<1x256x256xf32>
      %402 = vector.shape_cast %401 : vector<1x256x256xf32> to vector<256x256xf32>
      %cst_183 = arith.constant dense<0.000000e+00> : vector<8x256xf32>
      %403 = tpu.matmul %400, %402, %cst_183 {dimension_numbers = #tpu.dot_dimension_numbers<[1], [0], [0], [1], [0, 0, 1, 1], [], []>} : vector<8x256xf32>, vector<256x256xf32>, vector<8x256xf32> -> vector<8x256xf32>
      %c8_184 = arith.constant 8 : index
      %c0_185 = arith.constant 0 : index
      %c0_186 = arith.constant 0 : index
      %404 = vector.load %arg5[%c8_184, %c0_185, %c0_186] : memref<19x1x256xf32, #tpu.memory_space<vmem>>, vector<1x1x256xf32>
      %405 = vector.shape_cast %404 : vector<1x1x256xf32> to vector<1x256xf32>
      %406 = vector.broadcast %405 : vector<1x256xf32> to vector<8x256xf32>
      %407 = arith.addf %403, %406 : vector<8x256xf32>
      %cst_187 = arith.constant 0.000000e+00 : f32
      %408 = vector.broadcast %cst_187 : f32 to vector<8x256xf32>
      %409 = arith.cmpf ogt, %407, %408 : vector<8x256xf32>
      %cst_188 = arith.constant 1.000000e-01 : f32
      %410 = vector.broadcast %cst_188 : f32 to vector<8x256xf32>
      %411 = arith.mulf %410, %407 : vector<8x256xf32>
      %412 = arith.select %409, %407, %411 : vector<8x256xi1>, vector<8x256xf32>
      %413 = arith.addf %412, %386 : vector<8x256xf32>
      %414 = arith.addf %413, %361 : vector<8x256xf32>
      %415 = arith.addf %414, %284 : vector<8x256xf32>
      %c6_189 = arith.constant 6 : index
      %c0_190 = arith.constant 0 : index
      %c0_191 = arith.constant 0 : index
      %416 = vector.load %arg4[%c6_189, %c0_190, %c0_191] : memref<13x256x256xf32, #tpu.memory_space<vmem>>, vector<1x256x256xf32>
      %417 = vector.shape_cast %416 : vector<1x256x256xf32> to vector<256x256xf32>
      %cst_192 = arith.constant dense<0.000000e+00> : vector<8x256xf32>
      %418 = tpu.matmul %415, %417, %cst_192 {dimension_numbers = #tpu.dot_dimension_numbers<[1], [0], [0], [1], [0, 0, 1, 1], [], []>} : vector<8x256xf32>, vector<256x256xf32>, vector<8x256xf32> -> vector<8x256xf32>
      %c9_193 = arith.constant 9 : index
      %c0_194 = arith.constant 0 : index
      %c0_195 = arith.constant 0 : index
      %419 = vector.load %arg5[%c9_193, %c0_194, %c0_195] : memref<19x1x256xf32, #tpu.memory_space<vmem>>, vector<1x1x256xf32>
      %420 = vector.shape_cast %419 : vector<1x1x256xf32> to vector<1x256xf32>
      %421 = vector.broadcast %420 : vector<1x256xf32> to vector<8x256xf32>
      %422 = arith.addf %418, %421 : vector<8x256xf32>
      %cst_196 = arith.constant 0.000000e+00 : f32
      %423 = vector.broadcast %cst_196 : f32 to vector<8x256xf32>
      %424 = arith.cmpf ogt, %422, %423 : vector<8x256xf32>
      %cst_197 = arith.constant 0.000000e+00 : f32
      %425 = vector.broadcast %cst_197 : f32 to vector<8x256xf32>
      %426 = arith.minimumf %422, %425 : vector<8x256xf32>
      %427 = math.exp %426 : vector<8x256xf32>
      %cst_198 = arith.constant 1.000000e+00 : f32
      %428 = vector.broadcast %cst_198 : f32 to vector<8x256xf32>
      %429 = arith.subf %427, %428 : vector<8x256xf32>
      %430 = arith.select %424, %422, %429 : vector<8x256xi1>, vector<8x256xf32>
      %c7_199 = arith.constant 7 : index
      %c0_200 = arith.constant 0 : index
      %c0_201 = arith.constant 0 : index
      %431 = vector.load %arg4[%c7_199, %c0_200, %c0_201] : memref<13x256x256xf32, #tpu.memory_space<vmem>>, vector<1x256x256xf32>
      %432 = vector.shape_cast %431 : vector<1x256x256xf32> to vector<256x256xf32>
      %cst_202 = arith.constant dense<0.000000e+00> : vector<8x256xf32>
      %433 = tpu.matmul %430, %432, %cst_202 {dimension_numbers = #tpu.dot_dimension_numbers<[1], [0], [0], [1], [0, 0, 1, 1], [], []>} : vector<8x256xf32>, vector<256x256xf32>, vector<8x256xf32> -> vector<8x256xf32>
      %c10_203 = arith.constant 10 : index
      %c0_204 = arith.constant 0 : index
      %c0_205 = arith.constant 0 : index
      %434 = vector.load %arg5[%c10_203, %c0_204, %c0_205] : memref<19x1x256xf32, #tpu.memory_space<vmem>>, vector<1x1x256xf32>
      %435 = vector.shape_cast %434 : vector<1x1x256xf32> to vector<1x256xf32>
      %436 = vector.broadcast %435 : vector<1x256xf32> to vector<8x256xf32>
      %437 = arith.addf %433, %436 : vector<8x256xf32>
      %cst_206 = arith.constant 0.000000e+00 : f32
      %438 = vector.broadcast %cst_206 : f32 to vector<8x256xf32>
      %439 = arith.cmpf ogt, %437, %438 : vector<8x256xf32>
      %cst_207 = arith.constant 1.000000e-01 : f32
      %440 = vector.broadcast %cst_207 : f32 to vector<8x256xf32>
      %441 = arith.mulf %440, %437 : vector<8x256xf32>
      %442 = arith.select %439, %437, %441 : vector<8x256xi1>, vector<8x256xf32>
      %443 = arith.addf %442, %412 : vector<8x256xf32>
      %444 = arith.addf %443, %361 : vector<8x256xf32>
      %445 = arith.addf %444, %284 : vector<8x256xf32>
      %c0_208 = arith.constant 0 : index
      %c0_209 = arith.constant 0 : index
      %446 = vector.load %arg6[%c0_208, %c0_209] : memref<256x4xf32, #tpu.memory_space<vmem>>, vector<256x4xf32>
      %cst_210 = arith.constant dense<0.000000e+00> : vector<8x4xf32>
      %447 = tpu.matmul %445, %446, %cst_210 {dimension_numbers = #tpu.dot_dimension_numbers<[1], [0], [0], [1], [0, 0, 1, 1], [], []>} : vector<8x256xf32>, vector<256x4xf32>, vector<8x4xf32> -> vector<8x4xf32>
      %c0_211 = arith.constant 0 : index
      %c0_212 = arith.constant 0 : index
      %448 = vector.load %arg7[%c0_211, %c0_212] : memref<1x4xf32, #tpu.memory_space<vmem>>, vector<1x4xf32>
      %449 = vector.broadcast %448 : vector<1x4xf32> to vector<8x4xf32>
      %450 = arith.addf %447, %449 : vector<8x4xf32>
      %cst_213 = arith.constant 0.000000e+00 : f32
      %451 = vector.broadcast %cst_213 : f32 to vector<8x4xf32>
      %452 = arith.cmpf ogt, %450, %451 : vector<8x4xf32>
      %cst_214 = arith.constant 1.000000e-01 : f32
      %453 = vector.broadcast %cst_214 : f32 to vector<8x4xf32>
      %454 = arith.mulf %453, %450 : vector<8x4xf32>
      %455 = arith.select %452, %450, %454 : vector<8x4xi1>, vector<8x4xf32>
      %c0_215 = arith.constant 0 : index
      %c0_216 = arith.constant 0 : index
      %456 = vector.load %arg8[%c0_215, %c0_216] : memref<4x1024xf32, #tpu.memory_space<vmem>>, vector<4x1024xf32>
      %cst_217 = arith.constant dense<0.000000e+00> : vector<8x1024xf32>
      %457 = tpu.matmul %455, %456, %cst_217 {dimension_numbers = #tpu.dot_dimension_numbers<[1], [0], [0], [1], [0, 0, 1, 1], [], []>} : vector<8x4xf32>, vector<4x1024xf32>, vector<8x1024xf32> -> vector<8x1024xf32>
      %c0_218 = arith.constant 0 : index
      %c0_219 = arith.constant 0 : index
      %458 = vector.load %arg9[%c0_218, %c0_219] : memref<1x1024xf32, #tpu.memory_space<vmem>>, vector<1x1024xf32>
      %459 = vector.broadcast %458 : vector<1x1024xf32> to vector<8x1024xf32>
      %460 = arith.addf %457, %459 : vector<8x1024xf32>
      %cst_220 = arith.constant 0.000000e+00 : f32
      %461 = vector.broadcast %cst_220 : f32 to vector<8x1024xf32>
      %462 = arith.cmpf ogt, %460, %461 : vector<8x1024xf32>
      %cst_221 = arith.constant 1.000000e-01 : f32
      %463 = vector.broadcast %cst_221 : f32 to vector<8x1024xf32>
      %464 = arith.mulf %463, %460 : vector<8x1024xf32>
      %465 = arith.select %462, %460, %464 : vector<8x1024xi1>, vector<8x1024xf32>
      %c0_222 = arith.constant 0 : index
      %c0_223 = arith.constant 0 : index
      %466 = vector.load %arg10[%c0_222, %c0_223] : memref<1024x256xf32, #tpu.memory_space<vmem>>, vector<1024x256xf32>
      %cst_224 = arith.constant dense<0.000000e+00> : vector<8x256xf32>
      %467 = tpu.matmul %465, %466, %cst_224 {dimension_numbers = #tpu.dot_dimension_numbers<[1], [0], [0], [1], [0, 0, 1, 1], [], []>} : vector<8x1024xf32>, vector<1024x256xf32>, vector<8x256xf32> -> vector<8x256xf32>
      %c11_225 = arith.constant 11 : index
      %c0_226 = arith.constant 0 : index
      %c0_227 = arith.constant 0 : index
      %468 = vector.load %arg5[%c11_225, %c0_226, %c0_227] : memref<19x1x256xf32, #tpu.memory_space<vmem>>, vector<1x1x256xf32>
      %469 = vector.shape_cast %468 : vector<1x1x256xf32> to vector<1x256xf32>
      %470 = vector.broadcast %469 : vector<1x256xf32> to vector<8x256xf32>
      %471 = arith.addf %467, %470 : vector<8x256xf32>
      %cst_228 = arith.constant 0.000000e+00 : f32
      %472 = vector.broadcast %cst_228 : f32 to vector<8x256xf32>
      %473 = arith.cmpf ogt, %471, %472 : vector<8x256xf32>
      %cst_229 = arith.constant 1.000000e-01 : f32
      %474 = vector.broadcast %cst_229 : f32 to vector<8x256xf32>
      %475 = arith.mulf %474, %471 : vector<8x256xf32>
      %476 = arith.select %473, %471, %475 : vector<8x256xi1>, vector<8x256xf32>
      %477 = arith.addf %476, %442 : vector<8x256xf32>
      %478 = arith.addf %477, %361 : vector<8x256xf32>
      %479 = arith.addf %478, %284 : vector<8x256xf32>
      %c8_230 = arith.constant 8 : index
      %c0_231 = arith.constant 0 : index
      %c0_232 = arith.constant 0 : index
      %480 = vector.load %arg4[%c8_230, %c0_231, %c0_232] : memref<13x256x256xf32, #tpu.memory_space<vmem>>, vector<1x256x256xf32>
      %481 = vector.shape_cast %480 : vector<1x256x256xf32> to vector<256x256xf32>
      %cst_233 = arith.constant dense<0.000000e+00> : vector<8x256xf32>
      %482 = tpu.matmul %479, %481, %cst_233 {dimension_numbers = #tpu.dot_dimension_numbers<[1], [0], [0], [1], [0, 0, 1, 1], [], []>} : vector<8x256xf32>, vector<256x256xf32>, vector<8x256xf32> -> vector<8x256xf32>
      %c12_234 = arith.constant 12 : index
      %c0_235 = arith.constant 0 : index
      %c0_236 = arith.constant 0 : index
      %483 = vector.load %arg5[%c12_234, %c0_235, %c0_236] : memref<19x1x256xf32, #tpu.memory_space<vmem>>, vector<1x1x256xf32>
      %484 = vector.shape_cast %483 : vector<1x1x256xf32> to vector<1x256xf32>
      %485 = vector.broadcast %484 : vector<1x256xf32> to vector<8x256xf32>
      %486 = arith.addf %482, %485 : vector<8x256xf32>
      %c9_237 = arith.constant 9 : index
      %c0_238 = arith.constant 0 : index
      %c0_239 = arith.constant 0 : index
      %487 = vector.load %arg4[%c9_237, %c0_238, %c0_239] : memref<13x256x256xf32, #tpu.memory_space<vmem>>, vector<1x256x256xf32>
      %488 = vector.shape_cast %487 : vector<1x256x256xf32> to vector<256x256xf32>
      %cst_240 = arith.constant dense<0.000000e+00> : vector<8x256xf32>
      %489 = tpu.matmul %486, %488, %cst_240 {dimension_numbers = #tpu.dot_dimension_numbers<[1], [0], [0], [1], [0, 0, 1, 1], [], []>} : vector<8x256xf32>, vector<256x256xf32>, vector<8x256xf32> -> vector<8x256xf32>
      %c13_241 = arith.constant 13 : index
      %c0_242 = arith.constant 0 : index
      %c0_243 = arith.constant 0 : index
      %490 = vector.load %arg5[%c13_241, %c0_242, %c0_243] : memref<19x1x256xf32, #tpu.memory_space<vmem>>, vector<1x1x256xf32>
      %491 = vector.shape_cast %490 : vector<1x1x256xf32> to vector<1x256xf32>
      %492 = vector.broadcast %491 : vector<1x256xf32> to vector<8x256xf32>
      %493 = arith.addf %489, %492 : vector<8x256xf32>
      %494 = arith.addf %493, %476 : vector<8x256xf32>
      %495 = arith.addf %494, %361 : vector<8x256xf32>
      %496 = arith.addf %495, %284 : vector<8x256xf32>
      %497 = arith.truncf %284 : vector<8x256xf32> to vector<8x256xbf16>
      %c0_244 = arith.constant 0 : index
      %c0_245 = arith.constant 0 : index
      %498 = vector.load %arg15[%c0_244, %c0_245] : memref<8x256xbf16, #tpu.memory_space<vmem>>, vector<8x256xbf16>
      tpu.vector_store %arg15[%c0_244, %c0_245], %497 {strides = array<i32>} : memref<8x256xbf16, #tpu.memory_space<vmem>>, vector<8x256xbf16>,
      %499 = arith.addf %493, %361 : vector<8x256xf32>
      %500 = arith.addf %499, %284 : vector<8x256xf32>
      %c0_246 = arith.constant 0 : index
      %c0_247 = arith.constant 0 : index
      %501 = vector.load %arg16[%c0_246, %c0_247] : memref<8x256xf32, #tpu.memory_space<vmem>>, vector<8x256xf32>
      tpu.vector_store %arg16[%c0_246, %c0_247], %500 {strides = array<i32>} : memref<8x256xf32, #tpu.memory_space<vmem>>, vector<8x256xf32>,
      %502 = vector.extract_strided_slice %496 {offsets = [0, 0], sizes = [8, 32], strides = [1, 1]} : vector<8x256xf32> to vector<8x32xf32>
      %c0_248 = arith.constant 0 : index
      %c0_249 = arith.constant 0 : index
      %c0_250 = arith.constant 0 : index
      %503 = vector.load %arg17[%c0_248, %c0_249, %c0_250] : memref<8x8x32xf32, #tpu.memory_space<vmem>>, vector<1x8x32xf32>
      %504 = vector.shape_cast %503 : vector<1x8x32xf32> to vector<8x32xf32>
      %505 = vector.shape_cast %502 : vector<8x32xf32> to vector<1x8x32xf32>
      tpu.vector_store %arg17[%c0_248, %c0_249, %c0_250], %505 {strides = array<i32>} : memref<8x8x32xf32, #tpu.memory_space<vmem>>, vector<1x8x32xf32>,
      %506 = vector.extract_strided_slice %496 {offsets = [0, 32], sizes = [8, 32], strides = [1, 1]} : vector<8x256xf32> to vector<8x32xf32>
      %c1_251 = arith.constant 1 : index
      %c0_252 = arith.constant 0 : index
      %c0_253 = arith.constant 0 : index
      %507 = vector.load %arg17[%c1_251, %c0_252, %c0_253] : memref<8x8x32xf32, #tpu.memory_space<vmem>>, vector<1x8x32xf32>
      %508 = vector.shape_cast %507 : vector<1x8x32xf32> to vector<8x32xf32>
      %509 = vector.shape_cast %506 : vector<8x32xf32> to vector<1x8x32xf32>
      tpu.vector_store %arg17[%c1_251, %c0_252, %c0_253], %509 {strides = array<i32>} : memref<8x8x32xf32, #tpu.memory_space<vmem>>, vector<1x8x32xf32>,
      %510 = vector.extract_strided_slice %496 {offsets = [0, 64], sizes = [8, 32], strides = [1, 1]} : vector<8x256xf32> to vector<8x32xf32>
      %c2_254 = arith.constant 2 : index
      %c0_255 = arith.constant 0 : index
      %c0_256 = arith.constant 0 : index
      %511 = vector.load %arg17[%c2_254, %c0_255, %c0_256] : memref<8x8x32xf32, #tpu.memory_space<vmem>>, vector<1x8x32xf32>
      %512 = vector.shape_cast %511 : vector<1x8x32xf32> to vector<8x32xf32>
      %513 = vector.shape_cast %510 : vector<8x32xf32> to vector<1x8x32xf32>
      tpu.vector_store %arg17[%c2_254, %c0_255, %c0_256], %513 {strides = array<i32>} : memref<8x8x32xf32, #tpu.memory_space<vmem>>, vector<1x8x32xf32>,
      %514 = vector.extract_strided_slice %496 {offsets = [0, 96], sizes = [8, 32], strides = [1, 1]} : vector<8x256xf32> to vector<8x32xf32>
      %c3_257 = arith.constant 3 : index
      %c0_258 = arith.constant 0 : index
      %c0_259 = arith.constant 0 : index
      %515 = vector.load %arg17[%c3_257, %c0_258, %c0_259] : memref<8x8x32xf32, #tpu.memory_space<vmem>>, vector<1x8x32xf32>
      %516 = vector.shape_cast %515 : vector<1x8x32xf32> to vector<8x32xf32>
      %517 = vector.shape_cast %514 : vector<8x32xf32> to vector<1x8x32xf32>
      tpu.vector_store %arg17[%c3_257, %c0_258, %c0_259], %517 {strides = array<i32>} : memref<8x8x32xf32, #tpu.memory_space<vmem>>, vector<1x8x32xf32>,
      %518 = vector.extract_strided_slice %496 {offsets = [0, 128], sizes = [8, 32], strides = [1, 1]} : vector<8x256xf32> to vector<8x32xf32>
      %c4_260 = arith.constant 4 : index
      %c0_261 = arith.constant 0 : index
      %c0_262 = arith.constant 0 : index
      %519 = vector.load %arg17[%c4_260, %c0_261, %c0_262] : memref<8x8x32xf32, #tpu.memory_space<vmem>>, vector<1x8x32xf32>
      %520 = vector.shape_cast %519 : vector<1x8x32xf32> to vector<8x32xf32>
      %521 = vector.shape_cast %518 : vector<8x32xf32> to vector<1x8x32xf32>
      tpu.vector_store %arg17[%c4_260, %c0_261, %c0_262], %521 {strides = array<i32>} : memref<8x8x32xf32, #tpu.memory_space<vmem>>, vector<1x8x32xf32>,
      %522 = vector.extract_strided_slice %496 {offsets = [0, 160], sizes = [8, 32], strides = [1, 1]} : vector<8x256xf32> to vector<8x32xf32>
      %c5_263 = arith.constant 5 : index
      %c0_264 = arith.constant 0 : index
      %c0_265 = arith.constant 0 : index
      %523 = vector.load %arg17[%c5_263, %c0_264, %c0_265] : memref<8x8x32xf32, #tpu.memory_space<vmem>>, vector<1x8x32xf32>
      %524 = vector.shape_cast %523 : vector<1x8x32xf32> to vector<8x32xf32>
      %525 = vector.shape_cast %522 : vector<8x32xf32> to vector<1x8x32xf32>
      tpu.vector_store %arg17[%c5_263, %c0_264, %c0_265], %525 {strides = array<i32>} : memref<8x8x32xf32, #tpu.memory_space<vmem>>, vector<1x8x32xf32>,
      %526 = vector.extract_strided_slice %496 {offsets = [0, 192], sizes = [8, 32], strides = [1, 1]} : vector<8x256xf32> to vector<8x32xf32>
      %c6_266 = arith.constant 6 : index
      %c0_267 = arith.constant 0 : index
      %c0_268 = arith.constant 0 : index
      %527 = vector.load %arg17[%c6_266, %c0_267, %c0_268] : memref<8x8x32xf32, #tpu.memory_space<vmem>>, vector<1x8x32xf32>
      %528 = vector.shape_cast %527 : vector<1x8x32xf32> to vector<8x32xf32>
      %529 = vector.shape_cast %526 : vector<8x32xf32> to vector<1x8x32xf32>
      tpu.vector_store %arg17[%c6_266, %c0_267, %c0_268], %529 {strides = array<i32>} : memref<8x8x32xf32, #tpu.memory_space<vmem>>, vector<1x8x32xf32>,
      %530 = vector.extract_strided_slice %496 {offsets = [0, 224], sizes = [8, 32], strides = [1, 1]} : vector<8x256xf32> to vector<8x32xf32>
      %c7_269 = arith.constant 7 : index
      %c0_270 = arith.constant 0 : index
      %c0_271 = arith.constant 0 : index
      %531 = vector.load %arg17[%c7_269, %c0_270, %c0_271] : memref<8x8x32xf32, #tpu.memory_space<vmem>>, vector<1x8x32xf32>
      %532 = vector.shape_cast %531 : vector<1x8x32xf32> to vector<8x32xf32>
      %533 = vector.shape_cast %530 : vector<8x32xf32> to vector<1x8x32xf32>
      tpu.vector_store %arg17[%c7_269, %c0_270, %c0_271], %533 {strides = array<i32>} : memref<8x8x32xf32, #tpu.memory_space<vmem>>, vector<1x8x32xf32>,
      %cst_272 = arith.constant 0.000000e+00 : f32
      %534 = vector.broadcast %cst_272 : f32 to vector<8x256xf32>
      %c0_273 = arith.constant 0 : index
      %c0_274 = arith.constant 0 : index
      %535 = vector.load %arg18[%c0_273, %c0_274] : memref<8x256xf32, #tpu.memory_space<vmem>>, vector<8x256xf32>
      tpu.vector_store %arg18[%c0_273, %c0_274], %534 {strides = array<i32>} : memref<8x256xf32, #tpu.memory_space<vmem>>, vector<8x256xf32>,
    } else {
    }
    %3 = arith.index_cast %arg0 : i32 to index
    %c0 = arith.constant 0 : index
    %c0_1 = arith.constant 0 : index
    %4 = vector.load %arg17[%3, %c0, %c0_1] : memref<8x8x32xf32, #tpu.memory_space<vmem>>, vector<1x8x32xf32>
    %5 = vector.shape_cast %4 : vector<1x8x32xf32> to vector<8x32xf32>
    %c0_2 = arith.constant 0 : index
    %c0_3 = arith.constant 0 : index
    %6 = vector.load %arg15[%c0_2, %c0_3] : memref<8x256xbf16, #tpu.memory_space<vmem>>, vector<8x256xbf16>
    %c0_4 = arith.constant 0 : index
    %c0_5 = arith.constant 0 : index
    %7 = vector.load %arg18[%c0_4, %c0_5] : memref<8x256xf32, #tpu.memory_space<vmem>>, vector<8x256xf32>
    %c0_6 = arith.constant 0 : index
    %c0_7 = arith.constant 0 : index
    %c0_8 = arith.constant 0 : index
    %8 = vector.load %arg13[%c0_6, %c0_7, %c0_8] : memref<32x256x256xi8, #tpu.memory_space<vmem>>, vector<1x256x256xi8>
    %9 = vector.shape_cast %8 : vector<1x256x256xi8> to vector<256x256xi8>
    %10 = arith.sitofp %9 : vector<256x256xi8> to vector<256x256xbf16>
    %cst = arith.constant dense<0.000000e+00> : vector<8x256xf32>
    %11 = tpu.matmul %6, %10, %cst {dimension_numbers = #tpu.dot_dimension_numbers<[1], [0], [0], [1], [0, 0, 1, 1], [], []>} : vector<8x256xbf16>, vector<256x256xbf16>, vector<8x256xf32> -> vector<8x256xf32>
    %12 = vector.extract_strided_slice %5 {offsets = [0, 0], sizes = [8, 1], strides = [1, 1]} : vector<8x32xf32> to vector<8x1xf32>
    %13 = vector.broadcast %12 : vector<8x1xf32> to vector<8x256xf32>
    %14 = arith.mulf %13, %11 : vector<8x256xf32>
    %15 = arith.addf %7, %14 : vector<8x256xf32>
    %c1 = arith.constant 1 : index
    %c0_9 = arith.constant 0 : index
    %c0_10 = arith.constant 0 : index
    %16 = vector.load %arg13[%c1, %c0_9, %c0_10] : memref<32x256x256xi8, #tpu.memory_space<vmem>>, vector<1x256x256xi8>
    %17 = vector.shape_cast %16 : vector<1x256x256xi8> to vector<256x256xi8>
    %18 = arith.sitofp %17 : vector<256x256xi8> to vector<256x256xbf16>
    %cst_11 = arith.constant dense<0.000000e+00> : vector<8x256xf32>
    %19 = tpu.matmul %6, %18, %cst_11 {dimension_numbers = #tpu.dot_dimension_numbers<[1], [0], [0], [1], [0, 0, 1, 1], [], []>} : vector<8x256xbf16>, vector<256x256xbf16>, vector<8x256xf32> -> vector<8x256xf32>
    %20 = vector.extract_strided_slice %5 {offsets = [0, 1], sizes = [8, 1], strides = [1, 1]} : vector<8x32xf32> to vector<8x1xf32>
    %21 = vector.broadcast %20 : vector<8x1xf32> to vector<8x256xf32>
    %22 = arith.mulf %21, %19 : vector<8x256xf32>
    %23 = arith.addf %15, %22 : vector<8x256xf32>
    %c2 = arith.constant 2 : index
    %c0_12 = arith.constant 0 : index
    %c0_13 = arith.constant 0 : index
    %24 = vector.load %arg13[%c2, %c0_12, %c0_13] : memref<32x256x256xi8, #tpu.memory_space<vmem>>, vector<1x256x256xi8>
    %25 = vector.shape_cast %24 : vector<1x256x256xi8> to vector<256x256xi8>
    %26 = arith.sitofp %25 : vector<256x256xi8> to vector<256x256xbf16>
    %cst_14 = arith.constant dense<0.000000e+00> : vector<8x256xf32>
    %27 = tpu.matmul %6, %26, %cst_14 {dimension_numbers = #tpu.dot_dimension_numbers<[1], [0], [0], [1], [0, 0, 1, 1], [], []>} : vector<8x256xbf16>, vector<256x256xbf16>, vector<8x256xf32> -> vector<8x256xf32>
    %28 = vector.extract_strided_slice %5 {offsets = [0, 2], sizes = [8, 1], strides = [1, 1]} : vector<8x32xf32> to vector<8x1xf32>
    %29 = vector.broadcast %28 : vector<8x1xf32> to vector<8x256xf32>
    %30 = arith.mulf %29, %27 : vector<8x256xf32>
    %31 = arith.addf %23, %30 : vector<8x256xf32>
    %c3 = arith.constant 3 : index
    %c0_15 = arith.constant 0 : index
    %c0_16 = arith.constant 0 : index
    %32 = vector.load %arg13[%c3, %c0_15, %c0_16] : memref<32x256x256xi8, #tpu.memory_space<vmem>>, vector<1x256x256xi8>
    %33 = vector.shape_cast %32 : vector<1x256x256xi8> to vector<256x256xi8>
    %34 = arith.sitofp %33 : vector<256x256xi8> to vector<256x256xbf16>
    %cst_17 = arith.constant dense<0.000000e+00> : vector<8x256xf32>
    %35 = tpu.matmul %6, %34, %cst_17 {dimension_numbers = #tpu.dot_dimension_numbers<[1], [0], [0], [1], [0, 0, 1, 1], [], []>} : vector<8x256xbf16>, vector<256x256xbf16>, vector<8x256xf32> -> vector<8x256xf32>
    %36 = vector.extract_strided_slice %5 {offsets = [0, 3], sizes = [8, 1], strides = [1, 1]} : vector<8x32xf32> to vector<8x1xf32>
    %37 = vector.broadcast %36 : vector<8x1xf32> to vector<8x256xf32>
    %38 = arith.mulf %37, %35 : vector<8x256xf32>
    %39 = arith.addf %31, %38 : vector<8x256xf32>
    %c4 = arith.constant 4 : index
    %c0_18 = arith.constant 0 : index
    %c0_19 = arith.constant 0 : index
    %40 = vector.load %arg13[%c4, %c0_18, %c0_19] : memref<32x256x256xi8, #tpu.memory_space<vmem>>, vector<1x256x256xi8>
    %41 = vector.shape_cast %40 : vector<1x256x256xi8> to vector<256x256xi8>
    %42 = arith.sitofp %41 : vector<256x256xi8> to vector<256x256xbf16>
    %cst_20 = arith.constant dense<0.000000e+00> : vector<8x256xf32>
    %43 = tpu.matmul %6, %42, %cst_20 {dimension_numbers = #tpu.dot_dimension_numbers<[1], [0], [0], [1], [0, 0, 1, 1], [], []>} : vector<8x256xbf16>, vector<256x256xbf16>, vector<8x256xf32> -> vector<8x256xf32>
    %44 = vector.extract_strided_slice %5 {offsets = [0, 4], sizes = [8, 1], strides = [1, 1]} : vector<8x32xf32> to vector<8x1xf32>
    %45 = vector.broadcast %44 : vector<8x1xf32> to vector<8x256xf32>
    %46 = arith.mulf %45, %43 : vector<8x256xf32>
    %47 = arith.addf %39, %46 : vector<8x256xf32>
    %c5 = arith.constant 5 : index
    %c0_21 = arith.constant 0 : index
    %c0_22 = arith.constant 0 : index
    %48 = vector.load %arg13[%c5, %c0_21, %c0_22] : memref<32x256x256xi8, #tpu.memory_space<vmem>>, vector<1x256x256xi8>
    %49 = vector.shape_cast %48 : vector<1x256x256xi8> to vector<256x256xi8>
    %50 = arith.sitofp %49 : vector<256x256xi8> to vector<256x256xbf16>
    %cst_23 = arith.constant dense<0.000000e+00> : vector<8x256xf32>
    %51 = tpu.matmul %6, %50, %cst_23 {dimension_numbers = #tpu.dot_dimension_numbers<[1], [0], [0], [1], [0, 0, 1, 1], [], []>} : vector<8x256xbf16>, vector<256x256xbf16>, vector<8x256xf32> -> vector<8x256xf32>
    %52 = vector.extract_strided_slice %5 {offsets = [0, 5], sizes = [8, 1], strides = [1, 1]} : vector<8x32xf32> to vector<8x1xf32>
    %53 = vector.broadcast %52 : vector<8x1xf32> to vector<8x256xf32>
    %54 = arith.mulf %53, %51 : vector<8x256xf32>
    %55 = arith.addf %47, %54 : vector<8x256xf32>
    %c6 = arith.constant 6 : index
    %c0_24 = arith.constant 0 : index
    %c0_25 = arith.constant 0 : index
    %56 = vector.load %arg13[%c6, %c0_24, %c0_25] : memref<32x256x256xi8, #tpu.memory_space<vmem>>, vector<1x256x256xi8>
    %57 = vector.shape_cast %56 : vector<1x256x256xi8> to vector<256x256xi8>
    %58 = arith.sitofp %57 : vector<256x256xi8> to vector<256x256xbf16>
    %cst_26 = arith.constant dense<0.000000e+00> : vector<8x256xf32>
    %59 = tpu.matmul %6, %58, %cst_26 {dimension_numbers = #tpu.dot_dimension_numbers<[1], [0], [0], [1], [0, 0, 1, 1], [], []>} : vector<8x256xbf16>, vector<256x256xbf16>, vector<8x256xf32> -> vector<8x256xf32>
    %60 = vector.extract_strided_slice %5 {offsets = [0, 6], sizes = [8, 1], strides = [1, 1]} : vector<8x32xf32> to vector<8x1xf32>
    %61 = vector.broadcast %60 : vector<8x1xf32> to vector<8x256xf32>
    %62 = arith.mulf %61, %59 : vector<8x256xf32>
    %63 = arith.addf %55, %62 : vector<8x256xf32>
    %c7 = arith.constant 7 : index
    %c0_27 = arith.constant 0 : index
    %c0_28 = arith.constant 0 : index
    %64 = vector.load %arg13[%c7, %c0_27, %c0_28] : memref<32x256x256xi8, #tpu.memory_space<vmem>>, vector<1x256x256xi8>
    %65 = vector.shape_cast %64 : vector<1x256x256xi8> to vector<256x256xi8>
    %66 = arith.sitofp %65 : vector<256x256xi8> to vector<256x256xbf16>
    %cst_29 = arith.constant dense<0.000000e+00> : vector<8x256xf32>
    %67 = tpu.matmul %6, %66, %cst_29 {dimension_numbers = #tpu.dot_dimension_numbers<[1], [0], [0], [1], [0, 0, 1, 1], [], []>} : vector<8x256xbf16>, vector<256x256xbf16>, vector<8x256xf32> -> vector<8x256xf32>
    %68 = vector.extract_strided_slice %5 {offsets = [0, 7], sizes = [8, 1], strides = [1, 1]} : vector<8x32xf32> to vector<8x1xf32>
    %69 = vector.broadcast %68 : vector<8x1xf32> to vector<8x256xf32>
    %70 = arith.mulf %69, %67 : vector<8x256xf32>
    %71 = arith.addf %63, %70 : vector<8x256xf32>
    %c8 = arith.constant 8 : index
    %c0_30 = arith.constant 0 : index
    %c0_31 = arith.constant 0 : index
    %72 = vector.load %arg13[%c8, %c0_30, %c0_31] : memref<32x256x256xi8, #tpu.memory_space<vmem>>, vector<1x256x256xi8>
    %73 = vector.shape_cast %72 : vector<1x256x256xi8> to vector<256x256xi8>
    %74 = arith.sitofp %73 : vector<256x256xi8> to vector<256x256xbf16>
    %cst_32 = arith.constant dense<0.000000e+00> : vector<8x256xf32>
    %75 = tpu.matmul %6, %74, %cst_32 {dimension_numbers = #tpu.dot_dimension_numbers<[1], [0], [0], [1], [0, 0, 1, 1], [], []>} : vector<8x256xbf16>, vector<256x256xbf16>, vector<8x256xf32> -> vector<8x256xf32>
    %76 = vector.extract_strided_slice %5 {offsets = [0, 8], sizes = [8, 1], strides = [1, 1]} : vector<8x32xf32> to vector<8x1xf32>
    %77 = vector.broadcast %76 : vector<8x1xf32> to vector<8x256xf32>
    %78 = arith.mulf %77, %75 : vector<8x256xf32>
    %79 = arith.addf %71, %78 : vector<8x256xf32>
    %c9 = arith.constant 9 : index
    %c0_33 = arith.constant 0 : index
    %c0_34 = arith.constant 0 : index
    %80 = vector.load %arg13[%c9, %c0_33, %c0_34] : memref<32x256x256xi8, #tpu.memory_space<vmem>>, vector<1x256x256xi8>
    %81 = vector.shape_cast %80 : vector<1x256x256xi8> to vector<256x256xi8>
    %82 = arith.sitofp %81 : vector<256x256xi8> to vector<256x256xbf16>
    %cst_35 = arith.constant dense<0.000000e+00> : vector<8x256xf32>
    %83 = tpu.matmul %6, %82, %cst_35 {dimension_numbers = #tpu.dot_dimension_numbers<[1], [0], [0], [1], [0, 0, 1, 1], [], []>} : vector<8x256xbf16>, vector<256x256xbf16>, vector<8x256xf32> -> vector<8x256xf32>
    %84 = vector.extract_strided_slice %5 {offsets = [0, 9], sizes = [8, 1], strides = [1, 1]} : vector<8x32xf32> to vector<8x1xf32>
    %85 = vector.broadcast %84 : vector<8x1xf32> to vector<8x256xf32>
    %86 = arith.mulf %85, %83 : vector<8x256xf32>
    %87 = arith.addf %79, %86 : vector<8x256xf32>
    %c10 = arith.constant 10 : index
    %c0_36 = arith.constant 0 : index
    %c0_37 = arith.constant 0 : index
    %88 = vector.load %arg13[%c10, %c0_36, %c0_37] : memref<32x256x256xi8, #tpu.memory_space<vmem>>, vector<1x256x256xi8>
    %89 = vector.shape_cast %88 : vector<1x256x256xi8> to vector<256x256xi8>
    %90 = arith.sitofp %89 : vector<256x256xi8> to vector<256x256xbf16>
    %cst_38 = arith.constant dense<0.000000e+00> : vector<8x256xf32>
    %91 = tpu.matmul %6, %90, %cst_38 {dimension_numbers = #tpu.dot_dimension_numbers<[1], [0], [0], [1], [0, 0, 1, 1], [], []>} : vector<8x256xbf16>, vector<256x256xbf16>, vector<8x256xf32> -> vector<8x256xf32>
    %92 = vector.extract_strided_slice %5 {offsets = [0, 10], sizes = [8, 1], strides = [1, 1]} : vector<8x32xf32> to vector<8x1xf32>
    %93 = vector.broadcast %92 : vector<8x1xf32> to vector<8x256xf32>
    %94 = arith.mulf %93, %91 : vector<8x256xf32>
    %95 = arith.addf %87, %94 : vector<8x256xf32>
    %c11 = arith.constant 11 : index
    %c0_39 = arith.constant 0 : index
    %c0_40 = arith.constant 0 : index
    %96 = vector.load %arg13[%c11, %c0_39, %c0_40] : memref<32x256x256xi8, #tpu.memory_space<vmem>>, vector<1x256x256xi8>
    %97 = vector.shape_cast %96 : vector<1x256x256xi8> to vector<256x256xi8>
    %98 = arith.sitofp %97 : vector<256x256xi8> to vector<256x256xbf16>
    %cst_41 = arith.constant dense<0.000000e+00> : vector<8x256xf32>
    %99 = tpu.matmul %6, %98, %cst_41 {dimension_numbers = #tpu.dot_dimension_numbers<[1], [0], [0], [1], [0, 0, 1, 1], [], []>} : vector<8x256xbf16>, vector<256x256xbf16>, vector<8x256xf32> -> vector<8x256xf32>
    %100 = vector.extract_strided_slice %5 {offsets = [0, 11], sizes = [8, 1], strides = [1, 1]} : vector<8x32xf32> to vector<8x1xf32>
    %101 = vector.broadcast %100 : vector<8x1xf32> to vector<8x256xf32>
    %102 = arith.mulf %101, %99 : vector<8x256xf32>
    %103 = arith.addf %95, %102 : vector<8x256xf32>
    %c12 = arith.constant 12 : index
    %c0_42 = arith.constant 0 : index
    %c0_43 = arith.constant 0 : index
    %104 = vector.load %arg13[%c12, %c0_42, %c0_43] : memref<32x256x256xi8, #tpu.memory_space<vmem>>, vector<1x256x256xi8>
    %105 = vector.shape_cast %104 : vector<1x256x256xi8> to vector<256x256xi8>
    %106 = arith.sitofp %105 : vector<256x256xi8> to vector<256x256xbf16>
    %cst_44 = arith.constant dense<0.000000e+00> : vector<8x256xf32>
    %107 = tpu.matmul %6, %106, %cst_44 {dimension_numbers = #tpu.dot_dimension_numbers<[1], [0], [0], [1], [0, 0, 1, 1], [], []>} : vector<8x256xbf16>, vector<256x256xbf16>, vector<8x256xf32> -> vector<8x256xf32>
    %108 = vector.extract_strided_slice %5 {offsets = [0, 12], sizes = [8, 1], strides = [1, 1]} : vector<8x32xf32> to vector<8x1xf32>
    %109 = vector.broadcast %108 : vector<8x1xf32> to vector<8x256xf32>
    %110 = arith.mulf %109, %107 : vector<8x256xf32>
    %111 = arith.addf %103, %110 : vector<8x256xf32>
    %c13 = arith.constant 13 : index
    %c0_45 = arith.constant 0 : index
    %c0_46 = arith.constant 0 : index
    %112 = vector.load %arg13[%c13, %c0_45, %c0_46] : memref<32x256x256xi8, #tpu.memory_space<vmem>>, vector<1x256x256xi8>
    %113 = vector.shape_cast %112 : vector<1x256x256xi8> to vector<256x256xi8>
    %114 = arith.sitofp %113 : vector<256x256xi8> to vector<256x256xbf16>
    %cst_47 = arith.constant dense<0.000000e+00> : vector<8x256xf32>
    %115 = tpu.matmul %6, %114, %cst_47 {dimension_numbers = #tpu.dot_dimension_numbers<[1], [0], [0], [1], [0, 0, 1, 1], [], []>} : vector<8x256xbf16>, vector<256x256xbf16>, vector<8x256xf32> -> vector<8x256xf32>
    %116 = vector.extract_strided_slice %5 {offsets = [0, 13], sizes = [8, 1], strides = [1, 1]} : vector<8x32xf32> to vector<8x1xf32>
    %117 = vector.broadcast %116 : vector<8x1xf32> to vector<8x256xf32>
    %118 = arith.mulf %117, %115 : vector<8x256xf32>
    %119 = arith.addf %111, %118 : vector<8x256xf32>
    %c14 = arith.constant 14 : index
    %c0_48 = arith.constant 0 : index
    %c0_49 = arith.constant 0 : index
    %120 = vector.load %arg13[%c14, %c0_48, %c0_49] : memref<32x256x256xi8, #tpu.memory_space<vmem>>, vector<1x256x256xi8>
    %121 = vector.shape_cast %120 : vector<1x256x256xi8> to vector<256x256xi8>
    %122 = arith.sitofp %121 : vector<256x256xi8> to vector<256x256xbf16>
    %cst_50 = arith.constant dense<0.000000e+00> : vector<8x256xf32>
    %123 = tpu.matmul %6, %122, %cst_50 {dimension_numbers = #tpu.dot_dimension_numbers<[1], [0], [0], [1], [0, 0, 1, 1], [], []>} : vector<8x256xbf16>, vector<256x256xbf16>, vector<8x256xf32> -> vector<8x256xf32>
    %124 = vector.extract_strided_slice %5 {offsets = [0, 14], sizes = [8, 1], strides = [1, 1]} : vector<8x32xf32> to vector<8x1xf32>
    %125 = vector.broadcast %124 : vector<8x1xf32> to vector<8x256xf32>
    %126 = arith.mulf %125, %123 : vector<8x256xf32>
    %127 = arith.addf %119, %126 : vector<8x256xf32>
    %c15 = arith.constant 15 : index
    %c0_51 = arith.constant 0 : index
    %c0_52 = arith.constant 0 : index
    %128 = vector.load %arg13[%c15, %c0_51, %c0_52] : memref<32x256x256xi8, #tpu.memory_space<vmem>>, vector<1x256x256xi8>
    %129 = vector.shape_cast %128 : vector<1x256x256xi8> to vector<256x256xi8>
    %130 = arith.sitofp %129 : vector<256x256xi8> to vector<256x256xbf16>
    %cst_53 = arith.constant dense<0.000000e+00> : vector<8x256xf32>
    %131 = tpu.matmul %6, %130, %cst_53 {dimension_numbers = #tpu.dot_dimension_numbers<[1], [0], [0], [1], [0, 0, 1, 1], [], []>} : vector<8x256xbf16>, vector<256x256xbf16>, vector<8x256xf32> -> vector<8x256xf32>
    %132 = vector.extract_strided_slice %5 {offsets = [0, 15], sizes = [8, 1], strides = [1, 1]} : vector<8x32xf32> to vector<8x1xf32>
    %133 = vector.broadcast %132 : vector<8x1xf32> to vector<8x256xf32>
    %134 = arith.mulf %133, %131 : vector<8x256xf32>
    %135 = arith.addf %127, %134 : vector<8x256xf32>
    %c16 = arith.constant 16 : index
    %c0_54 = arith.constant 0 : index
    %c0_55 = arith.constant 0 : index
    %136 = vector.load %arg13[%c16, %c0_54, %c0_55] : memref<32x256x256xi8, #tpu.memory_space<vmem>>, vector<1x256x256xi8>
    %137 = vector.shape_cast %136 : vector<1x256x256xi8> to vector<256x256xi8>
    %138 = arith.sitofp %137 : vector<256x256xi8> to vector<256x256xbf16>
    %cst_56 = arith.constant dense<0.000000e+00> : vector<8x256xf32>
    %139 = tpu.matmul %6, %138, %cst_56 {dimension_numbers = #tpu.dot_dimension_numbers<[1], [0], [0], [1], [0, 0, 1, 1], [], []>} : vector<8x256xbf16>, vector<256x256xbf16>, vector<8x256xf32> -> vector<8x256xf32>
    %140 = vector.extract_strided_slice %5 {offsets = [0, 16], sizes = [8, 1], strides = [1, 1]} : vector<8x32xf32> to vector<8x1xf32>
    %141 = vector.broadcast %140 : vector<8x1xf32> to vector<8x256xf32>
    %142 = arith.mulf %141, %139 : vector<8x256xf32>
    %143 = arith.addf %135, %142 : vector<8x256xf32>
    %c17 = arith.constant 17 : index
    %c0_57 = arith.constant 0 : index
    %c0_58 = arith.constant 0 : index
    %144 = vector.load %arg13[%c17, %c0_57, %c0_58] : memref<32x256x256xi8, #tpu.memory_space<vmem>>, vector<1x256x256xi8>
    %145 = vector.shape_cast %144 : vector<1x256x256xi8> to vector<256x256xi8>
    %146 = arith.sitofp %145 : vector<256x256xi8> to vector<256x256xbf16>
    %cst_59 = arith.constant dense<0.000000e+00> : vector<8x256xf32>
    %147 = tpu.matmul %6, %146, %cst_59 {dimension_numbers = #tpu.dot_dimension_numbers<[1], [0], [0], [1], [0, 0, 1, 1], [], []>} : vector<8x256xbf16>, vector<256x256xbf16>, vector<8x256xf32> -> vector<8x256xf32>
    %148 = vector.extract_strided_slice %5 {offsets = [0, 17], sizes = [8, 1], strides = [1, 1]} : vector<8x32xf32> to vector<8x1xf32>
    %149 = vector.broadcast %148 : vector<8x1xf32> to vector<8x256xf32>
    %150 = arith.mulf %149, %147 : vector<8x256xf32>
    %151 = arith.addf %143, %150 : vector<8x256xf32>
    %c18 = arith.constant 18 : index
    %c0_60 = arith.constant 0 : index
    %c0_61 = arith.constant 0 : index
    %152 = vector.load %arg13[%c18, %c0_60, %c0_61] : memref<32x256x256xi8, #tpu.memory_space<vmem>>, vector<1x256x256xi8>
    %153 = vector.shape_cast %152 : vector<1x256x256xi8> to vector<256x256xi8>
    %154 = arith.sitofp %153 : vector<256x256xi8> to vector<256x256xbf16>
    %cst_62 = arith.constant dense<0.000000e+00> : vector<8x256xf32>
    %155 = tpu.matmul %6, %154, %cst_62 {dimension_numbers = #tpu.dot_dimension_numbers<[1], [0], [0], [1], [0, 0, 1, 1], [], []>} : vector<8x256xbf16>, vector<256x256xbf16>, vector<8x256xf32> -> vector<8x256xf32>
    %156 = vector.extract_strided_slice %5 {offsets = [0, 18], sizes = [8, 1], strides = [1, 1]} : vector<8x32xf32> to vector<8x1xf32>
    %157 = vector.broadcast %156 : vector<8x1xf32> to vector<8x256xf32>
    %158 = arith.mulf %157, %155 : vector<8x256xf32>
    %159 = arith.addf %151, %158 : vector<8x256xf32>
    %c19 = arith.constant 19 : index
    %c0_63 = arith.constant 0 : index
    %c0_64 = arith.constant 0 : index
    %160 = vector.load %arg13[%c19, %c0_63, %c0_64] : memref<32x256x256xi8, #tpu.memory_space<vmem>>, vector<1x256x256xi8>
    %161 = vector.shape_cast %160 : vector<1x256x256xi8> to vector<256x256xi8>
    %162 = arith.sitofp %161 : vector<256x256xi8> to vector<256x256xbf16>
    %cst_65 = arith.constant dense<0.000000e+00> : vector<8x256xf32>
    %163 = tpu.matmul %6, %162, %cst_65 {dimension_numbers = #tpu.dot_dimension_numbers<[1], [0], [0], [1], [0, 0, 1, 1], [], []>} : vector<8x256xbf16>, vector<256x256xbf16>, vector<8x256xf32> -> vector<8x256xf32>
    %164 = vector.extract_strided_slice %5 {offsets = [0, 19], sizes = [8, 1], strides = [1, 1]} : vector<8x32xf32> to vector<8x1xf32>
    %165 = vector.broadcast %164 : vector<8x1xf32> to vector<8x256xf32>
    %166 = arith.mulf %165, %163 : vector<8x256xf32>
    %167 = arith.addf %159, %166 : vector<8x256xf32>
    %c20 = arith.constant 20 : index
    %c0_66 = arith.constant 0 : index
    %c0_67 = arith.constant 0 : index
    %168 = vector.load %arg13[%c20, %c0_66, %c0_67] : memref<32x256x256xi8, #tpu.memory_space<vmem>>, vector<1x256x256xi8>
    %169 = vector.shape_cast %168 : vector<1x256x256xi8> to vector<256x256xi8>
    %170 = arith.sitofp %169 : vector<256x256xi8> to vector<256x256xbf16>
    %cst_68 = arith.constant dense<0.000000e+00> : vector<8x256xf32>
    %171 = tpu.matmul %6, %170, %cst_68 {dimension_numbers = #tpu.dot_dimension_numbers<[1], [0], [0], [1], [0, 0, 1, 1], [], []>} : vector<8x256xbf16>, vector<256x256xbf16>, vector<8x256xf32> -> vector<8x256xf32>
    %172 = vector.extract_strided_slice %5 {offsets = [0, 20], sizes = [8, 1], strides = [1, 1]} : vector<8x32xf32> to vector<8x1xf32>
    %173 = vector.broadcast %172 : vector<8x1xf32> to vector<8x256xf32>
    %174 = arith.mulf %173, %171 : vector<8x256xf32>
    %175 = arith.addf %167, %174 : vector<8x256xf32>
    %c21 = arith.constant 21 : index
    %c0_69 = arith.constant 0 : index
    %c0_70 = arith.constant 0 : index
    %176 = vector.load %arg13[%c21, %c0_69, %c0_70] : memref<32x256x256xi8, #tpu.memory_space<vmem>>, vector<1x256x256xi8>
    %177 = vector.shape_cast %176 : vector<1x256x256xi8> to vector<256x256xi8>
    %178 = arith.sitofp %177 : vector<256x256xi8> to vector<256x256xbf16>
    %cst_71 = arith.constant dense<0.000000e+00> : vector<8x256xf32>
    %179 = tpu.matmul %6, %178, %cst_71 {dimension_numbers = #tpu.dot_dimension_numbers<[1], [0], [0], [1], [0, 0, 1, 1], [], []>} : vector<8x256xbf16>, vector<256x256xbf16>, vector<8x256xf32> -> vector<8x256xf32>
    %180 = vector.extract_strided_slice %5 {offsets = [0, 21], sizes = [8, 1], strides = [1, 1]} : vector<8x32xf32> to vector<8x1xf32>
    %181 = vector.broadcast %180 : vector<8x1xf32> to vector<8x256xf32>
    %182 = arith.mulf %181, %179 : vector<8x256xf32>
    %183 = arith.addf %175, %182 : vector<8x256xf32>
    %c22 = arith.constant 22 : index
    %c0_72 = arith.constant 0 : index
    %c0_73 = arith.constant 0 : index
    %184 = vector.load %arg13[%c22, %c0_72, %c0_73] : memref<32x256x256xi8, #tpu.memory_space<vmem>>, vector<1x256x256xi8>
    %185 = vector.shape_cast %184 : vector<1x256x256xi8> to vector<256x256xi8>
    %186 = arith.sitofp %185 : vector<256x256xi8> to vector<256x256xbf16>
    %cst_74 = arith.constant dense<0.000000e+00> : vector<8x256xf32>
    %187 = tpu.matmul %6, %186, %cst_74 {dimension_numbers = #tpu.dot_dimension_numbers<[1], [0], [0], [1], [0, 0, 1, 1], [], []>} : vector<8x256xbf16>, vector<256x256xbf16>, vector<8x256xf32> -> vector<8x256xf32>
    %188 = vector.extract_strided_slice %5 {offsets = [0, 22], sizes = [8, 1], strides = [1, 1]} : vector<8x32xf32> to vector<8x1xf32>
    %189 = vector.broadcast %188 : vector<8x1xf32> to vector<8x256xf32>
    %190 = arith.mulf %189, %187 : vector<8x256xf32>
    %191 = arith.addf %183, %190 : vector<8x256xf32>
    %c23 = arith.constant 23 : index
    %c0_75 = arith.constant 0 : index
    %c0_76 = arith.constant 0 : index
    %192 = vector.load %arg13[%c23, %c0_75, %c0_76] : memref<32x256x256xi8, #tpu.memory_space<vmem>>, vector<1x256x256xi8>
    %193 = vector.shape_cast %192 : vector<1x256x256xi8> to vector<256x256xi8>
    %194 = arith.sitofp %193 : vector<256x256xi8> to vector<256x256xbf16>
    %cst_77 = arith.constant dense<0.000000e+00> : vector<8x256xf32>
    %195 = tpu.matmul %6, %194, %cst_77 {dimension_numbers = #tpu.dot_dimension_numbers<[1], [0], [0], [1], [0, 0, 1, 1], [], []>} : vector<8x256xbf16>, vector<256x256xbf16>, vector<8x256xf32> -> vector<8x256xf32>
    %196 = vector.extract_strided_slice %5 {offsets = [0, 23], sizes = [8, 1], strides = [1, 1]} : vector<8x32xf32> to vector<8x1xf32>
    %197 = vector.broadcast %196 : vector<8x1xf32> to vector<8x256xf32>
    %198 = arith.mulf %197, %195 : vector<8x256xf32>
    %199 = arith.addf %191, %198 : vector<8x256xf32>
    %c24 = arith.constant 24 : index
    %c0_78 = arith.constant 0 : index
    %c0_79 = arith.constant 0 : index
    %200 = vector.load %arg13[%c24, %c0_78, %c0_79] : memref<32x256x256xi8, #tpu.memory_space<vmem>>, vector<1x256x256xi8>
    %201 = vector.shape_cast %200 : vector<1x256x256xi8> to vector<256x256xi8>
    %202 = arith.sitofp %201 : vector<256x256xi8> to vector<256x256xbf16>
    %cst_80 = arith.constant dense<0.000000e+00> : vector<8x256xf32>
    %203 = tpu.matmul %6, %202, %cst_80 {dimension_numbers = #tpu.dot_dimension_numbers<[1], [0], [0], [1], [0, 0, 1, 1], [], []>} : vector<8x256xbf16>, vector<256x256xbf16>, vector<8x256xf32> -> vector<8x256xf32>
    %204 = vector.extract_strided_slice %5 {offsets = [0, 24], sizes = [8, 1], strides = [1, 1]} : vector<8x32xf32> to vector<8x1xf32>
    %205 = vector.broadcast %204 : vector<8x1xf32> to vector<8x256xf32>
    %206 = arith.mulf %205, %203 : vector<8x256xf32>
    %207 = arith.addf %199, %206 : vector<8x256xf32>
    %c25 = arith.constant 25 : index
    %c0_81 = arith.constant 0 : index
    %c0_82 = arith.constant 0 : index
    %208 = vector.load %arg13[%c25, %c0_81, %c0_82] : memref<32x256x256xi8, #tpu.memory_space<vmem>>, vector<1x256x256xi8>
    %209 = vector.shape_cast %208 : vector<1x256x256xi8> to vector<256x256xi8>
    %210 = arith.sitofp %209 : vector<256x256xi8> to vector<256x256xbf16>
    %cst_83 = arith.constant dense<0.000000e+00> : vector<8x256xf32>
    %211 = tpu.matmul %6, %210, %cst_83 {dimension_numbers = #tpu.dot_dimension_numbers<[1], [0], [0], [1], [0, 0, 1, 1], [], []>} : vector<8x256xbf16>, vector<256x256xbf16>, vector<8x256xf32> -> vector<8x256xf32>
    %212 = vector.extract_strided_slice %5 {offsets = [0, 25], sizes = [8, 1], strides = [1, 1]} : vector<8x32xf32> to vector<8x1xf32>
    %213 = vector.broadcast %212 : vector<8x1xf32> to vector<8x256xf32>
    %214 = arith.mulf %213, %211 : vector<8x256xf32>
    %215 = arith.addf %207, %214 : vector<8x256xf32>
    %c26 = arith.constant 26 : index
    %c0_84 = arith.constant 0 : index
    %c0_85 = arith.constant 0 : index
    %216 = vector.load %arg13[%c26, %c0_84, %c0_85] : memref<32x256x256xi8, #tpu.memory_space<vmem>>, vector<1x256x256xi8>
    %217 = vector.shape_cast %216 : vector<1x256x256xi8> to vector<256x256xi8>
    %218 = arith.sitofp %217 : vector<256x256xi8> to vector<256x256xbf16>
    %cst_86 = arith.constant dense<0.000000e+00> : vector<8x256xf32>
    %219 = tpu.matmul %6, %218, %cst_86 {dimension_numbers = #tpu.dot_dimension_numbers<[1], [0], [0], [1], [0, 0, 1, 1], [], []>} : vector<8x256xbf16>, vector<256x256xbf16>, vector<8x256xf32> -> vector<8x256xf32>
    %220 = vector.extract_strided_slice %5 {offsets = [0, 26], sizes = [8, 1], strides = [1, 1]} : vector<8x32xf32> to vector<8x1xf32>
    %221 = vector.broadcast %220 : vector<8x1xf32> to vector<8x256xf32>
    %222 = arith.mulf %221, %219 : vector<8x256xf32>
    %223 = arith.addf %215, %222 : vector<8x256xf32>
    %c27 = arith.constant 27 : index
    %c0_87 = arith.constant 0 : index
    %c0_88 = arith.constant 0 : index
    %224 = vector.load %arg13[%c27, %c0_87, %c0_88] : memref<32x256x256xi8, #tpu.memory_space<vmem>>, vector<1x256x256xi8>
    %225 = vector.shape_cast %224 : vector<1x256x256xi8> to vector<256x256xi8>
    %226 = arith.sitofp %225 : vector<256x256xi8> to vector<256x256xbf16>
    %cst_89 = arith.constant dense<0.000000e+00> : vector<8x256xf32>
    %227 = tpu.matmul %6, %226, %cst_89 {dimension_numbers = #tpu.dot_dimension_numbers<[1], [0], [0], [1], [0, 0, 1, 1], [], []>} : vector<8x256xbf16>, vector<256x256xbf16>, vector<8x256xf32> -> vector<8x256xf32>
    %228 = vector.extract_strided_slice %5 {offsets = [0, 27], sizes = [8, 1], strides = [1, 1]} : vector<8x32xf32> to vector<8x1xf32>
    %229 = vector.broadcast %228 : vector<8x1xf32> to vector<8x256xf32>
    %230 = arith.mulf %229, %227 : vector<8x256xf32>
    %231 = arith.addf %223, %230 : vector<8x256xf32>
    %c28 = arith.constant 28 : index
    %c0_90 = arith.constant 0 : index
    %c0_91 = arith.constant 0 : index
    %232 = vector.load %arg13[%c28, %c0_90, %c0_91] : memref<32x256x256xi8, #tpu.memory_space<vmem>>, vector<1x256x256xi8>
    %233 = vector.shape_cast %232 : vector<1x256x256xi8> to vector<256x256xi8>
    %234 = arith.sitofp %233 : vector<256x256xi8> to vector<256x256xbf16>
    %cst_92 = arith.constant dense<0.000000e+00> : vector<8x256xf32>
    %235 = tpu.matmul %6, %234, %cst_92 {dimension_numbers = #tpu.dot_dimension_numbers<[1], [0], [0], [1], [0, 0, 1, 1], [], []>} : vector<8x256xbf16>, vector<256x256xbf16>, vector<8x256xf32> -> vector<8x256xf32>
    %236 = vector.extract_strided_slice %5 {offsets = [0, 28], sizes = [8, 1], strides = [1, 1]} : vector<8x32xf32> to vector<8x1xf32>
    %237 = vector.broadcast %236 : vector<8x1xf32> to vector<8x256xf32>
    %238 = arith.mulf %237, %235 : vector<8x256xf32>
    %239 = arith.addf %231, %238 : vector<8x256xf32>
    %c29 = arith.constant 29 : index
    %c0_93 = arith.constant 0 : index
    %c0_94 = arith.constant 0 : index
    %240 = vector.load %arg13[%c29, %c0_93, %c0_94] : memref<32x256x256xi8, #tpu.memory_space<vmem>>, vector<1x256x256xi8>
    %241 = vector.shape_cast %240 : vector<1x256x256xi8> to vector<256x256xi8>
    %242 = arith.sitofp %241 : vector<256x256xi8> to vector<256x256xbf16>
    %cst_95 = arith.constant dense<0.000000e+00> : vector<8x256xf32>
    %243 = tpu.matmul %6, %242, %cst_95 {dimension_numbers = #tpu.dot_dimension_numbers<[1], [0], [0], [1], [0, 0, 1, 1], [], []>} : vector<8x256xbf16>, vector<256x256xbf16>, vector<8x256xf32> -> vector<8x256xf32>
    %244 = vector.extract_strided_slice %5 {offsets = [0, 29], sizes = [8, 1], strides = [1, 1]} : vector<8x32xf32> to vector<8x1xf32>
    %245 = vector.broadcast %244 : vector<8x1xf32> to vector<8x256xf32>
    %246 = arith.mulf %245, %243 : vector<8x256xf32>
    %247 = arith.addf %239, %246 : vector<8x256xf32>
    %c30 = arith.constant 30 : index
    %c0_96 = arith.constant 0 : index
    %c0_97 = arith.constant 0 : index
    %248 = vector.load %arg13[%c30, %c0_96, %c0_97] : memref<32x256x256xi8, #tpu.memory_space<vmem>>, vector<1x256x256xi8>
    %249 = vector.shape_cast %248 : vector<1x256x256xi8> to vector<256x256xi8>
    %250 = arith.sitofp %249 : vector<256x256xi8> to vector<256x256xbf16>
    %cst_98 = arith.constant dense<0.000000e+00> : vector<8x256xf32>
    %251 = tpu.matmul %6, %250, %cst_98 {dimension_numbers = #tpu.dot_dimension_numbers<[1], [0], [0], [1], [0, 0, 1, 1], [], []>} : vector<8x256xbf16>, vector<256x256xbf16>, vector<8x256xf32> -> vector<8x256xf32>
    %252 = vector.extract_strided_slice %5 {offsets = [0, 30], sizes = [8, 1], strides = [1, 1]} : vector<8x32xf32> to vector<8x1xf32>
    %253 = vector.broadcast %252 : vector<8x1xf32> to vector<8x256xf32>
    %254 = arith.mulf %253, %251 : vector<8x256xf32>
    %255 = arith.addf %247, %254 : vector<8x256xf32>
    %c31 = arith.constant 31 : index
    %c0_99 = arith.constant 0 : index
    %c0_100 = arith.constant 0 : index
    %256 = vector.load %arg13[%c31, %c0_99, %c0_100] : memref<32x256x256xi8, #tpu.memory_space<vmem>>, vector<1x256x256xi8>
    %257 = vector.shape_cast %256 : vector<1x256x256xi8> to vector<256x256xi8>
    %258 = arith.sitofp %257 : vector<256x256xi8> to vector<256x256xbf16>
    %cst_101 = arith.constant dense<0.000000e+00> : vector<8x256xf32>
    %259 = tpu.matmul %6, %258, %cst_101 {dimension_numbers = #tpu.dot_dimension_numbers<[1], [0], [0], [1], [0, 0, 1, 1], [], []>} : vector<8x256xbf16>, vector<256x256xbf16>, vector<8x256xf32> -> vector<8x256xf32>
    %260 = vector.extract_strided_slice %5 {offsets = [0, 31], sizes = [8, 1], strides = [1, 1]} : vector<8x32xf32> to vector<8x1xf32>
    %261 = vector.broadcast %260 : vector<8x1xf32> to vector<8x256xf32>
    %262 = arith.mulf %261, %259 : vector<8x256xf32>
    %263 = arith.addf %255, %262 : vector<8x256xf32>
    %c0_102 = arith.constant 0 : index
    %c0_103 = arith.constant 0 : index
    %264 = vector.load %arg18[%c0_102, %c0_103] : memref<8x256xf32, #tpu.memory_space<vmem>>, vector<8x256xf32>
    tpu.vector_store %arg18[%c0_102, %c0_103], %263 {strides = array<i32>} : memref<8x256xf32, #tpu.memory_space<vmem>>, vector<8x256xf32>,
    %c7_i32 = arith.constant 7 : i32
    %265 = arith.cmpi eq, %arg0, %c7_i32 : i32
    %266 = arith.extui %265 : i1 to i32
    %c0_i32_104 = arith.constant 0 : i32
    %267 = arith.cmpi ne, %266, %c0_i32_104 : i32
    scf.if %267 {
      %c0_105 = arith.constant 0 : index
      %c0_106 = arith.constant 0 : index
      %268 = vector.load %arg18[%c0_105, %c0_106] : memref<8x256xf32, #tpu.memory_space<vmem>>, vector<8x256xf32>
      %c15_107 = arith.constant 15 : index
      %c0_108 = arith.constant 0 : index
      %c0_109 = arith.constant 0 : index
      %269 = vector.load %arg5[%c15_107, %c0_108, %c0_109] : memref<19x1x256xf32, #tpu.memory_space<vmem>>, vector<1x1x256xf32>
      %270 = vector.shape_cast %269 : vector<1x1x256xf32> to vector<1x256xf32>
      %271 = vector.broadcast %270 : vector<1x256xf32> to vector<8x256xf32>
      %272 = arith.mulf %268, %271 : vector<8x256xf32>
      %c14_110 = arith.constant 14 : index
      %c0_111 = arith.constant 0 : index
      %c0_112 = arith.constant 0 : index
      %273 = vector.load %arg5[%c14_110, %c0_111, %c0_112] : memref<19x1x256xf32, #tpu.memory_space<vmem>>, vector<1x1x256xf32>
      %274 = vector.shape_cast %273 : vector<1x1x256xf32> to vector<1x256xf32>
      %275 = vector.broadcast %274 : vector<1x256xf32> to vector<8x256xf32>
      %276 = arith.addf %272, %275 : vector<8x256xf32>
      %c0_113 = arith.constant 0 : index
      %c0_114 = arith.constant 0 : index
      %277 = vector.load %arg16[%c0_113, %c0_114] : memref<8x256xf32, #tpu.memory_space<vmem>>, vector<8x256xf32>
      %278 = arith.addf %276, %277 : vector<8x256xf32>
      %cst_115 = arith.constant 0.000000e+00 : f32
      %279 = vector.broadcast %cst_115 : f32 to vector<8x256xf32>
      %280 = arith.cmpf ogt, %278, %279 : vector<8x256xf32>
      %cst_116 = arith.constant 1.000000e-01 : f32
      %281 = vector.broadcast %cst_116 : f32 to vector<8x256xf32>
      %282 = arith.mulf %281, %278 : vector<8x256xf32>
      %283 = arith.select %280, %278, %282 : vector<8x256xi1>, vector<8x256xf32>
      %c10_117 = arith.constant 10 : index
      %c0_118 = arith.constant 0 : index
      %c0_119 = arith.constant 0 : index
      %284 = vector.load %arg4[%c10_117, %c0_118, %c0_119] : memref<13x256x256xf32, #tpu.memory_space<vmem>>, vector<1x256x256xf32>
      %285 = vector.shape_cast %284 : vector<1x256x256xf32> to vector<256x256xf32>
      %cst_120 = arith.constant dense<0.000000e+00> : vector<8x256xf32>
      %286 = tpu.matmul %283, %285, %cst_120 {dimension_numbers = #tpu.dot_dimension_numbers<[1], [0], [0], [1], [0, 0, 1, 1], [], []>} : vector<8x256xf32>, vector<256x256xf32>, vector<8x256xf32> -> vector<8x256xf32>
      %c16_121 = arith.constant 16 : index
      %c0_122 = arith.constant 0 : index
      %c0_123 = arith.constant 0 : index
      %287 = vector.load %arg5[%c16_121, %c0_122, %c0_123] : memref<19x1x256xf32, #tpu.memory_space<vmem>>, vector<1x1x256xf32>
      %288 = vector.shape_cast %287 : vector<1x1x256xf32> to vector<1x256xf32>
      %289 = vector.broadcast %288 : vector<1x256xf32> to vector<8x256xf32>
      %290 = arith.addf %286, %289 : vector<8x256xf32>
      %cst_124 = arith.constant 0.000000e+00 : f32
      %291 = vector.broadcast %cst_124 : f32 to vector<8x256xf32>
      %292 = arith.cmpf ogt, %290, %291 : vector<8x256xf32>
      %cst_125 = arith.constant 1.000000e-01 : f32
      %293 = vector.broadcast %cst_125 : f32 to vector<8x256xf32>
      %294 = arith.mulf %293, %290 : vector<8x256xf32>
      %295 = arith.select %292, %290, %294 : vector<8x256xi1>, vector<8x256xf32>
      %c11_126 = arith.constant 11 : index
      %c0_127 = arith.constant 0 : index
      %c0_128 = arith.constant 0 : index
      %296 = vector.load %arg4[%c11_126, %c0_127, %c0_128] : memref<13x256x256xf32, #tpu.memory_space<vmem>>, vector<1x256x256xf32>
      %297 = vector.shape_cast %296 : vector<1x256x256xf32> to vector<256x256xf32>
      %cst_129 = arith.constant dense<0.000000e+00> : vector<8x256xf32>
      %298 = tpu.matmul %295, %297, %cst_129 {dimension_numbers = #tpu.dot_dimension_numbers<[1], [0], [0], [1], [0, 0, 1, 1], [], []>} : vector<8x256xf32>, vector<256x256xf32>, vector<8x256xf32> -> vector<8x256xf32>
      %c17_130 = arith.constant 17 : index
      %c0_131 = arith.constant 0 : index
      %c0_132 = arith.constant 0 : index
      %299 = vector.load %arg5[%c17_130, %c0_131, %c0_132] : memref<19x1x256xf32, #tpu.memory_space<vmem>>, vector<1x1x256xf32>
      %300 = vector.shape_cast %299 : vector<1x1x256xf32> to vector<1x256xf32>
      %301 = vector.broadcast %300 : vector<1x256xf32> to vector<8x256xf32>
      %302 = arith.addf %298, %301 : vector<8x256xf32>
      %cst_133 = arith.constant 0.000000e+00 : f32
      %303 = vector.broadcast %cst_133 : f32 to vector<8x256xf32>
      %304 = arith.cmpf ogt, %302, %303 : vector<8x256xf32>
      %cst_134 = arith.constant 1.000000e-01 : f32
      %305 = vector.broadcast %cst_134 : f32 to vector<8x256xf32>
      %306 = arith.mulf %305, %302 : vector<8x256xf32>
      %307 = arith.select %304, %302, %306 : vector<8x256xi1>, vector<8x256xf32>
      %cst_135 = arith.constant 0.000000e+00 : f32
      %308 = vector.broadcast %cst_135 : f32 to vector<8x256xf32>
      %309 = arith.cmpf ogt, %307, %308 : vector<8x256xf32>
      %cst_136 = arith.constant 1.000000e-01 : f32
      %310 = vector.broadcast %cst_136 : f32 to vector<8x256xf32>
      %311 = arith.mulf %310, %307 : vector<8x256xf32>
      %312 = arith.select %309, %307, %311 : vector<8x256xi1>, vector<8x256xf32>
      %c12_137 = arith.constant 12 : index
      %c0_138 = arith.constant 0 : index
      %c0_139 = arith.constant 0 : index
      %313 = vector.load %arg4[%c12_137, %c0_138, %c0_139] : memref<13x256x256xf32, #tpu.memory_space<vmem>>, vector<1x256x256xf32>
      %314 = vector.shape_cast %313 : vector<1x256x256xf32> to vector<256x256xf32>
      %cst_140 = arith.constant dense<0.000000e+00> : vector<8x256xf32>
      %315 = tpu.matmul %312, %314, %cst_140 {dimension_numbers = #tpu.dot_dimension_numbers<[1], [0], [0], [1], [0, 0, 1, 1], [], []>} : vector<8x256xf32>, vector<256x256xf32>, vector<8x256xf32> -> vector<8x256xf32>
      %c18_141 = arith.constant 18 : index
      %c0_142 = arith.constant 0 : index
      %c0_143 = arith.constant 0 : index
      %316 = vector.load %arg5[%c18_141, %c0_142, %c0_143] : memref<19x1x256xf32, #tpu.memory_space<vmem>>, vector<1x1x256xf32>
      %317 = vector.shape_cast %316 : vector<1x1x256xf32> to vector<1x256xf32>
      %318 = vector.broadcast %317 : vector<1x256xf32> to vector<8x256xf32>
      %319 = arith.addf %315, %318 : vector<8x256xf32>
      %cst_144 = arith.constant 0.000000e+00 : f32
      %320 = vector.broadcast %cst_144 : f32 to vector<8x256xf32>
      %321 = arith.cmpf ogt, %319, %320 : vector<8x256xf32>
      %cst_145 = arith.constant 1.000000e-01 : f32
      %322 = vector.broadcast %cst_145 : f32 to vector<8x256xf32>
      %323 = arith.mulf %322, %319 : vector<8x256xf32>
      %324 = arith.select %321, %319, %323 : vector<8x256xi1>, vector<8x256xf32>
      %c0_146 = arith.constant 0 : index
      %c0_147 = arith.constant 0 : index
      %325 = vector.load %arg11[%c0_146, %c0_147] : memref<256x1xf32, #tpu.memory_space<vmem>>, vector<256x1xf32>
      %cst_148 = arith.constant dense<0.000000e+00> : vector<8x1xf32>
      %326 = tpu.matmul %324, %325, %cst_148 {dimension_numbers = #tpu.dot_dimension_numbers<[1], [0], [0], [1], [0, 0, 1, 1], [], []>} : vector<8x256xf32>, vector<256x1xf32>, vector<8x1xf32> -> vector<8x1xf32>
      %c0_149 = arith.constant 0 : index
      %c0_150 = arith.constant 0 : index
      %327 = vector.load %arg12[%c0_149, %c0_150] : memref<1x1xf32, #tpu.memory_space<vmem>>, vector<1x1xf32>
      %328 = vector.broadcast %327 : vector<1x1xf32> to vector<8x1xf32>
      %329 = arith.addf %326, %328 : vector<8x1xf32>
      %330 = math.absf %329 : vector<8x1xf32>
      %cst_151 = arith.constant 0.000000e+00 : f32
      %331 = vector.broadcast %cst_151 : f32 to vector<8x1xf32>
      %332 = arith.subf %331, %330 : vector<8x1xf32>
      %333 = math.exp %332 : vector<8x1xf32>
      %cst_152 = arith.constant 0.000000e+00 : f32
      %334 = vector.broadcast %cst_152 : f32 to vector<8x1xf32>
      %335 = arith.cmpf oge, %329, %334 : vector<8x1xf32>
      %cst_153 = arith.constant 1.000000e+00 : f32
      %336 = vector.broadcast %cst_153 : f32 to vector<8x1xf32>
      %337 = arith.addf %336, %333 : vector<8x1xf32>
      %cst_154 = arith.constant 1.000000e+00 : f32
      %338 = vector.broadcast %cst_154 : f32 to vector<8x1xf32>
      %339 = arith.divf %338, %337 : vector<8x1xf32>
      %cst_155 = arith.constant 1.000000e+00 : f32
      %340 = vector.broadcast %cst_155 : f32 to vector<8x1xf32>
      %341 = arith.addf %340, %333 : vector<8x1xf32>
      %342 = arith.divf %333, %341 : vector<8x1xf32>
      %343 = arith.select %335, %339, %342 : vector<8x1xi1>, vector<8x1xf32>
      %c0_156 = arith.constant 0 : index
      %c0_157 = arith.constant 0 : index
      %344 = vector.load %arg14[%c0_156, %c0_157] : memref<8x1xf32, #tpu.memory_space<vmem>>, vector<8x1xf32>
      tpu.vector_store %arg14[%c0_156, %c0_157], %343 {strides = array<i32>} : memref<8x1xf32, #tpu.memory_space<vmem>>, vector<8x1xf32>,
    } else {
    }
    return
  }
  func.func @transform_0(%arg0: i32) -> (i32, i32) {
    %c0_i32 = arith.constant 0 : i32
    %c0_i32_0 = arith.constant 0 : i32
    %c0_i32_1 = arith.constant 0 : i32
    return %c0_i32, %c0_i32_0 : i32, i32
  }
  func.func @transform_1(%arg0: i32) -> (i32, i32) {
    %c0_i32 = arith.constant 0 : i32
    %c0_i32_0 = arith.constant 0 : i32
    %c0_i32_1 = arith.constant 0 : i32
    return %c0_i32, %c0_i32_0 : i32, i32
  }
  func.func @transform_2(%arg0: i32) -> (i32, i32) {
    %c0_i32 = arith.constant 0 : i32
    %c0_i32_0 = arith.constant 0 : i32
    %c0_i32_1 = arith.constant 0 : i32
    return %c0_i32, %c0_i32_0 : i32, i32
  }
  func.func @transform_3(%arg0: i32) -> (i32, i32, i32) {
    %c0_i32 = arith.constant 0 : i32
    %c0_i32_0 = arith.constant 0 : i32
    %c0_i32_1 = arith.constant 0 : i32
    %c0_i32_2 = arith.constant 0 : i32
    return %c0_i32, %c0_i32_0, %c0_i32_1 : i32, i32, i32
  }
  func.func @transform_4(%arg0: i32) -> (i32, i32, i32) {
    %c0_i32 = arith.constant 0 : i32
    %c0_i32_0 = arith.constant 0 : i32
    %c0_i32_1 = arith.constant 0 : i32
    %c0_i32_2 = arith.constant 0 : i32
    return %c0_i32, %c0_i32_0, %c0_i32_1 : i32, i32, i32
  }
  func.func @transform_5(%arg0: i32) -> (i32, i32) {
    %c0_i32 = arith.constant 0 : i32
    %c0_i32_0 = arith.constant 0 : i32
    %c0_i32_1 = arith.constant 0 : i32
    return %c0_i32, %c0_i32_0 : i32, i32
  }
  func.func @transform_6(%arg0: i32) -> (i32, i32) {
    %c0_i32 = arith.constant 0 : i32
    %c0_i32_0 = arith.constant 0 : i32
    %c0_i32_1 = arith.constant 0 : i32
    return %c0_i32, %c0_i32_0 : i32, i32
  }
  func.func @transform_7(%arg0: i32) -> (i32, i32) {
    %c0_i32 = arith.constant 0 : i32
    %c0_i32_0 = arith.constant 0 : i32
    %c0_i32_1 = arith.constant 0 : i32
    return %c0_i32, %c0_i32_0 : i32, i32
  }
  func.func @transform_8(%arg0: i32) -> (i32, i32) {
    %c0_i32 = arith.constant 0 : i32
    %c0_i32_0 = arith.constant 0 : i32
    %c0_i32_1 = arith.constant 0 : i32
    return %c0_i32, %c0_i32_0 : i32, i32
  }
  func.func @transform_9(%arg0: i32) -> (i32, i32) {
    %c0_i32 = arith.constant 0 : i32
    %c0_i32_0 = arith.constant 0 : i32
    %c0_i32_1 = arith.constant 0 : i32
    return %c0_i32, %c0_i32_0 : i32, i32
  }
  func.func @transform_10(%arg0: i32) -> (i32, i32) {
    %c0_i32 = arith.constant 0 : i32
    %c0_i32_0 = arith.constant 0 : i32
    %c0_i32_1 = arith.constant 0 : i32
    return %c0_i32, %c0_i32_0 : i32, i32
  }
  func.func @transform_11(%arg0: i32) -> (i32, i32) {
    %c0_i32 = arith.constant 0 : i32
    %c0_i32_0 = arith.constant 0 : i32
    %c0_i32_1 = arith.constant 0 : i32
    return %c0_i32, %c0_i32_0 : i32, i32
  }
  func.func @transform_12(%arg0: i32) -> (i32, i32, i32) {
    %c0_i32 = arith.constant 0 : i32
    %c0_i32_0 = arith.constant 0 : i32
    %c0_i32_1 = arith.constant 0 : i32
    return %arg0, %c0_i32, %c0_i32_0 : i32, i32, i32
  }
  func.func @transform_13(%arg0: i32) -> (i32, i32) {
    %c0_i32 = arith.constant 0 : i32
    %c0_i32_0 = arith.constant 0 : i32
    %c0_i32_1 = arith.constant 0 : i32
    return %c0_i32, %c0_i32_0 : i32, i32
  }
}

</mosaic_0001>

<bundles_post_ra>
// kernel: tpu_custom_call.1
= control target key start
LH: loop header
LB: loop body
LE: loop exit
PB: predicated region body
PF: predicated region fallthrough
CT: control target
= control target key end

     0   :  { %s9962_s0 = inlined_call_operand.hbm [shape: f32[8,32], index: 0, kind: input, shape index: {}]   ;;  %s9963_s1 = inlined_call_operand.vmem [shape: f32[8,1], index: 1, kind: input, shape index: {}]   ;;  %s9964_s2 = inlined_call_operand.hbm [shape: f32[32,256], index: 2, kind: input, shape index: {}]   ;;  %s9965_s3 = inlined_call_operand.hbm [shape: f32[13,256,256], index: 3, kind: input, shape index: {}]   ;;  %s9966_s4 = inlined_call_operand.hbm [shape: f32[19,1,256], index: 4, kind: input, shape index: {}]   ;;  %s9967_s5 = inlined_call_operand.vmem [shape: f32[256,4], index: 5, kind: input, shape index: {}]   ;;  %s9968_s6 = inlined_call_operand.hbm [shape: f32[1,4], index: 6, kind: input, shape index: {}]   ;;  %s9969_s7 = inlined_call_operand.hbm [shape: f32[4,1024], index: 7, kind: input, shape index: {}]   ;;  %s9970_s8 = inlined_call_operand.hbm [shape: f32[1,1024], index: 8, kind: input, shape index: {}]   ;;  %s9971_s9 = inlined_call_operand.hbm [shape: f32[1024,256], index: 9, kind: input, shape index: {}]   ;;  %s9972_s10 = inlined_call_operand.vmem [shape: f32[256,1], index: 10, kind: input, shape index: {}]   ;;  %s9973_s11 = inlined_call_operand.<no memory space> [shape: f32[1,1], index: 11, kind: input, shape index: {}]   ;;  %s9974_s12 = inlined_call_operand.hbm [shape: s8[256,256,256], index: 12, kind: input, shape index: {}]   ;;  %s9975_s13 = inlined_call_operand.vmem [shape: f32[8,1], index: 13, kind: output, shape index: {}]  }
   0x1   :  { %9983 = sst [smem:[#allocation27_spill]] %s9962_s0  ;;  %v18_v0 = vstv %s9973_s11 }
   0x2   :  { %9984 = sst [smem:[#allocation28_spill]] %s9964_s2  ;;  %19 = vst [vmem:[#allocation6] sm:$0x1] %v18_v0 }
   0x3   :  { %9985 = sst [smem:[#allocation29_spill]] %s9965_s3 }
   0x4   :  { %9986 = sst [smem:[#allocation30_spill]] %s9966_s4 }
   0x5   :  { %20 = vsyncpa [#allocation8], 0 }
   0x6   :  { %21 = vsyncpa [#allocation10], 0 }
   0x7   :  { %22 = vsyncpa [#allocation13], 0 }
   0x8   :  { %23 = vsyncpa [#allocation16], 0 }
   0x9   :  { %24 = vsyncpa [#allocation19], 0  ;;  %s8644_s27 = smov 0   ;;  %s8646_s28 = smov 0  }
   0xa   :  { %s8648_s29 = smov 0   ;;  %s8650_s30 = smov 0  }
   0xb LB: > { %s8521_s11 = smov [#allocation7]   ;;  %s8665_s15 = sadd.s32 4294967295, %s8519_s30   ;;  %s8519_s30 = sphi %s8650_s30, %s10015_s30   ;;  %s8515_s29 = sphi %s8648_s29, %s10014_s29   ;;  %s8511_s28 = sphi %s8646_s28, %s10013_s28   ;;  %s8507_s27 = sphi %s8644_s27, %s10012_s27  }
   0xc   : > { %s347_s14 = sshll.u32 %s8521_s11, 4  ;;  %p7373_p0 = scmp.ge.s32.totalorder %s8519_s30, 1  ;;  %s348_s14 = int_to_ptr.vmem [resolvable:$true] %s347_s14 }
   0xd   : > { %p9980_p1 = scmp.eq.s32.totalorder %s8665_s15, 0  ;;  %p334_p2 = scmp.lt.s32.totalorder %s8519_s30, 9 }
   0xe   : > { %s8522_s17 = smov [#allocation9]   ;;  %s8523_s20 = smov [#allocation12]  }
   0xf   : > { %p8671_p4 = pnand %p7373_p0, %p334_p2  ;;  %s360_s18 = sshll.u32 %s8522_s17, 4  ;;  %s8677_s18 = int_to_ptr.vmem [resolvable:$true] %s360_s18 }
  0x10   : > { %s386_s21 = sshll.u32 %s8523_s20, 4  ;;  %s8240_s23 = scalar_lea.vmem %s348_s14, 128  ;;  %s8685_s21 = int_to_ptr.vmem [resolvable:$true] %s386_s21 }
  0x11   : > { %s9987_s16 = scalar_select %p8671_p4, 1, 0 }
  0x12   : > { %p8027_p5 = pneg %p8671_p4  ;;  %p8241_p8 = scmp.ne.s32.totalorder %s348_s14, %s8240_s23 }
  0x13   : > { %p8248_p11 = scmp.lt.s32.totalorder %s348_s14, %s348_s14  ;;  %p8249_p12 = scmp.lt.s32.totalorder %s8240_s23, %s8240_s23 }
  0x14   : > { %p8681_p6 = pnand %p8027_p5, %p9980_p1 }
  0x15   : > { %p8250_p13 = por %p8249_p12, %p8248_p11 }
  0x16   : > { %p8689_p7 = pneg %p8681_p6 }
  0x18   : > { %p8243_p9 = pnand %p8241_p8, %p8689_p7 }
  0x1a   : > { %p8244_p10 = pneg %p8243_p9 }
  0x1c   : > { %p8251_p0 = pnand %p8250_p13, %p8244_p10 }
  0x1e   : > { %8254 = shalt.err (!%p8251_p0)
}
  0x1f   : > { %s9990_s0 = sld [smem:[#allocation27_spill]]  ;;  %s8266_s26 = scalar_lea.vmem %s8677_s18, 1024 }
  0x20   : > { %p8267_p2 = scmp.ne.s32.totalorder %s8677_s18, %s8266_s26  ;;  %p8274_p9 = scmp.lt.s32.totalorder %s8677_s18, %s8677_s18 }
  0x21   : > { %p8275_p11 = scmp.lt.s32.totalorder %s8266_s26, %s8266_s26 }
  0x22   : > { %p8269_p5 = pnand %p8267_p2, %p8689_p7 }
  0x23   : > { %p8276_p10 = por %p8275_p11, %p8274_p9 }
  0x24   : > { %p8270_p8 = pneg %p8269_p5 }
  0x25   : > { %8030 = dma.hbm_to_vmem [thread:$0]  (!%p8681_p6), %s9990_s0, 128, %s348_s14, [#allocation8]  }
  0x26   : > { %p8277_p12 = pnand %p8276_p10, %p8270_p8 }
  0x28   : > { %8280 = shalt.err (!%p8277_p12)
}
  0x29   : > { %s9976_s11 = smov 256   ;;  %s9978_s17 = smov 16  }
  0x2a   : > { %s9991_s2 = sld [smem:[#allocation28_spill]]  ;;  %s8292_s23 = scalar_lea.vmem %s8685_s21, 608 }
  0x2b   : > { %p8293_p13 = scmp.ne.s32.totalorder %s8685_s21, %s8292_s23  ;;  %p8300_p5 = scmp.lt.s32.totalorder %s8685_s21, %s8685_s21 }
  0x2c   : > { %p8301_p8 = scmp.lt.s32.totalorder %s8292_s23, %s8292_s23 }
  0x2d   : > { %p8295_p0 = pnand %p8293_p13, %p8689_p7 }
  0x2e   : > { %p8302_p9 = por %p8301_p8, %p8300_p5 }
  0x2f   : > { %p8296_p2 = pneg %p8295_p0 }
  0x30   : > { %8033 = dma.hbm_to_vmem [thread:$0]  (!%p8681_p6), %s9991_s2, 1024, %s8677_s18, [#allocation10], %s9976_s11, %s9976_s11, %s9978_s17  }
  0x31   : > { %p8303_p11 = pnand %p8302_p9, %p8296_p2 }
  0x33   : > { %8306 = shalt.err (!%p8303_p11)
}
  0x34   : > { %s8526_s24 = smov 32   ;;  %s8527_s25 = smov 2  }
  0x35   : > { %s9992_s4 = sld [smem:[#allocation30_spill]]  ;;  %s8528_s18 = smov [#allocation15]  }
  0x36   : > { %s414_s20 = sshll.u32 %s8528_s18, 4  ;;  %s8529_s11 = smov [#allocation11]   ;;  %s415_s20 = int_to_ptr.vmem [resolvable:$true] %s414_s20 }
  0x37   : > { %s373_s17 = sshll.u32 %s8529_s11, 4  ;;  %s8318_s0 = scalar_lea.vmem %s415_s20, 512  ;;  %s374_s17 = int_to_ptr.vmem [resolvable:$true] %s373_s17 }
  0x38   : > { %p8319_p10 = scmp.ne.s32.totalorder %s415_s20, %s8318_s0  ;;  %p8326_p0 = scmp.lt.s32.totalorder %s415_s20, %s415_s20 }
  0x39   : > { %p8327_p2 = scmp.lt.s32.totalorder %s8318_s0, %s8318_s0 }
  0x3a   : > { %p8321_p12 = pnand %p8319_p10, %p8689_p7 }
  0x3b   : > { %8039 = dma.hbm_to_vmem [thread:$0]  (!%p8681_p6), %s9992_s4, 608, %s8685_s21, [#allocation13], %s8526_s24, %s8526_s24, %s8527_s25  }
  0x3c   : > { %p8322_p13 = pneg %p8321_p12  ;;  %p8328_p5 = por %p8327_p2, %p8326_p0 }
  0x3e   : > { %p8329_p8 = pnand %p8328_p5, %p8322_p13 }
  0x40   : > { %8332 = shalt.err (!%p8329_p8)
}
  0x41   : > { %8045 = dma.hbm_to_vmem [thread:$0]  (!%p8681_p6), %s9969_s7, 512, %s415_s20, [#allocation16]  }
  0x42   : > { %s8344_s21 = scalar_lea.vmem %s374_s17, 106496  ;;  %p8352_p10 = scmp.lt.s32.totalorder %s374_s17, %s374_s17 }
  0x43   : > { %p8345_p9 = scmp.ne.s32.totalorder %s374_s17, %s8344_s21  ;;  %p8353_p12 = scmp.lt.s32.totalorder %s8344_s21, %s8344_s21 }
  0x45   : > { %p8347_p11 = pnand %p8345_p9, %p8689_p7  ;;  %p8354_p1 = por %p8353_p12, %p8352_p10 }
  0x47   : > { %p8348_p3 = pneg %p8347_p11 }
  0x49   : > { %p8355_p4 = pnand %p8354_p1, %p8348_p3 }
  0x4b   : > { %8358 = shalt.err (!%p8355_p4)
}
  0x4c   : > { %s9993_s0 = smov 16   ;;  %s9994_s11 = smov 256  }
  0x4d   : > { %s9995_s3 = sld [smem:[#allocation29_spill]]  ;;  %s8530_s14 = smov [#allocation14]  }
  0x4e   : > { %s403_s18 = sshll.u32 %s8530_s14, 4  ;;  %s8531_s20 = smov [#allocation17]   ;;  %s404_s18 = int_to_ptr.vmem [resolvable:$true] %s403_s18 }
  0x4f   : > { %s425_s23 = sshll.u32 %s8531_s20, 4  ;;  %s8370_s26 = scalar_lea.vmem %s404_s18, 16  ;;  %s426_s23 = int_to_ptr.vmem [resolvable:$true] %s425_s23 }
  0x50   : > { %p8371_p13 = scmp.ne.s32.totalorder %s404_s18, %s8370_s26  ;;  %s8377_s21 = scalar_lea.vmem %s404_s18, 32 }
  0x51   : > { %p8378_p4 = scmp.lt.s32.totalorder %s404_s18, %s404_s18  ;;  %p8379_p0 = scmp.lt.s32.totalorder %s8377_s21, %s8370_s26 }
  0x52   : > { %p8373_p1 = pnand %p8371_p13, %p8689_p7 }
  0x53   : > { %8036 = dma.hbm_to_vmem [thread:$0]  (!%p8681_p6), %s9995_s3, 106496, %s374_s17, [#allocation10], %s9994_s11, %s9994_s11, %s9993_s0  }
  0x54   : > { %p8374_p3 = pneg %p8373_p1  ;;  %p8380_p2 = por %p8379_p0, %p8378_p4 }
  0x56   : > { %p8381_p5 = pnand %p8380_p2, %p8374_p3 }
  0x58   : > { %8384 = shalt.err (!%p8381_p5)
}
  0x59   : > { %8042 = dma.hbm_to_vmem [thread:$0]  (!%p8681_p6), %s9968_s6, 16, %s404_s18, [#allocation13]  }
  0x5a   : > { %s8396_s25 = scalar_lea.vmem %s426_s23, 128  ;;  %p8404_p10 = scmp.lt.s32.totalorder %s426_s23, %s426_s23 }
  0x5b   : > { %p8397_p8 = scmp.ne.s32.totalorder %s426_s23, %s8396_s25  ;;  %p8405_p12 = scmp.lt.s32.totalorder %s8396_s25, %s8396_s25 }
  0x5d   : > { %p8399_p9 = pnand %p8397_p8, %p8689_p7  ;;  %p8406_p13 = por %p8405_p12, %p8404_p10 }
  0x5f   : > { %p8400_p11 = pneg %p8399_p9 }
  0x61   : > { %p8407_p1 = pnand %p8406_p13, %p8400_p11 }
  0x63   : > { %8410 = shalt.err (!%p8407_p1)
}
  0x64   : > { %8048 = dma.hbm_to_vmem [thread:$0]  (!%p8681_p6), %s9970_s8, 128, %s426_s23, [#allocation16]  }
  0x65   : > { %s8532_s26 = smov [#allocation18]  }
  0x66   : > { %s435_s18 = sshll.u32 %s8532_s26, 4  ;;  %s436_s18 = int_to_ptr.vmem [resolvable:$true] %s435_s18 }
  0x67   : > { %s8422_s21 = scalar_lea.vmem %s436_s18, 32768  ;;  %p8430_p2 = scmp.lt.s32.totalorder %s436_s18, %s436_s18 }
  0x68   : > { %p8423_p3 = scmp.ne.s32.totalorder %s436_s18, %s8422_s21  ;;  %p8431_p5 = scmp.lt.s32.totalorder %s8422_s21, %s8422_s21 }
  0x6a   : > { %p8425_p4 = pnand %p8423_p3, %p8689_p7  ;;  %p8432_p8 = por %p8431_p5, %p8430_p2 }
  0x6c   : > { %p8426_p0 = pneg %p8425_p4 }
  0x6e   : > { %p8433_p9 = pnand %p8432_p8, %p8426_p0 }
  0x70   : > { %8436 = shalt.err (!%p8433_p9)
}
  0x71   : > { %8051 = dma.hbm_to_vmem [thread:$0]  (!%p8681_p6), %s9971_s9, 32768, %s436_s18, [#allocation19], %s9994_s11, %s9994_s11, %s9993_s0  }
  0x72   : > { %s8769_s19 = sadd.s32 1, %s8519_s30   ;;  %s289_s22 = sadd.s32 1, %s8515_s29 }
  0x73   : > { %s286_s17 = ssub.s32 %s8519_s30, %s8769_s19  ;;  %p296_p7 = scmp.ne.s32.totalorder %s8515_s29, %s8511_s28 }
  0x74   : > { %p287_p11 = scmp.eq.s32.totalorder %s286_s17, 0  ;;  %p297_p10 = scmp.eq.s32.totalorder %s8519_s30, 0 }
  0x75   : > { %p302_p12 = scmp.ne.s32.totalorder %s8511_s28, %s8507_s27  ;;  %p8064_p13 = scmp.lt.s32.totalorder %s8519_s30, 8 }
  0x76   : > { %s8781_s25 = scalar_select %p287_p11, %s8515_s29, %s289_s22  }
  0x77   : > { %p298_p1 = por %p297_p10, %p296_p7  ;;  %p9996_p3 = scmp.eq.s32.totalorder %s8665_s15, 0 }
  0x78   : > { %s455_s20 = sand.u32 1, %s8519_s30   ;;  %s457_s26 = sand.u32 1, %s8515_s29  }
  0x79   : > { %p8785_p4 = por %p9996_p3, %p302_p12  ;;  %s7383_s18 = sshll.u32 %s457_s26, 12 }
  0x7a   : > { %s7919_s21 = sshll.u32 %s8519_s30, 16  ;;  %s459_s27 = scalar_lea.vmem [#allocation20], %s7383_s18 }
  0x7b   : > { %s9997_s14 = scalar_select %p8785_p4, 1, 0 }
  0x7c   : > { %s8795_s2 = scalar_lea.hbm %s9974_s12, %s7919_s21  ;;  %s467_s22 = sshll.u32 %s459_s27, 4  ;;  %s8797_s22 = int_to_ptr.vmem [resolvable:$true] %s467_s22 }
  0x7d   : > { %p8799_p6 = pnand %p8064_p13, %p298_p1  ;;  %s8803_s3 = scalar_lea.sflag [#allocation8], %s455_s20 }
  0x7e   : > { %s8437_s30 = scalar_lea.hbm %s8795_s2, 65536  ;;  %s8442_s18 = scalar_lea.hbm %s9974_s12, 524288 }
  0x7f   : > { %p8438_p0 = scmp.ne.s32.totalorder %s8795_s2, %s8437_s30  ;;  %p8439_p2 = pneg %p8799_p6 }
  0x80   : > { %p8443_p9 = scmp.lt.s32.totalorder %s8795_s2, %s9974_s12  ;;  %p8444_p7 = scmp.lt.s32.totalorder %s8442_s18, %s8437_s30 }
  0x81   : > { %p8440_p5 = pnand %p8439_p2, %p8438_p0 }
  0x82   : > { %p8445_p11 = por %p8444_p7, %p8443_p9 }
  0x83   : > { %p8441_p8 = pneg %p8440_p5 }
  0x85   : > { %p8446_p10 = pnand %p8445_p11, %p8441_p8 }
  0x87   : > { %8449 = shalt.err (!%p8446_p10)
}
  0x88   : > { %s8450_s20 = scalar_lea.vmem %s8797_s22, 65536  ;;  %s8533_s27 = smov [#allocation20]  }
  0x89   : > { %p8451_p12 = scmp.ne.s32.totalorder %s8797_s22, %s8450_s20  ;;  %s8455_s4 = sshll.u32 %s8533_s27, 4  ;;  %s8456_s4 = int_to_ptr.vmem [resolvable:$false] %s8455_s4 }
  0x8a   : > { %s8457_s26 = scalar_lea.vmem %s8456_s4, 131072  ;;  %p8458_p3 = scmp.lt.s32.totalorder %s8797_s22, %s8456_s4 }
  0x8b   : > { %p8453_p13 = pnand %p8451_p12, %p8439_p2  ;;  %p8459_p0 = scmp.lt.s32.totalorder %s8457_s26, %s8450_s20 }
  0x8d   : > { %p8454_p1 = pneg %p8453_p13  ;;  %p8460_p5 = por %p8459_p0, %p8458_p3 }
  0x8f   : > { %p8461_p4 = pnand %p8460_p5, %p8454_p1 }
  0x91   : > { %8464 = shalt.err (!%p8461_p4)
}
  0x92   : > { %8055 = dma.hbm_to_vmem [thread:$0]  (!%p8799_p6), %s8795_s2, 65536, %s8797_s22, %s8803_s3, %s9994_s11, %s9994_s11, %s9993_s0  }
  0x93   : > { %p9999_p2 = scmp.ne.s32.totalorder %s9987_s16, 0 }
  0x94   : > { %p10000_p8 = scmp.eq.s32.totalorder (!%p9999_p2), %s8665_s15, 0 }
  0x95   : > { %479 = sbr.rel (%p9999_p2) target bundleno = 5519 (0x158f), region = 72 }
  0x9a   : > { %8482 = dma.done.wait (%p10000_p8), [#allocation8], 128   ;;  %p10001_p9 = pmov %p10000_p8 }
  0x9b   : > { %p10002_p4 = pmov %p10000_p8 }
  0x9c   : > { %8484 = vsyncadd (%p10001_p9), [#allocation8], 4294967168 }
  0x9d   : > { %8486 = dma.done.wait (%p10002_p4), [#allocation10], 107520   ;;  %p10003_p7 = pmov %p10002_p4 }
  0x9e   : > { %p10004_p11 = pmov %p10002_p4 }
  0x9f   : > { %8488 = vsyncadd (%p10003_p7), [#allocation10], 4294859776 }
  0xa0   : > { %8490 = dma.done.wait (%p10004_p11), [#allocation13], 624   ;;  %p10005_p6 = pmov %p10002_p4 }
  0xa1   : > { %p10006_p10 = pmov %p10002_p4 }
  0xa2   : > { %8492 = vsyncadd (%p10005_p6), [#allocation13], 4294966672 }
  0xa3   : > { %8494 = dma.done.wait (%p10006_p10), [#allocation16], 640   ;;  %p10007_p12 = pmov %p10002_p4 }
  0xa4   : > { %p10008_p13 = pmov %p10002_p4 }
  0xa5   : > { %8496 = vsyncadd (%p10007_p12), [#allocation16], 4294966656 }
  0xa6   : > { %8498 = dma.done.wait (%p10008_p13), [#allocation19], 32768   ;;  %p10009_p1 = pmov %p10002_p4 }
  0xa7   : > { %s513_s2 = sand.u32 1, %s8665_s15   ;;  %s515_s3 = sand.u32 1, %s8511_s28  }
  0xa8   : > { %8500 = vsyncadd (%p10009_p1), [#allocation19], 4294934528  ;;  %s7396_s4 = sshll.u32 %s515_s3, 12  ;;  %s514_s16 = scalar_lea.sflag [#allocation8], %s513_s2 }
  0xa9   : > { %s8851_s0 = scalar_lea.vmem [#allocation20], %s7396_s4  ;;  %p10010_p3 = scmp.ne.s32.totalorder %s9997_s14, 0 }
  0xab   : > { %8502 = dma.done.wait (%p10010_p3), %s514_s16, 65536  }
  0xac   : > { %8504 = vsyncadd (%p10010_p3), %s514_s16, 4294901760  ;;  %p10011_p0 = scmp.ne.s32.totalorder %s8665_s15, 0 }
  0xad   : > { %s8536_s17 = smov (!%p10011_p0), 96   ;;  %s8537_s30 = smov (!%p10011_p0), 64  }
  0xae   : > { %559 = sbr.rel (%p10011_p0) target bundleno = 3380 (0xd34), region = 112  ;;  %s8538_s21 = smov (!%p10011_p0), 32  }
  0xb3   : > { %v580_v1 = vld [vmem:[#allocation9 + $0x38] sm:$0xff]  ;;  %v579_v2 = vld [vmem:[#allocation9 + $0x30] sm:$0xff]  ;;  %v578_v3 = vld [vmem:[#allocation9 + $0x28] sm:$0xff]  ;;  %v8534_v5 = vmov 0.0   ;;  %vm593_vm0 = vcmask 261120   ;;  %vm561_vm1 = vcmask 7168  }
  0xb4   : > { %621 = vmatprep.subr.mxu0 %v580_v1  ;;  %v577_v4 = vld [vmem:[#allocation9 + $0x20] sm:$0xff]  ;;  %661 = vmatprep.mubr.f32.mxu0 %v8534_v5  ;;  %3464 = vst [vmem:[#allocation5 + $0x8] sm:$0xff] %v8534_v5  ;;  %3465 = vst [vmem:[#allocation5] sm:$0xff] %v8534_v5  ;;  %v576_v6 = vld [vmem:[#allocation9 + $0x18] sm:$0xff] }
  0xb5   : > { %622 = vmatpush1.msra.mxu0 %v579_v2  ;;  %v575_v7 = vld [vmem:[#allocation9 + $0x10] sm:$0xff]  ;;  %v705_v8 = vld [vmem:[#allocation11 + $0xf8] sm:$0xff]  ;;  %v703_v10 = vld [vmem:[#allocation11 + $0xe8] sm:$0xff] }
  0xb6   : > { %623 = vmatprep.subr.mxu0 %v578_v3  ;;  %v704_v9 = vld [vmem:[#allocation11 + $0xf0] sm:$0xff]  ;;  %v574_v11 = vld [vmem:[#allocation9 + $0x8] sm:$0xff]  ;;  %751 = vmatprep.subr.mxu1 %v705_v8  ;;  %v702_v12 = vld [vmem:[#allocation11 + $0xe0] sm:$0xff] }
  0xb7   : > { %624 = vmatpush1.msra.mxu0 %v577_v4  ;;  %v573_v13 = vld [vmem:[#allocation9] sm:$0xff]  ;;  %752 = vmatpush1.msra.mxu1 %v704_v9  ;;  %v701_v14 = vld [vmem:[#allocation11 + $0xd8] sm:$0xff]  ;;  %v700_v16 = vld [vmem:[#allocation11 + $0xd0] sm:$0xff] }
  0xb8   : > { %625 = vmatprep.subr.mxu0 %v576_v6  ;;  %v572_v15 = vld [vmem:[#allocation7] sm:$0xff]  ;;  %753 = vmatprep.subr.mxu1 %v703_v10  ;;  %v699_v17 = vld [vmem:[#allocation11 + $0xc8] sm:$0xff]  ;;  %v698_v18 = vld [vmem:[#allocation11 + $0xc0] sm:$0xff] }
  0xb9   : > { %626 = vmatpush1.msra.mxu0 %v575_v7  ;;  %754 = vmatpush1.msra.mxu1 %v702_v12  ;;  %v697_v19 = vld [vmem:[#allocation11 + $0xb8] sm:$0xff]  ;;  %v696_v20 = vld [vmem:[#allocation11 + $0xb0] sm:$0xff]  ;;  %v695_v21 = vld [vmem:[#allocation11 + $0xa8] sm:$0xff] }
  0xba   : > { %627 = vmatprep.subr.mxu0 %v574_v11  ;;  %755 = vmatprep.subr.mxu1 %v701_v14  ;;  %v694_v22 = vld [vmem:[#allocation11 + $0xa0] sm:$0xff]  ;;  %v693_v23 = vld [vmem:[#allocation11 + $0x98] sm:$0xff]  ;;  %v692_v24 = vld [vmem:[#allocation11 + $0x90] sm:$0xff]  ;;  %v583_v14 = vlaneseq }
  0xbb   : > { %628 = vmatpush1.msra.mxu0 %v573_v13  ;;  %756 = vmatpush1.msra.mxu1 %v700_v16  ;;  %v691_v25 = vld [vmem:[#allocation11 + $0x88] sm:$0xff]  ;;  %v690_v26 = vld [vmem:[#allocation11 + $0x80] sm:$0xff]  ;;  %v689_v27 = vld [vmem:[#allocation11 + $0x78] sm:$0xff]  ;;  %v8535_v13 = vmov 0  }
  0xbc   : > { %7398 = vmatmul.mubr.msk.f32.vlgmr.msra.gmra.mxu0 %vm593_vm0, %v572_v15  ;;  %757 = vmatprep.subr.mxu1 %v699_v17  ;;  %v688_v28 = vld [vmem:[#allocation11 + $0x70] sm:$0xff]  ;;  %v687_v29 = vld [vmem:[#allocation11 + $0x68] sm:$0xff]  ;;  %v686_v30 = vld [vmem:[#allocation11 + $0x60] sm:$0xff]  ;;  %v8863_v15 = vshrl.u32 %v583_v14, 7 }
  0xbd   : > { %758 = vmatpush1.msra.mxu1 %v698_v18  ;;  %v685_v31 = vld [vmem:[#allocation11 + $0x58] sm:$0xff]  ;;  %v684_v32 = vld [vmem:[#allocation11 + $0x50] sm:$0xff]  ;;  %v683_v33 = vld [vmem:[#allocation11 + $0x48] sm:$0xff]  ;;  %8154 = vset.pattern.permute.xlu0 %v8535_v13 }
  0xbe   : > { %759 = vmatprep.subr.mxu1 %v697_v19  ;;  %v682_v34 = vld [vmem:[#allocation11 + $0x40] sm:$0xff]  ;;  %v681_v35 = vld [vmem:[#allocation11 + $0x38] sm:$0xff]  ;;  %v680_v36 = vld [vmem:[#allocation11 + $0x30] sm:$0xff]  ;;  %v8866_v16 = vsub.s32 0, %v8863_v15  ;;  %v8869_v18 = vsub.s32 1, %v8863_v15 }
  0xbf   : > { %760 = vmatpush1.msra.mxu1 %v696_v20  ;;  %v679_v37 = vld [vmem:[#allocation11 + $0x28] sm:$0xff]  ;;  %v678_v38 = vld [vmem:[#allocation11 + $0x20] sm:$0xff]  ;;  %v677_v39 = vld [vmem:[#allocation11 + $0x18] sm:$0xff] }
  0xc0   : > { %761 = vmatprep.subr.mxu1 %v695_v21  ;;  %v676_v40 = vld [vmem:[#allocation11 + $0x10] sm:$0xff]  ;;  %v675_v41 = vld [vmem:[#allocation11 + $0x8] sm:$0xff]  ;;  %v674_v42 = vld [vmem:[#allocation11] sm:$0xff] }
  0xc1   : > { %762 = vmatpush1.msra.mxu1 %v694_v22  ;;  %v737_v43 = vld [vmem:[#allocation11 + $0x1f8] sm:$0xff]  ;;  %v736_v44 = vld [vmem:[#allocation11 + $0x1f0] sm:$0xff]  ;;  %v735_v45 = vld [vmem:[#allocation11 + $0x1e8] sm:$0xff] }
  0xc2   : > { %763 = vmatprep.subr.mxu1 %v693_v23  ;;  %v734_v46 = vld [vmem:[#allocation11 + $0x1e0] sm:$0xff]  ;;  %v733_v47 = vld [vmem:[#allocation11 + $0x1d8] sm:$0xff]  ;;  %v732_v48 = vld [vmem:[#allocation11 + $0x1d0] sm:$0xff] }
  0xc3   : > { %764 = vmatpush1.msra.mxu1 %v692_v24  ;;  %v731_v49 = vld [vmem:[#allocation11 + $0x1c8] sm:$0xff]  ;;  %v730_v50 = vld [vmem:[#allocation11 + $0x1c0] sm:$0xff]  ;;  %v729_v51 = vld [vmem:[#allocation11 + $0x1b8] sm:$0xff] }
  0xc4   : > { %765 = vmatprep.subr.mxu1 %v691_v25  ;;  %v728_v52 = vld [vmem:[#allocation11 + $0x1b0] sm:$0xff]  ;;  %v727_v53 = vld [vmem:[#allocation11 + $0x1a8] sm:$0xff]  ;;  %v726_v54 = vld [vmem:[#allocation11 + $0x1a0] sm:$0xff] }
  0xc5   : > { %766 = vmatpush1.msra.mxu1 %v690_v26  ;;  %v725_v55 = vld [vmem:[#allocation11 + $0x198] sm:$0xff]  ;;  %v724_v56 = vld [vmem:[#allocation11 + $0x190] sm:$0xff]  ;;  %v723_v57 = vld [vmem:[#allocation11 + $0x188] sm:$0xff] }
  0xc6   : > { %767 = vmatprep.subr.mxu1 %v689_v27  ;;  %v722_v58 = vld [vmem:[#allocation11 + $0x180] sm:$0xff]  ;;  %v721_v59 = vld [vmem:[#allocation11 + $0x178] sm:$0xff]  ;;  %v720_v60 = vld [vmem:[#allocation11 + $0x170] sm:$0xff] }
  0xc7   : > { %768 = vmatpush1.msra.mxu1 %v688_v28  ;;  %v719_v61 = vld [vmem:[#allocation11 + $0x168] sm:$0xff]  ;;  %v718_v62 = vld [vmem:[#allocation11 + $0x160] sm:$0xff]  ;;  %v717_v63 = vld [vmem:[#allocation11 + $0x158] sm:$0xff] }
  0xc8   : > { %769 = vmatprep.subr.mxu1 %v687_v29  ;;  %v716_v0 = vld [vmem:[#allocation11 + $0x150] sm:$0xff]  ;;  %v715_v1 = vld [vmem:[#allocation11 + $0x148] sm:$0xff]  ;;  %v714_v2 = vld [vmem:[#allocation11 + $0x140] sm:$0xff] }
  0xc9   : > { %770 = vmatpush1.msra.mxu1 %v686_v30  ;;  %v713_v3 = vld [vmem:[#allocation11 + $0x138] sm:$0xff]  ;;  %v560_v4 = vld [vmem:[%s9963_s1] sm:$0xff]  ;;  %v710_v8 = vld [vmem:[#allocation11 + $0x120] sm:$0xff] }
  0xca   : > { %771 = vmatprep.subr.mxu1 %v685_v31  ;;  %v712_v5 = vld [vmem:[#allocation11 + $0x130] sm:$0xff]  ;;  %v562_v6 = vsel %vm561_vm1, %v560_v4, 0.0  ;;  %v711_v7 = vld [vmem:[#allocation11 + $0x128] sm:$0xff]  ;;  %v709_v9 = vld [vmem:[#allocation11 + $0x118] sm:$0xff] }
  0xcb   : > { %772 = vmatpush1.msra.mxu1 %v684_v32  ;;  %563 = vadd.xlane.f32.xlu0 %v562_v6  ;;  %v708_v10 = vld [vmem:[#allocation11 + $0x110] sm:$0xff]  ;;  %v707_v11 = vld [vmem:[#allocation11 + $0x108] sm:$0xff]  ;;  %v706_v12 = vld [vmem:[#allocation11 + $0x100] sm:$0xff] }
  0xcc   : > { %773 = vmatprep.subr.mxu1 %v683_v33  ;;  %v581_v17 = vld [vmem:[#allocation12] sm:$0x3]  ;;  %v990_v6 = vld [vmem:[#allocation11 + $0x3f0] sm:$0xff]  ;;  %v983_v13 = vld [vmem:[#allocation11 + $0x3b8] sm:$0xff] }
  0xcd   : > { %774 = vmatpush1.msra.mxu1 %v682_v34  ;;  %v586_v19 = vrot.slane %v581_v17, %v8866_v16  ;;  %v590_v20 = vrot.slane %v581_v17, %v8869_v18  ;;  %v982_v14 = vld [vmem:[#allocation11 + $0x3b0] sm:$0xff]  ;;  %v981_v17 = vld [vmem:[#allocation11 + $0x3a8] sm:$0xff] }
  0xce   : > { %775 = vmatprep.subr.mxu1 %v681_v35 }
  0xcf   : > { %776 = vmatpush1.msra.mxu1 %v680_v36 }
  0xd0   : > { %777 = vmatprep.subr.mxu1 %v679_v37  ;;  %v959_v37 = vld [vmem:[#allocation11 + $0x2f8] sm:$0xff] }
  0xd1   : > { %778 = vmatpush1.msra.mxu1 %v678_v38  ;;  %1005 = vmatprep.subr.mxu0 %v959_v37  ;;  %v958_v38 = vld [vmem:[#allocation11 + $0x2f0] sm:$0xff]  ;;  %v964_v37 = vld [vmem:[#allocation11 + $0x320] sm:$0xff] }
  0xd2   : > { %779 = vmatprep.subr.mxu1 %v677_v39  ;;  %1006 = vmatpush1.msra.mxu0 %v958_v38  ;;  %v957_v39 = vld [vmem:[#allocation11 + $0x2e8] sm:$0xff]  ;;  %v963_v38 = vld [vmem:[#allocation11 + $0x318] sm:$0xff] }
  0xd3   : > { %780 = vmatpush1.msra.mxu1 %v676_v40  ;;  %1007 = vmatprep.subr.mxu0 %v957_v39  ;;  %v956_v40 = vld [vmem:[#allocation11 + $0x2e0] sm:$0xff]  ;;  %v962_v39 = vld [vmem:[#allocation11 + $0x310] sm:$0xff] }
  0xd4   : > { %781 = vmatprep.subr.mxu1 %v675_v41  ;;  %1008 = vmatpush1.msra.mxu0 %v956_v40  ;;  %v955_v41 = vld [vmem:[#allocation11 + $0x2d8] sm:$0xff]  ;;  %v961_v40 = vld [vmem:[#allocation11 + $0x308] sm:$0xff] }
  0xd5   : > { %782 = vmatpush1.msra.mxu1 %v674_v42  ;;  %1009 = vmatprep.subr.mxu0 %v955_v41  ;;  %v954_v42 = vld [vmem:[#allocation11 + $0x2d0] sm:$0xff]  ;;  %v960_v41 = vld [vmem:[#allocation11 + $0x300] sm:$0xff] }
  0xd6   : > { %783 = vmatprep.subr.mxu1 %v737_v43  ;;  %1010 = vmatpush1.msra.mxu0 %v954_v42  ;;  %v953_v43 = vld [vmem:[#allocation11 + $0x2c8] sm:$0xff]  ;;  %v1130_v42 = vld [vmem:[#allocation11 + $0x4f8] sm:$0xff] }
  0xd7   : > { %784 = vmatpush2.msra.mxu1 %v736_v44  ;;  %1011 = vmatprep.subr.mxu0 %v953_v43  ;;  %v952_v44 = vld [vmem:[#allocation11 + $0x2c0] sm:$0xff]  ;;  %v1129_v43 = vld [vmem:[#allocation11 + $0x4f0] sm:$0xff] }
  0xd8   : > { %785 = vmatprep.subr.mxu1 %v735_v45  ;;  %1012 = vmatpush1.msra.mxu0 %v952_v44  ;;  %v951_v45 = vld [vmem:[#allocation11 + $0x2b8] sm:$0xff]  ;;  %v1128_v44 = vld [vmem:[#allocation11 + $0x4e8] sm:$0xff] }
  0xd9   : > { %786 = vmatpush2.msra.mxu1 %v734_v46  ;;  %1013 = vmatprep.subr.mxu0 %v951_v45  ;;  %v950_v46 = vld [vmem:[#allocation11 + $0x2b0] sm:$0xff]  ;;  %v1127_v45 = vld [vmem:[#allocation11 + $0x4e0] sm:$0xff] }
  0xda   : > { %787 = vmatprep.subr.mxu1 %v733_v47  ;;  %1014 = vmatpush1.msra.mxu0 %v950_v46  ;;  %v949_v47 = vld [vmem:[#allocation11 + $0x2a8] sm:$0xff]  ;;  %v1126_v46 = vld [vmem:[#allocation11 + $0x4d8] sm:$0xff] }
  0xdb   : > { %788 = vmatpush2.msra.mxu1 %v732_v48  ;;  %1015 = vmatprep.subr.mxu0 %v949_v47  ;;  %v948_v48 = vld [vmem:[#allocation11 + $0x2a0] sm:$0xff]  ;;  %v1125_v47 = vld [vmem:[#allocation11 + $0x4d0] sm:$0xff] }
  0xdc   : > { %789 = vmatprep.subr.mxu1 %v731_v49  ;;  %1016 = vmatpush1.msra.mxu0 %v948_v48  ;;  %v947_v49 = vld [vmem:[#allocation11 + $0x298] sm:$0xff]  ;;  %v1124_v48 = vld [vmem:[#allocation11 + $0x4c8] sm:$0xff] }
  0xdd   : > { %790 = vmatpush2.msra.mxu1 %v730_v50  ;;  %1017 = vmatprep.subr.mxu0 %v947_v49  ;;  %v946_v50 = vld [vmem:[#allocation11 + $0x290] sm:$0xff]  ;;  %v1123_v49 = vld [vmem:[#allocation11 + $0x4c0] sm:$0xff] }
  0xde   : > { %791 = vmatprep.subr.mxu1 %v729_v51  ;;  %1018 = vmatpush1.msra.mxu0 %v946_v50  ;;  %v945_v51 = vld [vmem:[#allocation11 + $0x288] sm:$0xff]  ;;  %v1122_v50 = vld [vmem:[#allocation11 + $0x4b8] sm:$0xff] }
  0xdf   : > { %792 = vmatpush2.msra.mxu1 %v728_v52  ;;  %1019 = vmatprep.subr.mxu0 %v945_v51  ;;  %v944_v52 = vld [vmem:[#allocation11 + $0x280] sm:$0xff]  ;;  %v1121_v51 = vld [vmem:[#allocation11 + $0x4b0] sm:$0xff] }
  0xe0   : > { %793 = vmatprep.subr.mxu1 %v727_v53  ;;  %1020 = vmatpush1.msra.mxu0 %v944_v52  ;;  %v943_v53 = vld [vmem:[#allocation11 + $0x278] sm:$0xff]  ;;  %v1120_v52 = vld [vmem:[#allocation11 + $0x4a8] sm:$0xff] }
  0xe1   : > { %794 = vmatpush2.msra.mxu1 %v726_v54  ;;  %830 = vperm.xlu0 %8154, %v560_v4   ;;  %v942_v54 = vld [vmem:[#allocation11 + $0x270] sm:$0xff]  ;;  %v928_v4 = vld [vmem:[#allocation11 + $0x200] sm:$0xff] }
  0xe2   : > { %795 = vmatprep.subr.mxu1 %v725_v55  ;;  %1021 = vmatprep.subr.mxu0 %v943_v53  ;;  %v941_v55 = vld [vmem:[#allocation11 + $0x268] sm:$0xff]  ;;  %v1119_v53 = vld [vmem:[#allocation11 + $0x4a0] sm:$0xff] }
  0xe3   : > { %796 = vmatpush2.msra.mxu1 %v724_v56  ;;  %1022 = vmatpush1.msra.mxu0 %v942_v54  ;;  %v940_v56 = vld [vmem:[#allocation11 + $0x260] sm:$0xff]  ;;  %v1118_v54 = vld [vmem:[#allocation11 + $0x498] sm:$0xff] }
  0xe4   : > { %797 = vmatprep.subr.mxu1 %v723_v57  ;;  %1023 = vmatprep.subr.mxu0 %v941_v55  ;;  %v939_v57 = vld [vmem:[#allocation11 + $0x258] sm:$0xff]  ;;  %v1117_v55 = vld [vmem:[#allocation11 + $0x490] sm:$0xff] }
  0xe5   : > { %798 = vmatpush2.msra.mxu1 %v722_v58  ;;  %v938_v58 = vld [vmem:[#allocation11 + $0x250] sm:$0xff]  ;;  %1024 = vmatpush1.msra.mxu0 %v940_v56  ;;  %v1116_v56 = vld [vmem:[#allocation11 + $0x488] sm:$0xff] }
  0xe6   : > { %799 = vmatprep.subr.mxu1 %v721_v59  ;;  %v937_v59 = vld [vmem:[#allocation11 + $0x248] sm:$0xff]  ;;  %1025 = vmatprep.subr.mxu0 %v939_v57  ;;  %v1115_v57 = vld [vmem:[#allocation11 + $0x480] sm:$0xff] }
  0xe7   : > { %800 = vmatpush2.msra.mxu1 %v720_v60  ;;  %v936_v60 = vld [vmem:[#allocation11 + $0x240] sm:$0xff]  ;;  %1026 = vmatpush1.msra.mxu0 %v938_v58  ;;  %v1114_v58 = vld [vmem:[#allocation11 + $0x478] sm:$0xff] }
  0xe8   : > { %801 = vmatprep.subr.mxu1 %v719_v61  ;;  %v935_v61 = vld [vmem:[#allocation11 + $0x238] sm:$0xff]  ;;  %1027 = vmatprep.subr.mxu0 %v937_v59  ;;  %v739_v59 = vld [vmem:[#allocation12 + $0x2] sm:$0x3] }
  0xe9   : > { %802 = vmatpush2.msra.mxu1 %v718_v62  ;;  %v934_v62 = vld [vmem:[#allocation11 + $0x230] sm:$0xff]  ;;  %1028 = vmatpush1.msra.mxu0 %v936_v60  ;;  %v744_v60 = vrot.slane %v739_v59, %v8866_v16 }
  0xea   : > { %803 = vmatprep.subr.mxu1 %v717_v63  ;;  %v933_v63 = vld [vmem:[#allocation11 + $0x228] sm:$0xff]  ;;  %1029 = vmatprep.subr.mxu0 %v935_v61  ;;  %v748_v61 = vrot.slane %v739_v59, %v8869_v18 }
  0xeb   : > { %804 = vmatpush2.msra.mxu1 %v716_v0  ;;  %v932_v0 = vld [vmem:[#allocation11 + $0x220] sm:$0xff]  ;;  %1030 = vmatpush1.msra.mxu0 %v934_v62 }
  0xec   : > { %805 = vmatprep.subr.mxu1 %v715_v1  ;;  %v931_v1 = vld [vmem:[#allocation11 + $0x218] sm:$0xff]  ;;  %1031 = vmatprep.subr.mxu0 %v933_v63 }
  0xed   : > { %806 = vmatpush2.msra.mxu1 %v714_v2  ;;  %v930_v2 = vld [vmem:[#allocation11 + $0x210] sm:$0xff]  ;;  %1032 = vmatpush1.msra.mxu0 %v932_v0 }
  0xee   : > { %807 = vmatprep.subr.mxu1 %v713_v3  ;;  %v929_v3 = vld [vmem:[#allocation11 + $0x208] sm:$0xff]  ;;  %1033 = vmatprep.subr.mxu0 %v931_v1 }
  0xef   : > { %808 = vmatpush2.msra.mxu1 %v712_v5  ;;  %1034 = vmatpush1.msra.mxu0 %v930_v2  ;;  %v991_v5 = vld [vmem:[#allocation11 + $0x3f8] sm:$0xff] }
  0xf0   : > { %809 = vmatprep.subr.mxu1 %v711_v7  ;;  %1035 = vmatprep.subr.mxu0 %v929_v3  ;;  %v989_v7 = vld [vmem:[#allocation11 + $0x3e8] sm:$0xff] }
  0xf1   : > { %810 = vmatpush2.msra.mxu1 %v710_v8  ;;  %1036 = vmatpush1.msra.mxu0 %v928_v4  ;;  %v988_v8 = vld [vmem:[#allocation11 + $0x3e0] sm:$0xff] }
  0xf2   : > { %811 = vmatprep.subr.mxu1 %v709_v9  ;;  %1037 = vmatprep.subr.mxu0 %v991_v5  ;;  %v987_v9 = vld [vmem:[#allocation11 + $0x3d8] sm:$0xff] }
  0xf3   : > { %812 = vmatpush2.msra.mxu1 %v708_v10  ;;  %1038 = vmatpush2.msra.mxu0 %v990_v6  ;;  %v986_v10 = vld [vmem:[#allocation11 + $0x3d0] sm:$0xff] }
  0xf4   : > { %813 = vmatprep.subr.mxu1 %v707_v11  ;;  %1039 = vmatprep.subr.mxu0 %v989_v7  ;;  %v985_v11 = vld [vmem:[#allocation11 + $0x3c8] sm:$0xff] }
  0xf5   : > { %814 = vmatpush2.msra.mxu1 %v706_v12  ;;  %1040 = vmatpush2.msra.mxu0 %v988_v8  ;;  %v984_v12 = vld [vmem:[#allocation11 + $0x3c0] sm:$0xff] }
  0xf6   : > { %1041 = vmatprep.subr.mxu0 %v987_v9  ;;  %1176 = vmatprep.subr.mxu1 %v1130_v42 }
  0xf7   : > { %1042 = vmatpush2.msra.mxu0 %v986_v10 }
  0xf8   : > { %1043 = vmatprep.subr.mxu0 %v985_v11 }
  0xf9   : > { %1044 = vmatpush2.msra.mxu0 %v984_v12 }
  0xfa   : > { %1045 = vmatprep.subr.mxu0 %v983_v13 }
  0xfb   : > { %1046 = vmatpush2.msra.mxu0 %v982_v14 }
  0xfc   : > { %1047 = vmatprep.subr.mxu0 %v981_v17 }
 0x154   : > { %v564_v30 = vpop.xlane.xlu0 %563 }
 0x155   : > { %v565_v31 = vrot.slane %v564_v30, 4 }
 0x157   : > { %v566_v32 = vadd.f32 %v565_v31, %v564_v30  ;;  %v971_v30 = vld [vmem:[#allocation11 + $0x358] sm:$0xff]  ;;  %v970_v31 = vld [vmem:[#allocation11 + $0x350] sm:$0xff] }
 0x159   : > { %v567_v33 = vrot.slane %v566_v32, 2 }
 0x15b   : > { %v568_v34 = vadd.f32 %v567_v33, %v566_v32  ;;  %v969_v32 = vld [vmem:[#allocation11 + $0x348] sm:$0xff]  ;;  %v968_v33 = vld [vmem:[#allocation11 + $0x340] sm:$0xff] }
 0x15c   : > { %v831_v4 = vpop.permute.xlu0 %830 }
 0x15d   : > { %v569_v35 = vrot.slane %v568_v34, 1 }
 0x15f   : > { %v570_v36 = vadd.f32 %v569_v35, %v568_v34  ;;  %v967_v34 = vld [vmem:[#allocation11 + $0x338] sm:$0xff]  ;;  %v966_v35 = vld [vmem:[#allocation11 + $0x330] sm:$0xff] }
 0x161   : > { %7991 = vpush %v570_v36  ;;  %v965_v36 = vld [vmem:[#allocation11 + $0x328] sm:$0xff] }
 0x17c   : > { %v663_v21 = vpop.f32.mrf.mxu0 }
 0x17d   : > { %v664_v22 = vadd.f32 %v663_v21, %v586_v19  ;;  %v980_v19 = vld [vmem:[#allocation11 + $0x3a0] sm:$0xff]  ;;  %v978_v21 = vld [vmem:[#allocation11 + $0x390] sm:$0xff] }
 0x17e   : > { %v665_v23 = vpop.f32.mrf.mxu0  ;;  %1048 = vmatpush2.msra.mxu0 %v980_v19 }
 0x17f   : > { %v670_v24 = vmul.f32 0.1, %v664_v22  ;;  %v666_v25 = vadd.f32 %v665_v23, %v590_v20  ;;  %vm668_vm2 = vcmp.gt.f32.partialorder %v664_v22, 0.0  ;;  %v979_v20 = vld [vmem:[#allocation11 + $0x398] sm:$0xff]  ;;  %v976_v23 = vld [vmem:[#allocation11 + $0x380] sm:$0xff] }
 0x180   : > { %1049 = vmatprep.subr.mxu0 %v979_v20 }
 0x181   : > { %vm669_vm3 = vcmp.gt.f32.partialorder %v666_v25, 0.0  ;;  %v671_v26 = vmul.f32 0.1, %v666_v25  ;;  %v8873_v27 = vsel %vm668_vm2, %v664_v22, %v670_v24  ;;  %v977_v22 = vld [vmem:[#allocation11 + $0x388] sm:$0xff]  ;;  %1050 = vmatpush2.msra.mxu0 %v978_v21  ;;  %v975_v24 = vld [vmem:[#allocation11 + $0x378] sm:$0xff] }
 0x182   : > { %1051 = vmatprep.subr.mxu0 %v977_v22 }
 0x183   : > { %v8875_v28 = vsel %vm669_vm3, %v666_v25, %v671_v26  ;;  %v974_v25 = vld [vmem:[#allocation11 + $0x370] sm:$0xff]  ;;  %1052 = vmatpush2.msra.mxu0 %v976_v23  ;;  %v973_v26 = vld [vmem:[#allocation11 + $0x368] sm:$0xff] }
 0x184   : > { %v7920_v29 = vpack.c.bf16 %v8875_v28, %v8873_v27  ;;  %815 = vmatprep.mubr.f32.mxu1 %v8875_v28  ;;  %1053 = vmatprep.subr.mxu0 %v975_v24 }
 0x185   : > { %816 = vmatmul.mubr.f32.vlgmr.msra.gmra.mxu1 %v8873_v27  ;;  %1054 = vmatpush2.msra.mxu0 %v974_v25 }
 0x186   : > { %3422 = vst [vmem:[#allocation2] sm:$0xff] %v7920_v29  ;;  %v972_v29 = vld [vmem:[#allocation11 + $0x360] sm:$0xff]  ;;  %1055 = vmatprep.subr.mxu0 %v973_v26  ;;  %1177 = vmatpush1.msra.mxu1 %v1129_v43 }
 0x187   : > { %1056 = vmatpush2.msra.mxu0 %v972_v29  ;;  %1178 = vmatprep.subr.mxu1 %v1128_v44 }
 0x188   : > { %1057 = vmatprep.subr.mxu0 %v971_v30  ;;  %1179 = vmatpush1.msra.mxu1 %v1127_v45 }
 0x189   : > { %1058 = vmatpush2.msra.mxu0 %v970_v31  ;;  %1180 = vmatprep.subr.mxu1 %v1126_v46 }
 0x18a   : > { %1059 = vmatprep.subr.mxu0 %v969_v32  ;;  %1181 = vmatpush1.msra.mxu1 %v1125_v47 }
 0x18b   : > { %1060 = vmatpush2.msra.mxu0 %v968_v33  ;;  %1182 = vmatprep.subr.mxu1 %v1124_v48 }
 0x18c   : > { %1061 = vmatprep.subr.mxu0 %v967_v34  ;;  %1183 = vmatpush1.msra.mxu1 %v1123_v49 }
 0x18d   : > { %1062 = vmatpush2.msra.mxu0 %v966_v35  ;;  %1184 = vmatprep.subr.mxu1 %v1122_v50 }
 0x18e   : > { %1063 = vmatprep.subr.mxu0 %v965_v36  ;;  %1185 = vmatpush1.msra.mxu1 %v1121_v51 }
 0x18f   : > { %1064 = vmatpush2.msra.mxu0 %v964_v37  ;;  %1186 = vmatprep.subr.mxu1 %v1120_v52  ;;  %v878_v52 = vld [vmem:[#allocation12 + $0x4] sm:$0x3] }
 0x190   : > { %1065 = vmatprep.subr.mxu0 %v963_v38  ;;  %1187 = vmatpush1.msra.mxu1 %v1119_v53  ;;  %v893_v53 = vld [vmem:[#allocation12 + $0x6] sm:$0x3] }
 0x191   : > { %1066 = vmatpush2.msra.mxu0 %v962_v39  ;;  %1188 = vmatprep.subr.mxu1 %v1118_v54  ;;  %v883_v54 = vrot.slane %v878_v52, %v8866_v16 }
 0x192   : > { %1067 = vmatprep.subr.mxu0 %v961_v40  ;;  %1189 = vmatpush1.msra.mxu1 %v1117_v55  ;;  %s7992_s22 = spop %7991 }
 0x193   : > { %1068 = vmatpush2.msra.mxu0 %v960_v41  ;;  %1190 = vmatprep.subr.mxu1 %v1116_v56  ;;  %v847_v1 = vstv %s7992_s22 }
 0x194   : > { %1191 = vmatpush1.msra.mxu1 %v1115_v57  ;;  %8159 = vrcp.f32 %v847_v1  ;;  %v887_v57 = vrot.slane %v878_v52, %v8869_v18  ;;  %v1148_v52 = vld [vmem:[#allocation11 + $0x588] sm:$0xff] }
 0x195   : > { %1192 = vmatprep.subr.mxu1 %v1114_v58  ;;  %v898_v58 = vrot.slane %v893_v53, %v8866_v16 }
 0x1a1   : > { %v8160_v24 = vpop.eup %8159 }
 0x245   : > { %v817_v62 = vpop.f32.mrf.mxu1 }
 0x246   : > { %v818_v63 = vadd.f32 %v817_v62, %v744_v60  ;;  %v902_v62 = vrot.slane %v893_v53, %v8869_v18  ;;  %v1147_v53 = vld [vmem:[#allocation11 + $0x580] sm:$0xff] }
 0x247   : > { %v819_v0 = vpop.f32.mrf.mxu1 }
 0x248   : > { %vm822_vm4 = vcmp.gt.f32.partialorder %v818_v63, 0.0  ;;  %v824_v2 = vmul.f32 0.1, %v818_v63  ;;  %v820_v3 = vadd.f32 %v819_v0, %v748_v61 }
 0x24a   : > { %vm823_vm5 = vcmp.gt.f32.partialorder %v820_v3, 0.0  ;;  %v825_v5 = vmul.f32 0.1, %v820_v3  ;;  %v826_v6 = vsel %vm822_vm4, %v818_v63, %v824_v2 }
 0x24b   : > { %v833_v7 = vmul.f32 %v831_v4, %v826_v6 }
 0x24c   : > { %v827_v8 = vsel %vm823_vm5, %v820_v3, %v825_v5 }
 0x24d   : > { %v834_v9 = vmul.f32 %v831_v4, %v827_v8  ;;  %v835_v10 = vrot.slane %v833_v7, 4 }
 0x24f   : > { %v836_v11 = vadd.f32 %v835_v10, %v833_v7  ;;  %v841_v12 = vrot.slane %v834_v9, 4 }
 0x251   : > { %v837_v13 = vrot.slane %v836_v11, 2  ;;  %v842_v14 = vadd.f32 %v841_v12, %v834_v9 }
 0x253   : > { %v838_v17 = vadd.f32 %v837_v13, %v836_v11  ;;  %v843_v19 = vrot.slane %v842_v14, 2 }
 0x255   : > { %v839_v20 = vrot.slane %v838_v17, 1  ;;  %v844_v21 = vadd.f32 %v843_v19, %v842_v14 }
 0x257   : > { %v840_v22 = vadd.f32 %v839_v20, %v838_v17  ;;  %v845_v23 = vrot.slane %v844_v21, 1 }
 0x259   : > { %v846_v25 = vadd.f32 %v845_v23, %v844_v21  ;;  %v849_v26 = vmul.f32 %v8160_v24, %v840_v22  ;;  %v1113_v21 = vld [vmem:[#allocation11 + $0x470] sm:$0xff]  ;;  %v1112_v22 = vld [vmem:[#allocation11 + $0x468] sm:$0xff]  ;;  %v1111_v23 = vld [vmem:[#allocation11 + $0x460] sm:$0xff] }
 0x25a   : > { %1193 = vmatpush1.msra.mxu1 %v1113_v21  ;;  %v1273_v21 = vld [vmem:[#allocation11 + $0x698] sm:$0xff] }
 0x25b   : > { %v850_v29 = vmul.f32 %v8160_v24, %v846_v25  ;;  %v851_v30 = vsub.f32 %v826_v6, %v849_v26  ;;  %1194 = vmatprep.subr.mxu1 %v1112_v22  ;;  %v1109_v25 = vld [vmem:[#allocation11 + $0x450] sm:$0xff]  ;;  %v1108_v26 = vld [vmem:[#allocation11 + $0x448] sm:$0xff] }
 0x25c   : > { %1195 = vmatpush1.msra.mxu1 %v1111_v23  ;;  %v1272_v22 = vld [vmem:[#allocation11 + $0x690] sm:$0xff]  ;;  %v1271_v23 = vld [vmem:[#allocation11 + $0x688] sm:$0xff] }
 0x25d   : > { %v852_v31 = vsub.f32 %v827_v8, %v850_v29  ;;  %v853_v32 = vmul.f32 %v851_v30, %v851_v30  ;;  %v1107_v29 = vld [vmem:[#allocation11 + $0x440] sm:$0xff] }
 0x25f   : > { %v854_v33 = vmul.f32 %v852_v31, %v852_v31  ;;  %v855_v34 = vmul.f32 %v853_v32, %v831_v4  ;;  %v1104_v32 = vld [vmem:[#allocation11 + $0x428] sm:$0xff] }
 0x261   : > { %v856_v35 = vmul.f32 %v854_v33, %v831_v4  ;;  %v857_v36 = vrot.slane %v855_v34, 4  ;;  %v1103_v33 = vld [vmem:[#allocation11 + $0x420] sm:$0xff] }
 0x263   : > { %v858_v37 = vadd.f32 %v857_v36, %v855_v34  ;;  %v863_v38 = vrot.slane %v856_v35, 4  ;;  %v1102_v34 = vld [vmem:[#allocation11 + $0x418] sm:$0xff]  ;;  %v1100_v36 = vld [vmem:[#allocation11 + $0x408] sm:$0xff] }
 0x265   : > { %v859_v39 = vrot.slane %v858_v37, 2  ;;  %v864_v40 = vadd.f32 %v863_v38, %v856_v35  ;;  %v1101_v35 = vld [vmem:[#allocation11 + $0x410] sm:$0xff]  ;;  %v1162_v38 = vld [vmem:[#allocation11 + $0x5f8] sm:$0xff] }
 0x267   : > { %v860_v41 = vadd.f32 %v859_v39, %v858_v37  ;;  %v865_v42 = vrot.slane %v864_v40, 2  ;;  %v1099_v37 = vld [vmem:[#allocation11 + $0x400] sm:$0xff]  ;;  %v1161_v39 = vld [vmem:[#allocation11 + $0x5f0] sm:$0xff] }
 0x269   : > { %v861_v43 = vrot.slane %v860_v41, 1  ;;  %v866_v44 = vadd.f32 %v865_v42, %v864_v40  ;;  %v1160_v40 = vld [vmem:[#allocation11 + $0x5e8] sm:$0xff]  ;;  %v1158_v42 = vld [vmem:[#allocation11 + $0x5d8] sm:$0xff] }
 0x26b   : > { %v862_v45 = vadd.f32 %v861_v43, %v860_v41  ;;  %v867_v46 = vrot.slane %v866_v44, 1  ;;  %v1159_v41 = vld [vmem:[#allocation11 + $0x5e0] sm:$0xff]  ;;  %v1157_v43 = vld [vmem:[#allocation11 + $0x5d0] sm:$0xff] }
 0x26d   : > { %v868_v47 = vadd.f32 %v867_v46, %v866_v44  ;;  %v869_v48 = vmul.f32 %v8160_v24, %v862_v45  ;;  %v1156_v44 = vld [vmem:[#allocation11 + $0x5c8] sm:$0xff]  ;;  %v1155_v45 = vld [vmem:[#allocation11 + $0x5c0] sm:$0xff]  ;;  %v1154_v46 = vld [vmem:[#allocation11 + $0x5b8] sm:$0xff] }
 0x26f   : > { %v870_v49 = vmul.f32 %v8160_v24, %v868_v47  ;;  %v871_v50 = vadd.f32 1e-05, %v869_v48  ;;  %v1110_v24 = vld [vmem:[#allocation11 + $0x458] sm:$0xff]  ;;  %v1153_v47 = vld [vmem:[#allocation11 + $0x5b0] sm:$0xff]  ;;  %v1152_v48 = vld [vmem:[#allocation11 + $0x5a8] sm:$0xff] }
 0x270   : > { %1196 = vmatprep.subr.mxu1 %v1110_v24  ;;  %v1270_v24 = vld [vmem:[#allocation11 + $0x680] sm:$0xff] }
 0x271   : > { %v872_v51 = vadd.f32 1e-05, %v870_v49  ;;  %8161 = vrsqrt.f32 %v871_v50  ;;  %1197 = vmatpush1.msra.mxu1 %v1109_v25  ;;  %v1151_v49 = vld [vmem:[#allocation11 + $0x5a0] sm:$0xff]  ;;  %v1150_v50 = vld [vmem:[#allocation11 + $0x598] sm:$0xff] }
 0x272   : > { %1198 = vmatprep.subr.mxu1 %v1108_v26  ;;  %v1269_v25 = vld [vmem:[#allocation11 + $0x678] sm:$0xff]  ;;  %v1268_v26 = vld [vmem:[#allocation11 + $0x670] sm:$0xff] }
 0x273   : > { %8163 = vrsqrt.f32 %v872_v51  ;;  %1199 = vmatpush1.msra.mxu1 %v1107_v29  ;;  %v1149_v51 = vld [vmem:[#allocation11 + $0x590] sm:$0xff]  ;;  %v1267_v29 = vld [vmem:[#allocation11 + $0x668] sm:$0xff] }
 0x27e   : > { %v8162_v55 = vpop.eup %8161 }
 0x27f   : > { %v875_v56 = vmul.f32 %v8162_v55, %v851_v30  ;;  %v1106_v30 = vld [vmem:[#allocation11 + $0x438] sm:$0xff]  ;;  %v1145_v55 = vld [vmem:[#allocation11 + $0x570] sm:$0xff] }
 0x280   : > { %v8164_v59 = vpop.eup %8163  ;;  %1200 = vmatprep.subr.mxu1 %v1106_v30  ;;  %v1266_v30 = vld [vmem:[#allocation11 + $0x660] sm:$0xff] }
 0x281   : > { %v876_v60 = vmul.f32 %v8164_v59, %v852_v31  ;;  %v890_v61 = vmul.f32 %v883_v54, %v875_v56  ;;  %v1105_v31 = vld [vmem:[#allocation11 + $0x430] sm:$0xff]  ;;  %v1146_v54 = vld [vmem:[#allocation11 + $0x578] sm:$0xff]  ;;  %v1144_v56 = vld [vmem:[#allocation11 + $0x568] sm:$0xff] }
 0x282   : > { %1201 = vmatpush1.msra.mxu1 %v1105_v31  ;;  %v1141_v59 = vld [vmem:[#allocation11 + $0x550] sm:$0xff]  ;;  %v1265_v31 = vld [vmem:[#allocation11 + $0x658] sm:$0xff] }
 0x283   : > { %v891_v63 = vmul.f32 %v887_v57, %v876_v60  ;;  %v905_v0 = vadd.f32 %v898_v58, %v890_v61  ;;  %1202 = vmatprep.subr.mxu1 %v1104_v32  ;;  %v1143_v57 = vld [vmem:[#allocation11 + $0x560] sm:$0xff]  ;;  %v1142_v58 = vld [vmem:[#allocation11 + $0x558] sm:$0xff]  ;;  %v1140_v60 = vld [vmem:[#allocation11 + $0x548] sm:$0xff] }
 0x284   : > { %1203 = vmatpush1.msra.mxu1 %v1103_v33  ;;  %v1139_v61 = vld [vmem:[#allocation11 + $0x540] sm:$0xff]  ;;  %v1264_v32 = vld [vmem:[#allocation11 + $0x650] sm:$0xff]  ;;  %v1263_v33 = vld [vmem:[#allocation11 + $0x648] sm:$0xff] }
 0x285   : > { %v906_v1 = vadd.f32 %v902_v62, %v891_v63  ;;  %v907_v2 = vand.u32 2147483647, %v905_v0  ;;  %vm915_vm7 = vcmp.ge.f32.partialorder %v905_v0, 0.0  ;;  %1204 = vmatprep.subr.mxu1 %v1102_v34  ;;  %v1138_v62 = vld [vmem:[#allocation11 + $0x538] sm:$0xff]  ;;  %v1137_v63 = vld [vmem:[#allocation11 + $0x530] sm:$0xff]  ;;  %v1136_v0 = vld [vmem:[#allocation11 + $0x528] sm:$0xff] }
 0x286   : > { %1205 = vmatpush1.msra.mxu1 %v1101_v35  ;;  %v1262_v34 = vld [vmem:[#allocation11 + $0x640] sm:$0xff]  ;;  %v1261_v35 = vld [vmem:[#allocation11 + $0x638] sm:$0xff] }
 0x287   : > { %v908_v3 = vand.u32 2147483647, %v906_v1  ;;  %v909_v4 = vsub.f32 0.0, %v907_v2  ;;  %vm916_vm6 = vcmp.ge.f32.partialorder %v906_v1, 0.0  ;;  %1206 = vmatprep.subr.mxu1 %v1100_v36  ;;  %v1135_v1 = vld [vmem:[#allocation11 + $0x520] sm:$0xff]  ;;  %v1134_v2 = vld [vmem:[#allocation11 + $0x518] sm:$0xff] }
 0x288   : > { %1207 = vmatpush1.msra.mxu1 %v1099_v37  ;;  %v1260_v36 = vld [vmem:[#allocation11 + $0x630] sm:$0xff]  ;;  %v1259_v37 = vld [vmem:[#allocation11 + $0x628] sm:$0xff] }
 0x289   : > { %v910_v5 = vsub.f32 0.0, %v908_v3  ;;  %v911_v6 = vmul.f32 1.442695, %v909_v4  ;;  %1208 = vmatprep.subr.mxu1 %v1162_v38  ;;  %v1133_v3 = vld [vmem:[#allocation11 + $0x510] sm:$0xff]  ;;  %v1132_v4 = vld [vmem:[#allocation11 + $0x508] sm:$0xff]  ;;  %v1258_v38 = vld [vmem:[#allocation11 + $0x620] sm:$0xff] }
 0x28a   : > { %1209 = vmatpush2.msra.mxu1 %v1161_v39  ;;  %v1257_v39 = vld [vmem:[#allocation11 + $0x618] sm:$0xff] }
 0x28b   : > { %v913_v7 = vmul.f32 1.442695, %v910_v5  ;;  %8165 = vpow2.f32 %v911_v6  ;;  %1210 = vmatprep.subr.mxu1 %v1160_v40  ;;  %v1131_v5 = vld [vmem:[#allocation11 + $0x500] sm:$0xff]  ;;  %v1285_v6 = vld [vmem:[#allocation11 + $0x6f8] sm:$0xff]  ;;  %v1256_v40 = vld [vmem:[#allocation11 + $0x610] sm:$0xff] }
 0x28c   : > { %1211 = vmatpush2.msra.mxu1 %v1159_v41  ;;  %1331 = vmatprep.subr.mxu0 %v1285_v6  ;;  %v1255_v41 = vld [vmem:[#allocation11 + $0x608] sm:$0xff] }
 0x28d   : > { %8167 = vpow2.f32 %v913_v7  ;;  %1212 = vmatprep.subr.mxu1 %v1158_v42  ;;  %v1284_v7 = vld [vmem:[#allocation11 + $0x6f0] sm:$0xff]  ;;  %v1254_v42 = vld [vmem:[#allocation11 + $0x600] sm:$0xff] }
 0x28e   : > { %1213 = vmatpush2.msra.mxu1 %v1157_v43  ;;  %v1317_v43 = vld [vmem:[#allocation11 + $0x7f8] sm:$0xff] }
 0x28f   : > { %1214 = vmatprep.subr.mxu1 %v1156_v44  ;;  %v1316_v44 = vld [vmem:[#allocation11 + $0x7f0] sm:$0xff] }
 0x290   : > { %1215 = vmatpush2.msra.mxu1 %v1155_v45  ;;  %v1315_v45 = vld [vmem:[#allocation11 + $0x7e8] sm:$0xff] }
 0x291   : > { %1216 = vmatprep.subr.mxu1 %v1154_v46  ;;  %v1314_v46 = vld [vmem:[#allocation11 + $0x7e0] sm:$0xff] }
 0x292   : > { %1217 = vmatpush2.msra.mxu1 %v1153_v47  ;;  %v1313_v47 = vld [vmem:[#allocation11 + $0x7d8] sm:$0xff] }
 0x293   : > { %1218 = vmatprep.subr.mxu1 %v1152_v48  ;;  %v1312_v48 = vld [vmem:[#allocation11 + $0x7d0] sm:$0xff] }
 0x294   : > { %1219 = vmatpush2.msra.mxu1 %v1151_v49  ;;  %v1311_v49 = vld [vmem:[#allocation11 + $0x7c8] sm:$0xff] }
 0x295   : > { %1220 = vmatprep.subr.mxu1 %v1150_v50  ;;  %v1310_v50 = vld [vmem:[#allocation11 + $0x7c0] sm:$0xff] }
 0x296   : > { %1221 = vmatpush2.msra.mxu1 %v1149_v51  ;;  %v1309_v51 = vld [vmem:[#allocation11 + $0x7b8] sm:$0xff] }
 0x297   : > { %1222 = vmatprep.subr.mxu1 %v1148_v52  ;;  %v1308_v52 = vld [vmem:[#allocation11 + $0x7b0] sm:$0xff] }
 0x298   : > { %v8166_v8 = vpop.eup %8165  ;;  %1223 = vmatpush2.msra.mxu1 %v1147_v53  ;;  %v1307_v53 = vld [vmem:[#allocation11 + $0x7a8] sm:$0xff] }
 0x299   : > { %v917_v9 = vadd.f32 1.0, %v8166_v8  ;;  %1224 = vmatprep.subr.mxu1 %v1146_v54  ;;  %v1306_v54 = vld [vmem:[#allocation11 + $0x7a0] sm:$0xff] }
 0x29a   : > { %v8168_v10 = vpop.eup %8167  ;;  %1225 = vmatpush2.msra.mxu1 %v1145_v55  ;;  %v1305_v55 = vld [vmem:[#allocation11 + $0x798] sm:$0xff] }
 0x29b   : > { %v918_v11 = vadd.f32 1.0, %v8168_v10  ;;  %8169 = vrcp.f32 %v917_v9  ;;  %1226 = vmatprep.subr.mxu1 %v1144_v56  ;;  %v1282_v9 = vld [vmem:[#allocation11 + $0x6e0] sm:$0xff]  ;;  %v1304_v56 = vld [vmem:[#allocation11 + $0x790] sm:$0xff] }
 0x29c   : > { %1227 = vmatpush2.msra.mxu1 %v1143_v57  ;;  %v1303_v57 = vld [vmem:[#allocation11 + $0x788] sm:$0xff] }
 0x29d   : > { %8171 = vrcp.f32 %v918_v11  ;;  %1228 = vmatprep.subr.mxu1 %v1142_v58  ;;  %v1280_v11 = vld [vmem:[#allocation11 + $0x6d0] sm:$0xff]  ;;  %v1302_v58 = vld [vmem:[#allocation11 + $0x780] sm:$0xff] }
 0x29e   : > { %1229 = vmatpush2.msra.mxu1 %v1141_v59  ;;  %v1301_v59 = vld [vmem:[#allocation11 + $0x778] sm:$0xff] }
 0x29f   : > { %1230 = vmatprep.subr.mxu1 %v1140_v60  ;;  %v1300_v60 = vld [vmem:[#allocation11 + $0x770] sm:$0xff] }
 0x2a0   : > { %1231 = vmatpush2.msra.mxu1 %v1139_v61  ;;  %v1299_v61 = vld [vmem:[#allocation11 + $0x768] sm:$0xff] }
 0x2a1   : > { %1232 = vmatprep.subr.mxu1 %v1138_v62  ;;  %v1298_v62 = vld [vmem:[#allocation11 + $0x760] sm:$0xff] }
 0x2a2   : > { %1233 = vmatpush2.msra.mxu1 %v1137_v63  ;;  %v1297_v63 = vld [vmem:[#allocation11 + $0x758] sm:$0xff] }
 0x2a3   : > { %1234 = vmatprep.subr.mxu1 %v1136_v0  ;;  %v1296_v0 = vld [vmem:[#allocation11 + $0x750] sm:$0xff] }
 0x2a4   : > { %1235 = vmatpush2.msra.mxu1 %v1135_v1  ;;  %v1295_v1 = vld [vmem:[#allocation11 + $0x748] sm:$0xff] }
 0x2a5   : > { %1236 = vmatprep.subr.mxu1 %v1134_v2  ;;  %v993_v2 = vld [vmem:[#allocation12 + $0x8] sm:$0x3] }
 0x2a6   : > { %1237 = vmatpush2.msra.mxu1 %v1133_v3  ;;  %v998_v3 = vrot.slane %v993_v2, %v8866_v16 }
 0x2a7   : > { %1238 = vmatprep.subr.mxu1 %v1132_v4  ;;  %v1002_v4 = vrot.slane %v993_v2, %v8869_v18  ;;  %v1419_v2 = vld [vmem:[#allocation11 + $0x830] sm:$0xff] }
 0x2a8   : > { %v8170_v12 = vpop.eup %8169  ;;  %1239 = vmatpush2.msra.mxu1 %v1131_v5 }
 0x2a9   : > { %v923_v14 = vmul.f32 %v8170_v12, %v8166_v8  ;;  %v1283_v8 = vld [vmem:[#allocation11 + $0x6e8] sm:$0xff] }
 0x2aa   : > { %v8172_v13 = vpop.eup %8171 }
 0x2ab   : > { %v924_v17 = vmul.f32 %v8172_v13, %v8168_v10  ;;  %v925_v20 = vsel %vm915_vm7, %v8170_v12, %v923_v14  ;;  %v1281_v10 = vld [vmem:[#allocation11 + $0x6d8] sm:$0xff]  ;;  %v1279_v12 = vld [vmem:[#allocation11 + $0x6c8] sm:$0xff]  ;;  %vm2220_vm7 = vcmask 1043456  }
 0x2ac   : > { %v1277_v14 = vld [vmem:[#allocation11 + $0x6b8] sm:$0xff] }
 0x2ad   : > { %v926_v19 = vsel %vm916_vm6, %v8172_v13, %v924_v17  ;;  %v1278_v13 = vld [vmem:[#allocation11 + $0x6c0] sm:$0xff]  ;;  %v1276_v17 = vld [vmem:[#allocation11 + $0x6b0] sm:$0xff] }
 0x2ae   : > { %1069 = vmatprep.mubr.f32.mxu0 %v926_v19  ;;  %v1275_v19 = vld [vmem:[#allocation11 + $0x6a8] sm:$0xff] }
 0x2af   : > { %1070 = vmatmul.mubr.f32.vlgmr.msra.gmra.mxu0 %v925_v20  ;;  %v1274_v20 = vld [vmem:[#allocation11 + $0x6a0] sm:$0xff] }
 0x2b0   : > { %1332 = vmatpush1.msra.mxu0 %v1284_v7 }
 0x2b1   : > { %1333 = vmatprep.subr.mxu0 %v1283_v8 }
 0x2b2   : > { %1334 = vmatpush1.msra.mxu0 %v1282_v9 }
 0x2b3   : > { %1335 = vmatprep.subr.mxu0 %v1281_v10 }
 0x2b4   : > { %1336 = vmatpush1.msra.mxu0 %v1280_v11 }
 0x2b5   : > { %1337 = vmatprep.subr.mxu0 %v1279_v12 }
 0x2b6   : > { %1338 = vmatpush1.msra.mxu0 %v1278_v13 }
 0x2b7   : > { %1339 = vmatprep.subr.mxu0 %v1277_v14 }
 0x2b8   : > { %1340 = vmatpush1.msra.mxu0 %v1276_v17 }
 0x2b9   : > { %1341 = vmatprep.subr.mxu0 %v1275_v19 }
 0x2ba   : > { %1342 = vmatpush1.msra.mxu0 %v1274_v20 }
 0x2bb   : > { %1343 = vmatprep.subr.mxu0 %v1273_v21 }
 0x2bc   : > { %1344 = vmatpush1.msra.mxu0 %v1272_v22 }
 0x2bd   : > { %1345 = vmatprep.subr.mxu0 %v1271_v23 }
 0x2be   : > { %1346 = vmatpush1.msra.mxu0 %v1270_v24 }
 0x2bf   : > { %1347 = vmatprep.subr.mxu0 %v1269_v25 }
 0x2c0   : > { %1348 = vmatpush1.msra.mxu0 %v1268_v26 }
 0x2c1   : > { %1349 = vmatprep.subr.mxu0 %v1267_v29 }
 0x2c2   : > { %1350 = vmatpush1.msra.mxu0 %v1266_v30 }
 0x2c3   : > { %1351 = vmatprep.subr.mxu0 %v1265_v31 }
 0x2c4   : > { %1352 = vmatpush1.msra.mxu0 %v1264_v32  ;;  %v1294_v32 = vld [vmem:[#allocation11 + $0x740] sm:$0xff] }
 0x2c5   : > { %1353 = vmatprep.subr.mxu0 %v1263_v33  ;;  %v1293_v33 = vld [vmem:[#allocation11 + $0x738] sm:$0xff] }
 0x2c6   : > { %1354 = vmatpush1.msra.mxu0 %v1262_v34  ;;  %v1292_v34 = vld [vmem:[#allocation11 + $0x730] sm:$0xff] }
 0x2c7   : > { %1355 = vmatprep.subr.mxu0 %v1261_v35  ;;  %v1291_v35 = vld [vmem:[#allocation11 + $0x728] sm:$0xff] }
 0x2c8   : > { %1356 = vmatpush1.msra.mxu0 %v1260_v36  ;;  %v1290_v36 = vld [vmem:[#allocation11 + $0x720] sm:$0xff] }
 0x2c9   : > { %1357 = vmatprep.subr.mxu0 %v1259_v37  ;;  %v1289_v37 = vld [vmem:[#allocation11 + $0x718] sm:$0xff] }
 0x2ca   : > { %1358 = vmatpush1.msra.mxu0 %v1258_v38  ;;  %v1288_v38 = vld [vmem:[#allocation11 + $0x710] sm:$0xff] }
 0x2cb   : > { %1359 = vmatprep.subr.mxu0 %v1257_v39  ;;  %v1287_v39 = vld [vmem:[#allocation11 + $0x708] sm:$0xff] }
 0x2cc   : > { %1360 = vmatpush1.msra.mxu0 %v1256_v40  ;;  %v1286_v40 = vld [vmem:[#allocation11 + $0x700] sm:$0xff] }
 0x2cd   : > { %1361 = vmatprep.subr.mxu0 %v1255_v41  ;;  %v1444_v41 = vld [vmem:[#allocation11 + $0x8f8] sm:$0xff] }
 0x2ce   : > { %1362 = vmatpush1.msra.mxu0 %v1254_v42  ;;  %v1443_v42 = vld [vmem:[#allocation11 + $0x8f0] sm:$0xff]  ;;  %1490 = vmatprep.subr.mxu1 %v1444_v41 }
 0x2cf   : > { %1363 = vmatprep.subr.mxu0 %v1317_v43  ;;  %v1442_v43 = vld [vmem:[#allocation11 + $0x8e8] sm:$0xff] }
 0x2d0   : > { %1364 = vmatpush2.msra.mxu0 %v1316_v44  ;;  %v1441_v44 = vld [vmem:[#allocation11 + $0x8e0] sm:$0xff] }
 0x2d1   : > { %1365 = vmatprep.subr.mxu0 %v1315_v45  ;;  %v1440_v45 = vld [vmem:[#allocation11 + $0x8d8] sm:$0xff] }
 0x2d2   : > { %1366 = vmatpush2.msra.mxu0 %v1314_v46  ;;  %v1439_v46 = vld [vmem:[#allocation11 + $0x8d0] sm:$0xff] }
 0x2d3   : > { %1367 = vmatprep.subr.mxu0 %v1313_v47  ;;  %v1438_v47 = vld [vmem:[#allocation11 + $0x8c8] sm:$0xff] }
 0x2d4   : > { %1368 = vmatpush2.msra.mxu0 %v1312_v48  ;;  %v1437_v48 = vld [vmem:[#allocation11 + $0x8c0] sm:$0xff] }
 0x2d5   : > { %1369 = vmatprep.subr.mxu0 %v1311_v49  ;;  %v1436_v49 = vld [vmem:[#allocation11 + $0x8b8] sm:$0xff] }
 0x2d6   : > { %1370 = vmatpush2.msra.mxu0 %v1310_v50  ;;  %v1435_v50 = vld [vmem:[#allocation11 + $0x8b0] sm:$0xff] }
 0x2d7   : > { %1371 = vmatprep.subr.mxu0 %v1309_v51  ;;  %v1434_v51 = vld [vmem:[#allocation11 + $0x8a8] sm:$0xff] }
 0x2d8   : > { %1372 = vmatpush2.msra.mxu0 %v1308_v52  ;;  %v1433_v52 = vld [vmem:[#allocation11 + $0x8a0] sm:$0xff] }
 0x2d9   : > { %1373 = vmatprep.subr.mxu0 %v1307_v53  ;;  %v1432_v53 = vld [vmem:[#allocation11 + $0x898] sm:$0xff] }
 0x2da   : > { %1374 = vmatpush2.msra.mxu0 %v1306_v54  ;;  %v1431_v54 = vld [vmem:[#allocation11 + $0x890] sm:$0xff] }
 0x2db   : > { %1375 = vmatprep.subr.mxu0 %v1305_v55  ;;  %v1430_v55 = vld [vmem:[#allocation11 + $0x888] sm:$0xff] }
 0x2dc   : > { %1376 = vmatpush2.msra.mxu0 %v1304_v56  ;;  %v1429_v56 = vld [vmem:[#allocation11 + $0x880] sm:$0xff] }
 0x2dd   : > { %1377 = vmatprep.subr.mxu0 %v1303_v57  ;;  %v1428_v57 = vld [vmem:[#allocation11 + $0x878] sm:$0xff] }
 0x2de   : > { %1378 = vmatpush2.msra.mxu0 %v1302_v58  ;;  %v1427_v58 = vld [vmem:[#allocation11 + $0x870] sm:$0xff] }
 0x2df   : > { %1379 = vmatprep.subr.mxu0 %v1301_v59  ;;  %v1426_v59 = vld [vmem:[#allocation11 + $0x868] sm:$0xff] }
 0x2e0   : > { %1380 = vmatpush2.msra.mxu0 %v1300_v60  ;;  %v1425_v60 = vld [vmem:[#allocation11 + $0x860] sm:$0xff] }
 0x2e1   : > { %1381 = vmatprep.subr.mxu0 %v1299_v61  ;;  %v1424_v61 = vld [vmem:[#allocation11 + $0x858] sm:$0xff] }
 0x2e2   : > { %1382 = vmatpush2.msra.mxu0 %v1298_v62  ;;  %v1423_v62 = vld [vmem:[#allocation11 + $0x850] sm:$0xff] }
 0x2e3   : > { %1383 = vmatprep.subr.mxu0 %v1297_v63  ;;  %v1422_v63 = vld [vmem:[#allocation11 + $0x848] sm:$0xff] }
 0x2e4   : > { %1384 = vmatpush2.msra.mxu0 %v1296_v0  ;;  %v1421_v0 = vld [vmem:[#allocation11 + $0x840] sm:$0xff] }
 0x2e5   : > { %1385 = vmatprep.subr.mxu0 %v1295_v1  ;;  %v1420_v1 = vld [vmem:[#allocation11 + $0x838] sm:$0xff] }
 0x2e6   : > { %1386 = vmatpush2.msra.mxu0 %v1294_v32  ;;  %v1460_v32 = vld [vmem:[#allocation11 + $0x978] sm:$0xff] }
 0x2e7   : > { %1387 = vmatprep.subr.mxu0 %v1293_v33  ;;  %v1459_v33 = vld [vmem:[#allocation11 + $0x970] sm:$0xff] }
 0x2e8   : > { %1388 = vmatpush2.msra.mxu0 %v1292_v34  ;;  %v1458_v34 = vld [vmem:[#allocation11 + $0x968] sm:$0xff] }
 0x2e9   : > { %1389 = vmatprep.subr.mxu0 %v1291_v35  ;;  %v1164_v35 = vld [vmem:[#allocation12 + $0xa] sm:$0x3] }
 0x2ea   : > { %1390 = vmatpush2.msra.mxu0 %v1290_v36  ;;  %v1169_v36 = vrot.slane %v1164_v35, %v8866_v16 }
 0x2eb   : > { %1391 = vmatprep.subr.mxu0 %v1289_v37  ;;  %v1173_v37 = vrot.slane %v1164_v35, %v8869_v18  ;;  %v1630_v35 = vld [vmem:[#allocation11 + $0xbf0] sm:$0xff] }
 0x2ec   : > { %1392 = vmatpush2.msra.mxu0 %v1288_v38 }
 0x2ed   : > { %1393 = vmatprep.subr.mxu0 %v1287_v39 }
 0x2ee   : > { %1394 = vmatpush2.msra.mxu0 %v1286_v40 }
 0x36f   : > { %v1071_v5 = vpop.f32.mrf.mxu0 }
 0x370   : > { %v1072_v6 = vadd.f32 %v1071_v5, %v998_v3  ;;  %v1418_v3 = vld [vmem:[#allocation11 + $0x828] sm:$0xff]  ;;  %v1416_v5 = vld [vmem:[#allocation11 + $0x818] sm:$0xff] }
 0x371   : > { %v1073_v7 = vpop.f32.mrf.mxu0 }
 0x372   : > { %v1076_v8 = vand.u32 2147483647, %v1072_v6  ;;  %v1074_v9 = vadd.f32 %v1073_v7, %v1002_v4  ;;  %vm1084_vm8 = vcmp.ge.f32.partialorder %v1072_v6, 0.0  ;;  %v1417_v4 = vld [vmem:[#allocation11 + $0x820] sm:$0xff]  ;;  %v1415_v6 = vld [vmem:[#allocation11 + $0x810] sm:$0xff]  ;;  %v1414_v7 = vld [vmem:[#allocation11 + $0x808] sm:$0xff] }
 0x374   : > { %v1078_v10 = vsub.f32 0.0, %v1076_v8  ;;  %v1077_v11 = vand.u32 2147483647, %v1074_v9  ;;  %vm1085_vm9 = vcmp.ge.f32.partialorder %v1074_v9, 0.0  ;;  %v1413_v8 = vld [vmem:[#allocation11 + $0x800] sm:$0xff]  ;;  %v1476_v9 = vld [vmem:[#allocation11 + $0x9f8] sm:$0xff] }
 0x376   : > { %v1080_v12 = vmul.f32 1.442695, %v1078_v10  ;;  %v1079_v13 = vsub.f32 0.0, %v1077_v11  ;;  %v1475_v10 = vld [vmem:[#allocation11 + $0x9f0] sm:$0xff]  ;;  %v1474_v11 = vld [vmem:[#allocation11 + $0x9e8] sm:$0xff] }
 0x378   : > { %8173 = vpow2.f32 %v1080_v12  ;;  %v1082_v14 = vmul.f32 1.442695, %v1079_v13  ;;  %v1473_v12 = vld [vmem:[#allocation11 + $0x9e0] sm:$0xff]  ;;  %v1472_v13 = vld [vmem:[#allocation11 + $0x9d8] sm:$0xff] }
 0x37a   : > { %8175 = vpow2.f32 %v1082_v14  ;;  %v1471_v14 = vld [vmem:[#allocation11 + $0x9d0] sm:$0xff] }
 0x385   : > { %v8174_v17 = vpop.eup %8173 }
 0x386   : > { %v1086_v19 = vadd.f32 1.0, %v8174_v17 }
 0x387   : > { %v8176_v20 = vpop.eup %8175 }
 0x388   : > { %8177 = vrcp.f32 %v1086_v19  ;;  %v1087_v21 = vadd.f32 1.0, %v8176_v20  ;;  %v1469_v19 = vld [vmem:[#allocation11 + $0x9c0] sm:$0xff] }
 0x38a   : > { %8179 = vrcp.f32 %v1087_v21  ;;  %v1467_v21 = vld [vmem:[#allocation11 + $0x9b0] sm:$0xff] }
 0x395   : > { %v8178_v22 = vpop.eup %8177 }
 0x396   : > { %v1092_v23 = vmul.f32 %v8178_v22, %v8174_v17  ;;  %v1470_v17 = vld [vmem:[#allocation11 + $0x9c8] sm:$0xff] }
 0x397   : > { %v8180_v24 = vpop.eup %8179 }
 0x398   : > { %v1093_v25 = vmul.f32 %v8180_v24, %v8176_v20  ;;  %v8889_v26 = vsel %vm1084_vm8, %v8178_v22, %v1092_v23  ;;  %v1468_v20 = vld [vmem:[#allocation11 + $0x9b8] sm:$0xff]  ;;  %v1466_v22 = vld [vmem:[#allocation11 + $0x9a8] sm:$0xff]  ;;  %v1465_v23 = vld [vmem:[#allocation11 + $0x9a0] sm:$0xff] }
 0x399   : > { %v1096_v31 = vadd.f32 %v8889_v26, %v8873_v27 }
 0x39a   : > { %v8891_v29 = vsel %vm1085_vm9, %v8180_v24, %v1093_v25  ;;  %v1464_v24 = vld [vmem:[#allocation11 + $0x998] sm:$0xff]  ;;  %v1463_v25 = vld [vmem:[#allocation11 + $0x990] sm:$0xff]  ;;  %vm2216_vm9 = vcmask 31744  }
 0x39b   : > { %v1097_v30 = vadd.f32 %v8891_v29, %v8875_v28 }
 0x39d   : > { %1240 = vmatprep.mubr.f32.mxu1 %v1097_v30  ;;  %v1462_v30 = vld [vmem:[#allocation11 + $0x988] sm:$0xff] }
 0x39e   : > { %1241 = vmatmul.mubr.f32.vlgmr.msra.gmra.mxu1 %v1096_v31  ;;  %v1461_v31 = vld [vmem:[#allocation11 + $0x980] sm:$0xff] }
 0x39f   : > { %1491 = vmatpush1.msra.mxu1 %v1443_v42 }
 0x3a0   : > { %1492 = vmatprep.subr.mxu1 %v1442_v43 }
 0x3a1   : > { %1493 = vmatpush1.msra.mxu1 %v1441_v44 }
 0x3a2   : > { %1494 = vmatprep.subr.mxu1 %v1440_v45 }
 0x3a3   : > { %1495 = vmatpush1.msra.mxu1 %v1439_v46  ;;  %v1457_v46 = vld [vmem:[#allocation11 + $0x960] sm:$0xff] }
 0x3a4   : > { %1496 = vmatprep.subr.mxu1 %v1438_v47  ;;  %v1456_v47 = vld [vmem:[#allocation11 + $0x958] sm:$0xff] }
 0x3a5   : > { %1497 = vmatpush1.msra.mxu1 %v1437_v48  ;;  %v1455_v48 = vld [vmem:[#allocation11 + $0x950] sm:$0xff] }
 0x3a6   : > { %1498 = vmatprep.subr.mxu1 %v1436_v49  ;;  %v1454_v49 = vld [vmem:[#allocation11 + $0x948] sm:$0xff] }
 0x3a7   : > { %1499 = vmatpush1.msra.mxu1 %v1435_v50  ;;  %v1453_v50 = vld [vmem:[#allocation11 + $0x940] sm:$0xff] }
 0x3a8   : > { %1500 = vmatprep.subr.mxu1 %v1434_v51  ;;  %v1452_v51 = vld [vmem:[#allocation11 + $0x938] sm:$0xff] }
 0x3a9   : > { %1501 = vmatpush1.msra.mxu1 %v1433_v52  ;;  %v1451_v52 = vld [vmem:[#allocation11 + $0x930] sm:$0xff] }
 0x3aa   : > { %1502 = vmatprep.subr.mxu1 %v1432_v53  ;;  %v1450_v53 = vld [vmem:[#allocation11 + $0x928] sm:$0xff] }
 0x3ab   : > { %1503 = vmatpush1.msra.mxu1 %v1431_v54  ;;  %v1449_v54 = vld [vmem:[#allocation11 + $0x920] sm:$0xff] }
 0x3ac   : > { %1504 = vmatprep.subr.mxu1 %v1430_v55  ;;  %v1448_v55 = vld [vmem:[#allocation11 + $0x918] sm:$0xff] }
 0x3ad   : > { %1505 = vmatpush1.msra.mxu1 %v1429_v56  ;;  %v1447_v56 = vld [vmem:[#allocation11 + $0x910] sm:$0xff] }
 0x3ae   : > { %1506 = vmatprep.subr.mxu1 %v1428_v57  ;;  %v1446_v57 = vld [vmem:[#allocation11 + $0x908] sm:$0xff] }
 0x3af   : > { %1507 = vmatpush1.msra.mxu1 %v1427_v58  ;;  %v1445_v58 = vld [vmem:[#allocation11 + $0x900] sm:$0xff] }
 0x3b0   : > { %1508 = vmatprep.subr.mxu1 %v1426_v59  ;;  %v1599_v59 = vld [vmem:[#allocation11 + $0xaf8] sm:$0xff] }
 0x3b1   : > { %1509 = vmatpush1.msra.mxu1 %v1425_v60  ;;  %v1598_v60 = vld [vmem:[#allocation11 + $0xaf0] sm:$0xff]  ;;  %1645 = vmatprep.subr.mxu0 %v1599_v59 }
 0x3b2   : > { %1510 = vmatprep.subr.mxu1 %v1424_v61  ;;  %v1597_v61 = vld [vmem:[#allocation11 + $0xae8] sm:$0xff] }
 0x3b3   : > { %1511 = vmatpush1.msra.mxu1 %v1423_v62  ;;  %v1596_v62 = vld [vmem:[#allocation11 + $0xae0] sm:$0xff] }
 0x3b4   : > { %1512 = vmatprep.subr.mxu1 %v1422_v63  ;;  %v1595_v63 = vld [vmem:[#allocation11 + $0xad8] sm:$0xff] }
 0x3b5   : > { %1513 = vmatpush1.msra.mxu1 %v1421_v0  ;;  %v1594_v0 = vld [vmem:[#allocation11 + $0xad0] sm:$0xff] }
 0x3b6   : > { %1514 = vmatprep.subr.mxu1 %v1420_v1  ;;  %v1593_v1 = vld [vmem:[#allocation11 + $0xac8] sm:$0xff] }
 0x3b7   : > { %1515 = vmatpush1.msra.mxu1 %v1419_v2  ;;  %v1592_v2 = vld [vmem:[#allocation11 + $0xac0] sm:$0xff] }
 0x3b8   : > { %1516 = vmatprep.subr.mxu1 %v1418_v3  ;;  %v1591_v3 = vld [vmem:[#allocation11 + $0xab8] sm:$0xff] }
 0x3b9   : > { %1517 = vmatpush1.msra.mxu1 %v1417_v4  ;;  %v1590_v4 = vld [vmem:[#allocation11 + $0xab0] sm:$0xff] }
 0x3ba   : > { %1518 = vmatprep.subr.mxu1 %v1416_v5  ;;  %v1589_v5 = vld [vmem:[#allocation11 + $0xaa8] sm:$0xff] }
 0x3bb   : > { %1519 = vmatpush1.msra.mxu1 %v1415_v6  ;;  %v1588_v6 = vld [vmem:[#allocation11 + $0xaa0] sm:$0xff] }
 0x3bc   : > { %1520 = vmatprep.subr.mxu1 %v1414_v7  ;;  %v1587_v7 = vld [vmem:[#allocation11 + $0xa98] sm:$0xff] }
 0x3bd   : > { %1521 = vmatpush1.msra.mxu1 %v1413_v8  ;;  %v1586_v8 = vld [vmem:[#allocation11 + $0xa90] sm:$0xff] }
 0x3be   : > { %1522 = vmatprep.subr.mxu1 %v1476_v9  ;;  %v1585_v9 = vld [vmem:[#allocation11 + $0xa88] sm:$0xff] }
 0x3bf   : > { %1523 = vmatpush2.msra.mxu1 %v1475_v10  ;;  %v1584_v10 = vld [vmem:[#allocation11 + $0xa80] sm:$0xff] }
 0x3c0   : > { %1524 = vmatprep.subr.mxu1 %v1474_v11  ;;  %v1583_v11 = vld [vmem:[#allocation11 + $0xa78] sm:$0xff] }
 0x3c1   : > { %1525 = vmatpush2.msra.mxu1 %v1473_v12  ;;  %v1582_v12 = vld [vmem:[#allocation11 + $0xa70] sm:$0xff] }
 0x3c2   : > { %1526 = vmatprep.subr.mxu1 %v1472_v13  ;;  %v1581_v13 = vld [vmem:[#allocation11 + $0xa68] sm:$0xff] }
 0x3c3   : > { %1527 = vmatpush2.msra.mxu1 %v1471_v14  ;;  %v1580_v14 = vld [vmem:[#allocation11 + $0xa60] sm:$0xff] }
 0x3c4   : > { %1528 = vmatprep.subr.mxu1 %v1470_v17  ;;  %v1579_v17 = vld [vmem:[#allocation11 + $0xa58] sm:$0xff] }
 0x3c5   : > { %1529 = vmatpush2.msra.mxu1 %v1469_v19  ;;  %v1578_v19 = vld [vmem:[#allocation11 + $0xa50] sm:$0xff] }
 0x3c6   : > { %1530 = vmatprep.subr.mxu1 %v1468_v20  ;;  %v1577_v20 = vld [vmem:[#allocation11 + $0xa48] sm:$0xff] }
 0x3c7   : > { %1531 = vmatpush2.msra.mxu1 %v1467_v21  ;;  %v1576_v21 = vld [vmem:[#allocation11 + $0xa40] sm:$0xff] }
 0x3c8   : > { %1532 = vmatprep.subr.mxu1 %v1466_v22  ;;  %v1575_v22 = vld [vmem:[#allocation11 + $0xa38] sm:$0xff] }
 0x3c9   : > { %1533 = vmatpush2.msra.mxu1 %v1465_v23  ;;  %v1574_v23 = vld [vmem:[#allocation11 + $0xa30] sm:$0xff] }
 0x3ca   : > { %1534 = vmatprep.subr.mxu1 %v1464_v24  ;;  %v1573_v24 = vld [vmem:[#allocation11 + $0xa28] sm:$0xff] }
 0x3cb   : > { %1535 = vmatpush2.msra.mxu1 %v1463_v25  ;;  %v1572_v25 = vld [vmem:[#allocation11 + $0xa20] sm:$0xff] }
 0x3cc   : > { %1536 = vmatprep.subr.mxu1 %v1462_v30  ;;  %v1571_v30 = vld [vmem:[#allocation11 + $0xa18] sm:$0xff] }
 0x3cd   : > { %1537 = vmatpush2.msra.mxu1 %v1461_v31  ;;  %v1570_v31 = vld [vmem:[#allocation11 + $0xa10] sm:$0xff] }
 0x3ce   : > { %1538 = vmatprep.subr.mxu1 %v1460_v32  ;;  %v1569_v32 = vld [vmem:[#allocation11 + $0xa08] sm:$0xff] }
 0x3cf   : > { %1539 = vmatpush2.msra.mxu1 %v1459_v33  ;;  %v1568_v33 = vld [vmem:[#allocation11 + $0xa00] sm:$0xff] }
 0x3d0   : > { %1540 = vmatprep.subr.mxu1 %v1458_v34  ;;  %v1631_v34 = vld [vmem:[#allocation11 + $0xbf8] sm:$0xff] }
 0x3d1   : > { %1541 = vmatpush2.msra.mxu1 %v1457_v46  ;;  %v1619_v46 = vld [vmem:[#allocation11 + $0xb98] sm:$0xff] }
 0x3d2   : > { %1542 = vmatprep.subr.mxu1 %v1456_v47  ;;  %v1618_v47 = vld [vmem:[#allocation11 + $0xb90] sm:$0xff] }
 0x3d3   : > { %1543 = vmatpush2.msra.mxu1 %v1455_v48  ;;  %v1617_v48 = vld [vmem:[#allocation11 + $0xb88] sm:$0xff] }
 0x3d4   : > { %1544 = vmatprep.subr.mxu1 %v1454_v49  ;;  %v1616_v49 = vld [vmem:[#allocation11 + $0xb80] sm:$0xff] }
 0x3d5   : > { %1545 = vmatpush2.msra.mxu1 %v1453_v50  ;;  %v1615_v50 = vld [vmem:[#allocation11 + $0xb78] sm:$0xff] }
 0x3d6   : > { %1546 = vmatprep.subr.mxu1 %v1452_v51  ;;  %v1614_v51 = vld [vmem:[#allocation11 + $0xb70] sm:$0xff] }
 0x3d7   : > { %1547 = vmatpush2.msra.mxu1 %v1451_v52  ;;  %v1613_v52 = vld [vmem:[#allocation11 + $0xb68] sm:$0xff] }
 0x3d8   : > { %1548 = vmatprep.subr.mxu1 %v1450_v53  ;;  %v1612_v53 = vld [vmem:[#allocation11 + $0xb60] sm:$0xff] }
 0x3d9   : > { %1549 = vmatpush2.msra.mxu1 %v1449_v54  ;;  %v1611_v54 = vld [vmem:[#allocation11 + $0xb58] sm:$0xff] }
 0x3da   : > { %1550 = vmatprep.subr.mxu1 %v1448_v55  ;;  %v1610_v55 = vld [vmem:[#allocation11 + $0xb50] sm:$0xff] }
 0x3db   : > { %1551 = vmatpush2.msra.mxu1 %v1447_v56  ;;  %v1609_v56 = vld [vmem:[#allocation11 + $0xb48] sm:$0xff] }
 0x3dc   : > { %1552 = vmatprep.subr.mxu1 %v1446_v57  ;;  %v1319_v57 = vld [vmem:[#allocation12 + $0xc] sm:$0x3] }
 0x3dd   : > { %1553 = vmatpush2.msra.mxu1 %v1445_v58  ;;  %v1324_v58 = vrot.slane %v1319_v57, %v8866_v16  ;;  %v1328_v59 = vrot.slane %v1319_v57, %v8869_v18  ;;  %v1791_v57 = vld [vmem:[#allocation11 + $0xdf0] sm:$0xff] }
 0x45e   : > { %v1242_v38 = vpop.f32.mrf.mxu1 }
 0x45f   : > { %v1243_v39 = vadd.f32 %v1242_v38, %v1169_v36  ;;  %v1629_v36 = vld [vmem:[#allocation11 + $0xbe8] sm:$0xff]  ;;  %v1627_v38 = vld [vmem:[#allocation11 + $0xbd8] sm:$0xff] }
 0x460   : > { %v1244_v40 = vpop.f32.mrf.mxu1 }
 0x461   : > { %v1245_v41 = vadd.f32 %v1244_v40, %v1173_v37  ;;  %v1249_v42 = vmul.f32 0.1, %v1243_v39  ;;  %vm1247_vm10 = vcmp.gt.f32.partialorder %v1243_v39, 0.0  ;;  %v1628_v37 = vld [vmem:[#allocation11 + $0xbe0] sm:$0xff]  ;;  %v1625_v40 = vld [vmem:[#allocation11 + $0xbc8] sm:$0xff] }
 0x463   : > { %v1250_v43 = vmul.f32 0.1, %v1245_v41  ;;  %vm1248_vm11 = vcmp.gt.f32.partialorder %v1245_v41, 0.0  ;;  %v1251_v45 = vsel %vm1247_vm10, %v1243_v39, %v1249_v42  ;;  %v1626_v39 = vld [vmem:[#allocation11 + $0xbd0] sm:$0xff]  ;;  %v1623_v42 = vld [vmem:[#allocation11 + $0xbb8] sm:$0xff] }
 0x465   : > { %v1252_v44 = vsel %vm1248_vm11, %v1245_v41, %v1250_v43  ;;  %v1624_v41 = vld [vmem:[#allocation11 + $0xbc0] sm:$0xff]  ;;  %v1622_v43 = vld [vmem:[#allocation11 + $0xbb0] sm:$0xff] }
 0x466   : > { %1395 = vmatprep.mubr.f32.mxu0 %v1252_v44  ;;  %v1621_v44 = vld [vmem:[#allocation11 + $0xba8] sm:$0xff] }
 0x467   : > { %1396 = vmatmul.mubr.f32.vlgmr.msra.gmra.mxu0 %v1251_v45  ;;  %v1620_v45 = vld [vmem:[#allocation11 + $0xba0] sm:$0xff] }
 0x468   : > { %1646 = vmatpush1.msra.mxu0 %v1598_v60 }
 0x469   : > { %1647 = vmatprep.subr.mxu0 %v1597_v61 }
 0x46a   : > { %1648 = vmatpush1.msra.mxu0 %v1596_v62 }
 0x46b   : > { %1649 = vmatprep.subr.mxu0 %v1595_v63 }
 0x46c   : > { %1650 = vmatpush1.msra.mxu0 %v1594_v0 }
 0x46d   : > { %1651 = vmatprep.subr.mxu0 %v1593_v1 }
 0x46e   : > { %1652 = vmatpush1.msra.mxu0 %v1592_v2 }
 0x46f   : > { %1653 = vmatprep.subr.mxu0 %v1591_v3 }
 0x470   : > { %1654 = vmatpush1.msra.mxu0 %v1590_v4 }
 0x471   : > { %1655 = vmatprep.subr.mxu0 %v1589_v5 }
 0x472   : > { %1656 = vmatpush1.msra.mxu0 %v1588_v6 }
 0x473   : > { %1657 = vmatprep.subr.mxu0 %v1587_v7 }
 0x474   : > { %1658 = vmatpush1.msra.mxu0 %v1586_v8  ;;  %v1608_v8 = vld [vmem:[#allocation11 + $0xb40] sm:$0xff] }
 0x475   : > { %1659 = vmatprep.subr.mxu0 %v1585_v9  ;;  %v1607_v9 = vld [vmem:[#allocation11 + $0xb38] sm:$0xff] }
 0x476   : > { %1660 = vmatpush1.msra.mxu0 %v1584_v10  ;;  %v1606_v10 = vld [vmem:[#allocation11 + $0xb30] sm:$0xff] }
 0x477   : > { %1661 = vmatprep.subr.mxu0 %v1583_v11  ;;  %v1605_v11 = vld [vmem:[#allocation11 + $0xb28] sm:$0xff] }
 0x478   : > { %1662 = vmatpush1.msra.mxu0 %v1582_v12  ;;  %v1604_v12 = vld [vmem:[#allocation11 + $0xb20] sm:$0xff] }
 0x479   : > { %1663 = vmatprep.subr.mxu0 %v1581_v13  ;;  %v1603_v13 = vld [vmem:[#allocation11 + $0xb18] sm:$0xff] }
 0x47a   : > { %1664 = vmatpush1.msra.mxu0 %v1580_v14  ;;  %v1602_v14 = vld [vmem:[#allocation11 + $0xb10] sm:$0xff] }
 0x47b   : > { %1665 = vmatprep.subr.mxu0 %v1579_v17  ;;  %v1601_v17 = vld [vmem:[#allocation11 + $0xb08] sm:$0xff] }
 0x47c   : > { %1666 = vmatpush1.msra.mxu0 %v1578_v19  ;;  %v1600_v19 = vld [vmem:[#allocation11 + $0xb00] sm:$0xff] }
 0x47d   : > { %1667 = vmatprep.subr.mxu0 %v1577_v20  ;;  %v1760_v20 = vld [vmem:[#allocation11 + $0xcf8] sm:$0xff] }
 0x47e   : > { %1668 = vmatpush1.msra.mxu0 %v1576_v21  ;;  %v1759_v21 = vld [vmem:[#allocation11 + $0xcf0] sm:$0xff]  ;;  %1806 = vmatprep.subr.mxu1 %v1760_v20 }
 0x47f   : > { %1669 = vmatprep.subr.mxu0 %v1575_v22  ;;  %v1758_v22 = vld [vmem:[#allocation11 + $0xce8] sm:$0xff] }
 0x480   : > { %1670 = vmatpush1.msra.mxu0 %v1574_v23  ;;  %v1757_v23 = vld [vmem:[#allocation11 + $0xce0] sm:$0xff] }
 0x481   : > { %1671 = vmatprep.subr.mxu0 %v1573_v24  ;;  %v1756_v24 = vld [vmem:[#allocation11 + $0xcd8] sm:$0xff] }
 0x482   : > { %1672 = vmatpush1.msra.mxu0 %v1572_v25  ;;  %v1755_v25 = vld [vmem:[#allocation11 + $0xcd0] sm:$0xff] }
 0x483   : > { %1673 = vmatprep.subr.mxu0 %v1571_v30  ;;  %v1754_v30 = vld [vmem:[#allocation11 + $0xcc8] sm:$0xff] }
 0x484   : > { %1674 = vmatpush1.msra.mxu0 %v1570_v31  ;;  %v1753_v31 = vld [vmem:[#allocation11 + $0xcc0] sm:$0xff] }
 0x485   : > { %1675 = vmatprep.subr.mxu0 %v1569_v32  ;;  %v1752_v32 = vld [vmem:[#allocation11 + $0xcb8] sm:$0xff] }
 0x486   : > { %1676 = vmatpush1.msra.mxu0 %v1568_v33  ;;  %v1751_v33 = vld [vmem:[#allocation11 + $0xcb0] sm:$0xff] }
 0x487   : > { %1677 = vmatprep.subr.mxu0 %v1631_v34  ;;  %v1750_v34 = vld [vmem:[#allocation11 + $0xca8] sm:$0xff] }
 0x488   : > { %1678 = vmatpush2.msra.mxu0 %v1630_v35  ;;  %v1749_v35 = vld [vmem:[#allocation11 + $0xca0] sm:$0xff] }
 0x489   : > { %1679 = vmatprep.subr.mxu0 %v1629_v36  ;;  %v1748_v36 = vld [vmem:[#allocation11 + $0xc98] sm:$0xff] }
 0x48a   : > { %1680 = vmatpush2.msra.mxu0 %v1628_v37  ;;  %v1747_v37 = vld [vmem:[#allocation11 + $0xc90] sm:$0xff] }
 0x48b   : > { %1681 = vmatprep.subr.mxu0 %v1627_v38  ;;  %v1746_v38 = vld [vmem:[#allocation11 + $0xc88] sm:$0xff] }
 0x48c   : > { %1682 = vmatpush2.msra.mxu0 %v1626_v39  ;;  %v1745_v39 = vld [vmem:[#allocation11 + $0xc80] sm:$0xff] }
 0x48d   : > { %1683 = vmatprep.subr.mxu0 %v1625_v40  ;;  %v1744_v40 = vld [vmem:[#allocation11 + $0xc78] sm:$0xff] }
 0x48e   : > { %1684 = vmatpush2.msra.mxu0 %v1624_v41  ;;  %v1743_v41 = vld [vmem:[#allocation11 + $0xc70] sm:$0xff] }
 0x48f   : > { %1685 = vmatprep.subr.mxu0 %v1623_v42  ;;  %v1742_v42 = vld [vmem:[#allocation11 + $0xc68] sm:$0xff] }
 0x490   : > { %1686 = vmatpush2.msra.mxu0 %v1622_v43  ;;  %v1741_v43 = vld [vmem:[#allocation11 + $0xc60] sm:$0xff] }
 0x491   : > { %1687 = vmatprep.subr.mxu0 %v1621_v44  ;;  %v1740_v44 = vld [vmem:[#allocation11 + $0xc58] sm:$0xff] }
 0x492   : > { %1688 = vmatpush2.msra.mxu0 %v1620_v45  ;;  %v1739_v45 = vld [vmem:[#allocation11 + $0xc50] sm:$0xff] }
 0x493   : > { %1689 = vmatprep.subr.mxu0 %v1619_v46  ;;  %v1738_v46 = vld [vmem:[#allocation11 + $0xc48] sm:$0xff] }
 0x494   : > { %1690 = vmatpush2.msra.mxu0 %v1618_v47  ;;  %v1737_v47 = vld [vmem:[#allocation11 + $0xc40] sm:$0xff] }
 0x495   : > { %1691 = vmatprep.subr.mxu0 %v1617_v48  ;;  %v1736_v48 = vld [vmem:[#allocation11 + $0xc38] sm:$0xff] }
 0x496   : > { %1692 = vmatpush2.msra.mxu0 %v1616_v49  ;;  %v1735_v49 = vld [vmem:[#allocation11 + $0xc30] sm:$0xff] }
 0x497   : > { %1693 = vmatprep.subr.mxu0 %v1615_v50  ;;  %v1734_v50 = vld [vmem:[#allocation11 + $0xc28] sm:$0xff] }
 0x498   : > { %1694 = vmatpush2.msra.mxu0 %v1614_v51  ;;  %v1733_v51 = vld [vmem:[#allocation11 + $0xc20] sm:$0xff] }
 0x499   : > { %1695 = vmatprep.subr.mxu0 %v1613_v52  ;;  %v1732_v52 = vld [vmem:[#allocation11 + $0xc18] sm:$0xff] }
 0x49a   : > { %1696 = vmatpush2.msra.mxu0 %v1612_v53  ;;  %v1731_v53 = vld [vmem:[#allocation11 + $0xc10] sm:$0xff] }
 0x49b   : > { %1697 = vmatprep.subr.mxu0 %v1611_v54  ;;  %v1730_v54 = vld [vmem:[#allocation11 + $0xc08] sm:$0xff] }
 0x49c   : > { %1698 = vmatpush2.msra.mxu0 %v1610_v55  ;;  %v1729_v55 = vld [vmem:[#allocation11 + $0xc00] sm:$0xff] }
 0x49d   : > { %1699 = vmatprep.subr.mxu0 %v1609_v56  ;;  %v1792_v56 = vld [vmem:[#allocation11 + $0xdf8] sm:$0xff] }
 0x49e   : > { %1700 = vmatpush2.msra.mxu0 %v1608_v8  ;;  %v1778_v8 = vld [vmem:[#allocation11 + $0xd88] sm:$0xff] }
 0x49f   : > { %1701 = vmatprep.subr.mxu0 %v1607_v9  ;;  %v1777_v9 = vld [vmem:[#allocation11 + $0xd80] sm:$0xff] }
 0x4a0   : > { %1702 = vmatpush2.msra.mxu0 %v1606_v10  ;;  %v1776_v10 = vld [vmem:[#allocation11 + $0xd78] sm:$0xff] }
 0x4a1   : > { %1703 = vmatprep.subr.mxu0 %v1605_v11  ;;  %v1478_v11 = vld [vmem:[#allocation12 + $0xe] sm:$0x3] }
 0x4a2   : > { %1704 = vmatpush2.msra.mxu0 %v1604_v12  ;;  %v1483_v12 = vrot.slane %v1478_v11, %v8866_v16 }
 0x4a3   : > { %1705 = vmatprep.subr.mxu0 %v1603_v13  ;;  %v1487_v13 = vrot.slane %v1478_v11, %v8869_v18  ;;  %v1892_v11 = vld [vmem:[#allocation11 + $0xe10] sm:$0xff] }
 0x4a4   : > { %1706 = vmatpush2.msra.mxu0 %v1602_v14 }
 0x4a5   : > { %1707 = vmatprep.subr.mxu0 %v1601_v17 }
 0x4a6   : > { %1708 = vmatpush2.msra.mxu0 %v1600_v19 }
 0x527   : > { %v1397_v60 = vpop.f32.mrf.mxu0 }
 0x528   : > { %v1398_v61 = vadd.f32 %v1397_v60, %v1324_v58  ;;  %v1790_v58 = vld [vmem:[#allocation11 + $0xde8] sm:$0xff]  ;;  %v1788_v60 = vld [vmem:[#allocation11 + $0xdd8] sm:$0xff] }
 0x529   : > { %v1399_v62 = vpop.f32.mrf.mxu0 }
 0x52a   : > { %vm1402_vm12 = vcmp.gt.f32.partialorder %v1398_v61, 0.0  ;;  %v1404_v63 = vmul.f32 0.1, %v1398_v61  ;;  %v1400_v0 = vadd.f32 %v1399_v62, %v1328_v59  ;;  %v1789_v59 = vld [vmem:[#allocation11 + $0xde0] sm:$0xff]  ;;  %v1786_v62 = vld [vmem:[#allocation11 + $0xdc8] sm:$0xff] }
 0x52c   : > { %v8901_v1 = vsel %vm1402_vm12, %v1398_v61, %v1404_v63  ;;  %vm1403_vm13 = vcmp.gt.f32.partialorder %v1400_v0, 0.0  ;;  %v1405_v2 = vmul.f32 0.1, %v1400_v0  ;;  %v1787_v61 = vld [vmem:[#allocation11 + $0xdd0] sm:$0xff]  ;;  %v1785_v63 = vld [vmem:[#allocation11 + $0xdc0] sm:$0xff] }
 0x52d   : > { %v1408_v3 = vadd.f32 %v8901_v1, %v8889_v26 }
 0x52e   : > { %v8905_v4 = vsel %vm1403_vm13, %v1400_v0, %v1405_v2  ;;  %v1784_v0 = vld [vmem:[#allocation11 + $0xdb8] sm:$0xff]  ;;  %v1783_v2 = vld [vmem:[#allocation11 + $0xdb0] sm:$0xff] }
 0x52f   : > { %v1409_v5 = vadd.f32 %v8905_v4, %v8891_v29  ;;  %v1410_v7 = vadd.f32 %v1408_v3, %v8873_v27  ;;  %v1782_v3 = vld [vmem:[#allocation11 + $0xda8] sm:$0xff] }
 0x531   : > { %v1411_v6 = vadd.f32 %v1409_v5, %v8875_v28  ;;  %v1781_v5 = vld [vmem:[#allocation11 + $0xda0] sm:$0xff] }
 0x533   : > { %1554 = vmatprep.mubr.f32.mxu1 %v1411_v6  ;;  %v1780_v6 = vld [vmem:[#allocation11 + $0xd98] sm:$0xff] }
 0x534   : > { %1555 = vmatmul.mubr.f32.vlgmr.msra.gmra.mxu1 %v1410_v7  ;;  %v1779_v7 = vld [vmem:[#allocation11 + $0xd90] sm:$0xff] }
 0x535   : > { %1807 = vmatpush1.msra.mxu1 %v1759_v21 }
 0x536   : > { %1808 = vmatprep.subr.mxu1 %v1758_v22 }
 0x537   : > { %1809 = vmatpush1.msra.mxu1 %v1757_v23 }
 0x538   : > { %1810 = vmatprep.subr.mxu1 %v1756_v24 }
 0x539   : > { %1811 = vmatpush1.msra.mxu1 %v1755_v25  ;;  %v1775_v25 = vld [vmem:[#allocation11 + $0xd70] sm:$0xff] }
 0x53a   : > { %1812 = vmatprep.subr.mxu1 %v1754_v30  ;;  %v1774_v30 = vld [vmem:[#allocation11 + $0xd68] sm:$0xff] }
 0x53b   : > { %1813 = vmatpush1.msra.mxu1 %v1753_v31  ;;  %v1773_v31 = vld [vmem:[#allocation11 + $0xd60] sm:$0xff] }
 0x53c   : > { %1814 = vmatprep.subr.mxu1 %v1752_v32  ;;  %v1772_v32 = vld [vmem:[#allocation11 + $0xd58] sm:$0xff] }
 0x53d   : > { %1815 = vmatpush1.msra.mxu1 %v1751_v33  ;;  %v1771_v33 = vld [vmem:[#allocation11 + $0xd50] sm:$0xff] }
 0x53e   : > { %1816 = vmatprep.subr.mxu1 %v1750_v34  ;;  %v1770_v34 = vld [vmem:[#allocation11 + $0xd48] sm:$0xff] }
 0x53f   : > { %1817 = vmatpush1.msra.mxu1 %v1749_v35  ;;  %v1769_v35 = vld [vmem:[#allocation11 + $0xd40] sm:$0xff] }
 0x540   : > { %1818 = vmatprep.subr.mxu1 %v1748_v36  ;;  %v1768_v36 = vld [vmem:[#allocation11 + $0xd38] sm:$0xff] }
 0x541   : > { %1819 = vmatpush1.msra.mxu1 %v1747_v37  ;;  %v1767_v37 = vld [vmem:[#allocation11 + $0xd30] sm:$0xff] }
 0x542   : > { %1820 = vmatprep.subr.mxu1 %v1746_v38  ;;  %v1766_v38 = vld [vmem:[#allocation11 + $0xd28] sm:$0xff] }
 0x543   : > { %1821 = vmatpush1.msra.mxu1 %v1745_v39  ;;  %v1765_v39 = vld [vmem:[#allocation11 + $0xd20] sm:$0xff] }
 0x544   : > { %1822 = vmatprep.subr.mxu1 %v1744_v40  ;;  %v1764_v40 = vld [vmem:[#allocation11 + $0xd18] sm:$0xff] }
 0x545   : > { %1823 = vmatpush1.msra.mxu1 %v1743_v41  ;;  %v1763_v41 = vld [vmem:[#allocation11 + $0xd10] sm:$0xff] }
 0x546   : > { %1824 = vmatprep.subr.mxu1 %v1742_v42  ;;  %v1762_v42 = vld [vmem:[#allocation11 + $0xd08] sm:$0xff] }
 0x547   : > { %1825 = vmatpush1.msra.mxu1 %v1741_v43  ;;  %v1761_v43 = vld [vmem:[#allocation11 + $0xd00] sm:$0xff] }
 0x548   : > { %1826 = vmatprep.subr.mxu1 %v1740_v44  ;;  %v1921_v44 = vld [vmem:[#allocation11 + $0xef8] sm:$0xff] }
 0x549   : > { %1827 = vmatpush1.msra.mxu1 %v1739_v45  ;;  %v1920_v45 = vld [vmem:[#allocation11 + $0xef0] sm:$0xff]  ;;  %1967 = vmatprep.subr.mxu0 %v1921_v44  ;;  %v1947_v44 = vld [vmem:[#allocation11 + $0xfc8] sm:$0xff] }
 0x54a   : > { %1828 = vmatprep.subr.mxu1 %v1738_v46  ;;  %v1919_v46 = vld [vmem:[#allocation11 + $0xee8] sm:$0xff] }
 0x54b   : > { %1829 = vmatpush1.msra.mxu1 %v1737_v47  ;;  %v1918_v47 = vld [vmem:[#allocation11 + $0xee0] sm:$0xff] }
 0x54c   : > { %1830 = vmatprep.subr.mxu1 %v1736_v48  ;;  %v1917_v48 = vld [vmem:[#allocation11 + $0xed8] sm:$0xff] }
 0x54d   : > { %1831 = vmatpush1.msra.mxu1 %v1735_v49  ;;  %v1916_v49 = vld [vmem:[#allocation11 + $0xed0] sm:$0xff] }
 0x54e   : > { %1832 = vmatprep.subr.mxu1 %v1734_v50  ;;  %v1915_v50 = vld [vmem:[#allocation11 + $0xec8] sm:$0xff] }
 0x54f   : > { %1833 = vmatpush1.msra.mxu1 %v1733_v51  ;;  %v1914_v51 = vld [vmem:[#allocation11 + $0xec0] sm:$0xff] }
 0x550   : > { %1834 = vmatprep.subr.mxu1 %v1732_v52  ;;  %v1913_v52 = vld [vmem:[#allocation11 + $0xeb8] sm:$0xff] }
 0x551   : > { %1835 = vmatpush1.msra.mxu1 %v1731_v53  ;;  %v1912_v53 = vld [vmem:[#allocation11 + $0xeb0] sm:$0xff] }
 0x552   : > { %1836 = vmatprep.subr.mxu1 %v1730_v54  ;;  %v1911_v54 = vld [vmem:[#allocation11 + $0xea8] sm:$0xff] }
 0x553   : > { %1837 = vmatpush1.msra.mxu1 %v1729_v55  ;;  %v1910_v55 = vld [vmem:[#allocation11 + $0xea0] sm:$0xff] }
 0x554   : > { %1838 = vmatprep.subr.mxu1 %v1792_v56  ;;  %v1909_v56 = vld [vmem:[#allocation11 + $0xe98] sm:$0xff] }
 0x555   : > { %1839 = vmatpush2.msra.mxu1 %v1791_v57  ;;  %v1908_v57 = vld [vmem:[#allocation11 + $0xe90] sm:$0xff] }
 0x556   : > { %1840 = vmatprep.subr.mxu1 %v1790_v58  ;;  %v1907_v58 = vld [vmem:[#allocation11 + $0xe88] sm:$0xff] }
 0x557   : > { %1841 = vmatpush2.msra.mxu1 %v1789_v59  ;;  %v1906_v59 = vld [vmem:[#allocation11 + $0xe80] sm:$0xff] }
 0x558   : > { %1842 = vmatprep.subr.mxu1 %v1788_v60  ;;  %v1905_v60 = vld [vmem:[#allocation11 + $0xe78] sm:$0xff] }
 0x559   : > { %1843 = vmatpush2.msra.mxu1 %v1787_v61  ;;  %v1904_v61 = vld [vmem:[#allocation11 + $0xe70] sm:$0xff] }
 0x55a   : > { %1844 = vmatprep.subr.mxu1 %v1786_v62  ;;  %v1903_v62 = vld [vmem:[#allocation11 + $0xe68] sm:$0xff] }
 0x55b   : > { %1845 = vmatpush2.msra.mxu1 %v1785_v63  ;;  %v1902_v63 = vld [vmem:[#allocation11 + $0xe60] sm:$0xff] }
 0x55c   : > { %1846 = vmatprep.subr.mxu1 %v1784_v0  ;;  %v1901_v0 = vld [vmem:[#allocation11 + $0xe58] sm:$0xff] }
 0x55d   : > { %1847 = vmatpush2.msra.mxu1 %v1783_v2  ;;  %v1900_v2 = vld [vmem:[#allocation11 + $0xe50] sm:$0xff] }
 0x55e   : > { %1848 = vmatprep.subr.mxu1 %v1782_v3  ;;  %v1899_v3 = vld [vmem:[#allocation11 + $0xe48] sm:$0xff] }
 0x55f   : > { %1849 = vmatpush2.msra.mxu1 %v1781_v5  ;;  %v1898_v5 = vld [vmem:[#allocation11 + $0xe40] sm:$0xff] }
 0x560   : > { %1850 = vmatprep.subr.mxu1 %v1780_v6  ;;  %v1897_v6 = vld [vmem:[#allocation11 + $0xe38] sm:$0xff] }
 0x561   : > { %1851 = vmatpush2.msra.mxu1 %v1779_v7  ;;  %v1896_v7 = vld [vmem:[#allocation11 + $0xe30] sm:$0xff] }
 0x562   : > { %1852 = vmatprep.subr.mxu1 %v1778_v8  ;;  %v1895_v8 = vld [vmem:[#allocation11 + $0xe28] sm:$0xff] }
 0x563   : > { %1853 = vmatpush2.msra.mxu1 %v1777_v9  ;;  %v1894_v9 = vld [vmem:[#allocation11 + $0xe20] sm:$0xff] }
 0x564   : > { %1854 = vmatprep.subr.mxu1 %v1776_v10  ;;  %v1893_v10 = vld [vmem:[#allocation11 + $0xe18] sm:$0xff] }
 0x565   : > { %1855 = vmatpush2.msra.mxu1 %v1775_v25 }
 0x566   : > { %1856 = vmatprep.subr.mxu1 %v1774_v30 }
 0x567   : > { %1857 = vmatpush2.msra.mxu1 %v1773_v31 }
 0x568   : > { %1858 = vmatprep.subr.mxu1 %v1772_v32 }
 0x569   : > { %1859 = vmatpush2.msra.mxu1 %v1771_v33 }
 0x56a   : > { %1860 = vmatprep.subr.mxu1 %v1770_v34 }
 0x56b   : > { %1861 = vmatpush2.msra.mxu1 %v1769_v35 }
 0x56c   : > { %1862 = vmatprep.subr.mxu1 %v1768_v36 }
 0x56d   : > { %1863 = vmatpush2.msra.mxu1 %v1767_v37 }
 0x56e   : > { %1864 = vmatprep.subr.mxu1 %v1766_v38 }
 0x56f   : > { %1865 = vmatpush2.msra.mxu1 %v1765_v39 }
 0x570   : > { %1866 = vmatprep.subr.mxu1 %v1764_v40 }
 0x571   : > { %1867 = vmatpush2.msra.mxu1 %v1763_v41 }
 0x572   : > { %1868 = vmatprep.subr.mxu1 %v1762_v42 }
 0x573   : > { %1869 = vmatpush2.msra.mxu1 %v1761_v43  ;;  %v1948_v43 = vld [vmem:[#allocation11 + $0xfd0] sm:$0xff] }
 0x5f4   : > { %v1556_v14 = vpop.f32.mrf.mxu1 }
 0x5f5   : > { %v1557_v17 = vadd.f32 %v1556_v14, %v1483_v12  ;;  %v1891_v12 = vld [vmem:[#allocation11 + $0xe08] sm:$0xff]  ;;  %v1953_v14 = vld [vmem:[#allocation11 + $0xff8] sm:$0xff] }
 0x5f6   : > { %v1558_v19 = vpop.f32.mrf.mxu1 }
 0x5f7   : > { %v1559_v20 = vadd.f32 %v1558_v19, %v1487_v13  ;;  %v1563_v21 = vmul.f32 0.1, %v1557_v17  ;;  %vm1561_vm14 = vcmp.gt.f32.partialorder %v1557_v17, 0.0  ;;  %v1890_v13 = vld [vmem:[#allocation11 + $0xe00] sm:$0xff]  ;;  %v1951_v19 = vld [vmem:[#allocation11 + $0xfe8] sm:$0xff] }
 0x5f9   : > { %v1564_v22 = vmul.f32 0.1, %v1559_v20  ;;  %vm1562_vm15 = vcmp.gt.f32.partialorder %v1559_v20, 0.0  ;;  %v1565_v24 = vsel %vm1561_vm14, %v1557_v17, %v1563_v21  ;;  %v1952_v17 = vld [vmem:[#allocation11 + $0xff0] sm:$0xff]  ;;  %v1949_v21 = vld [vmem:[#allocation11 + $0xfd8] sm:$0xff] }
 0x5fb   : > { %v1566_v23 = vsel %vm1562_vm15, %v1559_v20, %v1564_v22  ;;  %v1950_v20 = vld [vmem:[#allocation11 + $0xfe0] sm:$0xff]  ;;  %v1633_v22 = vld [vmem:[#allocation12 + $0x10] sm:$0x3] }
 0x5fc   : > { %1709 = vmatprep.mubr.f32.mxu0 %v1566_v23  ;;  %v1638_v23 = vrot.slane %v1633_v22, %v8866_v16 }
 0x5fd   : > { %1710 = vmatmul.mubr.f32.vlgmr.msra.gmra.mxu0 %v1565_v24  ;;  %v1642_v24 = vrot.slane %v1633_v22, %v8869_v18  ;;  %v2059_v22 = vld [vmem:[%s9967_s5 + $0x48] sm:$0xff] }
 0x5fe   : > { %1968 = vmatpush1.msra.mxu0 %v1920_v45  ;;  %v1945_v45 = vld [vmem:[#allocation11 + $0xfb8] sm:$0xff] }
 0x5ff   : > { %1969 = vmatprep.subr.mxu0 %v1919_v46  ;;  %v1944_v46 = vld [vmem:[#allocation11 + $0xfb0] sm:$0xff] }
 0x600   : > { %1970 = vmatpush1.msra.mxu0 %v1918_v47  ;;  %v1942_v47 = vld [vmem:[#allocation11 + $0xfa0] sm:$0xff] }
 0x601   : > { %1971 = vmatprep.subr.mxu0 %v1917_v48  ;;  %v1941_v48 = vld [vmem:[#allocation11 + $0xf98] sm:$0xff] }
 0x602   : > { %1972 = vmatpush1.msra.mxu0 %v1916_v49  ;;  %v1940_v49 = vld [vmem:[#allocation11 + $0xf90] sm:$0xff] }
 0x603   : > { %1973 = vmatprep.subr.mxu0 %v1915_v50  ;;  %v1939_v50 = vld [vmem:[#allocation11 + $0xf88] sm:$0xff] }
 0x604   : > { %1974 = vmatpush1.msra.mxu0 %v1914_v51  ;;  %v1938_v51 = vld [vmem:[#allocation11 + $0xf80] sm:$0xff] }
 0x605   : > { %1975 = vmatprep.subr.mxu0 %v1913_v52  ;;  %v1937_v52 = vld [vmem:[#allocation11 + $0xf78] sm:$0xff] }
 0x606   : > { %1976 = vmatpush1.msra.mxu0 %v1912_v53  ;;  %v1936_v53 = vld [vmem:[#allocation11 + $0xf70] sm:$0xff] }
 0x607   : > { %1977 = vmatprep.subr.mxu0 %v1911_v54  ;;  %v1935_v54 = vld [vmem:[#allocation11 + $0xf68] sm:$0xff] }
 0x608   : > { %1978 = vmatpush1.msra.mxu0 %v1910_v55  ;;  %v1934_v55 = vld [vmem:[#allocation11 + $0xf60] sm:$0xff] }
 0x609   : > { %1979 = vmatprep.subr.mxu0 %v1909_v56  ;;  %v1933_v56 = vld [vmem:[#allocation11 + $0xf58] sm:$0xff] }
 0x60a   : > { %1980 = vmatpush1.msra.mxu0 %v1908_v57  ;;  %v1932_v57 = vld [vmem:[#allocation11 + $0xf50] sm:$0xff] }
 0x60b   : > { %1981 = vmatprep.subr.mxu0 %v1907_v58  ;;  %v1931_v58 = vld [vmem:[#allocation11 + $0xf48] sm:$0xff] }
 0x60c   : > { %1982 = vmatpush1.msra.mxu0 %v1906_v59  ;;  %v1930_v59 = vld [vmem:[#allocation11 + $0xf40] sm:$0xff] }
 0x60d   : > { %1983 = vmatprep.subr.mxu0 %v1905_v60  ;;  %v1929_v60 = vld [vmem:[#allocation11 + $0xf38] sm:$0xff] }
 0x60e   : > { %1984 = vmatpush1.msra.mxu0 %v1904_v61  ;;  %v1928_v61 = vld [vmem:[#allocation11 + $0xf30] sm:$0xff] }
 0x60f   : > { %1985 = vmatprep.subr.mxu0 %v1903_v62  ;;  %v1927_v62 = vld [vmem:[#allocation11 + $0xf28] sm:$0xff] }
 0x610   : > { %1986 = vmatpush1.msra.mxu0 %v1902_v63  ;;  %v1926_v63 = vld [vmem:[#allocation11 + $0xf20] sm:$0xff] }
 0x611   : > { %1987 = vmatprep.subr.mxu0 %v1901_v0  ;;  %v1925_v0 = vld [vmem:[#allocation11 + $0xf18] sm:$0xff] }
 0x612   : > { %1988 = vmatpush1.msra.mxu0 %v1900_v2  ;;  %v1924_v2 = vld [vmem:[#allocation11 + $0xf10] sm:$0xff] }
 0x613   : > { %1989 = vmatprep.subr.mxu0 %v1899_v3  ;;  %v1923_v3 = vld [vmem:[#allocation11 + $0xf08] sm:$0xff] }
 0x614   : > { %1990 = vmatpush1.msra.mxu0 %v1898_v5  ;;  %v1922_v5 = vld [vmem:[#allocation11 + $0xf00] sm:$0xff] }
 0x615   : > { %1991 = vmatprep.subr.mxu0 %v1897_v6  ;;  %v2081_v6 = vld [vmem:[%s9967_s5 + $0xf8] sm:$0xff] }
 0x616   : > { %1992 = vmatpush1.msra.mxu0 %v1896_v7  ;;  %v2065_v7 = vld [vmem:[%s9967_s5 + $0x78] sm:$0xff]  ;;  %7921 = vmatprep.subr.mxu1 %v2081_v6 }
 0x617   : > { %1993 = vmatprep.subr.mxu0 %v1895_v8  ;;  %v2080_v8 = vld [vmem:[%s9967_s5 + $0xf0] sm:$0xff] }
 0x618   : > { %1994 = vmatpush1.msra.mxu0 %v1894_v9  ;;  %v2064_v9 = vld [vmem:[%s9967_s5 + $0x70] sm:$0xff] }
 0x619   : > { %1995 = vmatprep.subr.mxu0 %v1893_v10  ;;  %v2079_v10 = vld [vmem:[%s9967_s5 + $0xe8] sm:$0xff] }
 0x61a   : > { %1996 = vmatpush1.msra.mxu0 %v1892_v11  ;;  %v2063_v11 = vld [vmem:[%s9967_s5 + $0x68] sm:$0xff] }
 0x61b   : > { %1997 = vmatprep.subr.mxu0 %v1891_v12  ;;  %v2078_v12 = vld [vmem:[%s9967_s5 + $0xe0] sm:$0xff] }
 0x61c   : > { %1998 = vmatpush1.msra.mxu0 %v1890_v13  ;;  %v2062_v13 = vld [vmem:[%s9967_s5 + $0x60] sm:$0xff] }
 0x61d   : > { %1999 = vmatprep.subr.mxu0 %v1953_v14  ;;  %v2077_v14 = vld [vmem:[%s9967_s5 + $0xd8] sm:$0xff] }
 0x61e   : > { %2000 = vmatpush2.msra.mxu0 %v1952_v17  ;;  %v2061_v17 = vld [vmem:[%s9967_s5 + $0x58] sm:$0xff] }
 0x61f   : > { %2001 = vmatprep.subr.mxu0 %v1951_v19  ;;  %v2076_v19 = vld [vmem:[%s9967_s5 + $0xd0] sm:$0xff] }
 0x620   : > { %2002 = vmatpush2.msra.mxu0 %v1950_v20  ;;  %v2060_v20 = vld [vmem:[%s9967_s5 + $0x50] sm:$0xff] }
 0x621   : > { %2003 = vmatprep.subr.mxu0 %v1949_v21  ;;  %v2075_v21 = vld [vmem:[%s9967_s5 + $0xc8] sm:$0xff] }
 0x622   : > { %2004 = vmatpush2.msra.mxu0 %v1948_v43 }
 0x623   : > { %2005 = vmatprep.subr.mxu0 %v1947_v44 }
 0x6bd   : > { %v1711_v25 = vpop.f32.mrf.mxu0 }
 0x6be   : > { %v1712_v30 = vadd.f32 %v1711_v25, %v1638_v23  ;;  %v2074_v23 = vld [vmem:[%s9967_s5 + $0xc0] sm:$0xff]  ;;  %v2073_v25 = vld [vmem:[%s9967_s5 + $0xb8] sm:$0xff] }
 0x6bf   : > { %v1713_v31 = vpop.f32.mrf.mxu0 }
 0x6c0   : > { %vm1716_vm1 = vcmp.gt.f32.partialorder %v1712_v30, 0.0  ;;  %v1718_v32 = vmul.f32 0.1, %v1712_v30  ;;  %v1714_v33 = vadd.f32 %v1713_v31, %v1642_v24  ;;  %v2058_v24 = vld [vmem:[%s9967_s5 + $0x40] sm:$0xff] }
 0x6c2   : > { %v8915_v34 = vsel %vm1716_vm1, %v1712_v30, %v1718_v32  ;;  %vm1717_vm2 = vcmp.gt.f32.partialorder %v1714_v33, 0.0  ;;  %v1719_v35 = vmul.f32 0.1, %v1714_v33  ;;  %v1794_v30 = vld [vmem:[#allocation12 + $0x12] sm:$0x3] }
 0x6c3   : > { %v1722_v36 = vadd.f32 %v8915_v34, %v8901_v1  ;;  %v1946_v1 = vld [vmem:[#allocation11 + $0xfc0] sm:$0xff]  ;;  %v1799_v31 = vrot.slane %v1794_v30, %v8866_v16  ;;  %v1803_v32 = vrot.slane %v1794_v30, %v8869_v18  ;;  %v2637_v30 = vld [vmem:[#allocation18 + $0x2e0] sm:$0xff] }
 0x6c4   : > { %v8919_v37 = vsel %vm1717_vm2, %v1714_v33, %v1719_v35  ;;  %2006 = vmatpush2.msra.mxu0 %v1946_v1 }
 0x6c5   : > { %v1723_v38 = vadd.f32 %v8919_v37, %v8905_v4  ;;  %v1724_v39 = vadd.f32 %v1722_v36, %v8889_v26  ;;  %2007 = vmatprep.subr.mxu0 %v1945_v45  ;;  %v1943_v4 = vld [vmem:[#allocation11 + $0xfa8] sm:$0xff] }
 0x6c6   : > { %2008 = vmatpush2.msra.mxu0 %v1944_v46 }
 0x6c7   : > { %v1725_v40 = vadd.f32 %v1723_v38, %v8891_v29  ;;  %v1726_v42 = vadd.f32 %v1724_v39, %v8873_v27  ;;  %2009 = vmatprep.subr.mxu0 %v1943_v4 }
 0x6c8   : > { %2010 = vmatpush2.msra.mxu0 %v1942_v47  ;;  %v8980_v47 = vld [vmem:[#allocation5 + $0x8] sm:$0xff] }
 0x6c9   : > { %v1727_v41 = vadd.f32 %v1725_v40, %v8875_v28  ;;  %2011 = vmatprep.subr.mxu0 %v1941_v48  ;;  %v2057_v48 = vld [vmem:[%s9967_s5 + $0x38] sm:$0xff] }
 0x6ca   : > { %2012 = vmatpush2.msra.mxu0 %v1940_v49  ;;  %v2072_v49 = vld [vmem:[%s9967_s5 + $0xb0] sm:$0xff] }
 0x6cb   : > { %1870 = vmatprep.mubr.f32.mxu1 %v1727_v41  ;;  %2013 = vmatprep.subr.mxu0 %v1939_v50  ;;  %v2056_v50 = vld [vmem:[%s9967_s5 + $0x30] sm:$0xff] }
 0x6cc   : > { %1871 = vmatmul.mubr.f32.vlgmr.msra.gmra.mxu1 %v1726_v42  ;;  %2014 = vmatpush2.msra.mxu0 %v1938_v51  ;;  %v2071_v51 = vld [vmem:[%s9967_s5 + $0xa8] sm:$0xff] }
 0x6cd   : > { %2015 = vmatprep.subr.mxu0 %v1937_v52  ;;  %7922 = vmatpush3.msra.mxu1 %v2065_v7  ;;  %v2055_v52 = vld [vmem:[%s9967_s5 + $0x28] sm:$0xff] }
 0x6ce   : > { %2016 = vmatpush2.msra.mxu0 %v1936_v53  ;;  %7923 = vmatprep.subr.mxu1 %v2080_v8  ;;  %v2070_v53 = vld [vmem:[%s9967_s5 + $0xa0] sm:$0xff] }
 0x6cf   : > { %2017 = vmatprep.subr.mxu0 %v1935_v54  ;;  %7924 = vmatpush3.msra.mxu1 %v2064_v9  ;;  %v2054_v54 = vld [vmem:[%s9967_s5 + $0x20] sm:$0xff] }
 0x6d0   : > { %2018 = vmatpush2.msra.mxu0 %v1934_v55  ;;  %7925 = vmatprep.subr.mxu1 %v2079_v10  ;;  %v2069_v55 = vld [vmem:[%s9967_s5 + $0x98] sm:$0xff] }
 0x6d1   : > { %2019 = vmatprep.subr.mxu0 %v1933_v56  ;;  %7926 = vmatpush3.msra.mxu1 %v2063_v11  ;;  %v2053_v56 = vld [vmem:[%s9967_s5 + $0x18] sm:$0xff] }
 0x6d2   : > { %2020 = vmatpush2.msra.mxu0 %v1932_v57  ;;  %7927 = vmatprep.subr.mxu1 %v2078_v12  ;;  %v2068_v57 = vld [vmem:[%s9967_s5 + $0x90] sm:$0xff] }
 0x6d3   : > { %2021 = vmatprep.subr.mxu0 %v1931_v58  ;;  %7928 = vmatpush3.msra.mxu1 %v2062_v13  ;;  %v2052_v58 = vld [vmem:[%s9967_s5 + $0x10] sm:$0xff] }
 0x6d4   : > { %2022 = vmatpush2.msra.mxu0 %v1930_v59  ;;  %7929 = vmatprep.subr.mxu1 %v2077_v14  ;;  %v2067_v59 = vld [vmem:[%s9967_s5 + $0x88] sm:$0xff] }
 0x6d5   : > { %2023 = vmatprep.subr.mxu0 %v1929_v60  ;;  %7930 = vmatpush3.msra.mxu1 %v2061_v17  ;;  %v2051_v60 = vld [vmem:[%s9967_s5 + $0x8] sm:$0xff] }
 0x6d6   : > { %2024 = vmatpush2.msra.mxu0 %v1928_v61  ;;  %7931 = vmatprep.subr.mxu1 %v2076_v19  ;;  %v2066_v61 = vld [vmem:[%s9967_s5 + $0x80] sm:$0xff] }
 0x6d7   : > { %2025 = vmatprep.subr.mxu0 %v1927_v62  ;;  %7932 = vmatpush3.msra.mxu1 %v2060_v20  ;;  %v2050_v62 = vld [vmem:[%s9967_s5] sm:$0xff] }
 0x6d8   : > { %2026 = vmatpush2.msra.mxu0 %v1926_v63  ;;  %7933 = vmatprep.subr.mxu1 %v2075_v21  ;;  %v1955_v63 = vld [vmem:[#allocation12 + $0x14] sm:$0x3]  ;;  %v2162_v21 = vld [vmem:[#allocation15] sm:$0xff] }
 0x6d9   : > { %2027 = vmatprep.subr.mxu0 %v1925_v0  ;;  %7934 = vmatpush3.msra.mxu1 %v2059_v22  ;;  %v1960_v0 = vrot.slane %v1955_v63, %v8866_v16  ;;  %v2212_v22 = vcombine.high %v2162_v21, %v2162_v21 }
 0x6da   : > { %2028 = vmatpush2.msra.mxu0 %v1924_v2  ;;  %7935 = vmatprep.subr.mxu1 %v2074_v23  ;;  %v1964_v2 = vrot.slane %v1955_v63, %v8869_v18  ;;  %v9042_v23 = vld [vmem:[#allocation15 + $0x8] sm:$0xff] }
 0x6db   : > { %2029 = vmatprep.subr.mxu0 %v1923_v3  ;;  %7936 = vmatpush3.msra.mxu1 %v2058_v24  ;;  %v2639_v24 = vld [vmem:[#allocation18 + $0x2f0] sm:$0xff]  ;;  %v2669_v63 = vld [vmem:[#allocation18 + $0x3e0] sm:$0xff] }
 0x6dc   : > { %2030 = vmatpush2.msra.mxu0 %v1922_v5  ;;  %7937 = vmatprep.subr.mxu1 %v2073_v25  ;;  %v2638_v25 = vld [vmem:[#allocation18 + $0x2e8] sm:$0xff] }
 0x6dd   : > { %7938 = vmatpush3.msra.mxu1 %v2057_v48  ;;  %7402 = vmatprep.subr.msk.mxu0 %vm2220_vm7, %v2212_v22  ;;  %v2620_v48 = vld [vmem:[#allocation18 + $0x258] sm:$0xff]  ;;  %v2653_v22 = vld [vmem:[#allocation18 + $0x360] sm:$0xff] }
 0x6de   : > { %7939 = vmatprep.subr.mxu1 %v2072_v49  ;;  %v2619_v49 = vld [vmem:[#allocation18 + $0x250] sm:$0xff] }
 0x6df   : > { %7940 = vmatpush3.msra.mxu1 %v2056_v50  ;;  %v2618_v50 = vld [vmem:[#allocation18 + $0x248] sm:$0xff] }
 0x6e0   : > { %7941 = vmatprep.subr.mxu1 %v2071_v51  ;;  %v2617_v51 = vld [vmem:[#allocation18 + $0x240] sm:$0xff] }
 0x6e1   : > { %7942 = vmatpush3.msra.mxu1 %v2055_v52  ;;  %v2616_v52 = vld [vmem:[#allocation18 + $0x238] sm:$0xff] }
 0x6e2   : > { %7943 = vmatprep.subr.mxu1 %v2070_v53  ;;  %v2615_v53 = vld [vmem:[#allocation18 + $0x230] sm:$0xff] }
 0x6e3   : > { %7944 = vmatpush3.msra.mxu1 %v2054_v54  ;;  %v2614_v54 = vld [vmem:[#allocation18 + $0x228] sm:$0xff] }
 0x6e4   : > { %7945 = vmatprep.subr.mxu1 %v2069_v55  ;;  %v2613_v55 = vld [vmem:[#allocation18 + $0x220] sm:$0xff] }
 0x6e5   : > { %7946 = vmatpush3.msra.mxu1 %v2053_v56  ;;  %v2612_v56 = vld [vmem:[#allocation18 + $0x218] sm:$0xff] }
 0x6e6   : > { %7947 = vmatprep.subr.mxu1 %v2068_v57  ;;  %v2611_v57 = vld [vmem:[#allocation18 + $0x210] sm:$0xff] }
 0x6e7   : > { %7948 = vmatpush3.msra.mxu1 %v2052_v58  ;;  %v2610_v58 = vld [vmem:[#allocation18 + $0x208] sm:$0xff] }
 0x6e8   : > { %7949 = vmatprep.subr.mxu1 %v2067_v59  ;;  %v2609_v59 = vld [vmem:[#allocation18 + $0x200] sm:$0xff] }
 0x6e9   : > { %7950 = vmatpush3.msra.mxu1 %v2051_v60  ;;  %v2672_v60 = vld [vmem:[#allocation18 + $0x3f8] sm:$0xff] }
 0x6ea   : > { %7951 = vmatprep.subr.mxu1 %v2066_v61  ;;  %v2671_v61 = vld [vmem:[#allocation18 + $0x3f0] sm:$0xff] }
 0x6eb   : > { %7952 = vmatpush3.msra.mxu1 %v2050_v62  ;;  %v2670_v62 = vld [vmem:[#allocation18 + $0x3e8] sm:$0xff] }
 0x78c   : > { %v1872_v33 = vpop.f32.mrf.mxu1 }
 0x78d   : > { %v1873_v35 = vadd.f32 %v1872_v33, %v1799_v31  ;;  %v2636_v31 = vld [vmem:[#allocation18 + $0x2d8] sm:$0xff]  ;;  %v2634_v33 = vld [vmem:[#allocation18 + $0x2c8] sm:$0xff] }
 0x78e   : > { %v1874_v36 = vpop.f32.mrf.mxu1 }
 0x78f   : > { %v1879_v38 = vmin.f32 %v1873_v35, 0.0  ;;  %v1875_v39 = vadd.f32 %v1874_v36, %v1803_v32  ;;  %vm1877_vm4 = vcmp.gt.f32.partialorder %v1873_v35, 0.0  ;;  %v2635_v32 = vld [vmem:[#allocation18 + $0x2d0] sm:$0xff]  ;;  %v2632_v36 = vld [vmem:[#allocation18 + $0x2b8] sm:$0xff] }
 0x791   : > { %v1881_v40 = vmul.f32 1.442695, %v1879_v38  ;;  %v1880_v41 = vmin.f32 %v1875_v39, 0.0  ;;  %vm1878_vm3 = vcmp.gt.f32.partialorder %v1875_v39, 0.0  ;;  %v2631_v38 = vld [vmem:[#allocation18 + $0x2b0] sm:$0xff] }
 0x793   : > { %8181 = vpow2.f32 %v1881_v40  ;;  %v1883_v42 = vmul.f32 1.442695, %v1880_v41  ;;  %v2629_v40 = vld [vmem:[#allocation18 + $0x2a0] sm:$0xff]  ;;  %v2628_v41 = vld [vmem:[#allocation18 + $0x298] sm:$0xff] }
 0x795   : > { %8183 = vpow2.f32 %v1883_v42  ;;  %v2627_v42 = vld [vmem:[#allocation18 + $0x290] sm:$0xff] }
 0x7a0   : > { %v8182_v43 = vpop.eup %8181 }
 0x7a1   : > { %v7399_v1 = vadd.f32 -1.0, %v8182_v43  ;;  %v2626_v43 = vld [vmem:[#allocation18 + $0x288] sm:$0xff] }
 0x7a2   : > { %v8184_v44 = vpop.eup %8183 }
 0x7a3   : > { %v7400_v45 = vadd.f32 -1.0, %v8184_v44  ;;  %v1887_v4 = vsel %vm1877_vm4, %v1873_v35, %v7399_v1  ;;  %v2633_v35 = vld [vmem:[#allocation18 + $0x2c0] sm:$0xff]  ;;  %v2624_v1 = vld [vmem:[#allocation18 + $0x278] sm:$0xff] }
 0x7a4   : > { %v2625_v44 = vld [vmem:[#allocation18 + $0x280] sm:$0xff] }
 0x7a5   : > { %v1888_v46 = vsel %vm1878_vm3, %v1875_v39, %v7400_v45  ;;  %v2630_v39 = vld [vmem:[#allocation18 + $0x2a8] sm:$0xff]  ;;  %v2623_v45 = vld [vmem:[#allocation18 + $0x270] sm:$0xff] }
 0x7a6   : > { %2031 = vmatprep.mubr.f32.mxu0 %v1888_v46  ;;  %v2622_v46 = vld [vmem:[#allocation18 + $0x268] sm:$0xff] }
 0x7a7   : > { %2032 = vmatmul.mubr.f32.vlgmr.msra.gmra.mxu0 %v1887_v4  ;;  %v2621_v4 = vld [vmem:[#allocation18 + $0x260] sm:$0xff] }
 0x7a8   : > { %2301 = vmatprep.mubr.f32.mxu0 %v8980_v47  ;;  %7403 = vmatpush1.msk.msra.mxu0 %vm2220_vm7, %v2162_v21  ;;  %v2654_v21 = vld [vmem:[#allocation18 + $0x368] sm:$0xff] }
 0x867   : > { %v2033_v3 = vpop.f32.mrf.mxu0 }
 0x868   : > { %v2034_v5 = vadd.f32 %v2033_v3, %v1960_v0  ;;  %v2668_v0 = vld [vmem:[#allocation18 + $0x3d8] sm:$0xff]  ;;  %v2666_v3 = vld [vmem:[#allocation18 + $0x3c8] sm:$0xff] }
 0x869   : > { %v2035_v6 = vpop.f32.mrf.mxu0 }
 0x86a   : > { %vm2038_vm5 = vcmp.gt.f32.partialorder %v2034_v5, 0.0  ;;  %v2040_v7 = vmul.f32 0.1, %v2034_v5  ;;  %v2036_v8 = vadd.f32 %v2035_v6, %v1964_v2  ;;  %v2667_v2 = vld [vmem:[#allocation18 + $0x3d0] sm:$0xff]  ;;  %v2664_v6 = vld [vmem:[#allocation18 + $0x3b8] sm:$0xff] }
 0x86c   : > { %v9030_v9 = vsel %vm2038_vm5, %v2034_v5, %v2040_v7  ;;  %vm2039_vm6 = vcmp.gt.f32.partialorder %v2036_v8, 0.0  ;;  %v2041_v10 = vmul.f32 0.1, %v2036_v8  ;;  %v2665_v5 = vld [vmem:[#allocation18 + $0x3c0] sm:$0xff]  ;;  %v2663_v7 = vld [vmem:[#allocation18 + $0x3b0] sm:$0xff] }
 0x86d   : > { %v2044_v11 = vadd.f32 %v9030_v9, %v8915_v34  ;;  %v2213_v34 = vcombine.high %v9042_v23, %v9042_v23 }
 0x86e   : > { %v9034_v12 = vsel %vm2039_vm6, %v2036_v8, %v2041_v10  ;;  %v2662_v8 = vld [vmem:[#allocation18 + $0x3a8] sm:$0xff]  ;;  %v2661_v10 = vld [vmem:[#allocation18 + $0x3a0] sm:$0xff] }
 0x86f   : > { %v2045_v13 = vadd.f32 %v9034_v12, %v8919_v37  ;;  %v2046_v14 = vadd.f32 %v2044_v11, %v8889_v26  ;;  %7405 = vmatprep.subr.msk.mxu0 %vm2220_vm7, %v2213_v34  ;;  %v2640_v37 = vld [vmem:[#allocation18 + $0x2f8] sm:$0xff] }
 0x870   : > { %2885 = vmatprep.subr.mxu1 %v2640_v37  ;;  %v2660_v11 = vld [vmem:[#allocation18 + $0x398] sm:$0xff]  ;;  %v7401_v37 = vld [vmem:[#allocation14] ss:$0 sm:$0xff] }
 0x871   : > { %v2047_v17 = vadd.f32 %v2045_v13, %v8891_v29  ;;  %v2048_v20 = vadd.f32 %v2046_v14, %v8873_v27  ;;  %v2659_v13 = vld [vmem:[#allocation18 + $0x390] sm:$0xff]  ;;  %v2658_v14 = vld [vmem:[#allocation18 + $0x388] sm:$0xff] }
 0x873   : > { %v2049_v19 = vadd.f32 %v2047_v17, %v8875_v28  ;;  %v2657_v17 = vld [vmem:[#allocation18 + $0x380] sm:$0xff] }
 0x875   : > { %2153 = vmatprep.mubr.f32.mxu1 %v2049_v19  ;;  %v2656_v19 = vld [vmem:[#allocation18 + $0x378] sm:$0xff] }
 0x876   : > { %2154 = vmatmul.mubr.f32.vlgmr.msra.gmra.mxu1 %v2048_v20  ;;  %v2655_v20 = vld [vmem:[#allocation18 + $0x370] sm:$0xff] }
 0x877   : > { %2886 = vmatpush1.msra.mxu1 %v2639_v24 }
 0x878   : > { %2887 = vmatprep.subr.mxu1 %v2638_v25 }
 0x879   : > { %2888 = vmatpush1.msra.mxu1 %v2637_v30 }
 0x87a   : > { %2889 = vmatprep.subr.mxu1 %v2636_v31  ;;  %v2164_v31 = vld [vmem:[#allocation15 + $0x10] sm:$0xff] }
 0x87b   : > { %2890 = vmatpush1.msra.mxu1 %v2635_v32 }
 0x87c   : > { %2891 = vmatprep.subr.mxu1 %v2634_v33  ;;  %v2214_v33 = vcombine.high %v2164_v31, %v2164_v31 }
 0x87d   : > { %2892 = vmatpush1.msra.mxu1 %v2633_v35 }
 0x87e   : > { %2893 = vmatprep.subr.mxu1 %v2632_v36  ;;  %v2165_v36 = vld [vmem:[#allocation15 + $0x18] sm:$0xff] }
 0x87f   : > { %2894 = vmatpush1.msra.mxu1 %v2631_v38  ;;  %v2215_v38 = vcombine.high %v2165_v36, %v2165_v36 }
 0x880   : > { %2895 = vmatprep.subr.mxu1 %v2630_v39  ;;  %v2576_v39 = vld [vmem:[#allocation18 + $0xf8] sm:$0xff] }
 0x881   : > { %2896 = vmatpush1.msra.mxu1 %v2629_v40  ;;  %v2574_v40 = vld [vmem:[#allocation18 + $0xe8] sm:$0xff] }
 0x882   : > { %2897 = vmatprep.subr.mxu1 %v2628_v41  ;;  %v2573_v41 = vld [vmem:[#allocation18 + $0xe0] sm:$0xff] }
 0x883   : > { %2898 = vmatpush1.msra.mxu1 %v2627_v42  ;;  %v2572_v42 = vld [vmem:[#allocation18 + $0xd8] sm:$0xff] }
 0x884   : > { %2899 = vmatprep.subr.mxu1 %v2626_v43  ;;  %v2571_v43 = vld [vmem:[#allocation18 + $0xd0] sm:$0xff] }
 0x885   : > { %2900 = vmatpush1.msra.mxu1 %v2625_v44  ;;  %v2570_v44 = vld [vmem:[#allocation18 + $0xc8] sm:$0xff] }
 0x886   : > { %2901 = vmatprep.subr.mxu1 %v2624_v1  ;;  %v2569_v1 = vld [vmem:[#allocation18 + $0xc0] sm:$0xff] }
 0x887   : > { %2902 = vmatpush1.msra.mxu1 %v2623_v45  ;;  %v2568_v45 = vld [vmem:[#allocation18 + $0xb8] sm:$0xff] }
 0x888   : > { %2903 = vmatprep.subr.mxu1 %v2622_v46  ;;  %v2567_v46 = vld [vmem:[#allocation18 + $0xb0] sm:$0xff] }
 0x889   : > { %2904 = vmatpush1.msra.mxu1 %v2621_v4  ;;  %v2565_v4 = vld [vmem:[#allocation18 + $0xa0] sm:$0xff] }
 0x88a   : > { %2905 = vmatprep.subr.mxu1 %v2620_v48  ;;  %v2564_v48 = vld [vmem:[#allocation18 + $0x98] sm:$0xff] }
 0x88b   : > { %2906 = vmatpush1.msra.mxu1 %v2619_v49  ;;  %v2563_v49 = vld [vmem:[#allocation18 + $0x90] sm:$0xff] }
 0x88c   : > { %2907 = vmatprep.subr.mxu1 %v2618_v50  ;;  %v2562_v50 = vld [vmem:[#allocation18 + $0x88] sm:$0xff] }
 0x88d   : > { %2908 = vmatpush1.msra.mxu1 %v2617_v51  ;;  %v2561_v51 = vld [vmem:[#allocation18 + $0x80] sm:$0xff] }
 0x88e   : > { %2909 = vmatprep.subr.mxu1 %v2616_v52  ;;  %v2560_v52 = vld [vmem:[#allocation18 + $0x78] sm:$0xff] }
 0x88f   : > { %2910 = vmatpush1.msra.mxu1 %v2615_v53  ;;  %v2559_v53 = vld [vmem:[#allocation18 + $0x70] sm:$0xff] }
 0x890   : > { %2911 = vmatprep.subr.mxu1 %v2614_v54  ;;  %v2558_v54 = vld [vmem:[#allocation18 + $0x68] sm:$0xff] }
 0x891   : > { %2912 = vmatpush1.msra.mxu1 %v2613_v55  ;;  %v2557_v55 = vld [vmem:[#allocation18 + $0x60] sm:$0xff] }
 0x892   : > { %2913 = vmatprep.subr.mxu1 %v2612_v56  ;;  %v2556_v56 = vld [vmem:[#allocation18 + $0x58] sm:$0xff] }
 0x893   : > { %2914 = vmatpush1.msra.mxu1 %v2611_v57  ;;  %v2555_v57 = vld [vmem:[#allocation18 + $0x50] sm:$0xff] }
 0x894   : > { %2915 = vmatprep.subr.mxu1 %v2610_v58  ;;  %v2554_v58 = vld [vmem:[#allocation18 + $0x48] sm:$0xff] }
 0x895   : > { %2916 = vmatpush1.msra.mxu1 %v2609_v59  ;;  %v2553_v59 = vld [vmem:[#allocation18 + $0x40] sm:$0xff] }
 0x896   : > { %2917 = vmatprep.subr.mxu1 %v2672_v60  ;;  %v2552_v60 = vld [vmem:[#allocation18 + $0x38] sm:$0xff] }
 0x897   : > { %2918 = vmatpush2.msra.mxu1 %v2671_v61  ;;  %v2551_v61 = vld [vmem:[#allocation18 + $0x30] sm:$0xff] }
 0x898   : > { %2919 = vmatprep.subr.mxu1 %v2670_v62  ;;  %v2550_v62 = vld [vmem:[#allocation18 + $0x28] sm:$0xff] }
 0x899   : > { %2920 = vmatpush2.msra.mxu1 %v2669_v63  ;;  %v2549_v63 = vld [vmem:[#allocation18 + $0x20] sm:$0xff] }
 0x89a   : > { %2921 = vmatprep.subr.mxu1 %v2668_v0  ;;  %v2548_v0 = vld [vmem:[#allocation18 + $0x18] sm:$0xff] }
 0x89b   : > { %2922 = vmatpush2.msra.mxu1 %v2667_v2  ;;  %v2547_v2 = vld [vmem:[#allocation18 + $0x10] sm:$0xff] }
 0x89c   : > { %2923 = vmatprep.subr.mxu1 %v2666_v3  ;;  %v2546_v3 = vld [vmem:[#allocation18 + $0x8] sm:$0xff] }
 0x89d   : > { %2924 = vmatpush2.msra.mxu1 %v2665_v5  ;;  %v2545_v5 = vld [vmem:[#allocation18] sm:$0xff] }
 0x89e   : > { %2925 = vmatprep.subr.mxu1 %v2664_v6  ;;  %v2608_v6 = vld [vmem:[#allocation18 + $0x1f8] sm:$0xff] }
 0x89f   : > { %2926 = vmatpush2.msra.mxu1 %v2663_v7  ;;  %v2607_v7 = vld [vmem:[#allocation18 + $0x1f0] sm:$0xff] }
 0x8a0   : > { %2927 = vmatprep.subr.mxu1 %v2662_v8  ;;  %v2606_v8 = vld [vmem:[#allocation18 + $0x1e8] sm:$0xff] }
 0x8a1   : > { %2928 = vmatpush2.msra.mxu1 %v2661_v10  ;;  %v2605_v10 = vld [vmem:[#allocation18 + $0x1e0] sm:$0xff] }
 0x8a2   : > { %2929 = vmatprep.subr.mxu1 %v2660_v11  ;;  %v2604_v11 = vld [vmem:[#allocation18 + $0x1d8] sm:$0xff] }
 0x8a3   : > { %2930 = vmatpush2.msra.mxu1 %v2659_v13  ;;  %v2603_v13 = vld [vmem:[#allocation18 + $0x1d0] sm:$0xff] }
 0x8a4   : > { %2931 = vmatprep.subr.mxu1 %v2658_v14  ;;  %v2602_v14 = vld [vmem:[#allocation18 + $0x1c8] sm:$0xff] }
 0x8a5   : > { %2932 = vmatpush2.msra.mxu1 %v2657_v17  ;;  %v2601_v17 = vld [vmem:[#allocation18 + $0x1c0] sm:$0xff] }
 0x8a6   : > { %2933 = vmatprep.subr.mxu1 %v2656_v19  ;;  %v2600_v19 = vld [vmem:[#allocation18 + $0x1b8] sm:$0xff] }
 0x8a7   : > { %2934 = vmatpush2.msra.mxu1 %v2655_v20  ;;  %v2599_v20 = vld [vmem:[#allocation18 + $0x1b0] sm:$0xff] }
 0x8a8   : > { %2935 = vmatprep.subr.mxu1 %v2654_v21  ;;  %v2598_v21 = vld [vmem:[#allocation18 + $0x1a8] sm:$0xff] }
 0x8a9   : > { %2936 = vmatpush2.msra.mxu1 %v2653_v22  ;;  %v2597_v22 = vld [vmem:[#allocation18 + $0x1a0] sm:$0xff] }
 0x936   : > { %v7953_v34 = vpop.f32.mrf.mxu1 }
 0x938   : > { %v7954_v24 = vpop.f32.mrf.mxu1 }
 0x939   : > { %v7955_v25 = vadd.f32 %v7954_v24, %v7953_v34  ;;  %v2596_v34 = vld [vmem:[#allocation18 + $0x198] sm:$0xff]  ;;  %v2594_v24 = vld [vmem:[#allocation18 + $0x188] sm:$0xff] }
 0x93b   : > { %v2156_v30 = vadd.f32 %v7955_v25, %v7401_v37  ;;  %v2595_v37 = vld [vmem:[#allocation18 + $0x190] sm:$0xff]  ;;  %v2593_v25 = vld [vmem:[#allocation18 + $0x180] sm:$0xff] }
 0x93d   : > { %vm2159_vm8 = vcmp.gt.f32.partialorder %v2156_v30, 0.0  ;;  %v2160_v32 = vmul.f32 0.1, %v2156_v30 }
 0x93f   : > { %v2161_v35 = vsel %vm2159_vm8, %v2156_v30, %v2160_v32  ;;  %v2592_v30 = vld [vmem:[#allocation18 + $0x178] sm:$0xff]  ;;  %v2590_v32 = vld [vmem:[#allocation18 + $0x168] sm:$0xff] }
 0x940   : > { %7404 = vmatmul.mubr.msk.f32.vlgmr.msra.gmra.mxu0 %vm2216_vm9, %v2161_v35 }
 0x941   : > { %7406 = vmatpush1.msk.msra.mxu0 %vm2220_vm7, %v9042_v23  ;;  %2372 = vmatprep.mubr.f32.mxu0 %v8980_v47  ;;  %v2575_v23 = vld [vmem:[#allocation18 + $0xf0] sm:$0xff] }
 0x942   : > { %7408 = vmatprep.subr.msk.mxu0 %vm2220_vm7, %v2214_v33  ;;  %v2589_v33 = vld [vmem:[#allocation18 + $0x160] sm:$0xff] }
 0x944   : > { %7407 = vmatmul.mubr.msk.f32.vlgmr.msra.gmra.mxu0 %vm2216_vm9, %v2161_v35 }
 0x945   : > { %7409 = vmatpush1.msk.msra.mxu0 %vm2220_vm7, %v2164_v31  ;;  %2443 = vmatprep.mubr.f32.mxu0 %v8980_v47  ;;  %v2591_v31 = vld [vmem:[#allocation18 + $0x170] sm:$0xff] }
 0x946   : > { %7411 = vmatprep.subr.msk.mxu0 %vm2220_vm7, %v2215_v38  ;;  %v2586_v38 = vld [vmem:[#allocation18 + $0x148] sm:$0xff] }
 0x948   : > { %7410 = vmatmul.mubr.msk.f32.vlgmr.msra.gmra.mxu0 %vm2216_vm9, %v2161_v35 }
 0x949   : > { %7412 = vmatpush1.msk.msra.mxu0 %vm2220_vm7, %v2165_v36  ;;  %2514 = vmatprep.mubr.f32.mxu0 %v8980_v47  ;;  %v2566_v47 = vld [vmem:[#allocation18 + $0xa8] sm:$0xff]  ;;  %v2587_v36 = vld [vmem:[#allocation18 + $0x150] sm:$0xff] }
 0x94a   : > { %2814 = vmatprep.subr.mxu0 %v2576_v39  ;;  %v2652_v39 = vld [vmem:[#allocation18 + $0x358] sm:$0xff] }
 0x94b   : > { %2937 = vmatprep.subr.mxu1 %v2652_v39  ;;  %v2699_v39 = vld [vmem:[#allocation18 + $0x4d0] sm:$0xff] }
 0x94c   : > { %7413 = vmatmul.mubr.msk.f32.vlgmr.msra.gmra.mxu0 %vm2216_vm9, %v2161_v35  ;;  %v2588_v35 = vld [vmem:[#allocation18 + $0x158] sm:$0xff] }
 0x94d   : > { %2815 = vmatpush1.msra.mxu0 %v2575_v23  ;;  %v2585_v23 = vld [vmem:[#allocation18 + $0x140] sm:$0xff] }
 0x94e   : > { %2816 = vmatprep.subr.mxu0 %v2574_v40  ;;  %v2651_v40 = vld [vmem:[#allocation18 + $0x350] sm:$0xff] }
 0x94f   : > { %2817 = vmatpush1.msra.mxu0 %v2573_v41  ;;  %v2584_v41 = vld [vmem:[#allocation18 + $0x138] sm:$0xff]  ;;  %2938 = vmatpush2.msra.mxu1 %v2651_v40 }
 0x950   : > { %2818 = vmatprep.subr.mxu0 %v2572_v42  ;;  %v2650_v42 = vld [vmem:[#allocation18 + $0x348] sm:$0xff] }
 0x951   : > { %2819 = vmatpush1.msra.mxu0 %v2571_v43  ;;  %v2583_v43 = vld [vmem:[#allocation18 + $0x130] sm:$0xff]  ;;  %2939 = vmatprep.subr.mxu1 %v2650_v42 }
 0x952   : > { %2820 = vmatprep.subr.mxu0 %v2570_v44  ;;  %v2649_v44 = vld [vmem:[#allocation18 + $0x340] sm:$0xff] }
 0x953   : > { %2821 = vmatpush1.msra.mxu0 %v2569_v1  ;;  %v2582_v1 = vld [vmem:[#allocation18 + $0x128] sm:$0xff]  ;;  %2940 = vmatpush2.msra.mxu1 %v2649_v44 }
 0x954   : > { %2822 = vmatprep.subr.mxu0 %v2568_v45  ;;  %v2648_v45 = vld [vmem:[#allocation18 + $0x338] sm:$0xff]  ;;  %v2766_v44 = vld [vmem:[#allocation18 + $0x6e8] sm:$0xff] }
 0x955   : > { %2823 = vmatpush1.msra.mxu0 %v2567_v46  ;;  %v2581_v46 = vld [vmem:[#allocation18 + $0x120] sm:$0xff]  ;;  %2941 = vmatprep.subr.mxu1 %v2648_v45 }
 0x956   : > { %2824 = vmatprep.subr.mxu0 %v2566_v47  ;;  %v2647_v47 = vld [vmem:[#allocation18 + $0x330] sm:$0xff]  ;;  %v2697_v45 = vld [vmem:[#allocation18 + $0x4c0] sm:$0xff] }
 0x957   : > { %2825 = vmatpush1.msra.mxu0 %v2565_v4  ;;  %v2580_v4 = vld [vmem:[#allocation18 + $0x118] sm:$0xff]  ;;  %2942 = vmatpush2.msra.mxu1 %v2647_v47 }
 0x958   : > { %2826 = vmatprep.subr.mxu0 %v2564_v48  ;;  %v2646_v48 = vld [vmem:[#allocation18 + $0x328] sm:$0xff] }
 0x959   : > { %2827 = vmatpush1.msra.mxu0 %v2563_v49  ;;  %v2579_v49 = vld [vmem:[#allocation18 + $0x110] sm:$0xff]  ;;  %2943 = vmatprep.subr.mxu1 %v2646_v48 }
 0x95a   : > { %2828 = vmatprep.subr.mxu0 %v2562_v50  ;;  %v2645_v50 = vld [vmem:[#allocation18 + $0x320] sm:$0xff] }
 0x95b   : > { %2829 = vmatpush1.msra.mxu0 %v2561_v51  ;;  %v2578_v51 = vld [vmem:[#allocation18 + $0x108] sm:$0xff]  ;;  %2944 = vmatpush2.msra.mxu1 %v2645_v50  ;;  %v2764_v50 = vld [vmem:[#allocation18 + $0x6d8] sm:$0xff] }
 0x95c   : > { %2830 = vmatprep.subr.mxu0 %v2560_v52  ;;  %v2644_v52 = vld [vmem:[#allocation18 + $0x318] sm:$0xff] }
 0x95d   : > { %2831 = vmatpush1.msra.mxu0 %v2559_v53  ;;  %v2577_v53 = vld [vmem:[#allocation18 + $0x100] sm:$0xff]  ;;  %2945 = vmatprep.subr.mxu1 %v2644_v52  ;;  %v2763_v52 = vld [vmem:[#allocation18 + $0x6d0] sm:$0xff] }
 0x95e   : > { %2832 = vmatprep.subr.mxu0 %v2558_v54  ;;  %v2643_v54 = vld [vmem:[#allocation18 + $0x310] sm:$0xff] }
 0x95f   : > { %2833 = vmatpush1.msra.mxu0 %v2557_v55  ;;  %v2704_v55 = vld [vmem:[#allocation18 + $0x4f8] sm:$0xff]  ;;  %2946 = vmatpush2.msra.mxu1 %v2643_v54 }
 0x960   : > { %2834 = vmatprep.subr.mxu0 %v2556_v56  ;;  %v2642_v56 = vld [vmem:[#allocation18 + $0x308] sm:$0xff] }
 0x961   : > { %2835 = vmatpush1.msra.mxu0 %v2555_v57  ;;  %2947 = vmatprep.subr.mxu1 %v2642_v56  ;;  %v2641_v57 = vld [vmem:[#allocation18 + $0x300] sm:$0xff] }
 0x962   : > { %2836 = vmatprep.subr.mxu0 %v2554_v58  ;;  %2948 = vmatpush2.msra.mxu1 %v2641_v57  ;;  %v2768_v58 = vld [vmem:[#allocation18 + $0x6f8] sm:$0xff]  ;;  %v2693_v56 = vld [vmem:[#allocation18 + $0x4a0] sm:$0xff] }
 0x963   : > { %2837 = vmatpush1.msra.mxu0 %v2553_v59  ;;  %3027 = vmatprep.subr.mxu1 %v2768_v58  ;;  %v9062_v59 = vld [vmem:[#allocation17] sm:$0xff]  ;;  %v2761_v57 = vld [vmem:[#allocation18 + $0x6c0] sm:$0xff] }
 0x964   : > { %2838 = vmatprep.subr.mxu0 %v2552_v60  ;;  %v2171_v60 = vrot.slane %v9062_v59, %v8866_v16  ;;  %v2692_v58 = vld [vmem:[#allocation18 + $0x498] sm:$0xff] }
 0x965   : > { %2839 = vmatpush1.msra.mxu0 %v2551_v61  ;;  %v2178_v61 = vsub.s32 2, %v8863_v15 }
 0x966   : > { %2840 = vmatprep.subr.mxu0 %v2550_v62  ;;  %v2175_v62 = vrot.slane %v9062_v59, %v8869_v18 }
 0x967   : > { %2841 = vmatpush1.msra.mxu0 %v2549_v63  ;;  %v2182_v63 = vsub.s32 3, %v8863_v15 }
 0x968   : > { %2842 = vmatprep.subr.mxu0 %v2548_v0 }
 0x969   : > { %2843 = vmatpush1.msra.mxu0 %v2547_v2 }
 0x96a   : > { %2844 = vmatprep.subr.mxu0 %v2546_v3  ;;  %v2179_v3 = vrot.slane %v9062_v59, %v2178_v61 }
 0x96b   : > { %2845 = vmatpush1.msra.mxu0 %v2545_v5 }
 0x96c   : > { %2846 = vmatprep.subr.mxu0 %v2608_v6 }
 0x96d   : > { %2847 = vmatpush2.msra.mxu0 %v2607_v7  ;;  %v2183_v7 = vrot.slane %v9062_v59, %v2182_v63  ;;  %v2759_v63 = vld [vmem:[#allocation18 + $0x6b0] sm:$0xff] }
 0x96e   : > { %2848 = vmatprep.subr.mxu0 %v2606_v8  ;;  %v2190_v8 = vsub.s32 5, %v8863_v15 }
 0x96f   : > { %2849 = vmatpush2.msra.mxu0 %v2605_v10 }
 0x970   : > { %2850 = vmatprep.subr.mxu0 %v2604_v11 }
 0x971   : > { %2851 = vmatpush2.msra.mxu0 %v2603_v13 }
 0x972   : > { %2852 = vmatprep.subr.mxu0 %v2602_v14 }
 0x973   : > { %2853 = vmatpush2.msra.mxu0 %v2601_v17 }
 0x974   : > { %2854 = vmatprep.subr.mxu0 %v2600_v19 }
 0x975   : > { %2855 = vmatpush2.msra.mxu0 %v2599_v20 }
 0x976   : > { %2856 = vmatprep.subr.mxu0 %v2598_v21  ;;  %v2703_v21 = vld [vmem:[#allocation18 + $0x4f0] sm:$0xff] }
 0x977   : > { %2857 = vmatpush2.msra.mxu0 %v2597_v22  ;;  %v2191_v22 = vrot.slane %v9062_v59, %v2190_v8  ;;  %v2687_v8 = vld [vmem:[#allocation18 + $0x470] sm:$0xff] }
 0x978   : > { %2858 = vmatprep.subr.mxu0 %v2596_v34  ;;  %v2198_v34 = vsub.s32 7, %v8863_v15 }
 0x979   : > { %2859 = vmatpush2.msra.mxu0 %v2595_v37 }
 0x97a   : > { %2860 = vmatprep.subr.mxu0 %v2594_v24  ;;  %v2199_v40 = vrot.slane %v9062_v59, %v2198_v34  ;;  %v2682_v34 = vld [vmem:[#allocation18 + $0x448] sm:$0xff] }
 0x97b   : > { %2861 = vmatpush2.msra.mxu0 %v2593_v25 }
 0x97c   : > { %2862 = vmatprep.subr.mxu0 %v2592_v30  ;;  %v2702_v30 = vld [vmem:[#allocation18 + $0x4e8] sm:$0xff] }
 0x97d   : > { %2863 = vmatpush2.msra.mxu0 %v2591_v31 }
 0x97e   : > { %2864 = vmatprep.subr.mxu0 %v2590_v32  ;;  %v2701_v32 = vld [vmem:[#allocation18 + $0x4e0] sm:$0xff] }
 0x97f   : > { %2865 = vmatpush2.msra.mxu0 %v2589_v33 }
 0x980   : > { %2866 = vmatprep.subr.mxu0 %v2588_v35  ;;  %v2700_v35 = vld [vmem:[#allocation18 + $0x4d8] sm:$0xff] }
 0x981   : > { %2867 = vmatpush2.msra.mxu0 %v2587_v36 }
 0x982   : > { %2868 = vmatprep.subr.mxu0 %v2586_v38 }
 0x983   : > { %2869 = vmatpush2.msra.mxu0 %v2585_v23  ;;  %v2767_v23 = vld [vmem:[#allocation18 + $0x6f0] sm:$0xff] }
 0x984   : > { %2870 = vmatprep.subr.mxu0 %v2584_v41 }
 0x985   : > { %2871 = vmatpush2.msra.mxu0 %v2583_v43  ;;  %v2698_v43 = vld [vmem:[#allocation18 + $0x4c8] sm:$0xff] }
 0x986   : > { %2872 = vmatprep.subr.mxu0 %v2582_v1 }
 0x987   : > { %2873 = vmatpush2.msra.mxu0 %v2581_v46  ;;  %v2765_v46 = vld [vmem:[#allocation18 + $0x6e0] sm:$0xff] }
 0x988   : > { %2874 = vmatprep.subr.mxu0 %v2580_v4  ;;  %v2696_v4 = vld [vmem:[#allocation18 + $0x4b8] sm:$0xff] }
 0x989   : > { %2875 = vmatpush2.msra.mxu0 %v2579_v49 }
 0x98a   : > { %2876 = vmatprep.subr.mxu0 %v2578_v51  ;;  %v2695_v51 = vld [vmem:[#allocation18 + $0x4b0] sm:$0xff] }
 0x98b   : > { %2877 = vmatpush2.msra.mxu0 %v2577_v53  ;;  %v2694_v53 = vld [vmem:[#allocation18 + $0x4a8] sm:$0xff] }
 0x98c   : > { %2956 = vmatprep.subr.mxu0 %v2704_v55  ;;  %v2762_v55 = vld [vmem:[#allocation18 + $0x6c8] sm:$0xff] }
 0xa00   : > { %v2303_v0 = vpop.f32.mrf.mxu0 }
 0xa01   : > { %v2304_v2 = vadd.f32 %v2303_v0, %v2171_v60  ;;  %v2760_v60 = vld [vmem:[#allocation18 + $0x6b8] sm:$0xff]  ;;  %v2690_v0 = vld [vmem:[#allocation18 + $0x488] sm:$0xff] }
 0xa02   : > { %v2305_v5 = vpop.f32.mrf.mxu0 }
 0xa03   : > { %v2306_v6 = vadd.f32 %v2305_v5, %v2175_v62  ;;  %v2529_v10 = vmul.f32 0.1, %v2304_v2  ;;  %vm2521_vm10 = vcmp.gt.f32.partialorder %v2304_v2, 0.0  ;;  %v2691_v62 = vld [vmem:[#allocation18 + $0x490] sm:$0xff]  ;;  %v2757_v5 = vld [vmem:[#allocation18 + $0x6a0] sm:$0xff] }
 0xa04   : > { %v2374_v11 = vpop.f32.mrf.mxu0 }
 0xa05   : > { %v2530_v13 = vmul.f32 0.1, %v2306_v6  ;;  %v2375_v14 = vadd.f32 %v2374_v11, %v2179_v3  ;;  %vm2522_vm11 = vcmp.gt.f32.partialorder %v2306_v6, 0.0  ;;  %v2537_v25 = vsel %vm2521_vm10, %v2304_v2, %v2529_v10  ;;  %v2758_v2 = vld [vmem:[#allocation18 + $0x6a8] sm:$0xff]  ;;  %v2689_v3 = vld [vmem:[#allocation18 + $0x480] sm:$0xff]  ;;  %v2755_v10 = vld [vmem:[#allocation18 + $0x690] sm:$0xff] }
 0xa06   : > { %v2376_v17 = vpop.f32.mrf.mxu0  ;;  %v2686_v11 = vld [vmem:[#allocation18 + $0x468] sm:$0xff] }
 0xa07   : > { %v2377_v19 = vadd.f32 %v2376_v17, %v2183_v7  ;;  %v2538_v20 = vsel %vm2522_vm11, %v2306_v6, %v2530_v13  ;;  %v2531_v37 = vmul.f32 0.1, %v2375_v14  ;;  %vm2523_vm12 = vcmp.gt.f32.partialorder %v2375_v14, 0.0  ;;  %v2688_v6 = vld [vmem:[#allocation18 + $0x478] sm:$0xff]  ;;  %v2754_v13 = vld [vmem:[#allocation18 + $0x688] sm:$0xff]  ;;  %v2753_v17 = vld [vmem:[#allocation18 + $0x680] sm:$0xff] }
 0xa08   : > { %v9075_v24 = vpop.f32.mrf.mxu0  ;;  %2878 = vmatprep.mubr.f32.mxu0 %v2538_v20  ;;  %v2756_v7 = vld [vmem:[#allocation18 + $0x698] sm:$0xff] }
 0xa09   : > { %v2532_v31 = vmul.f32 0.1, %v2377_v19  ;;  %2879 = vmatmul.mubr.f32.vlgmr.msra.gmra.mxu0 %v2537_v25  ;;  %vm2524_vm13 = vcmp.gt.f32.partialorder %v2377_v19, 0.0  ;;  %v2539_v42 = vsel %vm2523_vm12, %v2375_v14, %v2531_v37  ;;  %v2685_v14 = vld [vmem:[#allocation18 + $0x460] sm:$0xff]  ;;  %v2752_v20 = vld [vmem:[#allocation18 + $0x678] sm:$0xff]  ;;  %v2750_v37 = vld [vmem:[#allocation18 + $0x668] sm:$0xff] }
 0xa0a   : > { %2957 = vmatpush1.msra.mxu0 %v2703_v21  ;;  %v2447_v33 = vpop.f32.mrf.mxu0  ;;  %v2683_v21 = vld [vmem:[#allocation18 + $0x450] sm:$0xff]  ;;  %v2681_v25 = vld [vmem:[#allocation18 + $0x440] sm:$0xff] }
 0xa0b   : > { %v2448_v36 = vadd.f32 %v2447_v33, %v2191_v22  ;;  %2958 = vmatprep.subr.mxu0 %v2702_v30  ;;  %v2540_v38 = vsel %vm2524_vm13, %v2377_v19, %v2532_v31  ;;  %v2684_v19 = vld [vmem:[#allocation18 + $0x458] sm:$0xff]  ;;  %v2751_v22 = vld [vmem:[#allocation18 + $0x670] sm:$0xff]  ;;  %v2749_v30 = vld [vmem:[#allocation18 + $0x660] sm:$0xff] }
 0xa0c   : > { %2959 = vmatpush1.msra.mxu0 %v2701_v32  ;;  %v9078_v41 = vpop.f32.mrf.mxu0  ;;  %2949 = vmatprep.mubr.f32.mxu1 %v2540_v38  ;;  %v2680_v31 = vld [vmem:[#allocation18 + $0x438] sm:$0xff]  ;;  %v2679_v33 = vld [vmem:[#allocation18 + $0x430] sm:$0xff]  ;;  %v2746_v38 = vld [vmem:[#allocation18 + $0x648] sm:$0xff] }
 0xa0d   : > { %v2534_v1 = vmul.f32 0.1, %v2448_v36  ;;  %2960 = vmatprep.subr.mxu0 %v2700_v35  ;;  %2950 = vmatmul.mubr.f32.vlgmr.msra.gmra.mxu1 %v2539_v42  ;;  %vm2526_vm14 = vcmp.gt.f32.partialorder %v2448_v36, 0.0  ;;  %v2748_v32 = vld [vmem:[#allocation18 + $0x658] sm:$0xff]  ;;  %v2747_v35 = vld [vmem:[#allocation18 + $0x650] sm:$0xff] }
 0xa0e   : > { %2961 = vmatpush1.msra.mxu0 %v2699_v39  ;;  %3028 = vmatpush1.msra.mxu1 %v2767_v23  ;;  %v2518_v47 = vpop.f32.mrf.mxu0  ;;  %v2677_v39 = vld [vmem:[#allocation18 + $0x420] sm:$0xff]  ;;  %v2744_v42 = vld [vmem:[#allocation18 + $0x638] sm:$0xff] }
 0xa0f   : > { %v2519_v48 = vadd.f32 %v2518_v47, %v2199_v40  ;;  %2962 = vmatprep.subr.mxu0 %v2698_v43  ;;  %3029 = vmatprep.subr.mxu1 %v2766_v44  ;;  %v2542_v49 = vsel %vm2526_vm14, %v2448_v36, %v2534_v1  ;;  %v2678_v36 = vld [vmem:[#allocation18 + $0x428] sm:$0xff]  ;;  %v2745_v23 = vld [vmem:[#allocation18 + $0x640] sm:$0xff]  ;;  %v2676_v40 = vld [vmem:[#allocation18 + $0x418] sm:$0xff] }
 0xa10   : > { %2963 = vmatpush1.msra.mxu0 %v2697_v45  ;;  %3030 = vmatpush1.msra.mxu1 %v2765_v46  ;;  %v2675_v43 = vld [vmem:[#allocation18 + $0x410] sm:$0xff]  ;;  %v2674_v1 = vld [vmem:[#allocation18 + $0x408] sm:$0xff]  ;;  %v2673_v46 = vld [vmem:[#allocation18 + $0x400] sm:$0xff] }
 0xa11   : > { %v2536_v54 = vmul.f32 0.1, %v2519_v48  ;;  %2964 = vmatprep.subr.mxu0 %v2696_v4  ;;  %3020 = vmatprep.mubr.f32.mxu0 %v2542_v49  ;;  %vm2528_vm15 = vcmp.gt.f32.partialorder %v2519_v48, 0.0  ;;  %v2743_v44 = vld [vmem:[#allocation18 + $0x630] sm:$0xff]  ;;  %v2742_v45 = vld [vmem:[#allocation18 + $0x628] sm:$0xff]  ;;  %v2741_v47 = vld [vmem:[#allocation18 + $0x620] sm:$0xff] }
 0xa12   : > { %3031 = vmatprep.subr.mxu1 %v2764_v50  ;;  %2965 = vmatpush1.msra.mxu0 %v2695_v51  ;;  %v2736_v4 = vld [vmem:[#allocation18 + $0x5f8] sm:$0xff]  ;;  %v2735_v49 = vld [vmem:[#allocation18 + $0x5f0] sm:$0xff]  ;;  %v2734_v51 = vld [vmem:[#allocation18 + $0x5e8] sm:$0xff] }
 0xa13   : > { %3032 = vmatpush1.msra.mxu1 %v2763_v52  ;;  %2966 = vmatprep.subr.mxu0 %v2694_v53  ;;  %v2544_v61 = vsel %vm2528_vm15, %v2519_v48, %v2536_v54  ;;  %v2740_v48 = vld [vmem:[#allocation18 + $0x618] sm:$0xff]  ;;  %v2739_v50 = vld [vmem:[#allocation18 + $0x610] sm:$0xff]  ;;  %v2738_v52 = vld [vmem:[#allocation18 + $0x608] sm:$0xff] }
 0xa14   : > { %3033 = vmatprep.subr.mxu1 %v2762_v55  ;;  %2967 = vmatpush1.msra.mxu0 %v2693_v56  ;;  %v2733_v53 = vld [vmem:[#allocation18 + $0x5e0] sm:$0xff]  ;;  %v2732_v55 = vld [vmem:[#allocation18 + $0x5d8] sm:$0xff] }
 0xa15   : > { %3034 = vmatpush1.msra.mxu1 %v2761_v57  ;;  %2968 = vmatprep.subr.mxu0 %v2692_v58  ;;  %v2737_v54 = vld [vmem:[#allocation18 + $0x600] sm:$0xff]  ;;  %v2800_v56 = vld [vmem:[#allocation18 + $0x7f8] sm:$0xff]  ;;  %v2731_v57 = vld [vmem:[#allocation18 + $0x5d0] sm:$0xff] }
 0xa16   : > { %3035 = vmatprep.subr.mxu1 %v2760_v60  ;;  %3091 = vmatprep.mubr.f32.mxu1 %v2544_v61  ;;  %v2799_v58 = vld [vmem:[#allocation18 + $0x7f0] sm:$0xff]  ;;  %v2730_v60 = vld [vmem:[#allocation18 + $0x5c8] sm:$0xff] }
 0xa17   : > { %2969 = vmatpush1.msra.mxu0 %v2691_v62  ;;  %3036 = vmatpush1.msra.mxu1 %v2759_v63  ;;  %v2798_v61 = vld [vmem:[#allocation18 + $0x7e8] sm:$0xff]  ;;  %v2729_v62 = vld [vmem:[#allocation18 + $0x5c0] sm:$0xff] }
 0xa18   : > { %2970 = vmatprep.subr.mxu0 %v2690_v0  ;;  %3037 = vmatprep.subr.mxu1 %v2758_v2  ;;  %v2797_v63 = vld [vmem:[#allocation18 + $0x7e0] sm:$0xff]  ;;  %v2728_v0 = vld [vmem:[#allocation18 + $0x5b8] sm:$0xff] }
 0xa19   : > { %2971 = vmatpush1.msra.mxu0 %v2689_v3  ;;  %3038 = vmatpush1.msra.mxu1 %v2757_v5  ;;  %v2796_v2 = vld [vmem:[#allocation18 + $0x7d8] sm:$0xff]  ;;  %v2727_v3 = vld [vmem:[#allocation18 + $0x5b0] sm:$0xff] }
 0xa1a   : > { %2972 = vmatprep.subr.mxu0 %v2688_v6  ;;  %3039 = vmatprep.subr.mxu1 %v2756_v7  ;;  %v2795_v5 = vld [vmem:[#allocation18 + $0x7d0] sm:$0xff]  ;;  %v2726_v6 = vld [vmem:[#allocation18 + $0x5a8] sm:$0xff] }
 0xa1b   : > { %2973 = vmatpush1.msra.mxu0 %v2687_v8  ;;  %3040 = vmatpush1.msra.mxu1 %v2755_v10  ;;  %v2794_v7 = vld [vmem:[#allocation18 + $0x7c8] sm:$0xff]  ;;  %v2725_v8 = vld [vmem:[#allocation18 + $0x5a0] sm:$0xff] }
 0xa1c   : > { %2974 = vmatprep.subr.mxu0 %v2686_v11  ;;  %3041 = vmatprep.subr.mxu1 %v2754_v13  ;;  %v2793_v10 = vld [vmem:[#allocation18 + $0x7c0] sm:$0xff]  ;;  %v2724_v11 = vld [vmem:[#allocation18 + $0x598] sm:$0xff] }
 0xa1d   : > { %2975 = vmatpush1.msra.mxu0 %v2685_v14  ;;  %3042 = vmatpush1.msra.mxu1 %v2753_v17  ;;  %v2792_v13 = vld [vmem:[#allocation18 + $0x7b8] sm:$0xff]  ;;  %v2723_v14 = vld [vmem:[#allocation18 + $0x590] sm:$0xff] }
 0xa1e   : > { %2976 = vmatprep.subr.mxu0 %v2684_v19  ;;  %3043 = vmatprep.subr.mxu1 %v2752_v20  ;;  %v2791_v17 = vld [vmem:[#allocation18 + $0x7b0] sm:$0xff]  ;;  %v2722_v19 = vld [vmem:[#allocation18 + $0x588] sm:$0xff] }
 0xa1f   : > { %2977 = vmatpush1.msra.mxu0 %v2683_v21  ;;  %3044 = vmatpush1.msra.mxu1 %v2751_v22  ;;  %v2790_v20 = vld [vmem:[#allocation18 + $0x7a8] sm:$0xff]  ;;  %v2721_v21 = vld [vmem:[#allocation18 + $0x580] sm:$0xff] }
 0xa20   : > { %2978 = vmatprep.subr.mxu0 %v2682_v34  ;;  %3045 = vmatprep.subr.mxu1 %v2750_v37  ;;  %v2789_v22 = vld [vmem:[#allocation18 + $0x7a0] sm:$0xff]  ;;  %v2720_v34 = vld [vmem:[#allocation18 + $0x578] sm:$0xff] }
 0xa21   : > { %2979 = vmatpush1.msra.mxu0 %v2681_v25  ;;  %3046 = vmatpush1.msra.mxu1 %v2749_v30  ;;  %v2788_v37 = vld [vmem:[#allocation18 + $0x798] sm:$0xff]  ;;  %v2719_v25 = vld [vmem:[#allocation18 + $0x570] sm:$0xff] }
 0xa22   : > { %2980 = vmatprep.subr.mxu0 %v2680_v31  ;;  %3047 = vmatprep.subr.mxu1 %v2748_v32  ;;  %v2787_v30 = vld [vmem:[#allocation18 + $0x790] sm:$0xff]  ;;  %v2186_v31 = vsub.s32 4, %v8863_v15  ;;  %v2718_v32 = vld [vmem:[#allocation18 + $0x568] sm:$0xff] }
 0xa23   : > { %2981 = vmatpush1.msra.mxu0 %v2679_v33  ;;  %3048 = vmatpush1.msra.mxu1 %v2747_v35  ;;  %v2786_v33 = vld [vmem:[#allocation18 + $0x788] sm:$0xff]  ;;  %v2717_v35 = vld [vmem:[#allocation18 + $0x560] sm:$0xff] }
 0xa24   : > { %2982 = vmatprep.subr.mxu0 %v2678_v36  ;;  %3049 = vmatprep.subr.mxu1 %v2746_v38  ;;  %v2785_v36 = vld [vmem:[#allocation18 + $0x780] sm:$0xff]  ;;  %v2716_v38 = vld [vmem:[#allocation18 + $0x558] sm:$0xff] }
 0xa25   : > { %2983 = vmatpush1.msra.mxu0 %v2677_v39  ;;  %3050 = vmatpush1.msra.mxu1 %v2745_v23  ;;  %v2784_v39 = vld [vmem:[#allocation18 + $0x778] sm:$0xff]  ;;  %v2715_v23 = vld [vmem:[#allocation18 + $0x550] sm:$0xff] }
 0xa26   : > { %2984 = vmatprep.subr.mxu0 %v2676_v40  ;;  %3051 = vmatprep.subr.mxu1 %v2744_v42  ;;  %v2783_v40 = vld [vmem:[#allocation18 + $0x770] sm:$0xff]  ;;  %v2187_v42 = vrot.slane %v9062_v59, %v2186_v31  ;;  %v3128_v31 = vld [vmem:[#allocation11 + $0x1088] sm:$0xff] }
 0xa27   : > { %2985 = vmatpush1.msra.mxu0 %v2675_v43  ;;  %3052 = vmatpush1.msra.mxu1 %v2743_v44  ;;  %v2194_v43 = vsub.s32 6, %v8863_v15  ;;  %v2714_v44 = vld [vmem:[#allocation18 + $0x548] sm:$0xff] }
 0xa28   : > { %2986 = vmatprep.subr.mxu0 %v2674_v1  ;;  %3053 = vmatprep.subr.mxu1 %v2742_v45  ;;  %v2782_v1 = vld [vmem:[#allocation18 + $0x768] sm:$0xff]  ;;  %v2713_v45 = vld [vmem:[#allocation18 + $0x540] sm:$0xff] }
 0xa29   : > { %2987 = vmatpush1.msra.mxu0 %v2673_v46  ;;  %3054 = vmatpush1.msra.mxu1 %v2741_v47  ;;  %v2781_v46 = vld [vmem:[#allocation18 + $0x760] sm:$0xff]  ;;  %v2712_v47 = vld [vmem:[#allocation18 + $0x538] sm:$0xff]  ;;  %v2195_v15 = vrot.slane %v9062_v59, %v2194_v43  ;;  %v2706_v59 = vld [vmem:[#allocation18 + $0x508] sm:$0xff] }
 0xa2a   : > { %2988 = vmatprep.subr.mxu0 %v2736_v4  ;;  %3055 = vmatprep.subr.mxu1 %v2740_v48  ;;  %v2780_v4 = vld [vmem:[#allocation18 + $0x758] sm:$0xff]  ;;  %v2711_v48 = vld [vmem:[#allocation18 + $0x530] sm:$0xff]  ;;  %v3118_v43 = vld [vmem:[#allocation11 + $0x1038] sm:$0xff] }
 0xa2b   : > { %2989 = vmatpush2.msra.mxu0 %v2735_v49  ;;  %3056 = vmatpush1.msra.mxu1 %v2739_v50  ;;  %v2779_v49 = vld [vmem:[#allocation18 + $0x750] sm:$0xff]  ;;  %v2446_v50 = vadd.f32 %v9075_v24, %v2187_v42  ;;  %v2517_v24 = vadd.f32 %v9078_v41, %v2195_v15  ;;  %v2770_v41 = vld [vmem:[#allocation18 + $0x708] sm:$0xff]  ;;  %v3172_v15 = vld [vmem:[#allocation11 + $0x11e8] sm:$0xff] }
 0xa2c   : > { %2990 = vmatprep.subr.mxu0 %v2734_v51  ;;  %3057 = vmatprep.subr.mxu1 %v2738_v52  ;;  %v2710_v51 = vld [vmem:[#allocation18 + $0x528] sm:$0xff]  ;;  %v3119_v42 = vld [vmem:[#allocation11 + $0x1040] sm:$0xff] }
 0xa2d   : > { %2991 = vmatpush2.msra.mxu0 %v2733_v53  ;;  %3058 = vmatpush1.msra.mxu1 %v2737_v54  ;;  %v2778_v52 = vld [vmem:[#allocation18 + $0x748] sm:$0xff]  ;;  %v2709_v53 = vld [vmem:[#allocation18 + $0x520] sm:$0xff]  ;;  %vm2525_vm1 = vcmp.gt.f32.partialorder %v2446_v50, 0.0  ;;  %vm2527_vm2 = vcmp.gt.f32.partialorder %v2517_v24, 0.0 }
 0xa2e   : > { %2992 = vmatprep.subr.mxu0 %v2732_v55  ;;  %3059 = vmatprep.subr.mxu1 %v2800_v56  ;;  %v2777_v54 = vld [vmem:[#allocation18 + $0x740] sm:$0xff]  ;;  %v2708_v55 = vld [vmem:[#allocation18 + $0x518] sm:$0xff] }
 0xa2f   : > { %2993 = vmatpush2.msra.mxu0 %v2731_v57  ;;  %3060 = vmatpush2.msra.mxu1 %v2799_v58  ;;  %v2776_v56 = vld [vmem:[#allocation18 + $0x738] sm:$0xff]  ;;  %v2707_v57 = vld [vmem:[#allocation18 + $0x510] sm:$0xff] }
 0xa30   : > { %2994 = vmatprep.subr.mxu0 %v2730_v60  ;;  %3061 = vmatprep.subr.mxu1 %v2798_v61  ;;  %v2775_v58 = vld [vmem:[#allocation18 + $0x730] sm:$0xff]  ;;  %v2533_v60 = vmul.f32 0.1, %v2446_v50  ;;  %v2774_v61 = vld [vmem:[#allocation18 + $0x728] sm:$0xff] }
 0xa31   : > { %2995 = vmatpush2.msra.mxu0 %v2729_v62  ;;  %3062 = vmatpush2.msra.mxu1 %v2797_v63  ;;  %v2705_v62 = vld [vmem:[#allocation18 + $0x500] sm:$0xff] }
 0xa32   : > { %2996 = vmatprep.subr.mxu0 %v2728_v0  ;;  %3063 = vmatprep.subr.mxu1 %v2796_v2  ;;  %v2773_v63 = vld [vmem:[#allocation18 + $0x720] sm:$0xff]  ;;  %v2772_v0 = vld [vmem:[#allocation18 + $0x718] sm:$0xff]  ;;  %v2771_v2 = vld [vmem:[#allocation18 + $0x710] sm:$0xff] }
 0xa33   : > { %2997 = vmatpush2.msra.mxu0 %v2727_v3  ;;  %3064 = vmatpush2.msra.mxu1 %v2795_v5  ;;  %v2535_v3 = vmul.f32 0.1, %v2517_v24  ;;  %v2541_v5 = vsel %vm2525_vm1, %v2446_v50, %v2533_v60  ;;  %v3173_v50 = vld [vmem:[#allocation11 + $0x11f0] sm:$0xff]  ;;  %v3163_v60 = vld [vmem:[#allocation11 + $0x11a0] sm:$0xff] }
 0xa34   : > { %2998 = vmatprep.subr.mxu0 %v2726_v6  ;;  %3065 = vmatprep.subr.mxu1 %v2794_v7  ;;  %v2769_v6 = vld [vmem:[#allocation18 + $0x700] sm:$0xff] }
 0xa35   : > { %2999 = vmatpush2.msra.mxu0 %v2725_v8  ;;  %3066 = vmatpush2.msra.mxu1 %v2793_v10  ;;  %v2543_v7 = vsel %vm2527_vm2, %v2517_v24, %v2535_v3  ;;  %v3142_v8 = vld [vmem:[#allocation11 + $0x10f8] sm:$0xff]  ;;  %v3141_v10 = vld [vmem:[#allocation11 + $0x10f0] sm:$0xff]  ;;  %v3155_v3 = vld [vmem:[#allocation11 + $0x1160] sm:$0xff] }
 0xa36   : > { %3000 = vmatprep.subr.mxu0 %v2724_v11  ;;  %3067 = vmatprep.subr.mxu1 %v2792_v13  ;;  %v3140_v11 = vld [vmem:[#allocation11 + $0x10e8] sm:$0xff]  ;;  %v3139_v13 = vld [vmem:[#allocation11 + $0x10e0] sm:$0xff]  ;;  %v3162_v24 = vld [vmem:[#allocation11 + $0x1198] sm:$0xff] }
 0xa37   : > { %3001 = vmatpush2.msra.mxu0 %v2723_v14  ;;  %3068 = vmatpush2.msra.mxu1 %v2791_v17  ;;  %v3138_v14 = vld [vmem:[#allocation11 + $0x10d8] sm:$0xff]  ;;  %v3137_v17 = vld [vmem:[#allocation11 + $0x10d0] sm:$0xff] }
 0xa38   : > { %3002 = vmatprep.subr.mxu0 %v2722_v19  ;;  %3069 = vmatprep.subr.mxu1 %v2790_v20  ;;  %v3136_v19 = vld [vmem:[#allocation11 + $0x10c8] sm:$0xff]  ;;  %v3135_v20 = vld [vmem:[#allocation11 + $0x10c0] sm:$0xff] }
 0xa39   : > { %3003 = vmatpush2.msra.mxu0 %v2721_v21  ;;  %3070 = vmatpush2.msra.mxu1 %v2789_v22  ;;  %v3134_v21 = vld [vmem:[#allocation11 + $0x10b8] sm:$0xff]  ;;  %v3133_v22 = vld [vmem:[#allocation11 + $0x10b0] sm:$0xff] }
 0xa3a   : > { %3004 = vmatprep.subr.mxu0 %v2720_v34  ;;  %3071 = vmatprep.subr.mxu1 %v2788_v37  ;;  %v3132_v34 = vld [vmem:[#allocation11 + $0x10a8] sm:$0xff]  ;;  %v3131_v37 = vld [vmem:[#allocation11 + $0x10a0] sm:$0xff] }
 0xa3b   : > { %3005 = vmatpush2.msra.mxu0 %v2719_v25  ;;  %3072 = vmatpush2.msra.mxu1 %v2787_v30  ;;  %v3130_v25 = vld [vmem:[#allocation11 + $0x1098] sm:$0xff]  ;;  %v3129_v30 = vld [vmem:[#allocation11 + $0x1090] sm:$0xff] }
 0xa3c   : > { %3006 = vmatprep.subr.mxu0 %v2718_v32  ;;  %3073 = vmatprep.subr.mxu1 %v2786_v33  ;;  %v3127_v32 = vld [vmem:[#allocation11 + $0x1080] sm:$0xff]  ;;  %v3126_v33 = vld [vmem:[#allocation11 + $0x1078] sm:$0xff] }
 0xa3d   : > { %3007 = vmatpush2.msra.mxu0 %v2717_v35  ;;  %3074 = vmatpush2.msra.mxu1 %v2785_v36  ;;  %v3125_v35 = vld [vmem:[#allocation11 + $0x1070] sm:$0xff]  ;;  %v3124_v36 = vld [vmem:[#allocation11 + $0x1068] sm:$0xff] }
 0xa3e   : > { %3008 = vmatprep.subr.mxu0 %v2716_v38  ;;  %3075 = vmatprep.subr.mxu1 %v2784_v39  ;;  %v3123_v38 = vld [vmem:[#allocation11 + $0x1060] sm:$0xff]  ;;  %v3122_v39 = vld [vmem:[#allocation11 + $0x1058] sm:$0xff] }
 0xa3f   : > { %3009 = vmatpush2.msra.mxu0 %v2715_v23  ;;  %3076 = vmatpush2.msra.mxu1 %v2783_v40  ;;  %v3121_v23 = vld [vmem:[#allocation11 + $0x1050] sm:$0xff]  ;;  %v3120_v40 = vld [vmem:[#allocation11 + $0x1048] sm:$0xff] }
 0xa40   : > { %3010 = vmatprep.subr.mxu0 %v2714_v44  ;;  %3077 = vmatprep.subr.mxu1 %v2782_v1  ;;  %v3117_v44 = vld [vmem:[#allocation11 + $0x1030] sm:$0xff]  ;;  %v3116_v1 = vld [vmem:[#allocation11 + $0x1028] sm:$0xff] }
 0xa41   : > { %3011 = vmatpush2.msra.mxu0 %v2713_v45  ;;  %3078 = vmatpush2.msra.mxu1 %v2781_v46  ;;  %v3115_v45 = vld [vmem:[#allocation11 + $0x1020] sm:$0xff]  ;;  %v3114_v46 = vld [vmem:[#allocation11 + $0x1018] sm:$0xff] }
 0xa42   : > { %3012 = vmatprep.subr.mxu0 %v2712_v47  ;;  %3079 = vmatprep.subr.mxu1 %v2780_v4  ;;  %v3113_v47 = vld [vmem:[#allocation11 + $0x1010] sm:$0xff]  ;;  %v3112_v4 = vld [vmem:[#allocation11 + $0x1008] sm:$0xff] }
 0xa43   : > { %3013 = vmatpush2.msra.mxu0 %v2711_v48  ;;  %3080 = vmatpush2.msra.mxu1 %v2779_v49  ;;  %v3111_v48 = vld [vmem:[#allocation11 + $0x1000] sm:$0xff]  ;;  %v3174_v49 = vld [vmem:[#allocation11 + $0x11f8] sm:$0xff] }
 0xa44   : > { %3014 = vmatprep.subr.mxu0 %v2710_v51  ;;  %3081 = vmatprep.subr.mxu1 %v2778_v52  ;;  %v3171_v51 = vld [vmem:[#allocation11 + $0x11e0] sm:$0xff]  ;;  %v3170_v52 = vld [vmem:[#allocation11 + $0x11d8] sm:$0xff] }
 0xa45   : > { %3015 = vmatpush2.msra.mxu0 %v2709_v53  ;;  %3082 = vmatpush2.msra.mxu1 %v2777_v54  ;;  %v3169_v53 = vld [vmem:[#allocation11 + $0x11d0] sm:$0xff]  ;;  %v3168_v54 = vld [vmem:[#allocation11 + $0x11c8] sm:$0xff] }
 0xa46   : > { %3016 = vmatprep.subr.mxu0 %v2708_v55  ;;  %3083 = vmatprep.subr.mxu1 %v2776_v56  ;;  %v3167_v55 = vld [vmem:[#allocation11 + $0x11c0] sm:$0xff]  ;;  %v3166_v56 = vld [vmem:[#allocation11 + $0x11b8] sm:$0xff] }
 0xa47   : > { %3017 = vmatpush2.msra.mxu0 %v2707_v57  ;;  %3084 = vmatpush2.msra.mxu1 %v2775_v58  ;;  %v3165_v57 = vld [vmem:[#allocation11 + $0x11b0] sm:$0xff]  ;;  %v3164_v58 = vld [vmem:[#allocation11 + $0x11a8] sm:$0xff] }
 0xa48   : > { %3018 = vmatprep.subr.mxu0 %v2706_v59  ;;  %3085 = vmatprep.subr.mxu1 %v2774_v61  ;;  %v3161_v59 = vld [vmem:[#allocation11 + $0x1190] sm:$0xff]  ;;  %v3160_v61 = vld [vmem:[#allocation11 + $0x1188] sm:$0xff] }
 0xa49   : > { %3019 = vmatpush2.msra.mxu0 %v2705_v62  ;;  %3086 = vmatpush2.msra.mxu1 %v2773_v63  ;;  %v3159_v62 = vld [vmem:[#allocation11 + $0x1180] sm:$0xff]  ;;  %v3158_v63 = vld [vmem:[#allocation11 + $0x1178] sm:$0xff] }
 0xa4a   : > { %3021 = vmatmul.mubr.f32.vlgmr.msra.gmra.mxu0 %v2541_v5  ;;  %3087 = vmatprep.subr.mxu1 %v2772_v0  ;;  %v3157_v0 = vld [vmem:[#allocation11 + $0x1170] sm:$0xff]  ;;  %v3154_v5 = vld [vmem:[#allocation11 + $0x1158] sm:$0xff] }
 0xa4b   : > { %3088 = vmatpush2.msra.mxu1 %v2771_v2  ;;  %3188 = vmatprep.subr.mxu0 %v3142_v8  ;;  %v3156_v2 = vld [vmem:[#allocation11 + $0x1168] sm:$0xff]  ;;  %v3150_v8 = vld [vmem:[#allocation11 + $0x1138] sm:$0xff] }
 0xa4c   : > { %3089 = vmatprep.subr.mxu1 %v2770_v41  ;;  %3189 = vmatpush1.msra.mxu0 %v3141_v10  ;;  %v3153_v41 = vld [vmem:[#allocation11 + $0x1150] sm:$0xff] }
 0xa4d   : > { %3090 = vmatpush2.msra.mxu1 %v2769_v6  ;;  %3190 = vmatprep.subr.mxu0 %v3140_v11  ;;  %v3152_v6 = vld [vmem:[#allocation11 + $0x1148] sm:$0xff]  ;;  %v3149_v10 = vld [vmem:[#allocation11 + $0x1130] sm:$0xff] }
 0xa4e   : > { %3092 = vmatmul.mubr.f32.vlgmr.msra.gmra.mxu1 %v2543_v7  ;;  %3191 = vmatpush1.msra.mxu0 %v3139_v13  ;;  %v3151_v7 = vld [vmem:[#allocation11 + $0x1140] sm:$0xff]  ;;  %v3148_v11 = vld [vmem:[#allocation11 + $0x1128] sm:$0xff] }
 0xa4f   : > { %3192 = vmatprep.subr.mxu0 %v3138_v14  ;;  %v3147_v13 = vld [vmem:[#allocation11 + $0x1120] sm:$0xff]  ;;  %v3146_v14 = vld [vmem:[#allocation11 + $0x1118] sm:$0xff] }
 0xa50   : > { %3193 = vmatpush1.msra.mxu0 %v3137_v17  ;;  %v3145_v17 = vld [vmem:[#allocation11 + $0x1110] sm:$0xff] }
 0xa51   : > { %3194 = vmatprep.subr.mxu0 %v3136_v19  ;;  %v3144_v19 = vld [vmem:[#allocation11 + $0x1108] sm:$0xff] }
 0xa52   : > { %3195 = vmatpush1.msra.mxu0 %v3135_v20  ;;  %v3143_v20 = vld [vmem:[#allocation11 + $0x1100] sm:$0xff] }
 0xa53   : > { %3196 = vmatprep.subr.mxu0 %v3134_v21  ;;  %v3291_v21 = vld [vmem:[#allocation11 + $0x12f8] sm:$0xff] }
 0xa54   : > { %3197 = vmatpush1.msra.mxu0 %v3133_v22  ;;  %v3290_v22 = vld [vmem:[#allocation11 + $0x12f0] sm:$0xff]  ;;  %3337 = vmatprep.subr.mxu1 %v3291_v21  ;;  %v3299_v21 = vld [vmem:[#allocation11 + $0x1338] sm:$0xff] }
 0xa55   : > { %3198 = vmatprep.subr.mxu0 %v3132_v34  ;;  %v3289_v34 = vld [vmem:[#allocation11 + $0x12e8] sm:$0xff]  ;;  %3338 = vmatpush1.msra.mxu1 %v3290_v22  ;;  %v3298_v22 = vld [vmem:[#allocation11 + $0x1330] sm:$0xff] }
 0xa56   : > { %3199 = vmatpush1.msra.mxu0 %v3131_v37  ;;  %v3288_v37 = vld [vmem:[#allocation11 + $0x12e0] sm:$0xff]  ;;  %3339 = vmatprep.subr.mxu1 %v3289_v34  ;;  %v2802_v34 = vld [vmem:[#allocation12 + $0x16] sm:$0x3] }
 0xa57   : > { %3200 = vmatprep.subr.mxu0 %v3130_v25  ;;  %v3287_v25 = vld [vmem:[#allocation11 + $0x12d8] sm:$0xff]  ;;  %3340 = vmatpush1.msra.mxu1 %v3288_v37 }
 0xa58   : > { %3201 = vmatpush1.msra.mxu0 %v3129_v30  ;;  %v3286_v30 = vld [vmem:[#allocation11 + $0x12d0] sm:$0xff]  ;;  %3341 = vmatprep.subr.mxu1 %v3287_v25  ;;  %v2807_v25 = vrot.slane %v2802_v34, %v8866_v16 }
 0xa59   : > { %3202 = vmatprep.subr.mxu0 %v3128_v31  ;;  %v3285_v31 = vld [vmem:[#allocation11 + $0x12c8] sm:$0xff]  ;;  %3342 = vmatpush1.msra.mxu1 %v3286_v30 }
 0xa5a   : > { %3203 = vmatpush1.msra.mxu0 %v3127_v32  ;;  %v3284_v32 = vld [vmem:[#allocation11 + $0x12c0] sm:$0xff]  ;;  %3343 = vmatprep.subr.mxu1 %v3285_v31  ;;  %v2811_v31 = vrot.slane %v2802_v34, %v8869_v18 }
 0xa5b   : > { %3204 = vmatprep.subr.mxu0 %v3126_v33  ;;  %v3283_v33 = vld [vmem:[#allocation11 + $0x12b8] sm:$0xff]  ;;  %3344 = vmatpush1.msra.mxu1 %v3284_v32 }
 0xa5c   : > { %3205 = vmatpush1.msra.mxu0 %v3125_v35  ;;  %v3282_v35 = vld [vmem:[#allocation11 + $0x12b0] sm:$0xff]  ;;  %3345 = vmatprep.subr.mxu1 %v3283_v33 }
 0xa5d   : > { %3206 = vmatprep.subr.mxu0 %v3124_v36  ;;  %v3281_v36 = vld [vmem:[#allocation11 + $0x12a8] sm:$0xff]  ;;  %3346 = vmatpush1.msra.mxu1 %v3282_v35 }
 0xa5e   : > { %3207 = vmatpush1.msra.mxu0 %v3123_v38  ;;  %v3280_v38 = vld [vmem:[#allocation11 + $0x12a0] sm:$0xff]  ;;  %3347 = vmatprep.subr.mxu1 %v3281_v36 }
 0xa5f   : > { %3208 = vmatprep.subr.mxu0 %v3122_v39  ;;  %v3279_v39 = vld [vmem:[#allocation11 + $0x1298] sm:$0xff]  ;;  %3348 = vmatpush1.msra.mxu1 %v3280_v38 }
 0xa60   : > { %3209 = vmatpush1.msra.mxu0 %v3121_v23  ;;  %v3278_v23 = vld [vmem:[#allocation11 + $0x1290] sm:$0xff]  ;;  %3349 = vmatprep.subr.mxu1 %v3279_v39 }
 0xa61   : > { %3210 = vmatprep.subr.mxu0 %v3120_v40  ;;  %v3277_v40 = vld [vmem:[#allocation11 + $0x1288] sm:$0xff]  ;;  %3350 = vmatpush1.msra.mxu1 %v3278_v23 }
 0xa62   : > { %3211 = vmatpush1.msra.mxu0 %v3119_v42  ;;  %v3276_v42 = vld [vmem:[#allocation11 + $0x1280] sm:$0xff]  ;;  %3351 = vmatprep.subr.mxu1 %v3277_v40 }
 0xa63   : > { %3212 = vmatprep.subr.mxu0 %v3118_v43  ;;  %v3275_v43 = vld [vmem:[#allocation11 + $0x1278] sm:$0xff]  ;;  %3352 = vmatpush1.msra.mxu1 %v3276_v42 }
 0xa64   : > { %3213 = vmatpush1.msra.mxu0 %v3117_v44  ;;  %v3274_v44 = vld [vmem:[#allocation11 + $0x1270] sm:$0xff]  ;;  %3353 = vmatprep.subr.mxu1 %v3275_v43 }
 0xa65   : > { %3214 = vmatprep.subr.mxu0 %v3116_v1  ;;  %v3273_v1 = vld [vmem:[#allocation11 + $0x1268] sm:$0xff]  ;;  %3354 = vmatpush1.msra.mxu1 %v3274_v44 }
 0xa66   : > { %3215 = vmatpush1.msra.mxu0 %v3115_v45  ;;  %v3272_v45 = vld [vmem:[#allocation11 + $0x1260] sm:$0xff]  ;;  %3355 = vmatprep.subr.mxu1 %v3273_v1 }
 0xa67   : > { %3216 = vmatprep.subr.mxu0 %v3114_v46  ;;  %v3271_v46 = vld [vmem:[#allocation11 + $0x1258] sm:$0xff]  ;;  %3356 = vmatpush1.msra.mxu1 %v3272_v45 }
 0xa68   : > { %3217 = vmatpush1.msra.mxu0 %v3113_v47  ;;  %v3270_v47 = vld [vmem:[#allocation11 + $0x1250] sm:$0xff]  ;;  %3357 = vmatprep.subr.mxu1 %v3271_v46 }
 0xa69   : > { %3218 = vmatprep.subr.mxu0 %v3112_v4  ;;  %v3269_v4 = vld [vmem:[#allocation11 + $0x1248] sm:$0xff]  ;;  %3358 = vmatpush1.msra.mxu1 %v3270_v47 }
 0xa6a   : > { %3219 = vmatpush1.msra.mxu0 %v3111_v48  ;;  %v3268_v48 = vld [vmem:[#allocation11 + $0x1240] sm:$0xff]  ;;  %3359 = vmatprep.subr.mxu1 %v3269_v4 }
 0xa6b   : > { %3220 = vmatprep.subr.mxu0 %v3174_v49  ;;  %v3267_v49 = vld [vmem:[#allocation11 + $0x1238] sm:$0xff]  ;;  %3360 = vmatpush1.msra.mxu1 %v3268_v48 }
 0xa6c   : > { %3221 = vmatpush2.msra.mxu0 %v3173_v50  ;;  %v3266_v50 = vld [vmem:[#allocation11 + $0x1230] sm:$0xff]  ;;  %3361 = vmatprep.subr.mxu1 %v3267_v49 }
 0xa6d   : > { %3222 = vmatprep.subr.mxu0 %v3172_v15  ;;  %v3265_v15 = vld [vmem:[#allocation11 + $0x1228] sm:$0xff]  ;;  %3362 = vmatpush1.msra.mxu1 %v3266_v50 }
 0xa6e   : > { %3223 = vmatpush2.msra.mxu0 %v3171_v51  ;;  %v3264_v51 = vld [vmem:[#allocation11 + $0x1220] sm:$0xff]  ;;  %3363 = vmatprep.subr.mxu1 %v3265_v15 }
 0xa6f   : > { %3224 = vmatprep.subr.mxu0 %v3170_v52  ;;  %v3263_v52 = vld [vmem:[#allocation11 + $0x1218] sm:$0xff]  ;;  %3364 = vmatpush1.msra.mxu1 %v3264_v51 }
 0xa70   : > { %3225 = vmatpush2.msra.mxu0 %v3169_v53  ;;  %v3262_v53 = vld [vmem:[#allocation11 + $0x1210] sm:$0xff]  ;;  %3365 = vmatprep.subr.mxu1 %v3263_v52 }
 0xa71   : > { %3226 = vmatprep.subr.mxu0 %v3168_v54  ;;  %v3261_v54 = vld [vmem:[#allocation11 + $0x1208] sm:$0xff]  ;;  %3366 = vmatpush1.msra.mxu1 %v3262_v53 }
 0xa72   : > { %3227 = vmatpush2.msra.mxu0 %v3167_v55  ;;  %v3260_v55 = vld [vmem:[#allocation11 + $0x1200] sm:$0xff]  ;;  %3367 = vmatprep.subr.mxu1 %v3261_v54 }
 0xa73   : > { %3228 = vmatprep.subr.mxu0 %v3166_v56  ;;  %v3323_v56 = vld [vmem:[#allocation11 + $0x13f8] sm:$0xff]  ;;  %3368 = vmatpush1.msra.mxu1 %v3260_v55  ;;  %v3297_v55 = vld [vmem:[#allocation11 + $0x1328] sm:$0xff] }
 0xa74   : > { %3229 = vmatpush2.msra.mxu0 %v3165_v57  ;;  %v3322_v57 = vld [vmem:[#allocation11 + $0x13f0] sm:$0xff]  ;;  %3369 = vmatprep.subr.mxu1 %v3323_v56  ;;  %v3296_v56 = vld [vmem:[#allocation11 + $0x1320] sm:$0xff] }
 0xa75   : > { %3230 = vmatprep.subr.mxu0 %v3164_v58  ;;  %v3321_v58 = vld [vmem:[#allocation11 + $0x13e8] sm:$0xff]  ;;  %3370 = vmatpush2.msra.mxu1 %v3322_v57  ;;  %v3295_v57 = vld [vmem:[#allocation11 + $0x1318] sm:$0xff] }
 0xa76   : > { %3231 = vmatpush2.msra.mxu0 %v3163_v60  ;;  %v3320_v60 = vld [vmem:[#allocation11 + $0x13e0] sm:$0xff]  ;;  %3371 = vmatprep.subr.mxu1 %v3321_v58  ;;  %v3293_v58 = vld [vmem:[#allocation11 + $0x1308] sm:$0xff] }
 0xa77   : > { %3232 = vmatprep.subr.mxu0 %v3162_v24  ;;  %v3319_v24 = vld [vmem:[#allocation11 + $0x13d8] sm:$0xff]  ;;  %3372 = vmatpush2.msra.mxu1 %v3320_v60 }
 0xa78   : > { %3233 = vmatpush2.msra.mxu0 %v3161_v59  ;;  %v3318_v59 = vld [vmem:[#allocation11 + $0x13d0] sm:$0xff]  ;;  %3373 = vmatprep.subr.mxu1 %v3319_v24  ;;  %v3176_v60 = vld [vmem:[#allocation12 + $0x18] sm:$0x3] }
 0xa79   : > { %3234 = vmatprep.subr.mxu0 %v3160_v61  ;;  %v3317_v61 = vld [vmem:[#allocation11 + $0x13c8] sm:$0xff]  ;;  %3374 = vmatpush2.msra.mxu1 %v3318_v59  ;;  %v3185_v24 = vrot.slane %v3176_v60, %v8869_v18  ;;  %v3181_v59 = vrot.slane %v3176_v60, %v8866_v16 }
 0xa7a   : > { %3235 = vmatpush2.msra.mxu0 %v3159_v62  ;;  %v3316_v62 = vld [vmem:[#allocation11 + $0x13c0] sm:$0xff]  ;;  %3375 = vmatprep.subr.mxu1 %v3317_v61 }
 0xa7b   : > { %3236 = vmatprep.subr.mxu0 %v3158_v63  ;;  %v3315_v63 = vld [vmem:[#allocation11 + $0x13b8] sm:$0xff]  ;;  %3376 = vmatpush2.msra.mxu1 %v3316_v62 }
 0xa7c   : > { %3237 = vmatpush2.msra.mxu0 %v3157_v0  ;;  %v3314_v0 = vld [vmem:[#allocation11 + $0x13b0] sm:$0xff]  ;;  %3377 = vmatprep.subr.mxu1 %v3315_v63 }
 0xa7d   : > { %3238 = vmatprep.subr.mxu0 %v3156_v2  ;;  %v3313_v2 = vld [vmem:[#allocation11 + $0x13a8] sm:$0xff]  ;;  %3378 = vmatpush2.msra.mxu1 %v3314_v0 }
 0xa7e   : > { %3239 = vmatpush2.msra.mxu0 %v3155_v3  ;;  %v3312_v3 = vld [vmem:[#allocation11 + $0x13a0] sm:$0xff]  ;;  %3379 = vmatprep.subr.mxu1 %v3313_v2  ;;  %v3325_v2 = vld [vmem:[#allocation12 + $0x1a] sm:$0x3] }
 0xa7f   : > { %3240 = vmatprep.subr.mxu0 %v3154_v5  ;;  %v3311_v5 = vld [vmem:[#allocation11 + $0x1398] sm:$0xff]  ;;  %3380 = vmatpush2.msra.mxu1 %v3312_v3  ;;  %v3330_v3 = vrot.slane %v3325_v2, %v8866_v16 }
 0xa80   : > { %3241 = vmatpush2.msra.mxu0 %v3153_v41  ;;  %v3310_v41 = vld [vmem:[#allocation11 + $0x1390] sm:$0xff]  ;;  %3381 = vmatprep.subr.mxu1 %v3311_v5  ;;  %v3334_v5 = vrot.slane %v3325_v2, %v8869_v18 }
 0xa81   : > { %3242 = vmatprep.subr.mxu0 %v3152_v6  ;;  %v3309_v6 = vld [vmem:[#allocation11 + $0x1388] sm:$0xff]  ;;  %3382 = vmatpush2.msra.mxu1 %v3310_v41 }
 0xa82   : > { %3243 = vmatpush2.msra.mxu0 %v3151_v7  ;;  %v3308_v7 = vld [vmem:[#allocation11 + $0x1380] sm:$0xff]  ;;  %3383 = vmatprep.subr.mxu1 %v3309_v6 }
 0xa83   : > { %3244 = vmatprep.subr.mxu0 %v3150_v8  ;;  %v3307_v8 = vld [vmem:[#allocation11 + $0x1378] sm:$0xff]  ;;  %3384 = vmatpush2.msra.mxu1 %v3308_v7 }
 0xa84   : > { %3245 = vmatpush2.msra.mxu0 %v3149_v10  ;;  %v3306_v10 = vld [vmem:[#allocation11 + $0x1370] sm:$0xff]  ;;  %3385 = vmatprep.subr.mxu1 %v3307_v8 }
 0xa85   : > { %3246 = vmatprep.subr.mxu0 %v3148_v11  ;;  %v3305_v11 = vld [vmem:[#allocation11 + $0x1368] sm:$0xff]  ;;  %3386 = vmatpush2.msra.mxu1 %v3306_v10 }
 0xa86   : > { %3247 = vmatpush2.msra.mxu0 %v3147_v13  ;;  %v3304_v13 = vld [vmem:[#allocation11 + $0x1360] sm:$0xff]  ;;  %3387 = vmatprep.subr.mxu1 %v3305_v11 }
 0xa87   : > { %3248 = vmatprep.subr.mxu0 %v3146_v14  ;;  %v3303_v14 = vld [vmem:[#allocation11 + $0x1358] sm:$0xff]  ;;  %3388 = vmatpush2.msra.mxu1 %v3304_v13 }
 0xa88   : > { %3249 = vmatpush2.msra.mxu0 %v3145_v17  ;;  %v3302_v17 = vld [vmem:[#allocation11 + $0x1350] sm:$0xff]  ;;  %3389 = vmatprep.subr.mxu1 %v3303_v14 }
 0xa89   : > { %3250 = vmatprep.subr.mxu0 %v3144_v19  ;;  %v3301_v19 = vld [vmem:[#allocation11 + $0x1348] sm:$0xff]  ;;  %3390 = vmatpush2.msra.mxu1 %v3302_v17 }
 0xa8a   : > { %3251 = vmatpush2.msra.mxu0 %v3143_v20  ;;  %v3300_v20 = vld [vmem:[#allocation11 + $0x1340] sm:$0xff]  ;;  %3391 = vmatprep.subr.mxu1 %v3301_v19 }
 0xa8b   : > { %3392 = vmatpush2.msra.mxu1 %v3300_v20 }
 0xa8c   : > { %3393 = vmatprep.subr.mxu1 %v3299_v21 }
 0xa8d   : > { %3394 = vmatpush2.msra.mxu1 %v3298_v22 }
 0xa8e   : > { %3395 = vmatprep.subr.mxu1 %v3297_v55 }
 0xa8f   : > { %3396 = vmatpush2.msra.mxu1 %v3296_v56 }
 0xa90   : > { %3397 = vmatprep.subr.mxu1 %v3295_v57 }
 0xac9   : > { %v2880_v37 = vpop.f32.mrf.mxu0 }
 0xaca   : > { %v2881_v33 = vadd.f32 %v2880_v37, %v2807_v25 }
 0xacb   : > { %v2882_v32 = vpop.f32.mrf.mxu0 }
 0xacc   : > { %v2883_v38 = vadd.f32 %v2882_v32, %v2811_v31 }
 0xacd   : > { %v2951_v30 = vpop.f32.mrf.mxu1 }
 0xace   : > { %v2952_v39 = vadd.f32 %v2951_v30, %v2881_v33 }
 0xacf   : > { %v2953_v35 = vpop.f32.mrf.mxu1 }
 0xad0   : > { %v2954_v40 = vadd.f32 %v2953_v35, %v2883_v38 }
 0xb0a   : > { %v3022_v36 = vpop.f32.mrf.mxu0 }
 0xb0b   : > { %v3023_v42 = vadd.f32 %v3022_v36, %v2952_v39 }
 0xb0c   : > { %v3024_v23 = vpop.f32.mrf.mxu0 }
 0xb0d   : > { %v3025_v44 = vadd.f32 %v3024_v23, %v2954_v40 }
 0xb0e   : > { %v3093_v43 = vpop.f32.mrf.mxu1 }
 0xb0f   : > { %v3094_v1 = vadd.f32 %v3093_v43, %v3023_v42 }
 0xb10   : > { %v3095_v45 = vpop.f32.mrf.mxu1 }
 0xb11   : > { %vm3098_vm3 = vcmp.gt.f32.partialorder %v3094_v1, 0.0  ;;  %v3100_v46 = vmul.f32 0.1, %v3094_v1  ;;  %v3096_v47 = vadd.f32 %v3095_v45, %v3025_v44 }
 0xb13   : > { %v3102_v4 = vsel %vm3098_vm3, %v3094_v1, %v3100_v46  ;;  %vm3099_vm4 = vcmp.gt.f32.partialorder %v3096_v47, 0.0  ;;  %v3101_v48 = vmul.f32 0.1, %v3096_v47 }
 0xb14   : > { %v3104_v49 = vadd.f32 %v3102_v4, %v9030_v9  ;;  %v3294_v9 = vld [vmem:[#allocation11 + $0x1310] sm:$0xff] }
 0xb15   : > { %v3103_v50 = vsel %vm3099_vm4, %v3096_v47, %v3101_v48  ;;  %3398 = vmatpush2.msra.mxu1 %v3294_v9 }
 0xb16   : > { %v3105_v15 = vadd.f32 %v3103_v50, %v9034_v12  ;;  %v3106_v51 = vadd.f32 %v3104_v49, %v8889_v26  ;;  %v3292_v12 = vld [vmem:[#allocation11 + $0x1300] sm:$0xff]  ;;  %3399 = vmatprep.subr.mxu1 %v3293_v58 }
 0xb17   : > { %3400 = vmatpush2.msra.mxu1 %v3292_v12 }
 0xb18   : > { %v3107_v52 = vadd.f32 %v3105_v15, %v8891_v29  ;;  %v3108_v54 = vadd.f32 %v3106_v51, %v8873_v27 }
 0xb1a   : > { %v3109_v53 = vadd.f32 %v3107_v52, %v8875_v28 }
 0xb1c   : > { %3252 = vmatprep.mubr.f32.mxu0 %v3109_v53 }
 0xb1d   : > { %3253 = vmatmul.mubr.f32.vlgmr.msra.gmra.mxu0 %v3108_v54 }
 0xbdd   : > { %v3254_v61 = vpop.f32.mrf.mxu0 }
 0xbde   : > { %v3255_v0 = vadd.f32 %v3254_v61, %v3181_v59 }
 0xbdf   : > { %v3256_v62 = vpop.f32.mrf.mxu0 }
 0xbe0   : > { %v3257_v63 = vadd.f32 %v3256_v62, %v3185_v24 }
 0xbe2   : > { %3401 = vmatprep.mubr.f32.mxu1 %v3257_v63 }
 0xbe3   : > { %3402 = vmatmul.mubr.f32.vlgmr.msra.gmra.mxu1 %v3255_v0 }
 0xca3   : > { %v3403_v41 = vpop.f32.mrf.mxu1 }
 0xca4   : > { %v3404_v6 = vadd.f32 %v3403_v41, %v3330_v3 }
 0xca5   : > { %v3405_v7 = vpop.f32.mrf.mxu1 }
 0xca6   : > { %v3408_v8 = vadd.f32 %v3404_v6, %v3102_v4  ;;  %v3423_v10 = vadd.f32 %v3404_v6, %v8889_v26  ;;  %v3406_v11 = vadd.f32 %v3405_v7, %v3334_v5 }
 0xca8   : > { %v3410_v13 = vadd.f32 %v3408_v8, %v8889_v26  ;;  %v3425_v14 = vadd.f32 %v3423_v10, %v8873_v27  ;;  %v3409_v17 = vadd.f32 %v3406_v11, %v3103_v50  ;;  %v3424_v19 = vadd.f32 %v3406_v11, %v8891_v29 }
 0xcaa   : > { %v3412_v20 = vadd.f32 %v3410_v13, %v8873_v27  ;;  %3427 = vst [vmem:[#allocation3] sm:$0xff] %v3425_v14  ;;  %v3411_v16 = vadd.f32 %v3409_v17, %v8891_v29  ;;  %v3426_v18 = vadd.f32 %v3424_v19, %v8875_v28 }
 0xcac   : > { %3429 = vst.msk [vmem:[#allocation4] sm:$0xff] %vm593_vm0, %v3412_v20  ;;  %v3413_v21 = vadd.f32 %v3411_v16, %v8875_v28  ;;  %3428 = vst [vmem:[#allocation3 + $0x8] sm:$0xff] %v3426_v18  ;;  %3431 = vrot.lane.b32.xlu1 %v3412_v20, %s8536_s17 }
 0xcae   : > { %3447 = vst.msk [vmem:[#allocation4 + $0x20] sm:$0xff] %vm593_vm0, %v3413_v21 }
 0xcb0   : > { %3436 = vrot.lane.b32.xlu1 %v3412_v20, %s8537_s30 }
 0xcb4   : > { %3441 = vrot.lane.b32.xlu1 %v3412_v20, %s8538_s21 }
 0xcb8   : > { %3449 = vrot.lane.b32.xlu1 %v3413_v21, %s8536_s17 }
 0xcbc   : > { %3454 = vrot.lane.b32.xlu1 %v3413_v21, %s8537_s30 }
 0xcc0   : > { %3459 = vrot.lane.b32.xlu1 %v3413_v21, %s8538_s21 }
 0xd1e   : > { %v3432_v27 = vpop.permute.xlu1 %3431 }
 0xd1f   : > { %3435 = vst.msk [vmem:[#allocation4 + $0x8] sm:$0xff] %vm593_vm0, %v3432_v27 }
 0xd22   : > { %v3437_v26 = vpop.permute.xlu1 %3436 }
 0xd23   : > { %3440 = vst.msk [vmem:[#allocation4 + $0x10] sm:$0xff] %vm593_vm0, %v3437_v26 }
 0xd26   : > { %v3442_v29 = vpop.permute.xlu1 %3441 }
 0xd27   : > { %3445 = vst.msk [vmem:[#allocation4 + $0x18] sm:$0xff] %vm593_vm0, %v3442_v29 }
 0xd2a   : > { %v3450_v28 = vpop.permute.xlu1 %3449 }
 0xd2b   : > { %3453 = vst.msk [vmem:[#allocation4 + $0x28] sm:$0xff] %vm593_vm0, %v3450_v28 }
 0xd2e   : > { %v3455_v22 = vpop.permute.xlu1 %3454 }
 0xd2f   : > { %3458 = vst.msk [vmem:[#allocation4 + $0x30] sm:$0xff] %vm593_vm0, %v3455_v22 }
 0xd32   : > { %v3460_v34 = vpop.permute.xlu1 %3459 }
 0xd33   : > { %3463 = vst.msk [vmem:[#allocation4 + $0x38] sm:$0xff] %vm593_vm0, %v3460_v34 }
 0xd34 PF: > { %v3479_v37 = vld [vmem:[%s8851_s0 + $0x38] sm:$0xff]  ;;  %v3478_v30 = vld [vmem:[%s8851_s0 + $0x30] sm:$0xff]  ;;  %v3477_v23 = vld [vmem:[%s8851_s0 + $0x28] sm:$0xff]  ;;  %s7415_s18 = sshll.u32 %s8665_s15, 3  ;;  %v8539_v22 = vmov 0   ;;  %p7914_p5 = scmp.ne.s32.totalorder %s8665_s15, 7 }
 0xd35   : > { %v7425_v25 = vld [vmem:[%s8851_s0 + $0xb8] sm:$0xff]  ;;  %v3501_v31 = vunpack.c.l.s8.bf16 %v3479_v37  ;;  %v3503_v32 = vunpack.c.h.s8.bf16 %v3479_v37  ;;  %v7424_v36 = vld [vmem:[%s8851_s0 + $0xb0] sm:$0xff]  ;;  %v3502_v38 = vunpack.c.h.s8.bf16 %v3478_v30  ;;  %v7423_v40 = vld [vmem:[%s8851_s0 + $0xa8] sm:$0xff]  ;;  %v3500_v42 = vunpack.c.l.s8.bf16 %v3478_v30  ;;  %8186 = vset.pattern.permute.xlu0 %v8539_v22  ;;  %s9146_s24 = scalar_lea.vmem [#allocation4], %s7415_s18 }
 0xd36   : > { %v3607_v33 = vunpack.c.l.s8.bf16 %v7425_v25  ;;  %v3609_v35 = vunpack.c.h.s8.bf16 %v7425_v25  ;;  %v3608_v39 = vunpack.c.h.s8.bf16 %v7424_v36  ;;  %v3606_v43 = vunpack.c.l.s8.bf16 %v7424_v36  ;;  %v3476_v45 = vld [vmem:[%s8851_s0 + $0x20] sm:$0xff]  ;;  %v3475_v50 = vld [vmem:[%s8851_s0 + $0x18] sm:$0xff]  ;;  %v3474_v55 = vld [vmem:[%s8851_s0 + $0x10] sm:$0xff] }
 0xd37   : > { %3527 = vmatprep.subr.bf16.mxu0 %v3503_v32  ;;  %v3499_v44 = vunpack.c.h.s8.bf16 %v3477_v23  ;;  %v3605_v1 = vunpack.c.h.s8.bf16 %v7423_v40  ;;  %v7422_v46 = vld [vmem:[%s8851_s0 + $0xa0] sm:$0xff]  ;;  %v3498_v47 = vunpack.c.h.s8.bf16 %v3476_v45  ;;  %v3497_v48 = vunpack.c.l.s8.bf16 %v3477_v23  ;;  %v7421_v15 = vld [vmem:[%s8851_s0 + $0x98] sm:$0xff]  ;;  %v7420_v56 = vld [vmem:[%s8851_s0 + $0x90] sm:$0xff] }
 0xd38   : > { %3626 = vmatprep.subr.bf16.mxu1 %v3609_v35  ;;  %3528 = vmatpush1.bf16.msra.mxu0 %v3502_v38  ;;  %v3604_v4 = vunpack.c.h.s8.bf16 %v7422_v46  ;;  %v3603_v49 = vunpack.c.l.s8.bf16 %v7423_v40  ;;  %v3496_v51 = vunpack.c.l.s8.bf16 %v3476_v45  ;;  %v3602_v52 = vunpack.c.l.s8.bf16 %v7422_v46  ;;  %v9127_v57 = vld [vmem:[#allocation2] sm:$0xff]  ;;  %v3473_v59 = vld [vmem:[%s8851_s0 + $0x8] sm:$0xff]  ;;  %v3486_v20 = vld [vmem:[%s8851_s0 + $0x70] sm:$0xff] }
 0xd39   : > { %3627 = vmatpush1.bf16.msra.mxu1 %v3608_v39  ;;  %3529 = vmatprep.subr.bf16.mxu0 %v3501_v31  ;;  %v3495_v53 = vunpack.c.h.s8.bf16 %v3475_v50  ;;  %v3601_v54 = vunpack.c.h.s8.bf16 %v7421_v15  ;;  %v3494_v9 = vunpack.c.h.s8.bf16 %v3474_v55  ;;  %v3600_v58 = vunpack.c.h.s8.bf16 %v7420_v56  ;;  %v7419_v61 = vld [vmem:[%s8851_s0 + $0x88] sm:$0xff]  ;;  %v3472_v3 = vld [vmem:[%s8851_s0] sm:$0xff]  ;;  %v3487_v10 = vld [vmem:[%s8851_s0 + $0x78] sm:$0xff] }
 0xd3a   : > { %3628 = vmatprep.subr.bf16.mxu1 %v3607_v33  ;;  %v3493_v12 = vunpack.c.l.s8.bf16 %v3475_v50  ;;  %v3599_v60 = vunpack.c.l.s8.bf16 %v7421_v15  ;;  %v9131_v24 = vcombine.high %v9127_v57, %v9127_v57  ;;  %v3492_v62 = vunpack.c.l.s8.bf16 %v3474_v55  ;;  %v7418_v5 = vld [vmem:[%s8851_s0 + $0x80] sm:$0xff]  ;;  %v7433_v11 = vld [vmem:[%s8851_s0 + $0xf8] sm:$0xff]  ;;  %v7432_v16 = vld [vmem:[%s8851_s0 + $0xf0] sm:$0xff] }
 0xd3b   : > { %v3598_v63 = vunpack.c.l.s8.bf16 %v7420_v56  ;;  %v3491_v0 = vunpack.c.h.s8.bf16 %v3473_v59  ;;  %v3597_v2 = vunpack.c.h.s8.bf16 %v7419_v61  ;;  %v3490_v41 = vunpack.c.h.s8.bf16 %v3472_v3  ;;  %v3485_v29 = vld [vmem:[%s8851_s0 + $0x68] sm:$0xff]  ;;  %v9149_v34 = vld [vmem:[%s9146_s24] sm:$0xff]  ;;  %v3482_v46 = vld [vmem:[%s8851_s0 + $0x50] sm:$0xff] }
 0xd3c   : > { %3530 = vmatpush1.bf16.msra.mxu0 %v3500_v42  ;;  %3559 = vmatprep.mubr.bf16.mxu0 %v9131_v24  ;;  %v3596_v6 = vunpack.c.h.s8.bf16 %v7418_v5  ;;  %v3489_v7 = vunpack.c.l.s8.bf16 %v3473_v59  ;;  %v3595_v8 = vunpack.c.l.s8.bf16 %v7419_v61  ;;  %v3488_v13 = vunpack.c.l.s8.bf16 %v3472_v3  ;;  %v7431_v28 = vld [vmem:[%s8851_s0 + $0xe8] sm:$0xff]  ;;  %v3484_v32 = vld [vmem:[%s8851_s0 + $0x60] sm:$0xff]  ;;  %v3483_v23 = vld [vmem:[%s8851_s0 + $0x58] sm:$0xff] }
 0xd3d   : > { %3629 = vmatpush1.bf16.msra.mxu1 %v3606_v43  ;;  %3531 = vmatprep.subr.bf16.mxu0 %v3499_v44  ;;  %v3594_v14 = vunpack.c.l.s8.bf16 %v7418_v5  ;;  %v3519_v17 = vunpack.c.h.s8.bf16 %v3487_v10  ;;  %v3625_v19 = vunpack.c.h.s8.bf16 %v7433_v11  ;;  %v3518_v18 = vunpack.c.h.s8.bf16 %v3486_v20  ;;  %v7430_v33 = vld [vmem:[%s8851_s0 + $0xe0] sm:$0xff]  ;;  %v7429_v40 = vld [vmem:[%s8851_s0 + $0xd8] sm:$0xff]  ;;  %v3481_v15 = vld [vmem:[%s8851_s0 + $0x48] sm:$0xff] }
 0xd3e   : > { %3630 = vmatprep.subr.bf16.mxu1 %v3605_v1  ;;  %3658 = vmatprep.mubr.bf16.mxu1 %v9131_v24  ;;  %v3624_v21 = vunpack.c.h.s8.bf16 %v7432_v16  ;;  %v3517_v27 = vunpack.c.l.s8.bf16 %v3487_v10  ;;  %v3623_v26 = vunpack.c.l.s8.bf16 %v7433_v11  ;;  %v3516_v37 = vunpack.c.l.s8.bf16 %v3486_v20  ;;  %v3480_v56 = vld [vmem:[%s8851_s0 + $0x40] sm:$0xff]  ;;  %v7441_v61 = vld [vmem:[%s8851_s0 + $0x138] sm:$0xff]  ;;  %v7440_v5 = vld [vmem:[%s8851_s0 + $0x130] sm:$0xff] }
 0xd3f   : > { %v3622_v25 = vunpack.c.l.s8.bf16 %v7432_v16  ;;  %v3515_v30 = vunpack.c.h.s8.bf16 %v3485_v29  ;;  %v3621_v31 = vunpack.c.h.s8.bf16 %v7431_v28  ;;  %3570 = vperm.xlu0 %8186, %v9149_v34   ;;  %v3514_v35 = vunpack.c.h.s8.bf16 %v3484_v32  ;;  %v7438_v16 = vld [vmem:[%s8851_s0 + $0x120] sm:$0xff]  ;;  %v7437_v22 = vld [vmem:[%s8851_s0 + $0x118] sm:$0xff] }
 0xd40   : > { %3532 = vmatpush1.bf16.msra.mxu0 %v3498_v47  ;;  %v3620_v36 = vunpack.c.h.s8.bf16 %v7430_v33  ;;  %v3513_v38 = vunpack.c.l.s8.bf16 %v3485_v29  ;;  %v3619_v39 = vunpack.c.l.s8.bf16 %v7431_v28  ;;  %v8540_v42 = vmov 1   ;;  %v7428_v47 = vld [vmem:[%s8851_s0 + $0xd0] sm:$0xff] }
 0xd41   : > { %3631 = vmatpush1.bf16.msra.mxu1 %v3604_v4  ;;  %3533 = vmatprep.subr.bf16.mxu0 %v3497_v48  ;;  %v3512_v43 = vunpack.c.l.s8.bf16 %v3484_v32  ;;  %v3618_v44 = vunpack.c.l.s8.bf16 %v7430_v33  ;;  %v3511_v1 = vunpack.c.h.s8.bf16 %v3483_v23  ;;  %v3617_v45 = vunpack.c.h.s8.bf16 %v7429_v40  ;;  %v7436_v33 = vld [vmem:[%s8851_s0 + $0x110] sm:$0xff] }
 0xd42   : > { %3632 = vmatprep.subr.bf16.mxu1 %v3603_v49  ;;  %v3510_v4 = vunpack.c.h.s8.bf16 %v3482_v46  ;;  %v3616_v48 = vunpack.c.h.s8.bf16 %v7428_v47  ;;  %v3509_v49 = vunpack.c.l.s8.bf16 %v3483_v23  ;;  %v3615_v50 = vunpack.c.l.s8.bf16 %v7429_v40 }
 0xd43   : > { %8187 = vset.pattern.permute.xlu0 %v8540_v42  ;;  %v3705_v10 = vunpack.c.l.s8.bf16 %v7441_v61  ;;  %v3697_v23 = vunpack.c.l.s8.bf16 %v7437_v22  ;;  %v7435_v42 = vld [vmem:[%s8851_s0 + $0x108] sm:$0xff] }
 0xd44   : > { %3534 = vmatpush1.bf16.msra.mxu0 %v3496_v51  ;;  %3668 = vperm.xlu0 %8187, %v9149_v34   ;;  %v7427_v51 = vld [vmem:[%s8851_s0 + $0xc8] sm:$0xff] }
 0xd45   : > { %3633 = vmatpush1.bf16.msra.mxu1 %v3602_v52  ;;  %3535 = vmatprep.subr.bf16.mxu0 %v3495_v53  ;;  %v3508_v52 = vunpack.c.l.s8.bf16 %v3482_v46  ;;  %v3614_v53 = vunpack.c.l.s8.bf16 %v7428_v47  ;;  %v3613_v55 = vunpack.c.h.s8.bf16 %v7427_v51  ;;  %v3611_v59 = vunpack.c.l.s8.bf16 %v7427_v51  ;;  %v7434_v47 = vld [vmem:[%s8851_s0 + $0x100] sm:$0xff]  ;;  %v7449_v51 = vld [vmem:[%s8851_s0 + $0x178] sm:$0xff] }
 0xd46   : > { %3634 = vmatprep.subr.bf16.mxu1 %v3601_v54  ;;  %v3507_v54 = vunpack.c.h.s8.bf16 %v3481_v15 }
 0xd48   : > { %3536 = vmatpush1.bf16.msra.mxu0 %v3494_v9  ;;  %v7426_v9 = vld [vmem:[%s8851_s0 + $0xc0] sm:$0xff] }
 0xd49   : > { %3635 = vmatpush1.bf16.msra.mxu1 %v3600_v58  ;;  %3537 = vmatprep.subr.bf16.mxu0 %v3493_v12  ;;  %v3506_v58 = vunpack.c.h.s8.bf16 %v3480_v56  ;;  %v3612_v12 = vunpack.c.h.s8.bf16 %v7426_v9 }
 0xd4a   : > { %3636 = vmatprep.subr.bf16.mxu1 %v3599_v60  ;;  %v3505_v60 = vunpack.c.l.s8.bf16 %v3481_v15 }
 0xd4c   : > { %3538 = vmatpush1.bf16.msra.mxu0 %v3492_v62  ;;  %v7457_v62 = vld [vmem:[%s8851_s0 + $0x1b8] sm:$0xff] }
 0xd4d   : > { %3637 = vmatpush1.bf16.msra.mxu1 %v3598_v63  ;;  %3539 = vmatprep.subr.bf16.mxu0 %v3491_v0  ;;  %v3504_v63 = vunpack.c.l.s8.bf16 %v3480_v56  ;;  %v3610_v0 = vunpack.c.l.s8.bf16 %v7426_v9  ;;  %v3805_v3 = vunpack.c.h.s8.bf16 %v7457_v62  ;;  %v3803_v11 = vunpack.c.l.s8.bf16 %v7457_v62  ;;  %v7448_v9 = vld [vmem:[%s8851_s0 + $0x170] sm:$0xff]  ;;  %v7447_v62 = vld [vmem:[%s8851_s0 + $0x168] sm:$0xff] }
 0xd4e   : > { %3638 = vmatprep.subr.bf16.mxu1 %v3597_v2  ;;  %v3707_v2 = vunpack.c.h.s8.bf16 %v7441_v61 }
 0xd50   : > { %3540 = vmatpush1.bf16.msra.mxu0 %v3490_v41  ;;  %v7456_v41 = vld [vmem:[%s8851_s0 + $0x1b0] sm:$0xff] }
 0xd51   : > { %3639 = vmatpush1.bf16.msra.mxu1 %v3596_v6  ;;  %3541 = vmatprep.subr.bf16.mxu0 %v3489_v7  ;;  %v9169_v6 = vcombine.low %v9127_v57, %v9127_v57  ;;  %v3706_v7 = vunpack.c.h.s8.bf16 %v7440_v5  ;;  %v3704_v57 = vunpack.c.l.s8.bf16 %v7440_v5 }
 0xd52   : > { %3640 = vmatprep.subr.bf16.mxu1 %v3595_v8  ;;  %v3804_v8 = vunpack.c.h.s8.bf16 %v7456_v41 }
 0xd54   : > { %3542 = vmatpush1.bf16.msra.mxu0 %v3488_v13  ;;  %v7439_v13 = vld [vmem:[%s8851_s0 + $0x128] sm:$0xff] }
 0xd55   : > { %3641 = vmatpush1.bf16.msra.mxu1 %v3594_v14  ;;  %3543 = vmatprep.subr.bf16.mxu0 %v3519_v17  ;;  %v7455_v14 = vld [vmem:[%s8851_s0 + $0x1a8] sm:$0xff]  ;;  %v3802_v17 = vunpack.c.l.s8.bf16 %v7456_v41  ;;  %v3701_v29 = vunpack.c.l.s8.bf16 %v7439_v13  ;;  %v7446_v41 = vld [vmem:[%s8851_s0 + $0x160] sm:$0xff] }
 0xd56   : > { %3642 = vmatprep.subr.bf16.mxu1 %v3625_v19  ;;  %v3703_v19 = vunpack.c.h.s8.bf16 %v7439_v13  ;;  %v3801_v20 = vunpack.c.h.s8.bf16 %v7455_v14  ;;  %v3799_v28 = vunpack.c.l.s8.bf16 %v7455_v14  ;;  %v7445_v14 = vld [vmem:[%s8851_s0 + $0x158] sm:$0xff] }
 0xd58   : > { %3544 = vmatpush2.bf16.msra.mxu0 %v3518_v18  ;;  %v7454_v18 = vld [vmem:[%s8851_s0 + $0x1a0] sm:$0xff] }
 0xd59   : > { %3643 = vmatpush2.bf16.msra.mxu1 %v3624_v21  ;;  %3545 = vmatprep.subr.bf16.mxu0 %v3517_v27  ;;  %v8541_v21 = vmov 2   ;;  %v3702_v27 = vunpack.c.h.s8.bf16 %v7438_v16 }
 0xd5a   : > { %3644 = vmatprep.subr.bf16.mxu1 %v3623_v26  ;;  %8188 = vset.pattern.permute.xlu1 %v8541_v21  ;;  %v3800_v26 = vunpack.c.h.s8.bf16 %v7454_v18  ;;  %v7460_v21 = vld [vmem:[%s8851_s0 + $0x1d0] sm:$0xff] }
 0xd5b   : > { %3766 = vperm.xlu1 %8188, %v9149_v34  }
 0xd5c   : > { %3546 = vmatpush2.bf16.msra.mxu0 %v3516_v37  ;;  %v7453_v37 = vld [vmem:[%s8851_s0 + $0x198] sm:$0xff] }
 0xd5d   : > { %3645 = vmatpush2.bf16.msra.mxu1 %v3622_v25  ;;  %3547 = vmatprep.subr.bf16.mxu0 %v3515_v30  ;;  %v3700_v25 = vunpack.c.l.s8.bf16 %v7438_v16  ;;  %v3798_v30 = vunpack.c.l.s8.bf16 %v7454_v18  ;;  %v3797_v32 = vunpack.c.h.s8.bf16 %v7453_v37  ;;  %v3795_v40 = vunpack.c.l.s8.bf16 %v7453_v37  ;;  %v7444_v18 = vld [vmem:[%s8851_s0 + $0x150] sm:$0xff]  ;;  %v7459_v37 = vld [vmem:[%s8851_s0 + $0x1c8] sm:$0xff] }
 0xd5e   : > { %3646 = vmatprep.subr.bf16.mxu1 %v3621_v31  ;;  %v3699_v31 = vunpack.c.h.s8.bf16 %v7437_v22  ;;  %v7443_v22 = vld [vmem:[%s8851_s0 + $0x148] sm:$0xff] }
 0xd60   : > { %3548 = vmatpush2.bf16.msra.mxu0 %v3514_v35  ;;  %v7452_v35 = vld [vmem:[%s8851_s0 + $0x190] sm:$0xff] }
 0xd61   : > { %3647 = vmatpush2.bf16.msra.mxu1 %v3620_v36  ;;  %3549 = vmatprep.subr.bf16.mxu0 %v3513_v38  ;;  %v8542_v36 = vmov 3   ;;  %v3698_v38 = vunpack.c.h.s8.bf16 %v7436_v33 }
 0xd62   : > { %3648 = vmatprep.subr.bf16.mxu1 %v3619_v39  ;;  %8189 = vset.pattern.permute.xlu1 %v8542_v36  ;;  %v3796_v39 = vunpack.c.h.s8.bf16 %v7452_v35 }
 0xd63   : > { %3864 = vperm.xlu1 %8189, %v9149_v34  }
 0xd64   : > { %3550 = vmatpush2.bf16.msra.mxu0 %v3512_v43  ;;  %v7451_v43 = vld [vmem:[%s8851_s0 + $0x188] sm:$0xff] }
 0xd65   : > { %3649 = vmatpush2.bf16.msra.mxu1 %v3618_v44  ;;  %3551 = vmatprep.subr.bf16.mxu0 %v3511_v1  ;;  %v3696_v44 = vunpack.c.l.s8.bf16 %v7436_v33  ;;  %v3794_v1 = vunpack.c.l.s8.bf16 %v7452_v35  ;;  %v3793_v46 = vunpack.c.h.s8.bf16 %v7451_v43  ;;  %v3791_v15 = vunpack.c.l.s8.bf16 %v7451_v43  ;;  %v7442_v33 = vld [vmem:[%s8851_s0 + $0x140] sm:$0xff] }
 0xd66   : > { %3650 = vmatprep.subr.bf16.mxu1 %v3617_v45  ;;  %v3695_v45 = vunpack.c.h.s8.bf16 %v7435_v42  ;;  %v7458_v35 = vld [vmem:[%s8851_s0 + $0x1c0] sm:$0xff]  ;;  %v3710_v36 = vunpack.c.h.s8.bf16 %v7442_v33  ;;  %v3708_v43 = vunpack.c.l.s8.bf16 %v7442_v33 }
 0xd68   : > { %3552 = vmatpush2.bf16.msra.mxu0 %v3510_v4  ;;  %v7450_v4 = vld [vmem:[%s8851_s0 + $0x180] sm:$0xff] }
 0xd69   : > { %3651 = vmatpush2.bf16.msra.mxu1 %v3616_v48  ;;  %3553 = vmatprep.subr.bf16.mxu0 %v3509_v49  ;;  %v3694_v48 = vunpack.c.h.s8.bf16 %v7434_v47  ;;  %v3792_v49 = vunpack.c.h.s8.bf16 %v7450_v4 }
 0xd6a   : > { %3652 = vmatprep.subr.bf16.mxu1 %v3615_v50  ;;  %v3693_v50 = vunpack.c.l.s8.bf16 %v7435_v42  ;;  %v7489_v42 = vld [vmem:[%s8851_s0 + $0x2b8] sm:$0xff] }
 0xd6c   : > { %3554 = vmatpush2.bf16.msra.mxu0 %v3508_v52  ;;  %v7465_v52 = vld [vmem:[%s8851_s0 + $0x1f8] sm:$0xff] }
 0xd6d   : > { %3653 = vmatpush2.bf16.msra.mxu1 %v3614_v53  ;;  %3555 = vmatprep.subr.bf16.mxu0 %v3507_v54  ;;  %v3692_v53 = vunpack.c.l.s8.bf16 %v7434_v47  ;;  %v3790_v54 = vunpack.c.l.s8.bf16 %v7450_v4  ;;  %v3821_v56 = vunpack.c.h.s8.bf16 %v7465_v52  ;;  %v3819_v61 = vunpack.c.l.s8.bf16 %v7465_v52  ;;  %v7488_v47 = vld [vmem:[%s8851_s0 + $0x2b0] sm:$0xff] }
 0xd6e   : > { %3654 = vmatprep.subr.bf16.mxu1 %v3613_v55  ;;  %v3723_v55 = vunpack.c.h.s8.bf16 %v7449_v51 }
 0xd70   : > { %3556 = vmatpush2.bf16.msra.mxu0 %v3506_v58  ;;  %v7464_v58 = vld [vmem:[%s8851_s0 + $0x1f0] sm:$0xff] }
 0xd71   : > { %3655 = vmatpush2.bf16.msra.mxu1 %v3612_v12  ;;  %3557 = vmatprep.subr.bf16.mxu0 %v3505_v60  ;;  %v3722_v12 = vunpack.c.h.s8.bf16 %v7448_v9  ;;  %v3820_v60 = vunpack.c.h.s8.bf16 %v7464_v58 }
 0xd72   : > { %3656 = vmatprep.subr.bf16.mxu1 %v3611_v59  ;;  %v3721_v59 = vunpack.c.l.s8.bf16 %v7449_v51  ;;  %v7487_v51 = vld [vmem:[%s8851_s0 + $0x2a8] sm:$0xff] }
 0xd74   : > { %3558 = vmatpush2.bf16.msra.mxu0 %v3504_v63  ;;  %v7463_v63 = vld [vmem:[%s8851_s0 + $0x1e8] sm:$0xff] }
 0xd75   : > { %3657 = vmatpush2.bf16.msra.mxu1 %v3610_v0  ;;  %3724 = vmatprep.subr.bf16.mxu0 %v3707_v2  ;;  %v3720_v0 = vunpack.c.l.s8.bf16 %v7448_v9  ;;  %v3818_v2 = vunpack.c.l.s8.bf16 %v7464_v58  ;;  %v3817_v5 = vunpack.c.h.s8.bf16 %v7463_v63  ;;  %v3815_v13 = vunpack.c.l.s8.bf16 %v7463_v63  ;;  %v7486_v9 = vld [vmem:[%s8851_s0 + $0x2a0] sm:$0xff]  ;;  %v7485_v63 = vld [vmem:[%s8851_s0 + $0x298] sm:$0xff] }
 0xd76   : > { %3822 = vmatprep.subr.bf16.mxu1 %v3805_v3  ;;  %v3719_v3 = vunpack.c.h.s8.bf16 %v7447_v62  ;;  %v8543_v58 = vmov 4  }
 0xd77   : > { %3560 = vmatmul.mubr.bf16.vlgmr.msra.gmra.mxu0 %v9169_v6  ;;  %8190 = vset.pattern.permute.xlu1 %v8543_v58  ;;  %v7492_v58 = vld [vmem:[%s8851_s0 + $0x2d0] sm:$0xff] }
 0xd78   : > { %3659 = vmatmul.mubr.bf16.vlgmr.msra.gmra.mxu1 %v9169_v6  ;;  %3725 = vmatpush1.bf16.msra.mxu0 %v3706_v7  ;;  %v7462_v7 = vld [vmem:[%s8851_s0 + $0x1e0] sm:$0xff] }
 0xd79   : > { %3823 = vmatpush1.bf16.msra.mxu1 %v3804_v8  ;;  %3726 = vmatprep.subr.bf16.mxu0 %v3705_v10  ;;  %v3718_v8 = vunpack.c.h.s8.bf16 %v7446_v41  ;;  %v3816_v10 = vunpack.c.h.s8.bf16 %v7462_v7 }
 0xd7a   : > { %3824 = vmatprep.subr.bf16.mxu1 %v3803_v11  ;;  %3756 = vmatprep.mubr.bf16.mxu0 %v9131_v24  ;;  %v3717_v11 = vunpack.c.l.s8.bf16 %v7447_v62  ;;  %v7469_v62 = vld [vmem:[%s8851_s0 + $0x218] sm:$0xff] }
 0xd7b   : > { %3854 = vmatprep.mubr.bf16.mxu1 %v9131_v24  ;;  %3962 = vperm.xlu1 %8190, %v9149_v34  }
 0xd7c   : > { %3727 = vmatpush1.bf16.msra.mxu0 %v3704_v57  ;;  %v7461_v57 = vld [vmem:[%s8851_s0 + $0x1d8] sm:$0xff] }
 0xd7d   : > { %3825 = vmatpush1.bf16.msra.mxu1 %v3802_v17  ;;  %3728 = vmatprep.subr.bf16.mxu0 %v3703_v19  ;;  %v3716_v17 = vunpack.c.l.s8.bf16 %v7446_v41  ;;  %v3814_v19 = vunpack.c.l.s8.bf16 %v7462_v7  ;;  %v3813_v16 = vunpack.c.h.s8.bf16 %v7461_v57  ;;  %v3993_v41 = vunpack.c.h.s8.bf16 %v7485_v63  ;;  %v7468_v7 = vld [vmem:[%s8851_s0 + $0x210] sm:$0xff] }
 0xd7e   : > { %3826 = vmatprep.subr.bf16.mxu1 %v3801_v20  ;;  %v3715_v20 = vunpack.c.h.s8.bf16 %v7445_v14 }
 0xd80   : > { %3729 = vmatpush1.bf16.msra.mxu0 %v3702_v27  ;;  %v3714_v27 = vunpack.c.h.s8.bf16 %v7444_v18 }
 0xd81   : > { %3827 = vmatpush1.bf16.msra.mxu1 %v3800_v26  ;;  %3730 = vmatprep.subr.bf16.mxu0 %v3701_v29  ;;  %v3812_v26 = vunpack.c.h.s8.bf16 %v7460_v21  ;;  %v3713_v29 = vunpack.c.l.s8.bf16 %v7445_v14  ;;  %v3991_v14 = vunpack.c.l.s8.bf16 %v7485_v63  ;;  %v7491_v63 = vld [vmem:[%s8851_s0 + $0x2c8] sm:$0xff] }
 0xd82   : > { %3828 = vmatprep.subr.bf16.mxu1 %v3799_v28  ;;  %v3811_v28 = vunpack.c.l.s8.bf16 %v7461_v57  ;;  %v7467_v57 = vld [vmem:[%s8851_s0 + $0x208] sm:$0xff] }
 0xd84   : > { %3731 = vmatpush1.bf16.msra.mxu0 %v3700_v25  ;;  %v3712_v25 = vunpack.c.l.s8.bf16 %v7444_v18 }
 0xd85   : > { %3829 = vmatpush1.bf16.msra.mxu1 %v3798_v30  ;;  %3732 = vmatprep.subr.bf16.mxu0 %v3699_v31  ;;  %v3810_v30 = vunpack.c.l.s8.bf16 %v7460_v21  ;;  %v3711_v31 = vunpack.c.h.s8.bf16 %v7443_v22  ;;  %v7466_v21 = vld [vmem:[%s8851_s0 + $0x200] sm:$0xff] }
 0xd86   : > { %3830 = vmatprep.subr.bf16.mxu1 %v3797_v32  ;;  %v3809_v32 = vunpack.c.h.s8.bf16 %v7459_v37 }
 0xd88   : > { %3733 = vmatpush1.bf16.msra.mxu0 %v3698_v38  ;;  %v3808_v38 = vunpack.c.h.s8.bf16 %v7458_v35 }
 0xd89   : > { %3831 = vmatpush1.bf16.msra.mxu1 %v3796_v39  ;;  %3734 = vmatprep.subr.bf16.mxu0 %v3697_v23  ;;  %v3709_v39 = vunpack.c.l.s8.bf16 %v7443_v22  ;;  %v3807_v23 = vunpack.c.l.s8.bf16 %v7459_v37  ;;  %v7481_v37 = vld [vmem:[%s8851_s0 + $0x278] sm:$0xff] }
 0xd8a   : > { %3832 = vmatprep.subr.bf16.mxu1 %v3795_v40  ;;  %v7473_v40 = vld [vmem:[%s8851_s0 + $0x238] sm:$0xff] }
 0xd8c   : > { %3735 = vmatpush1.bf16.msra.mxu0 %v3696_v44  ;;  %v3806_v44 = vunpack.c.l.s8.bf16 %v7458_v35  ;;  %v7480_v35 = vld [vmem:[%s8851_s0 + $0x270] sm:$0xff] }
 0xd8d   : > { %3833 = vmatpush1.bf16.msra.mxu1 %v3794_v1  ;;  %3736 = vmatprep.subr.bf16.mxu0 %v3695_v45  ;;  %v3903_v1 = vunpack.c.h.s8.bf16 %v7473_v40  ;;  %v4001_v45 = vunpack.c.h.s8.bf16 %v7489_v42 }
 0xd8e   : > { %3834 = vmatprep.subr.bf16.mxu1 %v3793_v46  ;;  %v7472_v46 = vld [vmem:[%s8851_s0 + $0x230] sm:$0xff] }
 0xd8f   : > { %v3902_v4 = vunpack.c.h.s8.bf16 %v7472_v46  ;;  %v3900_v52 = vunpack.c.l.s8.bf16 %v7472_v46 }
 0xd90   : > { %3737 = vmatpush1.bf16.msra.mxu0 %v3694_v48  ;;  %v4000_v48 = vunpack.c.h.s8.bf16 %v7488_v47 }
 0xd91   : > { %3835 = vmatpush1.bf16.msra.mxu1 %v3792_v49  ;;  %3738 = vmatprep.subr.bf16.mxu0 %v3693_v50  ;;  %v3901_v49 = vunpack.c.l.s8.bf16 %v7473_v40  ;;  %v3999_v50 = vunpack.c.l.s8.bf16 %v7489_v42  ;;  %v7479_v42 = vld [vmem:[%s8851_s0 + $0x268] sm:$0xff] }
 0xd92   : > { %3836 = vmatprep.subr.bf16.mxu1 %v3791_v15  ;;  %v7471_v15 = vld [vmem:[%s8851_s0 + $0x228] sm:$0xff] }
 0xd94   : > { %3739 = vmatpush1.bf16.msra.mxu0 %v3692_v53  ;;  %v3998_v53 = vunpack.c.l.s8.bf16 %v7488_v47  ;;  %v7478_v47 = vld [vmem:[%s8851_s0 + $0x260] sm:$0xff] }
 0xd95   : > { %3837 = vmatpush1.bf16.msra.mxu1 %v3790_v54  ;;  %3740 = vmatprep.subr.bf16.mxu0 %v3723_v55  ;;  %v3899_v54 = vunpack.c.h.s8.bf16 %v7471_v15  ;;  %v3997_v55 = vunpack.c.h.s8.bf16 %v7487_v51 }
 0xd96   : > { %3838 = vmatprep.subr.bf16.mxu1 %v3821_v56  ;;  %v7470_v56 = vld [vmem:[%s8851_s0 + $0x220] sm:$0xff] }
 0xd98   : > { %3741 = vmatpush2.bf16.msra.mxu0 %v3722_v12  ;;  %v3898_v12 = vunpack.c.h.s8.bf16 %v7470_v56 }
 0xd99   : > { %3839 = vmatpush2.bf16.msra.mxu1 %v3820_v60  ;;  %3742 = vmatprep.subr.bf16.mxu0 %v3721_v59  ;;  %v3996_v60 = vunpack.c.h.s8.bf16 %v7486_v9  ;;  %v3897_v59 = vunpack.c.l.s8.bf16 %v7471_v15 }
 0xd9a   : > { %3840 = vmatprep.subr.bf16.mxu1 %v3819_v61  ;;  %v3995_v61 = vunpack.c.l.s8.bf16 %v7487_v51  ;;  %v7477_v51 = vld [vmem:[%s8851_s0 + $0x258] sm:$0xff] }
 0xd9c   : > { %3743 = vmatpush2.bf16.msra.mxu0 %v3720_v0  ;;  %v8544_v0 = vmov 5  }
 0xd9d   : > { %3841 = vmatpush2.bf16.msra.mxu1 %v3818_v2  ;;  %3744 = vmatprep.subr.bf16.mxu0 %v3719_v3  ;;  %v3896_v2 = vunpack.c.l.s8.bf16 %v7470_v56  ;;  %v3994_v3 = vunpack.c.l.s8.bf16 %v7486_v9  ;;  %v7476_v9 = vld [vmem:[%s8851_s0 + $0x250] sm:$0xff] }
 0xd9e   : > { %3842 = vmatprep.subr.bf16.mxu1 %v3817_v5  ;;  %8191 = vset.pattern.permute.xlu0 %v8544_v0  ;;  %v3895_v5 = vunpack.c.h.s8.bf16 %v7469_v62  ;;  %v3908_v0 = vunpack.c.l.s8.bf16 %v7476_v9 }
 0xd9f   : > { %4060 = vperm.xlu0 %8191, %v9149_v34  }
 0xda0   : > { %3745 = vmatpush2.bf16.msra.mxu0 %v3718_v8  ;;  %v7484_v8 = vld [vmem:[%s8851_s0 + $0x290] sm:$0xff] }
 0xda1   : > { %3843 = vmatpush2.bf16.msra.mxu1 %v3816_v10  ;;  %3746 = vmatprep.subr.bf16.mxu0 %v3717_v11  ;;  %v3894_v10 = vunpack.c.h.s8.bf16 %v7468_v7  ;;  %v3992_v11 = vunpack.c.h.s8.bf16 %v7484_v8 }
 0xda2   : > { %3844 = vmatprep.subr.bf16.mxu1 %v3815_v13  ;;  %v3893_v13 = vunpack.c.l.s8.bf16 %v7469_v62  ;;  %v7475_v62 = vld [vmem:[%s8851_s0 + $0x248] sm:$0xff] }
 0xda4   : > { %3747 = vmatpush2.bf16.msra.mxu0 %v3716_v17  ;;  %v7483_v17 = vld [vmem:[%s8851_s0 + $0x288] sm:$0xff] }
 0xda5   : > { %3845 = vmatpush2.bf16.msra.mxu1 %v3814_v19  ;;  %3748 = vmatprep.subr.bf16.mxu0 %v3715_v20  ;;  %v3892_v19 = vunpack.c.l.s8.bf16 %v7468_v7  ;;  %v3990_v20 = vunpack.c.l.s8.bf16 %v7484_v8  ;;  %v3989_v18 = vunpack.c.h.s8.bf16 %v7483_v17  ;;  %v3987_v22 = vunpack.c.l.s8.bf16 %v7483_v17  ;;  %v7490_v7 = vld [vmem:[%s8851_s0 + $0x2c0] sm:$0xff] }
 0xda6   : > { %3846 = vmatprep.subr.bf16.mxu1 %v3813_v16  ;;  %v3891_v16 = vunpack.c.h.s8.bf16 %v7467_v57 }
 0xda8   : > { %3749 = vmatpush2.bf16.msra.mxu0 %v3714_v27  ;;  %v7482_v27 = vld [vmem:[%s8851_s0 + $0x280] sm:$0xff] }
 0xda9   : > { %3847 = vmatpush2.bf16.msra.mxu1 %v3812_v26  ;;  %3750 = vmatprep.subr.bf16.mxu0 %v3713_v29  ;;  %v3890_v26 = vunpack.c.h.s8.bf16 %v7466_v21  ;;  %v3988_v29 = vunpack.c.h.s8.bf16 %v7482_v27 }
 0xdaa   : > { %3848 = vmatprep.subr.bf16.mxu1 %v3811_v28  ;;  %v3889_v28 = vunpack.c.l.s8.bf16 %v7467_v57  ;;  %v7521_v57 = vld [vmem:[%s8851_s0 + $0x3b8] sm:$0xff] }
 0xdac   : > { %3751 = vmatpush2.bf16.msra.mxu0 %v3712_v25  ;;  %v7497_v25 = vld [vmem:[%s8851_s0 + $0x2f8] sm:$0xff] }
 0xdad   : > { %3849 = vmatpush2.bf16.msra.mxu1 %v3810_v30  ;;  %3752 = vmatprep.subr.bf16.mxu0 %v3711_v31  ;;  %v3888_v30 = vunpack.c.l.s8.bf16 %v7466_v21  ;;  %v3986_v31 = vunpack.c.l.s8.bf16 %v7482_v27  ;;  %v4017_v33 = vunpack.c.h.s8.bf16 %v7497_v25  ;;  %v4015_v40 = vunpack.c.l.s8.bf16 %v7497_v25  ;;  %v7520_v21 = vld [vmem:[%s8851_s0 + $0x3b0] sm:$0xff] }
 0xdae   : > { %3850 = vmatprep.subr.bf16.mxu1 %v3809_v32  ;;  %v3919_v32 = vunpack.c.h.s8.bf16 %v7481_v37 }
 0xdb0   : > { %3753 = vmatpush2.bf16.msra.mxu0 %v3710_v36  ;;  %v7496_v36 = vld [vmem:[%s8851_s0 + $0x2f0] sm:$0xff] }
 0xdb1   : > { %3851 = vmatpush2.bf16.msra.mxu1 %v3808_v38  ;;  %3754 = vmatprep.subr.bf16.mxu0 %v3709_v39  ;;  %v3918_v38 = vunpack.c.h.s8.bf16 %v7480_v35  ;;  %v4016_v39 = vunpack.c.h.s8.bf16 %v7496_v36 }
 0xdb2   : > { %3852 = vmatprep.subr.bf16.mxu1 %v3807_v23  ;;  %v3917_v23 = vunpack.c.l.s8.bf16 %v7481_v37  ;;  %v7519_v37 = vld [vmem:[%s8851_s0 + $0x3a8] sm:$0xff] }
 0xdb4   : > { %3755 = vmatpush2.bf16.msra.mxu0 %v3708_v43  ;;  %v7495_v43 = vld [vmem:[%s8851_s0 + $0x2e8] sm:$0xff] }
 0xdb5   : > { %3853 = vmatpush2.bf16.msra.mxu1 %v3806_v44  ;;  %3920 = vmatprep.subr.bf16.mxu0 %v3903_v1  ;;  %v3916_v44 = vunpack.c.l.s8.bf16 %v7480_v35  ;;  %v4014_v1 = vunpack.c.l.s8.bf16 %v7496_v36  ;;  %v4013_v46 = vunpack.c.h.s8.bf16 %v7495_v43  ;;  %v4011_v15 = vunpack.c.l.s8.bf16 %v7495_v43  ;;  %v7518_v35 = vld [vmem:[%s8851_s0 + $0x3a0] sm:$0xff]  ;;  %v7517_v43 = vld [vmem:[%s8851_s0 + $0x398] sm:$0xff] }
 0xdb6   : > { %4018 = vmatprep.subr.bf16.mxu1 %v4001_v45  ;;  %v3915_v45 = vunpack.c.h.s8.bf16 %v7479_v42  ;;  %v8545_v36 = vmov 6  }
 0xdb7   : > { %3757 = vmatmul.mubr.bf16.vlgmr.msra.gmra.mxu0 %v9169_v6  ;;  %8192 = vset.pattern.permute.xlu1 %v8545_v36 }
 0xdb8   : > { %3855 = vmatmul.mubr.bf16.vlgmr.msra.gmra.mxu1 %v9169_v6  ;;  %3921 = vmatpush1.bf16.msra.mxu0 %v3902_v4  ;;  %v7494_v4 = vld [vmem:[%s8851_s0 + $0x2e0] sm:$0xff] }
 0xdb9   : > { %4019 = vmatpush1.bf16.msra.mxu1 %v4000_v48  ;;  %3922 = vmatprep.subr.bf16.mxu0 %v3901_v49  ;;  %v3914_v48 = vunpack.c.h.s8.bf16 %v7478_v47  ;;  %v4012_v49 = vunpack.c.h.s8.bf16 %v7494_v4 }
 0xdba   : > { %4020 = vmatprep.subr.bf16.mxu1 %v3999_v50  ;;  %3952 = vmatprep.mubr.bf16.mxu0 %v9131_v24  ;;  %v3913_v50 = vunpack.c.l.s8.bf16 %v7479_v42  ;;  %v7501_v42 = vld [vmem:[%s8851_s0 + $0x318] sm:$0xff] }
 0xdbb   : > { %4050 = vmatprep.mubr.bf16.mxu1 %v9131_v24  ;;  %4158 = vperm.xlu1 %8192, %v9149_v34  }
 0xdbc   : > { %3923 = vmatpush1.bf16.msra.mxu0 %v3900_v52  ;;  %v7493_v52 = vld [vmem:[%s8851_s0 + $0x2d8] sm:$0xff] }
 0xdbd   : > { %4021 = vmatpush1.bf16.msra.mxu1 %v3998_v53  ;;  %3924 = vmatprep.subr.bf16.mxu0 %v3899_v54  ;;  %v3912_v53 = vunpack.c.l.s8.bf16 %v7478_v47  ;;  %v4010_v54 = vunpack.c.l.s8.bf16 %v7494_v4  ;;  %v4009_v56 = vunpack.c.h.s8.bf16 %v7493_v52  ;;  %v7500_v47 = vld [vmem:[%s8851_s0 + $0x310] sm:$0xff] }
 0xdbe   : > { %4022 = vmatprep.subr.bf16.mxu1 %v3997_v55  ;;  %v3911_v55 = vunpack.c.h.s8.bf16 %v7477_v51  ;;  %v7516_v4 = vld [vmem:[%s8851_s0 + $0x390] sm:$0xff] }
 0xdc0   : > { %3925 = vmatpush1.bf16.msra.mxu0 %v3898_v12  ;;  %v3910_v12 = vunpack.c.h.s8.bf16 %v7476_v9  ;;  %v7498_v9 = vld [vmem:[%s8851_s0 + $0x300] sm:$0xff] }
 0xdc1   : > { %4023 = vmatpush1.bf16.msra.mxu1 %v3996_v60  ;;  %3926 = vmatprep.subr.bf16.mxu0 %v3897_v59  ;;  %v4008_v60 = vunpack.c.h.s8.bf16 %v7492_v58  ;;  %v3909_v59 = vunpack.c.l.s8.bf16 %v7477_v51  ;;  %v4187_v51 = vunpack.c.l.s8.bf16 %v7517_v43 }
 0xdc2   : > { %4024 = vmatprep.subr.bf16.mxu1 %v3995_v61  ;;  %v4007_v61 = vunpack.c.l.s8.bf16 %v7493_v52  ;;  %v7499_v52 = vld [vmem:[%s8851_s0 + $0x308] sm:$0xff] }
 0xdc4   : > { %3927 = vmatpush1.bf16.msra.mxu0 %v3896_v2  ;;  %v4006_v2 = vunpack.c.l.s8.bf16 %v7492_v58  ;;  %v7514_v58 = vld [vmem:[%s8851_s0 + $0x380] sm:$0xff] }
 0xdc5   : > { %4025 = vmatpush1.bf16.msra.mxu1 %v3994_v3  ;;  %3928 = vmatprep.subr.bf16.mxu0 %v3895_v5  ;;  %v3907_v3 = vunpack.c.h.s8.bf16 %v7475_v62  ;;  %v4005_v5 = vunpack.c.h.s8.bf16 %v7491_v63 }
 0xdc6   : > { %4026 = vmatprep.subr.bf16.mxu1 %v3993_v41  ;;  %v7474_v41 = vld [vmem:[%s8851_s0 + $0x240] sm:$0xff] }
 0xdc7   : > { %v3906_v8 = vunpack.c.h.s8.bf16 %v7474_v41  ;;  %v3904_v17 = vunpack.c.l.s8.bf16 %v7474_v41  ;;  %v7512_v41 = vld [vmem:[%s8851_s0 + $0x370] sm:$0xff] }
 0xdc8   : > { %3929 = vmatpush1.bf16.msra.mxu0 %v3894_v10  ;;  %v4004_v10 = vunpack.c.h.s8.bf16 %v7490_v7 }
 0xdc9   : > { %4027 = vmatpush1.bf16.msra.mxu1 %v3992_v11  ;;  %3930 = vmatprep.subr.bf16.mxu0 %v3893_v13  ;;  %v3905_v11 = vunpack.c.l.s8.bf16 %v7475_v62  ;;  %v4003_v13 = vunpack.c.l.s8.bf16 %v7491_v63  ;;  %v7513_v62 = vld [vmem:[%s8851_s0 + $0x378] sm:$0xff] }
 0xdca   : > { %4028 = vmatprep.subr.bf16.mxu1 %v3991_v14  ;;  %v7505_v14 = vld [vmem:[%s8851_s0 + $0x338] sm:$0xff] }
 0xdcb   : > { %v7529_v63 = vld [vmem:[%s8851_s0 + $0x3f8] sm:$0xff] }
 0xdcc   : > { %3931 = vmatpush1.bf16.msra.mxu0 %v3892_v19  ;;  %v4002_v19 = vunpack.c.l.s8.bf16 %v7490_v7  ;;  %v7528_v7 = vld [vmem:[%s8851_s0 + $0x3f0] sm:$0xff] }
 0xdcd   : > { %4029 = vmatpush1.bf16.msra.mxu1 %v3990_v20  ;;  %3932 = vmatprep.subr.bf16.mxu0 %v3891_v16  ;;  %v4099_v20 = vunpack.c.h.s8.bf16 %v7505_v14  ;;  %v4197_v16 = vunpack.c.h.s8.bf16 %v7521_v57 }
 0xdce   : > { %4030 = vmatprep.subr.bf16.mxu1 %v3989_v18  ;;  %v7504_v18 = vld [vmem:[%s8851_s0 + $0x330] sm:$0xff] }
 0xdcf   : > { %v4098_v27 = vunpack.c.h.s8.bf16 %v7504_v18  ;;  %v4096_v25 = vunpack.c.l.s8.bf16 %v7504_v18  ;;  %v7510_v18 = vld [vmem:[%s8851_s0 + $0x360] sm:$0xff] }
 0xdd0   : > { %3933 = vmatpush1.bf16.msra.mxu0 %v3890_v26  ;;  %v4196_v26 = vunpack.c.h.s8.bf16 %v7520_v21 }
 0xdd1   : > { %4031 = vmatpush1.bf16.msra.mxu1 %v3988_v29  ;;  %3934 = vmatprep.subr.bf16.mxu0 %v3889_v28  ;;  %v4097_v29 = vunpack.c.l.s8.bf16 %v7505_v14  ;;  %v4195_v28 = vunpack.c.l.s8.bf16 %v7521_v57  ;;  %v7511_v14 = vld [vmem:[%s8851_s0 + $0x368] sm:$0xff] }
 0xdd2   : > { %4032 = vmatprep.subr.bf16.mxu1 %v3987_v22  ;;  %v7503_v22 = vld [vmem:[%s8851_s0 + $0x328] sm:$0xff] }
 0xdd3   : > { %v7527_v57 = vld [vmem:[%s8851_s0 + $0x3e8] sm:$0xff] }
 0xdd4   : > { %3935 = vmatpush1.bf16.msra.mxu0 %v3888_v30  ;;  %v4194_v30 = vunpack.c.l.s8.bf16 %v7520_v21  ;;  %v7526_v21 = vld [vmem:[%s8851_s0 + $0x3e0] sm:$0xff] }
 0xdd5   : > { %4033 = vmatpush1.bf16.msra.mxu1 %v3986_v31  ;;  %3936 = vmatprep.subr.bf16.mxu0 %v3919_v32  ;;  %v4095_v31 = vunpack.c.h.s8.bf16 %v7503_v22  ;;  %v4193_v32 = vunpack.c.h.s8.bf16 %v7519_v37 }
 0xdd6   : > { %4034 = vmatprep.subr.bf16.mxu1 %v4017_v33  ;;  %v7502_v33 = vld [vmem:[%s8851_s0 + $0x320] sm:$0xff] }
 0xdd8   : > { %3937 = vmatpush2.bf16.msra.mxu0 %v3918_v38  ;;  %v4094_v38 = vunpack.c.h.s8.bf16 %v7502_v33 }
 0xdd9   : > { %4035 = vmatpush2.bf16.msra.mxu1 %v4016_v39  ;;  %3938 = vmatprep.subr.bf16.mxu0 %v3917_v23  ;;  %v4192_v39 = vunpack.c.h.s8.bf16 %v7518_v35  ;;  %v4093_v23 = vunpack.c.l.s8.bf16 %v7503_v22  ;;  %v7509_v22 = vld [vmem:[%s8851_s0 + $0x358] sm:$0xff] }
 0xdda   : > { %4036 = vmatprep.subr.bf16.mxu1 %v4015_v40  ;;  %v4191_v40 = vunpack.c.l.s8.bf16 %v7519_v37  ;;  %v7525_v37 = vld [vmem:[%s8851_s0 + $0x3d8] sm:$0xff] }
 0xddc   : > { %3939 = vmatpush2.bf16.msra.mxu0 %v3916_v44  ;;  %v4092_v44 = vunpack.c.l.s8.bf16 %v7502_v33  ;;  %v7508_v33 = vld [vmem:[%s8851_s0 + $0x350] sm:$0xff] }
 0xddd   : > { %4037 = vmatpush2.bf16.msra.mxu1 %v4014_v1  ;;  %3940 = vmatprep.subr.bf16.mxu0 %v3915_v45  ;;  %v4190_v1 = vunpack.c.l.s8.bf16 %v7518_v35  ;;  %v4091_v45 = vunpack.c.h.s8.bf16 %v7501_v42  ;;  %v7524_v35 = vld [vmem:[%s8851_s0 + $0x3d0] sm:$0xff]  ;;  %v4106_v36 = vunpack.c.h.s8.bf16 %v7508_v33 }
 0xdde   : > { %4038 = vmatprep.subr.bf16.mxu1 %v4013_v46  ;;  %v4189_v46 = vunpack.c.h.s8.bf16 %v7517_v43  ;;  %v4104_v43 = vunpack.c.l.s8.bf16 %v7508_v33 }
 0xde0   : > { %3941 = vmatpush2.bf16.msra.mxu0 %v3914_v48  ;;  %v8546_v48 = vmov 7  }
 0xde1   : > { %4039 = vmatpush2.bf16.msra.mxu1 %v4012_v49  ;;  %3942 = vmatprep.subr.bf16.mxu0 %v3913_v50  ;;  %v4090_v49 = vunpack.c.h.s8.bf16 %v7500_v47  ;;  %v4188_v50 = vunpack.c.h.s8.bf16 %v7516_v4 }
 0xde2   : > { %4040 = vmatprep.subr.bf16.mxu1 %v4011_v15  ;;  %8193 = vset.pattern.permute.xlu1 %v8546_v48  ;;  %v4089_v15 = vunpack.c.l.s8.bf16 %v7501_v42  ;;  %v7523_v42 = vld [vmem:[%s8851_s0 + $0x3c8] sm:$0xff] }
 0xde3   : > { %4256 = vperm.xlu1 %8193, %v9149_v34   ;;  %v4087_v34 = vunpack.c.h.s8.bf16 %v7499_v52 }
 0xde4   : > { %3943 = vmatpush2.bf16.msra.mxu0 %v3912_v53  ;;  %v7515_v53 = vld [vmem:[%s8851_s0 + $0x388] sm:$0xff] }
 0xde5   : > { %4041 = vmatpush2.bf16.msra.mxu1 %v4010_v54  ;;  %3944 = vmatprep.subr.bf16.mxu0 %v3911_v55  ;;  %v4088_v54 = vunpack.c.l.s8.bf16 %v7500_v47  ;;  %v4186_v55 = vunpack.c.l.s8.bf16 %v7516_v4  ;;  %v7522_v47 = vld [vmem:[%s8851_s0 + $0x3c0] sm:$0xff] }
 0xde6   : > { %4042 = vmatprep.subr.bf16.mxu1 %v4009_v56  ;;  %v4185_v56 = vunpack.c.h.s8.bf16 %v7515_v53  ;;  %v4200_v48 = vunpack.c.h.s8.bf16 %v7522_v47 }
 0xde8   : > { %3945 = vmatpush2.bf16.msra.mxu0 %v3910_v12  ;;  %v4086_v12 = vunpack.c.h.s8.bf16 %v7498_v9 }
 0xde9   : > { %4043 = vmatpush2.bf16.msra.mxu1 %v4008_v60  ;;  %3946 = vmatprep.subr.bf16.mxu0 %v3909_v59  ;;  %v4184_v60 = vunpack.c.h.s8.bf16 %v7514_v58  ;;  %v4085_v59 = vunpack.c.l.s8.bf16 %v7499_v52  ;;  %v3571_v52 = vpop.permute.xlu0 %3570 }
 0xdea   : > { %4044 = vmatprep.subr.bf16.mxu1 %v4007_v61  ;;  %v4183_v61 = vunpack.c.l.s8.bf16 %v7515_v53 }
 0xdec   : > { %3947 = vmatpush2.bf16.msra.mxu0 %v3908_v0  ;;  %v4084_v0 = vunpack.c.l.s8.bf16 %v7498_v9  ;;  %v7552_v9 = vld [vmem:[%s8851_s0 + $0x4b0] sm:$0xff] }
 0xded   : > { %4045 = vmatpush2.bf16.msra.mxu1 %v4006_v2  ;;  %3948 = vmatprep.subr.bf16.mxu0 %v3907_v3  ;;  %v4182_v2 = vunpack.c.l.s8.bf16 %v7514_v58  ;;  %v4115_v3 = vunpack.c.h.s8.bf16 %v7513_v62 }
 0xdee   : > { %4046 = vmatprep.subr.bf16.mxu1 %v4005_v5  ;;  %v4213_v5 = vunpack.c.h.s8.bf16 %v7529_v63 }
 0xdf0   : > { %3949 = vmatpush2.bf16.msra.mxu0 %v3906_v8  ;;  %v4114_v8 = vunpack.c.h.s8.bf16 %v7512_v41 }
 0xdf1   : > { %4047 = vmatpush2.bf16.msra.mxu1 %v4004_v10  ;;  %3950 = vmatprep.subr.bf16.mxu0 %v3905_v11  ;;  %v4212_v10 = vunpack.c.h.s8.bf16 %v7528_v7  ;;  %v4113_v11 = vunpack.c.l.s8.bf16 %v7513_v62  ;;  %v7535_v62 = vld [vmem:[%s8851_s0 + $0x428] sm:$0xff] }
 0xdf2   : > { %4048 = vmatprep.subr.bf16.mxu1 %v4003_v13  ;;  %v4211_v13 = vunpack.c.l.s8.bf16 %v7529_v63  ;;  %v7551_v63 = vld [vmem:[%s8851_s0 + $0x4a8] sm:$0xff] }
 0xdf4   : > { %3951 = vmatpush2.bf16.msra.mxu0 %v3904_v17  ;;  %v4112_v17 = vunpack.c.l.s8.bf16 %v7512_v41 }
 0xdf5   : > { %4049 = vmatpush2.bf16.msra.mxu1 %v4002_v19  ;;  %4116 = vmatprep.subr.bf16.mxu0 %v4099_v20  ;;  %v4210_v19 = vunpack.c.l.s8.bf16 %v7528_v7  ;;  %v4111_v20 = vunpack.c.h.s8.bf16 %v7511_v14 }
 0xdf6   : > { %4214 = vmatprep.subr.bf16.mxu1 %v4197_v16  ;;  %v4209_v16 = vunpack.c.h.s8.bf16 %v7527_v57 }
 0xdf7   : > { %3953 = vmatmul.mubr.bf16.vlgmr.msra.gmra.mxu0 %v9169_v6 }
 0xdf8   : > { %4051 = vmatmul.mubr.bf16.vlgmr.msra.gmra.mxu1 %v9169_v6  ;;  %4117 = vmatpush1.bf16.msra.mxu0 %v4098_v27  ;;  %v4110_v27 = vunpack.c.h.s8.bf16 %v7510_v18 }
 0xdf9   : > { %4215 = vmatpush1.bf16.msra.mxu1 %v4196_v26  ;;  %4118 = vmatprep.subr.bf16.mxu0 %v4097_v29  ;;  %v4208_v26 = vunpack.c.h.s8.bf16 %v7526_v21  ;;  %v4109_v29 = vunpack.c.l.s8.bf16 %v7511_v14 }
 0xdfa   : > { %4216 = vmatprep.subr.bf16.mxu1 %v4195_v28  ;;  %4148 = vmatprep.mubr.bf16.mxu0 %v9131_v24  ;;  %v4207_v28 = vunpack.c.l.s8.bf16 %v7527_v57  ;;  %v4291_v57 = vunpack.c.h.s8.bf16 %v7535_v62 }
 0xdfb   : > { %4246 = vmatprep.mubr.bf16.mxu1 %v9131_v24 }
 0xdfc   : > { %4119 = vmatpush1.bf16.msra.mxu0 %v4096_v25  ;;  %v4108_v25 = vunpack.c.l.s8.bf16 %v7510_v18 }
 0xdfd   : > { %4217 = vmatpush1.bf16.msra.mxu1 %v4194_v30  ;;  %4120 = vmatprep.subr.bf16.mxu0 %v4095_v31  ;;  %v4206_v30 = vunpack.c.l.s8.bf16 %v7526_v21  ;;  %v4107_v31 = vunpack.c.h.s8.bf16 %v7509_v22 }
 0xdfe   : > { %4218 = vmatprep.subr.bf16.mxu1 %v4193_v32  ;;  %v4205_v32 = vunpack.c.h.s8.bf16 %v7525_v37 }
 0xe00   : > { %4121 = vmatpush1.bf16.msra.mxu0 %v4094_v38  ;;  %v4204_v38 = vunpack.c.h.s8.bf16 %v7524_v35 }
 0xe01   : > { %4219 = vmatpush1.bf16.msra.mxu1 %v4192_v39  ;;  %4122 = vmatprep.subr.bf16.mxu0 %v4093_v23  ;;  %v4105_v39 = vunpack.c.l.s8.bf16 %v7509_v22  ;;  %v4203_v23 = vunpack.c.l.s8.bf16 %v7525_v37 }
 0xe02   : > { %4220 = vmatprep.subr.bf16.mxu1 %v4191_v40  ;;  %v7507_v40 = vld [vmem:[%s8851_s0 + $0x348] sm:$0xff] }
 0xe04   : > { %4123 = vmatpush1.bf16.msra.mxu0 %v4092_v44  ;;  %v4202_v44 = vunpack.c.l.s8.bf16 %v7524_v35  ;;  %v7533_v35 = vld [vmem:[%s8851_s0 + $0x418] sm:$0xff] }
 0xe05   : > { %4221 = vmatpush1.bf16.msra.mxu1 %v4190_v1  ;;  %4124 = vmatprep.subr.bf16.mxu0 %v4091_v45  ;;  %v4103_v1 = vunpack.c.h.s8.bf16 %v7507_v40  ;;  %v4201_v45 = vunpack.c.h.s8.bf16 %v7523_v42 }
 0xe06   : > { %4222 = vmatprep.subr.bf16.mxu1 %v4189_v46  ;;  %v7506_v46 = vld [vmem:[%s8851_s0 + $0x340] sm:$0xff] }
 0xe07   : > { %v4102_v4 = vunpack.c.h.s8.bf16 %v7506_v46  ;;  %v4100_v53 = vunpack.c.l.s8.bf16 %v7506_v46 }
 0xe08   : > { %4125 = vmatpush1.bf16.msra.mxu0 %v4090_v49  ;;  %v4101_v49 = vunpack.c.l.s8.bf16 %v7507_v40 }
 0xe09   : > { %4223 = vmatpush1.bf16.msra.mxu1 %v4188_v50  ;;  %4126 = vmatprep.subr.bf16.mxu0 %v4089_v15  ;;  %v4199_v50 = vunpack.c.l.s8.bf16 %v7523_v42  ;;  %v7537_v15 = vld [vmem:[%s8851_s0 + $0x438] sm:$0xff]  ;;  %v4287_v42 = vunpack.c.h.s8.bf16 %v7533_v35 }
 0xe0a   : > { %4224 = vmatprep.subr.bf16.mxu1 %v4187_v51  ;;  %v7553_v51 = vld [vmem:[%s8851_s0 + $0x4b8] sm:$0xff] }
 0xe0c   : > { %4127 = vmatpush1.bf16.msra.mxu0 %v4088_v54  ;;  %v4198_v54 = vunpack.c.l.s8.bf16 %v7522_v47  ;;  %v4285_v47 = vunpack.c.l.s8.bf16 %v7533_v35 }
 0xe0d   : > { %4225 = vmatpush1.bf16.msra.mxu1 %v4186_v55  ;;  %4128 = vmatprep.subr.bf16.mxu0 %v4087_v34  ;;  %v4295_v55 = vunpack.c.h.s8.bf16 %v7537_v15  ;;  %v4393_v34 = vunpack.c.h.s8.bf16 %v7553_v51 }
 0xe0e   : > { %4226 = vmatprep.subr.bf16.mxu1 %v4185_v56  ;;  %v7536_v56 = vld [vmem:[%s8851_s0 + $0x430] sm:$0xff] }
 0xe0f   : > { %v4294_v58 = vunpack.c.h.s8.bf16 %v7536_v56  ;;  %v4292_v7 = vunpack.c.l.s8.bf16 %v7536_v56 }
 0xe10   : > { %4129 = vmatpush1.bf16.msra.mxu0 %v4086_v12  ;;  %v4392_v12 = vunpack.c.h.s8.bf16 %v7552_v9 }
 0xe11   : > { %4227 = vmatpush1.bf16.msra.mxu1 %v4184_v60  ;;  %4130 = vmatprep.subr.bf16.mxu0 %v4085_v59  ;;  %v3669_v60 = vpop.permute.xlu0 %3668  ;;  %v4293_v59 = vunpack.c.l.s8.bf16 %v7537_v15 }
 0xe12   : > { %4228 = vmatprep.subr.bf16.mxu1 %v4183_v61  ;;  %v4391_v61 = vunpack.c.l.s8.bf16 %v7553_v51 }
 0xe14   : > { %4131 = vmatpush1.bf16.msra.mxu0 %v4084_v0  ;;  %v3470_v0 = vld [vmem:[#allocation5 + $0x8] sm:$0xff] }
 0xe15   : > { %4229 = vmatpush1.bf16.msra.mxu1 %v4182_v2  ;;  %4132 = vmatprep.subr.bf16.mxu0 %v4115_v3 }
 0xe16   : > { %4230 = vmatprep.subr.bf16.mxu1 %v4213_v5 }
 0xe18   : > { %4133 = vmatpush2.bf16.msra.mxu0 %v4114_v8  ;;  %v4390_v8 = vunpack.c.l.s8.bf16 %v7552_v9 }
 0xe19   : > { %4231 = vmatpush2.bf16.msra.mxu1 %v4212_v10  ;;  %4134 = vmatprep.subr.bf16.mxu0 %v4113_v11  ;;  %v7534_v10 = vld [vmem:[%s8851_s0 + $0x420] sm:$0xff]  ;;  %v3471_v11 = vld [vmem:[#allocation5] sm:$0xff] }
 0xe1a   : > { %4232 = vmatprep.subr.bf16.mxu1 %v4211_v13 }
 0xe1c   : > { %4135 = vmatpush2.bf16.msra.mxu0 %v4112_v17  ;;  %v4389_v17 = vunpack.c.h.s8.bf16 %v7551_v63 }
 0xe1d   : > { %4233 = vmatpush2.bf16.msra.mxu1 %v4210_v19  ;;  %4136 = vmatprep.subr.bf16.mxu0 %v4111_v20  ;;  %v7550_v19 = vld [vmem:[%s8851_s0 + $0x4a0] sm:$0xff] }
 0xe1e   : > { %4234 = vmatprep.subr.bf16.mxu1 %v4209_v16  ;;  %v4388_v37 = vunpack.c.h.s8.bf16 %v7550_v19  ;;  %v4386_v40 = vunpack.c.l.s8.bf16 %v7550_v19 }
 0xe20   : > { %4137 = vmatpush2.bf16.msra.mxu0 %v4110_v27 }
 0xe21   : > { %4235 = vmatpush2.bf16.msra.mxu1 %v4208_v26  ;;  %4138 = vmatprep.subr.bf16.mxu0 %v4109_v29  ;;  %v4290_v26 = vunpack.c.h.s8.bf16 %v7534_v10  ;;  %v8547_v29 = vmov 8  }
 0xe22   : > { %4236 = vmatprep.subr.bf16.mxu1 %v4207_v28  ;;  %8194 = vset.pattern.permute.xlu0 %v8547_v29 }
 0xe24   : > { %4139 = vmatpush2.bf16.msra.mxu0 %v4108_v25 }
 0xe25   : > { %4237 = vmatpush2.bf16.msra.mxu1 %v4206_v30  ;;  %4140 = vmatprep.subr.bf16.mxu0 %v4107_v31  ;;  %v4289_v31 = vunpack.c.l.s8.bf16 %v7535_v62 }
 0xe26   : > { %4238 = vmatprep.subr.bf16.mxu1 %v4205_v32  ;;  %v4387_v32 = vunpack.c.l.s8.bf16 %v7551_v63  ;;  %v7544_v63 = vld [vmem:[%s8851_s0 + $0x470] sm:$0xff] }
 0xe28   : > { %4141 = vmatpush2.bf16.msra.mxu0 %v4106_v36  ;;  %v7549_v36 = vld [vmem:[%s8851_s0 + $0x498] sm:$0xff] }
 0xe29   : > { %4239 = vmatpush2.bf16.msra.mxu1 %v4204_v38  ;;  %4142 = vmatprep.subr.bf16.mxu0 %v4105_v39  ;;  %v9300_v38 = vld [vmem:[%s9146_s24] sm:$0xff]  ;;  %v8548_v39 = vmov 9  }
 0xe2a   : > { %4240 = vmatprep.subr.bf16.mxu1 %v4203_v23  ;;  %4354 = vperm.xlu0 %8194, %v9300_v38   ;;  %v4288_v23 = vunpack.c.l.s8.bf16 %v7534_v10  ;;  %v4308_v10 = vunpack.c.l.s8.bf16 %v7544_v63 }
 0xe2b   : > { %8195 = vset.pattern.permute.xlu1 %v8548_v39  ;;  %v7539_v39 = vld [vmem:[%s8851_s0 + $0x448] sm:$0xff] }
 0xe2c   : > { %4143 = vmatpush2.bf16.msra.mxu0 %v4104_v43  ;;  %4452 = vperm.xlu1 %8195, %v9300_v38   ;;  %v4385_v43 = vunpack.c.h.s8.bf16 %v7549_v36 }
 0xe2d   : > { %4241 = vmatpush2.bf16.msra.mxu1 %v4202_v44  ;;  %4144 = vmatprep.subr.bf16.mxu0 %v4103_v1  ;;  %v7532_v44 = vld [vmem:[%s8851_s0 + $0x410] sm:$0xff] }
 0xe2e   : > { %4242 = vmatprep.subr.bf16.mxu1 %v4201_v45  ;;  %v7548_v1 = vld [vmem:[%s8851_s0 + $0x490] sm:$0xff]  ;;  %v4286_v45 = vunpack.c.h.s8.bf16 %v7532_v44 }
 0xe2f   : > { %v4384_v46 = vunpack.c.h.s8.bf16 %v7548_v1  ;;  %v4382_v15 = vunpack.c.l.s8.bf16 %v7548_v1  ;;  %v7538_v1 = vld [vmem:[%s8851_s0 + $0x440] sm:$0xff] }
 0xe30   : > { %4145 = vmatpush2.bf16.msra.mxu0 %v4102_v4  ;;  %v4383_v4 = vunpack.c.l.s8.bf16 %v7549_v36 }
 0xe31   : > { %4243 = vmatpush2.bf16.msra.mxu1 %v4200_v48  ;;  %4146 = vmatprep.subr.bf16.mxu0 %v4101_v49  ;;  %v7531_v48 = vld [vmem:[%s8851_s0 + $0x408] sm:$0xff] }
 0xe32   : > { %4244 = vmatprep.subr.bf16.mxu1 %v4199_v50  ;;  %v7547_v49 = vld [vmem:[%s8851_s0 + $0x488] sm:$0xff]  ;;  %v4284_v50 = vunpack.c.l.s8.bf16 %v7532_v44  ;;  %v4283_v51 = vunpack.c.h.s8.bf16 %v7531_v48  ;;  %v4281_v56 = vunpack.c.l.s8.bf16 %v7531_v48 }
 0xe33   : > { %v4379_v9 = vunpack.c.l.s8.bf16 %v7547_v49 }
 0xe34   : > { %4147 = vmatpush2.bf16.msra.mxu0 %v4100_v53  ;;  %v7530_v53 = vld [vmem:[%s8851_s0 + $0x400] sm:$0xff] }
 0xe35   : > { %4245 = vmatpush2.bf16.msra.mxu1 %v4198_v54  ;;  %4312 = vmatprep.subr.bf16.mxu0 %v4295_v55  ;;  %v7546_v54 = vld [vmem:[%s8851_s0 + $0x480] sm:$0xff]  ;;  %v4282_v55 = vunpack.c.h.s8.bf16 %v7530_v53 }
 0xe36   : > { %4410 = vmatprep.subr.bf16.mxu1 %v4393_v34  ;;  %v4380_v34 = vunpack.c.h.s8.bf16 %v7546_v54 }
 0xe37   : > { %v3561_v2 = vpop.f32.mrf.mxu0  ;;  %4149 = vmatmul.mubr.bf16.vlgmr.msra.gmra.mxu0 %v9169_v6 }
 0xe38   : > { %v3660_v3 = vpop.f32.mrf.mxu1  ;;  %4247 = vmatmul.mubr.bf16.vlgmr.msra.gmra.mxu1 %v9169_v6  ;;  %v3573_v5 = vmul.f32 %v3571_v52, %v3561_v2  ;;  %4313 = vmatpush1.bf16.msra.mxu0 %v4294_v58  ;;  %v7545_v58 = vld [vmem:[%s8851_s0 + $0x478] sm:$0xff]  ;;  %v4310_v2 = vunpack.c.h.s8.bf16 %v7544_v63 }
 0xe39   : > { %4411 = vmatpush1.bf16.msra.mxu1 %v4392_v12  ;;  %v3671_v41 = vmul.f32 %v3669_v60, %v3660_v3  ;;  %v3563_v13 = vpop.f32.mrf.mxu0  ;;  %4314 = vmatprep.subr.bf16.mxu0 %v4293_v59  ;;  %v7561_v12 = vld [vmem:[%s8851_s0 + $0x4f8] sm:$0xff]  ;;  %v4378_v59 = vunpack.c.l.s8.bf16 %v7546_v54 }
 0xe3a   : > { %v3662_v14 = vpop.f32.mrf.mxu1  ;;  %4412 = vmatprep.subr.bf16.mxu1 %v4391_v61  ;;  %v3575_v20 = vadd.f32 %v3573_v5, %v3470_v0  ;;  %v3574_v16 = vmul.f32 %v3571_v52, %v3563_v13  ;;  %4344 = vmatprep.mubr.bf16.mxu0 %v9131_v24  ;;  %v4381_v52 = vunpack.c.h.s8.bf16 %v7547_v49  ;;  %v4311_v61 = vunpack.c.h.s8.bf16 %v7545_v58  ;;  %v7560_v0 = vld [vmem:[%s8851_s0 + $0x4f0] sm:$0xff]  ;;  %v7569_v49 = vld [vmem:[%s8851_s0 + $0x538] sm:$0xff] }
 0xe3b   : > { %v3672_v18 = vmul.f32 %v3669_v60, %v3662_v14  ;;  %4442 = vmatprep.mubr.bf16.mxu1 %v9131_v24  ;;  %v3565_v21 = vpop.f32.mrf.mxu0  ;;  %v4280_v60 = vunpack.c.l.s8.bf16 %v7530_v53  ;;  %v4409_v62 = vunpack.c.h.s8.bf16 %v7561_v12  ;;  %v4408_v3 = vunpack.c.h.s8.bf16 %v7560_v0 }
 0xe3c   : > { %v3664_v27 = vpop.f32.mrf.mxu1  ;;  %v3576_v28 = vadd.f32 %v3574_v16, %v3471_v11  ;;  %v9293_v22 = vadd.f32 %v3671_v41, %v3575_v20  ;;  %4315 = vmatpush1.bf16.msra.mxu0 %v4292_v7  ;;  %v4309_v5 = vunpack.c.l.s8.bf16 %v7545_v58  ;;  %v4407_v41 = vunpack.c.l.s8.bf16 %v7561_v12  ;;  %v7543_v7 = vld [vmem:[%s8851_s0 + $0x468] sm:$0xff]  ;;  %v7541_v21 = vld [vmem:[%s8851_s0 + $0x458] sm:$0xff] }
 0xe3d   : > { %4413 = vmatpush1.bf16.msra.mxu1 %v4390_v8  ;;  %v3566_v25 = vpop.f32.mrf.mxu0  ;;  %4316 = vmatprep.subr.bf16.mxu0 %v4291_v57  ;;  %v7559_v8 = vld [vmem:[%s8851_s0 + $0x4e8] sm:$0xff]  ;;  %v4406_v11 = vunpack.c.l.s8.bf16 %v7560_v0  ;;  %v4307_v13 = vunpack.c.h.s8.bf16 %v7543_v7  ;;  %v7542_v57 = vld [vmem:[%s8851_s0 + $0x460] sm:$0xff]  ;;  %v4305_v16 = vunpack.c.l.s8.bf16 %v7543_v7  ;;  %v7557_v27 = vld [vmem:[%s8851_s0 + $0x4d8] sm:$0xff]  ;;  %v4301_v35 = vunpack.c.l.s8.bf16 %v7541_v21 }
 0xe3e   : > { %v3665_v30 = vpop.f32.mrf.mxu1  ;;  %4414 = vmatprep.subr.bf16.mxu1 %v4389_v17  ;;  %v9295_v33 = vadd.f32 %v3672_v18, %v3576_v28  ;;  %v4405_v14 = vunpack.c.h.s8.bf16 %v7559_v8  ;;  %v7558_v17 = vld [vmem:[%s8851_s0 + $0x4e0] sm:$0xff]  ;;  %v4306_v19 = vunpack.c.h.s8.bf16 %v7542_v57  ;;  %v4403_v18 = vunpack.c.l.s8.bf16 %v7559_v8  ;;  %v7540_v25 = vld [vmem:[%s8851_s0 + $0x450] sm:$0xff] }
 0xe3f   : > { %v4404_v20 = vunpack.c.h.s8.bf16 %v7558_v17  ;;  %v4402_v29 = vunpack.c.l.s8.bf16 %v7558_v17  ;;  %v4303_v28 = vunpack.c.h.s8.bf16 %v7541_v21  ;;  %v7556_v30 = vld [vmem:[%s8851_s0 + $0x4d0] sm:$0xff]  ;;  %v4399_v36 = vunpack.c.l.s8.bf16 %v7557_v27 }
 0xe40   : > { %4317 = vmatpush1.bf16.msra.mxu0 %v4290_v26  ;;  %v4304_v26 = vunpack.c.l.s8.bf16 %v7542_v57  ;;  %v4491_v53 = vunpack.c.h.s8.bf16 %v7569_v49  ;;  %v4489_v12 = vunpack.c.l.s8.bf16 %v7569_v49 }
 0xe41   : > { %4415 = vmatpush1.bf16.msra.mxu1 %v4388_v37  ;;  %4318 = vmatprep.subr.bf16.mxu0 %v4289_v31  ;;  %v4401_v37 = vunpack.c.h.s8.bf16 %v7557_v27  ;;  %v4302_v31 = vunpack.c.h.s8.bf16 %v7540_v25 }
 0xe42   : > { %4416 = vmatprep.subr.bf16.mxu1 %v4387_v32  ;;  %v4400_v32 = vunpack.c.h.s8.bf16 %v7556_v30 }
 0xe44   : > { %4319 = vmatpush1.bf16.msra.mxu0 %v4288_v23  ;;  %v7555_v23 = vld [vmem:[%s8851_s0 + $0x4c8] sm:$0xff] }
 0xe45   : > { %4417 = vmatpush1.bf16.msra.mxu1 %v4386_v40  ;;  %4320 = vmatprep.subr.bf16.mxu0 %v4287_v42  ;;  %v4300_v40 = vunpack.c.l.s8.bf16 %v7540_v25  ;;  %v4398_v42 = vunpack.c.l.s8.bf16 %v7556_v30  ;;  %v4397_v44 = vunpack.c.h.s8.bf16 %v7555_v23  ;;  %v4395_v48 = vunpack.c.l.s8.bf16 %v7555_v23  ;;  %v7565_v30 = vld [vmem:[%s8851_s0 + $0x518] sm:$0xff]  ;;  %v7564_v23 = vld [vmem:[%s8851_s0 + $0x510] sm:$0xff] }
 0xe46   : > { %4418 = vmatprep.subr.bf16.mxu1 %v4385_v43  ;;  %v4299_v43 = vunpack.c.h.s8.bf16 %v7539_v39 }
 0xe48   : > { %4321 = vmatpush1.bf16.msra.mxu0 %v4286_v45  ;;  %v7554_v45 = vld [vmem:[%s8851_s0 + $0x4c0] sm:$0xff] }
 0xe49   : > { %4419 = vmatpush1.bf16.msra.mxu1 %v4384_v46  ;;  %4322 = vmatprep.subr.bf16.mxu0 %v4285_v47  ;;  %v4298_v46 = vunpack.c.h.s8.bf16 %v7538_v1  ;;  %v4396_v47 = vunpack.c.h.s8.bf16 %v7554_v45 }
 0xe4a   : > { %4420 = vmatprep.subr.bf16.mxu1 %v4383_v4  ;;  %v4297_v4 = vunpack.c.l.s8.bf16 %v7539_v39 }
 0xe4c   : > { %4323 = vmatpush1.bf16.msra.mxu0 %v4284_v50  ;;  %v7585_v50 = vld [vmem:[%s8851_s0 + $0x5b8] sm:$0xff] }
 0xe4d   : > { %4421 = vmatpush1.bf16.msra.mxu1 %v4382_v15  ;;  %4324 = vmatprep.subr.bf16.mxu0 %v4283_v51  ;;  %v3767_v15 = vpop.permute.xlu1 %3766  ;;  %v4296_v51 = vunpack.c.l.s8.bf16 %v7538_v1  ;;  %v4589_v54 = vunpack.c.h.s8.bf16 %v7585_v50 }
 0xe4e   : > { %4422 = vmatprep.subr.bf16.mxu1 %v4381_v52  ;;  %v4394_v52 = vunpack.c.l.s8.bf16 %v7554_v45  ;;  %v7563_v45 = vld [vmem:[%s8851_s0 + $0x508] sm:$0xff] }
 0xe50   : > { %4325 = vmatpush1.bf16.msra.mxu0 %v4282_v55  ;;  %v7568_v55 = vld [vmem:[%s8851_s0 + $0x530] sm:$0xff] }
 0xe51   : > { %4423 = vmatpush1.bf16.msra.mxu1 %v4380_v34  ;;  %4326 = vmatprep.subr.bf16.mxu0 %v4281_v56  ;;  %v7584_v34 = vld [vmem:[%s8851_s0 + $0x5b0] sm:$0xff]  ;;  %v4490_v56 = vunpack.c.h.s8.bf16 %v7568_v55  ;;  %v3865_v58 = vpop.permute.xlu1 %3864 }
 0xe52   : > { %4424 = vmatprep.subr.bf16.mxu1 %v4379_v9  ;;  %v4588_v9 = vunpack.c.h.s8.bf16 %v7584_v34 }
 0xe54   : > { %4327 = vmatpush1.bf16.msra.mxu0 %v4280_v60  ;;  %v4587_v60 = vunpack.c.l.s8.bf16 %v7585_v50  ;;  %v7562_v50 = vld [vmem:[%s8851_s0 + $0x500] sm:$0xff] }
 0xe55   : > { %4425 = vmatpush1.bf16.msra.mxu1 %v4378_v59  ;;  %4328 = vmatprep.subr.bf16.mxu0 %v4311_v61  ;;  %v7567_v59 = vld [vmem:[%s8851_s0 + $0x528] sm:$0xff] }
 0xe56   : > { %4426 = vmatprep.subr.bf16.mxu1 %v4409_v62  ;;  %v7583_v61 = vld [vmem:[%s8851_s0 + $0x5a8] sm:$0xff] }
 0xe58   : > { %4329 = vmatpush2.bf16.msra.mxu0 %v4310_v2 }
 0xe59   : > { %4427 = vmatpush2.bf16.msra.mxu1 %v4408_v3  ;;  %4330 = vmatprep.subr.bf16.mxu0 %v4309_v5  ;;  %v4488_v3 = vunpack.c.l.s8.bf16 %v7568_v55  ;;  %v4586_v5 = vunpack.c.l.s8.bf16 %v7584_v34  ;;  %v7577_v55 = vld [vmem:[%s8851_s0 + $0x578] sm:$0xff] }
 0xe5a   : > { %4428 = vmatprep.subr.bf16.mxu1 %v4407_v41  ;;  %v7566_v41 = vld [vmem:[%s8851_s0 + $0x520] sm:$0xff]  ;;  %v7593_v34 = vld [vmem:[%s8851_s0 + $0x5f8] sm:$0xff] }
 0xe5c   : > { %4331 = vmatpush2.bf16.msra.mxu0 %v4308_v10  ;;  %v4487_v10 = vunpack.c.h.s8.bf16 %v7567_v59 }
 0xe5d   : > { %4429 = vmatpush2.bf16.msra.mxu1 %v4406_v11  ;;  %4332 = vmatprep.subr.bf16.mxu0 %v4307_v13  ;;  %v4585_v11 = vunpack.c.h.s8.bf16 %v7583_v61  ;;  %v7582_v13 = vld [vmem:[%s8851_s0 + $0x5a0] sm:$0xff] }
 0xe5e   : > { %4430 = vmatprep.subr.bf16.mxu1 %v4405_v14 }
 0xe60   : > { %4333 = vmatpush2.bf16.msra.mxu0 %v4306_v19 }
 0xe61   : > { %4431 = vmatpush2.bf16.msra.mxu1 %v4404_v20  ;;  %4334 = vmatprep.subr.bf16.mxu0 %v4305_v16  ;;  %v4486_v16 = vunpack.c.h.s8.bf16 %v7566_v41 }
 0xe62   : > { %4432 = vmatprep.subr.bf16.mxu1 %v4403_v18  ;;  %v8549_v18 = vmov 10  }
 0xe63   : > { %8196 = vset.pattern.permute.xlu1 %v8549_v18 }
 0xe64   : > { %4335 = vmatpush2.bf16.msra.mxu0 %v4304_v26  ;;  %4550 = vperm.xlu1 %8196, %v9300_v38  }
 0xe65   : > { %4433 = vmatpush2.bf16.msra.mxu1 %v4402_v29  ;;  %4336 = vmatprep.subr.bf16.mxu0 %v4303_v28  ;;  %v4485_v28 = vunpack.c.l.s8.bf16 %v7567_v59  ;;  %v7592_v59 = vld [vmem:[%s8851_s0 + $0x5f0] sm:$0xff] }
 0xe66   : > { %4434 = vmatprep.subr.bf16.mxu1 %v4401_v37  ;;  %v4583_v37 = vunpack.c.l.s8.bf16 %v7583_v61 }
 0xe68   : > { %4337 = vmatpush2.bf16.msra.mxu0 %v4302_v31  ;;  %v7581_v31 = vld [vmem:[%s8851_s0 + $0x598] sm:$0xff] }
 0xe69   : > { %4435 = vmatpush2.bf16.msra.mxu1 %v4400_v32  ;;  %4338 = vmatprep.subr.bf16.mxu0 %v4301_v35  ;;  %v4484_v32 = vunpack.c.l.s8.bf16 %v7566_v41  ;;  %v4582_v35 = vunpack.c.l.s8.bf16 %v7582_v13  ;;  %v4581_v39 = vunpack.c.h.s8.bf16 %v7581_v31  ;;  %v4579_v1 = vunpack.c.l.s8.bf16 %v7581_v31 }
 0xe6a   : > { %4436 = vmatprep.subr.bf16.mxu1 %v4399_v36  ;;  %v4483_v36 = vunpack.c.h.s8.bf16 %v7565_v30  ;;  %v4602_v41 = vunpack.c.l.s8.bf16 %v7592_v59 }
 0xe6c   : > { %4339 = vmatpush2.bf16.msra.mxu0 %v4300_v40  ;;  %v7580_v40 = vld [vmem:[%s8851_s0 + $0x590] sm:$0xff] }
 0xe6d   : > { %4437 = vmatpush2.bf16.msra.mxu1 %v4398_v42  ;;  %4340 = vmatprep.subr.bf16.mxu0 %v4299_v43  ;;  %v4482_v42 = vunpack.c.h.s8.bf16 %v7564_v23  ;;  %v4580_v43 = vunpack.c.h.s8.bf16 %v7580_v40 }
 0xe6e   : > { %4438 = vmatprep.subr.bf16.mxu1 %v4397_v44  ;;  %v4481_v44 = vunpack.c.l.s8.bf16 %v7565_v30 }
 0xe70   : > { %4341 = vmatpush2.bf16.msra.mxu0 %v4298_v46  ;;  %v7579_v46 = vld [vmem:[%s8851_s0 + $0x588] sm:$0xff] }
 0xe71   : > { %4439 = vmatpush2.bf16.msra.mxu1 %v4396_v47  ;;  %4342 = vmatprep.subr.bf16.mxu0 %v4297_v4  ;;  %v4480_v47 = vunpack.c.l.s8.bf16 %v7564_v23  ;;  %v4578_v4 = vunpack.c.l.s8.bf16 %v7580_v40  ;;  %v4577_v49 = vunpack.c.h.s8.bf16 %v7579_v46  ;;  %v7570_v40 = vld [vmem:[%s8851_s0 + $0x540] sm:$0xff] }
 0xe72   : > { %4440 = vmatprep.subr.bf16.mxu1 %v4395_v48  ;;  %v4479_v48 = vunpack.c.h.s8.bf16 %v7563_v45 }
 0xe74   : > { %4343 = vmatpush2.bf16.msra.mxu0 %v4296_v51  ;;  %v4478_v51 = vunpack.c.h.s8.bf16 %v7562_v50 }
 0xe75   : > { %4441 = vmatpush2.bf16.msra.mxu1 %v4394_v52  ;;  %4508 = vmatprep.subr.bf16.mxu0 %v4491_v53  ;;  %v4477_v53 = vunpack.c.l.s8.bf16 %v7563_v45 }
 0xe76   : > { %4606 = vmatprep.subr.bf16.mxu1 %v4589_v54  ;;  %v4575_v54 = vunpack.c.l.s8.bf16 %v7579_v46  ;;  %v7601_v46 = vld [vmem:[%s8851_s0 + $0x638] sm:$0xff] }
 0xe77   : > { %v3758_v62 = vpop.f32.mrf.mxu0  ;;  %4345 = vmatmul.mubr.bf16.vlgmr.msra.gmra.mxu0 %v9169_v6 }
 0xe78   : > { %v3856_v63 = vpop.f32.mrf.mxu1  ;;  %4443 = vmatmul.mubr.bf16.vlgmr.msra.gmra.mxu1 %v9169_v6  ;;  %v3769_v0 = vmul.f32 %v3767_v15, %v3758_v62  ;;  %4509 = vmatpush1.bf16.msra.mxu0 %v4490_v56  ;;  %v4476_v56 = vunpack.c.l.s8.bf16 %v7562_v50  ;;  %v4604_v62 = vunpack.c.h.s8.bf16 %v7592_v59 }
 0xe79   : > { %4607 = vmatpush1.bf16.msra.mxu1 %v4588_v9  ;;  %v3867_v2 = vmul.f32 %v3865_v58, %v3856_v63  ;;  %v3760_v7 = vpop.f32.mrf.mxu0  ;;  %4510 = vmatprep.subr.bf16.mxu0 %v4489_v12  ;;  %v4605_v12 = vunpack.c.h.s8.bf16 %v7593_v34  ;;  %v4505_v63 = vunpack.c.l.s8.bf16 %v7577_v55 }
 0xe7a   : > { %v3858_v8 = vpop.f32.mrf.mxu1  ;;  %4608 = vmatprep.subr.bf16.mxu1 %v4587_v60  ;;  %v3771_v14 = vadd.f32 %v3769_v0, %v9293_v22  ;;  %v3770_v57 = vmul.f32 %v3767_v15, %v3760_v7  ;;  %4540 = vmatprep.mubr.bf16.mxu0 %v9131_v24  ;;  %v4584_v22 = vunpack.c.h.s8.bf16 %v7582_v13  ;;  %v7578_v15 = vld [vmem:[%s8851_s0 + $0x580] sm:$0xff]  ;;  %v7576_v60 = vld [vmem:[%s8851_s0 + $0x570] sm:$0xff]  ;;  %v4603_v0 = vunpack.c.l.s8.bf16 %v7593_v34 }
 0xe7b   : > { %v3868_v17 = vmul.f32 %v3865_v58, %v3858_v8  ;;  %4638 = vmatprep.mubr.bf16.mxu1 %v9131_v24  ;;  %v3762_v19 = vpop.f32.mrf.mxu0  ;;  %v4576_v52 = vunpack.c.h.s8.bf16 %v7578_v15  ;;  %v4574_v9 = vunpack.c.l.s8.bf16 %v7578_v15  ;;  %v4507_v58 = vunpack.c.h.s8.bf16 %v7577_v55  ;;  %v7600_v15 = vld [vmem:[%s8851_s0 + $0x630] sm:$0xff]  ;;  %v4061_v55 = vpop.permute.xlu0 %4060 }
 0xe7c   : > { %v3860_v20 = vpop.f32.mrf.mxu1  ;;  %v3772_v21 = vadd.f32 %v3770_v57, %v9295_v33  ;;  %v9340_v27 = vadd.f32 %v3867_v2, %v3771_v14  ;;  %4511 = vmatpush1.bf16.msra.mxu0 %v4488_v3  ;;  %v8550_v33 = vmov 11   ;;  %v4506_v61 = vunpack.c.h.s8.bf16 %v7576_v60  ;;  %v7575_v2 = vld [vmem:[%s8851_s0 + $0x568] sm:$0xff]  ;;  %v7573_v19 = vld [vmem:[%s8851_s0 + $0x558] sm:$0xff] }
 0xe7d   : > { %4609 = vmatpush1.bf16.msra.mxu1 %v4586_v5  ;;  %v3763_v26 = vpop.f32.mrf.mxu0  ;;  %4512 = vmatprep.subr.bf16.mxu0 %v4487_v10  ;;  %v7591_v3 = vld [vmem:[%s8851_s0 + $0x5e8] sm:$0xff]  ;;  %v4504_v5 = vunpack.c.l.s8.bf16 %v7576_v60  ;;  %v4503_v7 = vunpack.c.h.s8.bf16 %v7575_v2  ;;  %v7574_v10 = vld [vmem:[%s8851_s0 + $0x560] sm:$0xff]  ;;  %v4501_v57 = vunpack.c.l.s8.bf16 %v7575_v2  ;;  %v7589_v20 = vld [vmem:[%s8851_s0 + $0x5d8] sm:$0xff]  ;;  %v4497_v30 = vunpack.c.l.s8.bf16 %v7573_v19 }
 0xe7e   : > { %v3861_v29 = vpop.f32.mrf.mxu1  ;;  %4610 = vmatprep.subr.bf16.mxu1 %v4585_v11  ;;  %v9342_v25 = vadd.f32 %v3868_v17, %v3772_v21  ;;  %8197 = vset.pattern.permute.xlu0 %v8550_v33  ;;  %v4601_v8 = vunpack.c.h.s8.bf16 %v7591_v3  ;;  %v7590_v11 = vld [vmem:[%s8851_s0 + $0x5e0] sm:$0xff]  ;;  %v4502_v13 = vunpack.c.h.s8.bf16 %v7574_v10  ;;  %v4599_v17 = vunpack.c.l.s8.bf16 %v7591_v3  ;;  %v7572_v26 = vld [vmem:[%s8851_s0 + $0x550] sm:$0xff]  ;;  %v7571_v33 = vld [vmem:[%s8851_s0 + $0x548] sm:$0xff] }
 0xe7f   : > { %4648 = vperm.xlu0 %8197, %v9300_v38   ;;  %v4600_v14 = vunpack.c.h.s8.bf16 %v7590_v11  ;;  %v4598_v18 = vunpack.c.l.s8.bf16 %v7590_v11  ;;  %v4499_v21 = vunpack.c.h.s8.bf16 %v7573_v19  ;;  %v7588_v29 = vld [vmem:[%s8851_s0 + $0x5d0] sm:$0xff]  ;;  %v4595_v31 = vunpack.c.l.s8.bf16 %v7589_v20 }
 0xe80   : > { %4513 = vmatpush1.bf16.msra.mxu0 %v4486_v16  ;;  %v4500_v16 = vunpack.c.l.s8.bf16 %v7574_v10  ;;  %v4685_v34 = vunpack.c.l.s8.bf16 %v7601_v46  ;;  %v4684_v59 = vunpack.c.l.s8.bf16 %v7600_v15 }
 0xe81   : > { %4611 = vmatpush1.bf16.msra.mxu1 %v4584_v22  ;;  %4514 = vmatprep.subr.bf16.mxu0 %v4485_v28  ;;  %v4597_v22 = vunpack.c.h.s8.bf16 %v7589_v20  ;;  %v4498_v28 = vunpack.c.h.s8.bf16 %v7572_v26 }
 0xe82   : > { %4612 = vmatprep.subr.bf16.mxu1 %v4583_v37  ;;  %v4596_v37 = vunpack.c.h.s8.bf16 %v7588_v29 }
 0xe84   : > { %4515 = vmatpush1.bf16.msra.mxu0 %v4484_v32  ;;  %v7587_v32 = vld [vmem:[%s8851_s0 + $0x5c8] sm:$0xff] }
 0xe85   : > { %4613 = vmatpush1.bf16.msra.mxu1 %v4582_v35  ;;  %4516 = vmatprep.subr.bf16.mxu0 %v4483_v36  ;;  %v4496_v35 = vunpack.c.l.s8.bf16 %v7572_v26  ;;  %v4594_v36 = vunpack.c.l.s8.bf16 %v7588_v29  ;;  %v4593_v23 = vunpack.c.h.s8.bf16 %v7587_v32  ;;  %v4591_v45 = vunpack.c.l.s8.bf16 %v7587_v32  ;;  %v7597_v29 = vld [vmem:[%s8851_s0 + $0x618] sm:$0xff]  ;;  %v7612_v32 = vld [vmem:[%s8851_s0 + $0x690] sm:$0xff] }
 0xe86   : > { %4614 = vmatprep.subr.bf16.mxu1 %v4581_v39  ;;  %v4495_v39 = vunpack.c.h.s8.bf16 %v7571_v33 }
 0xe88   : > { %4517 = vmatpush1.bf16.msra.mxu0 %v4482_v42  ;;  %v7586_v42 = vld [vmem:[%s8851_s0 + $0x5c0] sm:$0xff] }
 0xe89   : > { %4615 = vmatpush1.bf16.msra.mxu1 %v4580_v43  ;;  %4518 = vmatprep.subr.bf16.mxu0 %v4481_v44  ;;  %v4494_v43 = vunpack.c.h.s8.bf16 %v7570_v40  ;;  %v4592_v44 = vunpack.c.h.s8.bf16 %v7586_v42 }
 0xe8a   : > { %4616 = vmatprep.subr.bf16.mxu1 %v4579_v1  ;;  %v4493_v1 = vunpack.c.l.s8.bf16 %v7571_v33  ;;  %v7596_v33 = vld [vmem:[%s8851_s0 + $0x610] sm:$0xff] }
 0xe8c   : > { %4519 = vmatpush1.bf16.msra.mxu0 %v4480_v47  ;;  %v7617_v47 = vld [vmem:[%s8851_s0 + $0x6b8] sm:$0xff] }
 0xe8d   : > { %4617 = vmatpush1.bf16.msra.mxu1 %v4578_v4  ;;  %4520 = vmatprep.subr.bf16.mxu0 %v4479_v48  ;;  %v4492_v4 = vunpack.c.l.s8.bf16 %v7570_v40  ;;  %v4590_v48 = vunpack.c.l.s8.bf16 %v7586_v42  ;;  %v4785_v50 = vunpack.c.h.s8.bf16 %v7617_v47  ;;  %v7595_v42 = vld [vmem:[%s8851_s0 + $0x608] sm:$0xff] }
 0xe8e   : > { %4618 = vmatprep.subr.bf16.mxu1 %v4577_v49  ;;  %v4687_v49 = vunpack.c.h.s8.bf16 %v7601_v46  ;;  %v7594_v46 = vld [vmem:[%s8851_s0 + $0x600] sm:$0xff] }
 0xe90   : > { %4521 = vmatpush1.bf16.msra.mxu0 %v4478_v51  ;;  %v7616_v51 = vld [vmem:[%s8851_s0 + $0x6b0] sm:$0xff] }
 0xe91   : > { %4619 = vmatpush1.bf16.msra.mxu1 %v4576_v52  ;;  %4522 = vmatprep.subr.bf16.mxu0 %v4477_v53  ;;  %v4686_v52 = vunpack.c.h.s8.bf16 %v7600_v15  ;;  %v4784_v53 = vunpack.c.h.s8.bf16 %v7616_v51  ;;  %v7609_v15 = vld [vmem:[%s8851_s0 + $0x678] sm:$0xff] }
 0xe92   : > { %4620 = vmatprep.subr.bf16.mxu1 %v4575_v54  ;;  %v3963_v54 = vpop.permute.xlu1 %3962 }
 0xe94   : > { %4523 = vmatpush1.bf16.msra.mxu0 %v4476_v56  ;;  %v4783_v56 = vunpack.c.l.s8.bf16 %v7617_v47  ;;  %v7610_v47 = vld [vmem:[%s8851_s0 + $0x680] sm:$0xff] }
 0xe95   : > { %4621 = vmatpush1.bf16.msra.mxu1 %v4574_v9  ;;  %4524 = vmatprep.subr.bf16.mxu0 %v4507_v58  ;;  %v7599_v9 = vld [vmem:[%s8851_s0 + $0x628] sm:$0xff] }
 0xe96   : > { %4622 = vmatprep.subr.bf16.mxu1 %v4605_v12  ;;  %v7615_v58 = vld [vmem:[%s8851_s0 + $0x6a8] sm:$0xff]  ;;  %v4683_v3 = vunpack.c.h.s8.bf16 %v7599_v9 }
 0xe98   : > { %4525 = vmatpush2.bf16.msra.mxu0 %v4506_v61 }
 0xe99   : > { %4623 = vmatpush2.bf16.msra.mxu1 %v4604_v62  ;;  %4526 = vmatprep.subr.bf16.mxu0 %v4505_v63  ;;  %v4782_v63 = vunpack.c.l.s8.bf16 %v7616_v51  ;;  %v7625_v51 = vld [vmem:[%s8851_s0 + $0x6f8] sm:$0xff] }
 0xe9a   : > { %4624 = vmatprep.subr.bf16.mxu1 %v4603_v0 }
 0xe9c   : > { %4527 = vmatpush2.bf16.msra.mxu0 %v4504_v5  ;;  %v4781_v5 = vunpack.c.h.s8.bf16 %v7615_v58 }
 0xe9d   : > { %4625 = vmatpush2.bf16.msra.mxu1 %v4602_v41  ;;  %4528 = vmatprep.subr.bf16.mxu0 %v4503_v7  ;;  %v7598_v41 = vld [vmem:[%s8851_s0 + $0x620] sm:$0xff] }
 0xe9e   : > { %4626 = vmatprep.subr.bf16.mxu1 %v4601_v8  ;;  %v7614_v7 = vld [vmem:[%s8851_s0 + $0x6a0] sm:$0xff]  ;;  %v4682_v20 = vunpack.c.h.s8.bf16 %v7598_v41 }
 0xea0   : > { %4529 = vmatpush2.bf16.msra.mxu0 %v4502_v13 }
 0xea1   : > { %4627 = vmatpush2.bf16.msra.mxu1 %v4600_v14  ;;  %4530 = vmatprep.subr.bf16.mxu0 %v4501_v57  ;;  %v8551_v57 = vmov 12  }
 0xea2   : > { %4628 = vmatprep.subr.bf16.mxu1 %v4599_v17  ;;  %8198 = vset.pattern.permute.xlu1 %v8551_v57 }
 0xea3   : > { %4746 = vperm.xlu1 %8198, %v9300_v38  }
 0xea4   : > { %4531 = vmatpush2.bf16.msra.mxu0 %v4500_v16 }
 0xea5   : > { %4629 = vmatpush2.bf16.msra.mxu1 %v4598_v18  ;;  %4532 = vmatprep.subr.bf16.mxu0 %v4499_v21  ;;  %v4681_v21 = vunpack.c.l.s8.bf16 %v7599_v9 }
 0xea6   : > { %4630 = vmatprep.subr.bf16.mxu1 %v4597_v22  ;;  %v4779_v22 = vunpack.c.l.s8.bf16 %v7615_v58 }
 0xea8   : > { %4533 = vmatpush2.bf16.msra.mxu0 %v4498_v28  ;;  %v7613_v28 = vld [vmem:[%s8851_s0 + $0x698] sm:$0xff] }
 0xea9   : > { %4631 = vmatpush2.bf16.msra.mxu1 %v4596_v37  ;;  %4534 = vmatprep.subr.bf16.mxu0 %v4497_v30  ;;  %v4778_v37 = vunpack.c.l.s8.bf16 %v7614_v7  ;;  %v4679_v30 = vunpack.c.h.s8.bf16 %v7597_v29  ;;  %v4775_v40 = vunpack.c.l.s8.bf16 %v7613_v28 }
 0xeaa   : > { %4632 = vmatprep.subr.bf16.mxu1 %v4595_v31  ;;  %v4777_v31 = vunpack.c.h.s8.bf16 %v7613_v28  ;;  %v7603_v28 = vld [vmem:[%s8851_s0 + $0x648] sm:$0xff] }
 0xeac   : > { %4535 = vmatpush2.bf16.msra.mxu0 %v4496_v35  ;;  %v8552_v35 = vmov 13  }
 0xead   : > { %4633 = vmatpush2.bf16.msra.mxu1 %v4594_v36  ;;  %4536 = vmatprep.subr.bf16.mxu0 %v4495_v39  ;;  %v4678_v36 = vunpack.c.h.s8.bf16 %v7596_v33  ;;  %v4776_v39 = vunpack.c.h.s8.bf16 %v7612_v32 }
 0xeae   : > { %4634 = vmatprep.subr.bf16.mxu1 %v4593_v23  ;;  %8199 = vset.pattern.permute.xlu1 %v8552_v35  ;;  %v4677_v23 = vunpack.c.l.s8.bf16 %v7597_v29  ;;  %v7618_v35 = vld [vmem:[%s8851_s0 + $0x6c0] sm:$0xff] }
 0xeaf   : > { %4844 = vperm.xlu1 %8199, %v9300_v38   ;;  %v4675_v38 = vunpack.c.h.s8.bf16 %v7595_v42 }
 0xeb0   : > { %4537 = vmatpush2.bf16.msra.mxu0 %v4494_v43  ;;  %v7611_v43 = vld [vmem:[%s8851_s0 + $0x688] sm:$0xff] }
 0xeb1   : > { %4635 = vmatpush2.bf16.msra.mxu1 %v4592_v44  ;;  %4538 = vmatprep.subr.bf16.mxu0 %v4493_v1  ;;  %v4676_v44 = vunpack.c.l.s8.bf16 %v7596_v33  ;;  %v4774_v1 = vunpack.c.l.s8.bf16 %v7612_v32  ;;  %v7602_v32 = vld [vmem:[%s8851_s0 + $0x640] sm:$0xff] }
 0xeb2   : > { %4636 = vmatprep.subr.bf16.mxu1 %v4591_v45  ;;  %v4773_v45 = vunpack.c.h.s8.bf16 %v7611_v43 }
 0xeb4   : > { %4539 = vmatpush2.bf16.msra.mxu0 %v4492_v4  ;;  %v4674_v4 = vunpack.c.h.s8.bf16 %v7594_v46 }
 0xeb5   : > { %4637 = vmatpush2.bf16.msra.mxu1 %v4590_v48  ;;  %4704 = vmatprep.subr.bf16.mxu0 %v4687_v49  ;;  %v4772_v48 = vunpack.c.h.s8.bf16 %v7610_v47  ;;  %v4673_v49 = vunpack.c.l.s8.bf16 %v7595_v42  ;;  %v7633_v42 = vld [vmem:[%s8851_s0 + $0x738] sm:$0xff] }
 0xeb6   : > { %4802 = vmatprep.subr.bf16.mxu1 %v4785_v50  ;;  %v4771_v50 = vunpack.c.l.s8.bf16 %v7611_v43  ;;  %v7649_v43 = vld [vmem:[%s8851_s0 + $0x7b8] sm:$0xff] }
 0xeb7   : > { %v3954_v12 = vpop.f32.mrf.mxu0  ;;  %4541 = vmatmul.mubr.bf16.vlgmr.msra.gmra.mxu0 %v9169_v6 }
 0xeb8   : > { %v4052_v60 = vpop.f32.mrf.mxu1  ;;  %4639 = vmatmul.mubr.bf16.vlgmr.msra.gmra.mxu1 %v9169_v6  ;;  %v3965_v61 = vmul.f32 %v3963_v54, %v3954_v12  ;;  %4705 = vmatpush1.bf16.msra.mxu0 %v4686_v52  ;;  %v4672_v52 = vunpack.c.l.s8.bf16 %v7594_v46  ;;  %v4701_v12 = vunpack.c.l.s8.bf16 %v7609_v15  ;;  %v4981_v46 = vunpack.c.h.s8.bf16 %v7649_v43 }
 0xeb9   : > { %4803 = vmatpush1.bf16.msra.mxu1 %v4784_v53  ;;  %v4063_v62 = vmul.f32 %v4061_v55, %v4052_v60  ;;  %v3956_v0 = vpop.f32.mrf.mxu0  ;;  %4706 = vmatprep.subr.bf16.mxu0 %v4685_v34  ;;  %v4770_v53 = vunpack.c.l.s8.bf16 %v7610_v47  ;;  %v7608_v34 = vld [vmem:[%s8851_s0 + $0x670] sm:$0xff]  ;;  %v4799_v60 = vunpack.c.l.s8.bf16 %v7625_v51 }
 0xeba   : > { %v4054_v2 = vpop.f32.mrf.mxu1  ;;  %4804 = vmatprep.subr.bf16.mxu1 %v4783_v56  ;;  %v3967_v8 = vadd.f32 %v3965_v61, %v9340_v27  ;;  %v3966_v10 = vmul.f32 %v3963_v54, %v3956_v0  ;;  %4736 = vmatprep.mubr.bf16.mxu0 %v9131_v24  ;;  %v4780_v27 = vunpack.c.h.s8.bf16 %v7614_v7  ;;  %v4703_v54 = vunpack.c.h.s8.bf16 %v7609_v15  ;;  %v7624_v56 = vld [vmem:[%s8851_s0 + $0x6f0] sm:$0xff]  ;;  %v7623_v61 = vld [vmem:[%s8851_s0 + $0x6e8] sm:$0xff] }
 0xebb   : > { %v4064_v11 = vmul.f32 %v4061_v55, %v4054_v2  ;;  %4834 = vmatprep.mubr.bf16.mxu1 %v9131_v24  ;;  %v3958_v13 = vpop.f32.mrf.mxu0  ;;  %v4801_v55 = vunpack.c.h.s8.bf16 %v7625_v51  ;;  %v4702_v9 = vunpack.c.h.s8.bf16 %v7608_v34  ;;  %v4800_v58 = vunpack.c.h.s8.bf16 %v7624_v56  ;;  %v7632_v47 = vld [vmem:[%s8851_s0 + $0x730] sm:$0xff] }
 0xebc   : > { %v4056_v14 = vpop.f32.mrf.mxu1  ;;  %v3968_v17 = vadd.f32 %v3966_v10, %v9342_v25  ;;  %v9384_v19 = vadd.f32 %v4063_v62, %v3967_v8  ;;  %4707 = vmatpush1.bf16.msra.mxu0 %v4684_v59  ;;  %v4680_v25 = vunpack.c.l.s8.bf16 %v7598_v41  ;;  %v7607_v59 = vld [vmem:[%s8851_s0 + $0x668] sm:$0xff]  ;;  %v4700_v62 = vunpack.c.l.s8.bf16 %v7608_v34  ;;  %v7621_v13 = vld [vmem:[%s8851_s0 + $0x6d8] sm:$0xff] }
 0xebd   : > { %4805 = vmatpush1.bf16.msra.mxu1 %v4782_v63  ;;  %v3959_v16 = vpop.f32.mrf.mxu0  ;;  %4708 = vmatprep.subr.bf16.mxu0 %v4683_v3  ;;  %v4798_v63 = vunpack.c.l.s8.bf16 %v7624_v56  ;;  %v4699_v0 = vunpack.c.h.s8.bf16 %v7607_v59  ;;  %v4797_v2 = vunpack.c.h.s8.bf16 %v7623_v61  ;;  %v7606_v3 = vld [vmem:[%s8851_s0 + $0x660] sm:$0xff]  ;;  %v4697_v8 = vunpack.c.l.s8.bf16 %v7607_v59 }
 0xebe   : > { %v4057_v18 = vpop.f32.mrf.mxu1  ;;  %4806 = vmatprep.subr.bf16.mxu1 %v4781_v5  ;;  %v9386_v26 = vadd.f32 %v4064_v11, %v3968_v17  ;;  %v7622_v5 = vld [vmem:[%s8851_s0 + $0x6e0] sm:$0xff]  ;;  %v4698_v41 = vunpack.c.h.s8.bf16 %v7606_v3  ;;  %v4795_v10 = vunpack.c.l.s8.bf16 %v7623_v61  ;;  %v7605_v11 = vld [vmem:[%s8851_s0 + $0x658] sm:$0xff]  ;;  %v4696_v14 = vunpack.c.l.s8.bf16 %v7606_v3  ;;  %v7620_v16 = vld [vmem:[%s8851_s0 + $0x6d0] sm:$0xff] }
 0xebf   : > { %v4796_v7 = vunpack.c.h.s8.bf16 %v7622_v5  ;;  %v4794_v57 = vunpack.c.l.s8.bf16 %v7622_v5  ;;  %v4695_v17 = vunpack.c.h.s8.bf16 %v7605_v11  ;;  %v4791_v29 = vunpack.c.l.s8.bf16 %v7621_v13 }
 0xec0   : > { %4709 = vmatpush1.bf16.msra.mxu0 %v4682_v20  ;;  %v4793_v20 = vunpack.c.h.s8.bf16 %v7621_v13  ;;  %v4881_v15 = vunpack.c.l.s8.bf16 %v7633_v42  ;;  %v4979_v51 = vunpack.c.l.s8.bf16 %v7649_v43  ;;  %v7626_v43 = vld [vmem:[%s8851_s0 + $0x700] sm:$0xff] }
 0xec1   : > { %4807 = vmatpush1.bf16.msra.mxu1 %v4780_v27  ;;  %4710 = vmatprep.subr.bf16.mxu0 %v4681_v21  ;;  %v7604_v27 = vld [vmem:[%s8851_s0 + $0x650] sm:$0xff]  ;;  %v4792_v21 = vunpack.c.h.s8.bf16 %v7620_v16 }
 0xec2   : > { %4808 = vmatprep.subr.bf16.mxu1 %v4779_v22  ;;  %v4694_v18 = vunpack.c.h.s8.bf16 %v7604_v27  ;;  %v4693_v22 = vunpack.c.l.s8.bf16 %v7605_v11 }
 0xec4   : > { %4711 = vmatpush1.bf16.msra.mxu0 %v4680_v25  ;;  %v7619_v25 = vld [vmem:[%s8851_s0 + $0x6c8] sm:$0xff] }
 0xec5   : > { %4809 = vmatpush1.bf16.msra.mxu1 %v4778_v37  ;;  %4712 = vmatprep.subr.bf16.mxu0 %v4679_v30  ;;  %v4692_v37 = vunpack.c.l.s8.bf16 %v7604_v27  ;;  %v4790_v30 = vunpack.c.l.s8.bf16 %v7620_v16  ;;  %v4789_v33 = vunpack.c.h.s8.bf16 %v7619_v25  ;;  %v7629_v27 = vld [vmem:[%s8851_s0 + $0x718] sm:$0xff] }
 0xec6   : > { %4810 = vmatprep.subr.bf16.mxu1 %v4777_v31  ;;  %v4691_v31 = vunpack.c.h.s8.bf16 %v7603_v28  ;;  %v7645_v16 = vld [vmem:[%s8851_s0 + $0x798] sm:$0xff] }
 0xec8   : > { %4713 = vmatpush1.bf16.msra.mxu0 %v4678_v36  ;;  %v4690_v36 = vunpack.c.h.s8.bf16 %v7602_v32 }
 0xec9   : > { %4811 = vmatpush1.bf16.msra.mxu1 %v4776_v39  ;;  %4714 = vmatprep.subr.bf16.mxu0 %v4677_v23  ;;  %v4788_v39 = vunpack.c.h.s8.bf16 %v7618_v35  ;;  %v4689_v23 = vunpack.c.l.s8.bf16 %v7603_v28  ;;  %v4973_v28 = vunpack.c.h.s8.bf16 %v7645_v16 }
 0xeca   : > { %4812 = vmatprep.subr.bf16.mxu1 %v4775_v40  ;;  %v4787_v40 = vunpack.c.l.s8.bf16 %v7619_v25  ;;  %v7628_v25 = vld [vmem:[%s8851_s0 + $0x710] sm:$0xff] }
 0xecc   : > { %4715 = vmatpush1.bf16.msra.mxu0 %v4676_v44  ;;  %v4159_v44 = vpop.permute.xlu1 %4158 }
 0xecd   : > { %4813 = vmatpush1.bf16.msra.mxu1 %v4774_v1  ;;  %4716 = vmatprep.subr.bf16.mxu0 %v4675_v38  ;;  %v4688_v1 = vunpack.c.l.s8.bf16 %v7602_v32  ;;  %v4786_v38 = vunpack.c.l.s8.bf16 %v7618_v35  ;;  %v4971_v32 = vunpack.c.l.s8.bf16 %v7645_v16  ;;  %v7627_v35 = vld [vmem:[%s8851_s0 + $0x708] sm:$0xff] }
 0xece   : > { %4814 = vmatprep.subr.bf16.mxu1 %v4773_v45  ;;  %v4883_v45 = vunpack.c.h.s8.bf16 %v7633_v42 }
 0xed0   : > { %4717 = vmatpush1.bf16.msra.mxu0 %v4674_v4  ;;  %v7648_v4 = vld [vmem:[%s8851_s0 + $0x7b0] sm:$0xff] }
 0xed1   : > { %4815 = vmatpush1.bf16.msra.mxu1 %v4772_v48  ;;  %4718 = vmatprep.subr.bf16.mxu0 %v4673_v49  ;;  %v4882_v48 = vunpack.c.h.s8.bf16 %v7632_v47  ;;  %v4980_v49 = vunpack.c.h.s8.bf16 %v7648_v4 }
 0xed2   : > { %4816 = vmatprep.subr.bf16.mxu1 %v4771_v50  ;;  %v4257_v50 = vpop.permute.xlu1 %4256 }
 0xed4   : > { %4719 = vmatpush1.bf16.msra.mxu0 %v4672_v52  ;;  %v7631_v52 = vld [vmem:[%s8851_s0 + $0x728] sm:$0xff] }
 0xed5   : > { %4817 = vmatpush1.bf16.msra.mxu1 %v4770_v53  ;;  %4720 = vmatprep.subr.bf16.mxu0 %v4703_v54  ;;  %v7647_v53 = vld [vmem:[%s8851_s0 + $0x7a8] sm:$0xff]  ;;  %v4879_v61 = vunpack.c.h.s8.bf16 %v7631_v52 }
 0xed6   : > { %4818 = vmatprep.subr.bf16.mxu1 %v4801_v55 }
 0xed8   : > { %4721 = vmatpush2.bf16.msra.mxu0 %v4702_v9  ;;  %v4880_v9 = vunpack.c.l.s8.bf16 %v7632_v47  ;;  %v7641_v47 = vld [vmem:[%s8851_s0 + $0x778] sm:$0xff] }
 0xed9   : > { %4819 = vmatpush2.bf16.msra.mxu1 %v4800_v58  ;;  %4722 = vmatprep.subr.bf16.mxu0 %v4701_v12  ;;  %v4978_v58 = vunpack.c.l.s8.bf16 %v7648_v4  ;;  %v7630_v12 = vld [vmem:[%s8851_s0 + $0x720] sm:$0xff]  ;;  %v7657_v4 = vld [vmem:[%s8851_s0 + $0x7f8] sm:$0xff] }
 0xeda   : > { %4820 = vmatprep.subr.bf16.mxu1 %v4799_v60 }
 0xedc   : > { %4723 = vmatpush2.bf16.msra.mxu0 %v4700_v62  ;;  %v4977_v62 = vunpack.c.h.s8.bf16 %v7647_v53 }
 0xedd   : > { %4821 = vmatpush2.bf16.msra.mxu1 %v4798_v63  ;;  %4724 = vmatprep.subr.bf16.mxu0 %v4699_v0  ;;  %v7646_v63 = vld [vmem:[%s8851_s0 + $0x7a0] sm:$0xff] }
 0xede   : > { %4822 = vmatprep.subr.bf16.mxu1 %v4797_v2 }
 0xee0   : > { %4725 = vmatpush2.bf16.msra.mxu0 %v4698_v41 }
 0xee1   : > { %4823 = vmatpush2.bf16.msra.mxu1 %v4796_v7  ;;  %4726 = vmatprep.subr.bf16.mxu0 %v4697_v8  ;;  %v4878_v7 = vunpack.c.h.s8.bf16 %v7630_v12  ;;  %v8553_v8 = vmov 14  }
 0xee2   : > { %4824 = vmatprep.subr.bf16.mxu1 %v4795_v10  ;;  %8200 = vset.pattern.permute.xlu0 %v8553_v8 }
 0xee4   : > { %4727 = vmatpush2.bf16.msra.mxu0 %v4696_v14 }
 0xee5   : > { %4825 = vmatpush2.bf16.msra.mxu1 %v4794_v57  ;;  %4728 = vmatprep.subr.bf16.mxu0 %v4695_v17  ;;  %v4877_v57 = vunpack.c.l.s8.bf16 %v7631_v52  ;;  %v4975_v17 = vunpack.c.l.s8.bf16 %v7647_v53  ;;  %v7656_v52 = vld [vmem:[%s8851_s0 + $0x7f0] sm:$0xff] }
 0xee6   : > { %4826 = vmatprep.subr.bf16.mxu1 %v4793_v20 }
 0xee8   : > { %4729 = vmatpush2.bf16.msra.mxu0 %v4694_v18  ;;  %v9435_v18 = vld [vmem:[%s9146_s24] sm:$0xff] }
 0xee9   : > { %4827 = vmatpush2.bf16.msra.mxu1 %v4792_v21  ;;  %4730 = vmatprep.subr.bf16.mxu0 %v4693_v22  ;;  %v4876_v21 = vunpack.c.l.s8.bf16 %v7630_v12  ;;  %v4974_v22 = vunpack.c.l.s8.bf16 %v7646_v63  ;;  %v4994_v12 = vunpack.c.l.s8.bf16 %v7656_v52 }
 0xeea   : > { %4828 = vmatprep.subr.bf16.mxu1 %v4791_v29  ;;  %4942 = vperm.xlu0 %8200, %v9435_v18   ;;  %v4875_v29 = vunpack.c.h.s8.bf16 %v7629_v27 }
 0xeec   : > { %4731 = vmatpush2.bf16.msra.mxu0 %v4692_v37  ;;  %v7644_v37 = vld [vmem:[%s8851_s0 + $0x790] sm:$0xff] }
 0xeed   : > { %4829 = vmatpush2.bf16.msra.mxu1 %v4790_v30  ;;  %4732 = vmatprep.subr.bf16.mxu0 %v4691_v31  ;;  %v4874_v30 = vunpack.c.h.s8.bf16 %v7628_v25  ;;  %v4972_v31 = vunpack.c.h.s8.bf16 %v7644_v37 }
 0xeee   : > { %4830 = vmatprep.subr.bf16.mxu1 %v4789_v33  ;;  %v4873_v33 = vunpack.c.l.s8.bf16 %v7629_v27 }
 0xef0   : > { %4733 = vmatpush2.bf16.msra.mxu0 %v4690_v36  ;;  %v7643_v36 = vld [vmem:[%s8851_s0 + $0x788] sm:$0xff] }
 0xef1   : > { %4831 = vmatpush2.bf16.msra.mxu1 %v4788_v39  ;;  %4734 = vmatprep.subr.bf16.mxu0 %v4689_v23  ;;  %v4872_v39 = vunpack.c.l.s8.bf16 %v7628_v25  ;;  %v4970_v23 = vunpack.c.l.s8.bf16 %v7644_v37  ;;  %v4969_v42 = vunpack.c.h.s8.bf16 %v7643_v36  ;;  %v7634_v37 = vld [vmem:[%s8851_s0 + $0x740] sm:$0xff] }
 0xef2   : > { %4832 = vmatprep.subr.bf16.mxu1 %v4787_v40  ;;  %v4871_v40 = vunpack.c.h.s8.bf16 %v7627_v35 }
 0xef4   : > { %4735 = vmatpush2.bf16.msra.mxu0 %v4688_v1  ;;  %v4870_v1 = vunpack.c.h.s8.bf16 %v7626_v43 }
 0xef5   : > { %4833 = vmatpush2.bf16.msra.mxu1 %v4786_v38  ;;  %4900 = vmatprep.subr.bf16.mxu0 %v4883_v45  ;;  %v4869_v45 = vunpack.c.l.s8.bf16 %v7627_v35 }
 0xef6   : > { %4998 = vmatprep.subr.bf16.mxu1 %v4981_v46  ;;  %v4967_v46 = vunpack.c.l.s8.bf16 %v7643_v36  ;;  %v7665_v36 = vld [vmem:[%s8851_s0 + $0x838] sm:$0xff] }
 0xef7   : > { %v4150_v54 = vpop.f32.mrf.mxu0  ;;  %4737 = vmatmul.mubr.bf16.vlgmr.msra.gmra.mxu0 %v9169_v6 }
 0xef8   : > { %v4248_v55 = vpop.f32.mrf.mxu1  ;;  %4835 = vmatmul.mubr.bf16.vlgmr.msra.gmra.mxu1 %v9169_v6  ;;  %v4161_v34 = vmul.f32 %v4159_v44, %v4150_v54  ;;  %4901 = vmatpush1.bf16.msra.mxu0 %v4882_v48  ;;  %v4868_v48 = vunpack.c.l.s8.bf16 %v7626_v43  ;;  %v4996_v54 = vunpack.c.h.s8.bf16 %v7656_v52 }
 0xef9   : > { %4999 = vmatpush1.bf16.msra.mxu1 %v4980_v49  ;;  %v4259_v56 = vmul.f32 %v4257_v50, %v4248_v55  ;;  %v4152_v60 = vpop.f32.mrf.mxu0  ;;  %4902 = vmatprep.subr.bf16.mxu0 %v4881_v15  ;;  %v4997_v15 = vunpack.c.h.s8.bf16 %v7657_v4  ;;  %v4897_v55 = vunpack.c.l.s8.bf16 %v7641_v47 }
 0xefa   : > { %v4250_v59 = vpop.f32.mrf.mxu1  ;;  %5000 = vmatprep.subr.bf16.mxu1 %v4979_v51  ;;  %v4163_v0 = vadd.f32 %v4161_v34, %v9384_v19  ;;  %v4162_v2 = vmul.f32 %v4159_v44, %v4152_v60  ;;  %4932 = vmatprep.mubr.bf16.mxu0 %v9131_v24  ;;  %v4976_v19 = vunpack.c.h.s8.bf16 %v7646_v63  ;;  %v7642_v44 = vld [vmem:[%s8851_s0 + $0x780] sm:$0xff]  ;;  %v7640_v51 = vld [vmem:[%s8851_s0 + $0x770] sm:$0xff]  ;;  %v4995_v34 = vunpack.c.l.s8.bf16 %v7657_v4 }
 0xefb   : > { %v4260_v3 = vmul.f32 %v4257_v50, %v4250_v59  ;;  %5030 = vmatprep.mubr.bf16.mxu1 %v9131_v24  ;;  %v4154_v5 = vpop.f32.mrf.mxu0  ;;  %v4968_v38 = vunpack.c.h.s8.bf16 %v7642_v44  ;;  %v4966_v49 = vunpack.c.l.s8.bf16 %v7642_v44  ;;  %v4899_v50 = vunpack.c.h.s8.bf16 %v7641_v47  ;;  %v7664_v44 = vld [vmem:[%s8851_s0 + $0x830] sm:$0xff]  ;;  %v4453_v47 = vpop.permute.xlu1 %4452 }
 0xefc   : > { %v4252_v41 = vpop.f32.mrf.mxu1  ;;  %v4164_v10 = vadd.f32 %v4162_v2, %v9386_v26  ;;  %v9428_v11 = vadd.f32 %v4259_v56, %v4163_v0  ;;  %4903 = vmatpush1.bf16.msra.mxu0 %v4880_v9  ;;  %v8554_v26 = vmov 15   ;;  %v4898_v53 = vunpack.c.h.s8.bf16 %v7640_v51  ;;  %v7639_v56 = vld [vmem:[%s8851_s0 + $0x768] sm:$0xff]  ;;  %v7637_v5 = vld [vmem:[%s8851_s0 + $0x758] sm:$0xff] }
 0xefd   : > { %5001 = vmatpush1.bf16.msra.mxu1 %v4978_v58  ;;  %v4155_v13 = vpop.f32.mrf.mxu0  ;;  %4904 = vmatprep.subr.bf16.mxu0 %v4879_v61  ;;  %v7655_v9 = vld [vmem:[%s8851_s0 + $0x7e8] sm:$0xff]  ;;  %v4896_v58 = vunpack.c.l.s8.bf16 %v7640_v51  ;;  %v4895_v60 = vunpack.c.h.s8.bf16 %v7639_v56  ;;  %v7638_v61 = vld [vmem:[%s8851_s0 + $0x760] sm:$0xff]  ;;  %v4893_v2 = vunpack.c.l.s8.bf16 %v7639_v56  ;;  %v7653_v41 = vld [vmem:[%s8851_s0 + $0x7d8] sm:$0xff]  ;;  %v4889_v27 = vunpack.c.l.s8.bf16 %v7637_v5 }
 0xefe   : > { %v4253_v14 = vpop.f32.mrf.mxu1  ;;  %5002 = vmatprep.subr.bf16.mxu1 %v4977_v62  ;;  %v9430_v20 = vadd.f32 %v4260_v3, %v4164_v10  ;;  %8201 = vset.pattern.permute.xlu1 %v8554_v26  ;;  %v4993_v59 = vunpack.c.h.s8.bf16 %v7655_v9  ;;  %v7654_v62 = vld [vmem:[%s8851_s0 + $0x7e0] sm:$0xff]  ;;  %v4894_v63 = vunpack.c.h.s8.bf16 %v7638_v61  ;;  %v4991_v3 = vunpack.c.l.s8.bf16 %v7655_v9  ;;  %v7636_v13 = vld [vmem:[%s8851_s0 + $0x750] sm:$0xff]  ;;  %v7635_v26 = vld [vmem:[%s8851_s0 + $0x748] sm:$0xff] }
 0xeff   : > { %5040 = vperm.xlu1 %8201, %v9435_v18   ;;  %v4992_v0 = vunpack.c.h.s8.bf16 %v7654_v62  ;;  %v4990_v8 = vunpack.c.l.s8.bf16 %v7654_v62  ;;  %v4891_v10 = vunpack.c.h.s8.bf16 %v7637_v5  ;;  %v7652_v14 = vld [vmem:[%s8851_s0 + $0x7d0] sm:$0xff]  ;;  %v4987_v16 = vunpack.c.l.s8.bf16 %v7653_v41 }
 0xf00   : > { %4905 = vmatpush1.bf16.msra.mxu0 %v4878_v7  ;;  %v4892_v7 = vunpack.c.l.s8.bf16 %v7638_v61  ;;  %v5077_v4 = vunpack.c.l.s8.bf16 %v7665_v36 }
 0xf01   : > { %5003 = vmatpush1.bf16.msra.mxu1 %v4976_v19  ;;  %4906 = vmatprep.subr.bf16.mxu0 %v4877_v57  ;;  %v4989_v19 = vunpack.c.h.s8.bf16 %v7653_v41  ;;  %v4890_v57 = vunpack.c.h.s8.bf16 %v7636_v13 }
 0xf02   : > { %5004 = vmatprep.subr.bf16.mxu1 %v4975_v17  ;;  %v4988_v17 = vunpack.c.h.s8.bf16 %v7652_v14 }
 0xf04   : > { %4907 = vmatpush1.bf16.msra.mxu0 %v4876_v21  ;;  %v7651_v21 = vld [vmem:[%s8851_s0 + $0x7c8] sm:$0xff] }
 0xf05   : > { %5005 = vmatpush1.bf16.msra.mxu1 %v4974_v22  ;;  %4908 = vmatprep.subr.bf16.mxu0 %v4875_v29  ;;  %v4888_v22 = vunpack.c.l.s8.bf16 %v7636_v13  ;;  %v4986_v29 = vunpack.c.l.s8.bf16 %v7652_v14  ;;  %v4985_v25 = vunpack.c.h.s8.bf16 %v7651_v21  ;;  %v4983_v35 = vunpack.c.l.s8.bf16 %v7651_v21  ;;  %v7661_v14 = vld [vmem:[%s8851_s0 + $0x818] sm:$0xff]  ;;  %v7660_v21 = vld [vmem:[%s8851_s0 + $0x810] sm:$0xff] }
 0xf06   : > { %5006 = vmatprep.subr.bf16.mxu1 %v4973_v28  ;;  %v4887_v28 = vunpack.c.h.s8.bf16 %v7635_v26 }
 0xf08   : > { %4909 = vmatpush1.bf16.msra.mxu0 %v4874_v30  ;;  %v7650_v30 = vld [vmem:[%s8851_s0 + $0x7c0] sm:$0xff] }
 0xf09   : > { %5007 = vmatpush1.bf16.msra.mxu1 %v4972_v31  ;;  %4910 = vmatprep.subr.bf16.mxu0 %v4873_v33  ;;  %v4886_v31 = vunpack.c.h.s8.bf16 %v7634_v37  ;;  %v4984_v33 = vunpack.c.h.s8.bf16 %v7650_v30 }
 0xf0a   : > { %5008 = vmatprep.subr.bf16.mxu1 %v4971_v32  ;;  %v4885_v32 = vunpack.c.l.s8.bf16 %v7635_v26 }
 0xf0c   : > { %4911 = vmatpush1.bf16.msra.mxu0 %v4872_v39  ;;  %v7681_v39 = vld [vmem:[%s8851_s0 + $0x8b8] sm:$0xff] }
 0xf0d   : > { %5009 = vmatpush1.bf16.msra.mxu1 %v4970_v23  ;;  %4912 = vmatprep.subr.bf16.mxu0 %v4871_v40  ;;  %v4884_v23 = vunpack.c.l.s8.bf16 %v7634_v37  ;;  %v4982_v40 = vunpack.c.l.s8.bf16 %v7650_v30  ;;  %v5177_v43 = vunpack.c.h.s8.bf16 %v7681_v39  ;;  %v7659_v30 = vld [vmem:[%s8851_s0 + $0x808] sm:$0xff] }
 0xf0e   : > { %5010 = vmatprep.subr.bf16.mxu1 %v4969_v42  ;;  %v5079_v42 = vunpack.c.h.s8.bf16 %v7665_v36 }
 0xf10   : > { %4913 = vmatpush1.bf16.msra.mxu0 %v4870_v1  ;;  %v7680_v1 = vld [vmem:[%s8851_s0 + $0x8b0] sm:$0xff] }
 0xf11   : > { %5011 = vmatpush1.bf16.msra.mxu1 %v4968_v38  ;;  %4914 = vmatprep.subr.bf16.mxu0 %v4869_v45  ;;  %v5078_v38 = vunpack.c.h.s8.bf16 %v7664_v44  ;;  %v5176_v45 = vunpack.c.h.s8.bf16 %v7680_v1 }
 0xf12   : > { %5012 = vmatprep.subr.bf16.mxu1 %v4967_v46  ;;  %v4355_v46 = vpop.permute.xlu0 %4354 }
 0xf14   : > { %4915 = vmatpush1.bf16.msra.mxu0 %v4868_v48  ;;  %v5175_v48 = vunpack.c.l.s8.bf16 %v7681_v39  ;;  %v7658_v39 = vld [vmem:[%s8851_s0 + $0x800] sm:$0xff] }
 0xf15   : > { %5013 = vmatpush1.bf16.msra.mxu1 %v4966_v49  ;;  %4916 = vmatprep.subr.bf16.mxu0 %v4899_v50  ;;  %v7663_v49 = vld [vmem:[%s8851_s0 + $0x828] sm:$0xff] }
 0xf16   : > { %5014 = vmatprep.subr.bf16.mxu1 %v4997_v15  ;;  %v7679_v50 = vld [vmem:[%s8851_s0 + $0x8a8] sm:$0xff] }
 0xf18   : > { %4917 = vmatpush2.bf16.msra.mxu0 %v4898_v53 }
 0xf19   : > { %5015 = vmatpush2.bf16.msra.mxu1 %v4996_v54  ;;  %4918 = vmatprep.subr.bf16.mxu0 %v4897_v55  ;;  %v5076_v54 = vunpack.c.l.s8.bf16 %v7664_v44  ;;  %v5174_v55 = vunpack.c.l.s8.bf16 %v7680_v1  ;;  %v7673_v1 = vld [vmem:[%s8851_s0 + $0x878] sm:$0xff] }
 0xf1a   : > { %5016 = vmatprep.subr.bf16.mxu1 %v4995_v34  ;;  %v7662_v34 = vld [vmem:[%s8851_s0 + $0x820] sm:$0xff] }
 0xf1c   : > { %4919 = vmatpush2.bf16.msra.mxu0 %v4896_v58  ;;  %v5075_v58 = vunpack.c.h.s8.bf16 %v7663_v49 }
 0xf1d   : > { %5017 = vmatpush2.bf16.msra.mxu1 %v4994_v12  ;;  %4920 = vmatprep.subr.bf16.mxu0 %v4895_v60  ;;  %v5173_v12 = vunpack.c.h.s8.bf16 %v7679_v50  ;;  %v7678_v60 = vld [vmem:[%s8851_s0 + $0x8a0] sm:$0xff] }
 0xf1e   : > { %5018 = vmatprep.subr.bf16.mxu1 %v4993_v59 }
 0xf20   : > { %4921 = vmatpush2.bf16.msra.mxu0 %v4894_v63 }
 0xf21   : > { %5019 = vmatpush2.bf16.msra.mxu1 %v4992_v0  ;;  %4922 = vmatprep.subr.bf16.mxu0 %v4893_v2  ;;  %v5074_v2 = vunpack.c.h.s8.bf16 %v7662_v34 }
 0xf22   : > { %5020 = vmatprep.subr.bf16.mxu1 %v4991_v3  ;;  %v8555_v3 = vmov 16  }
 0xf23   : > { %8202 = vset.pattern.permute.xlu1 %v8555_v3 }
 0xf24   : > { %4923 = vmatpush2.bf16.msra.mxu0 %v4892_v7  ;;  %5138 = vperm.xlu1 %8202, %v9435_v18  }
 0xf25   : > { %5021 = vmatpush2.bf16.msra.mxu1 %v4990_v8  ;;  %4924 = vmatprep.subr.bf16.mxu0 %v4891_v10  ;;  %v5073_v10 = vunpack.c.l.s8.bf16 %v7663_v49  ;;  %v7688_v49 = vld [vmem:[%s8851_s0 + $0x8f0] sm:$0xff] }
 0xf26   : > { %5022 = vmatprep.subr.bf16.mxu1 %v4989_v19  ;;  %v5171_v19 = vunpack.c.l.s8.bf16 %v7679_v50 }
 0xf28   : > { %4925 = vmatpush2.bf16.msra.mxu0 %v4890_v57  ;;  %v7677_v57 = vld [vmem:[%s8851_s0 + $0x898] sm:$0xff] }
 0xf29   : > { %5023 = vmatpush2.bf16.msra.mxu1 %v4988_v17  ;;  %4926 = vmatprep.subr.bf16.mxu0 %v4889_v27  ;;  %v5072_v17 = vunpack.c.l.s8.bf16 %v7662_v34  ;;  %v5170_v27 = vunpack.c.l.s8.bf16 %v7678_v60  ;;  %v5169_v26 = vunpack.c.h.s8.bf16 %v7677_v57  ;;  %v5167_v37 = vunpack.c.l.s8.bf16 %v7677_v57 }
 0xf2a   : > { %5024 = vmatprep.subr.bf16.mxu1 %v4987_v16  ;;  %v5071_v16 = vunpack.c.h.s8.bf16 %v7661_v14  ;;  %v5190_v34 = vunpack.c.l.s8.bf16 %v7688_v49 }
 0xf2c   : > { %4927 = vmatpush2.bf16.msra.mxu0 %v4888_v22  ;;  %v7676_v22 = vld [vmem:[%s8851_s0 + $0x890] sm:$0xff] }
 0xf2d   : > { %5025 = vmatpush2.bf16.msra.mxu1 %v4986_v29  ;;  %4928 = vmatprep.subr.bf16.mxu0 %v4887_v28  ;;  %v5070_v29 = vunpack.c.h.s8.bf16 %v7660_v21  ;;  %v5168_v28 = vunpack.c.h.s8.bf16 %v7676_v22 }
 0xf2e   : > { %5026 = vmatprep.subr.bf16.mxu1 %v4985_v25  ;;  %v5069_v25 = vunpack.c.l.s8.bf16 %v7661_v14 }
 0xf30   : > { %4929 = vmatpush2.bf16.msra.mxu0 %v4886_v31  ;;  %v7675_v31 = vld [vmem:[%s8851_s0 + $0x888] sm:$0xff] }
 0xf31   : > { %5027 = vmatpush2.bf16.msra.mxu1 %v4984_v33  ;;  %4930 = vmatprep.subr.bf16.mxu0 %v4885_v32  ;;  %v5068_v33 = vunpack.c.l.s8.bf16 %v7660_v21  ;;  %v5166_v32 = vunpack.c.l.s8.bf16 %v7676_v22  ;;  %v5165_v36 = vunpack.c.h.s8.bf16 %v7675_v31  ;;  %v5163_v44 = vunpack.c.l.s8.bf16 %v7675_v31  ;;  %v7666_v22 = vld [vmem:[%s8851_s0 + $0x840] sm:$0xff]  ;;  %v7697_v31 = vld [vmem:[%s8851_s0 + $0x938] sm:$0xff] }
 0xf32   : > { %5028 = vmatprep.subr.bf16.mxu1 %v4983_v35  ;;  %v5067_v35 = vunpack.c.h.s8.bf16 %v7659_v30 }
 0xf34   : > { %4931 = vmatpush2.bf16.msra.mxu0 %v4884_v23  ;;  %v7674_v23 = vld [vmem:[%s8851_s0 + $0x880] sm:$0xff] }
 0xf35   : > { %5029 = vmatpush2.bf16.msra.mxu1 %v4982_v40  ;;  %5096 = vmatprep.subr.bf16.mxu0 %v5079_v42  ;;  %v5066_v40 = vunpack.c.h.s8.bf16 %v7658_v39  ;;  %v5164_v42 = vunpack.c.h.s8.bf16 %v7674_v23 }
 0xf36   : > { %5194 = vmatprep.subr.bf16.mxu1 %v5177_v43  ;;  %v5065_v43 = vunpack.c.l.s8.bf16 %v7659_v30 }
 0xf37   : > { %v4346_v15 = vpop.f32.mrf.mxu0  ;;  %4933 = vmatmul.mubr.bf16.vlgmr.msra.gmra.mxu0 %v9169_v6 }
 0xf38   : > { %v4444_v51 = vpop.f32.mrf.mxu1  ;;  %5031 = vmatmul.mubr.bf16.vlgmr.msra.gmra.mxu1 %v9169_v6  ;;  %v4357_v52 = vmul.f32 %v4355_v46, %v4346_v15  ;;  %5097 = vmatpush1.bf16.msra.mxu0 %v5078_v38  ;;  %v7689_v38 = vld [vmem:[%s8851_s0 + $0x8f8] sm:$0xff]  ;;  %v5192_v15 = vunpack.c.h.s8.bf16 %v7688_v49 }
 0xf39   : > { %5195 = vmatpush1.bf16.msra.mxu1 %v5176_v45  ;;  %v4455_v53 = vmul.f32 %v4453_v47, %v4444_v51  ;;  %v4348_v56 = vpop.f32.mrf.mxu0  ;;  %5098 = vmatprep.subr.bf16.mxu0 %v5077_v4  ;;  %v5064_v45 = vunpack.c.l.s8.bf16 %v7658_v39  ;;  %v5193_v4 = vunpack.c.h.s8.bf16 %v7689_v38  ;;  %v5093_v51 = vunpack.c.l.s8.bf16 %v7673_v1 }
 0xf3a   : > { %v4446_v9 = vpop.f32.mrf.mxu1  ;;  %5196 = vmatprep.subr.bf16.mxu1 %v5175_v48  ;;  %v4359_v59 = vadd.f32 %v4357_v52, %v9428_v11  ;;  %v4358_v61 = vmul.f32 %v4355_v46, %v4348_v56  ;;  %5128 = vmatprep.mubr.bf16.mxu0 %v9131_v24  ;;  %v5172_v11 = vunpack.c.h.s8.bf16 %v7678_v60  ;;  %v5162_v46 = vunpack.c.l.s8.bf16 %v7674_v23  ;;  %v7672_v48 = vld [vmem:[%s8851_s0 + $0x870] sm:$0xff] }
 0xf3b   : > { %v4456_v62 = vmul.f32 %v4453_v47, %v4446_v9  ;;  %5226 = vmatprep.mubr.bf16.mxu1 %v9131_v24  ;;  %v4350_v63 = vpop.f32.mrf.mxu0  ;;  %v5095_v47 = vunpack.c.h.s8.bf16 %v7673_v1  ;;  %v5094_v50 = vunpack.c.h.s8.bf16 %v7672_v48  ;;  %v5191_v52 = vunpack.c.l.s8.bf16 %v7689_v38  ;;  %v7696_v23 = vld [vmem:[%s8851_s0 + $0x930] sm:$0xff]  ;;  %v4649_v1 = vpop.permute.xlu0 %4648 }
 0xf3c   : > { %v4448_v0 = vpop.f32.mrf.mxu1  ;;  %v4360_v5 = vadd.f32 %v4358_v61, %v9430_v20  ;;  %v9475_v41 = vadd.f32 %v4455_v53, %v4359_v59  ;;  %5099 = vmatpush1.bf16.msra.mxu0 %v5076_v54  ;;  %v8556_v20 = vmov 17   ;;  %v7671_v53 = vld [vmem:[%s8851_s0 + $0x868] sm:$0xff]  ;;  %v7669_v63 = vld [vmem:[%s8851_s0 + $0x858] sm:$0xff]  ;;  %v5273_v38 = vunpack.c.l.s8.bf16 %v7697_v31 }
 0xf3d   : > { %5197 = vmatpush1.bf16.msra.mxu1 %v5174_v55  ;;  %v4351_v7 = vpop.f32.mrf.mxu0  ;;  %5100 = vmatprep.subr.bf16.mxu0 %v5075_v58  ;;  %v7687_v54 = vld [vmem:[%s8851_s0 + $0x8e8] sm:$0xff]  ;;  %v5092_v55 = vunpack.c.l.s8.bf16 %v7672_v48  ;;  %v5091_v56 = vunpack.c.h.s8.bf16 %v7671_v53  ;;  %v7670_v58 = vld [vmem:[%s8851_s0 + $0x860] sm:$0xff]  ;;  %v5089_v61 = vunpack.c.l.s8.bf16 %v7671_v53  ;;  %v7685_v0 = vld [vmem:[%s8851_s0 + $0x8d8] sm:$0xff]  ;;  %v5085_v14 = vunpack.c.l.s8.bf16 %v7669_v63 }
 0xf3e   : > { %v4449_v8 = vpop.f32.mrf.mxu1  ;;  %5198 = vmatprep.subr.bf16.mxu1 %v5173_v12  ;;  %v9477_v13 = vadd.f32 %v4456_v62, %v4360_v5  ;;  %8203 = vset.pattern.permute.xlu0 %v8556_v20  ;;  %v5189_v9 = vunpack.c.h.s8.bf16 %v7687_v54  ;;  %v7686_v12 = vld [vmem:[%s8851_s0 + $0x8e0] sm:$0xff]  ;;  %v5090_v60 = vunpack.c.h.s8.bf16 %v7670_v58  ;;  %v5187_v62 = vunpack.c.l.s8.bf16 %v7687_v54  ;;  %v7668_v7 = vld [vmem:[%s8851_s0 + $0x850] sm:$0xff]  ;;  %v7667_v20 = vld [vmem:[%s8851_s0 + $0x848] sm:$0xff] }
 0xf3f   : > { %5236 = vperm.xlu0 %8203, %v9435_v18   ;;  %v5188_v59 = vunpack.c.h.s8.bf16 %v7686_v12  ;;  %v5186_v3 = vunpack.c.l.s8.bf16 %v7686_v12  ;;  %v5087_v5 = vunpack.c.h.s8.bf16 %v7669_v63  ;;  %v7684_v8 = vld [vmem:[%s8851_s0 + $0x8d0] sm:$0xff]  ;;  %v5183_v57 = vunpack.c.l.s8.bf16 %v7685_v0 }
 0xf40   : > { %5101 = vmatpush1.bf16.msra.mxu0 %v5074_v2  ;;  %v5088_v2 = vunpack.c.l.s8.bf16 %v7670_v58  ;;  %v5272_v49 = vunpack.c.l.s8.bf16 %v7696_v23 }
 0xf41   : > { %5199 = vmatpush1.bf16.msra.mxu1 %v5172_v11  ;;  %5102 = vmatprep.subr.bf16.mxu0 %v5073_v10  ;;  %v5185_v11 = vunpack.c.h.s8.bf16 %v7685_v0  ;;  %v5086_v10 = vunpack.c.h.s8.bf16 %v7668_v7 }
 0xf42   : > { %5200 = vmatprep.subr.bf16.mxu1 %v5171_v19  ;;  %v5184_v19 = vunpack.c.h.s8.bf16 %v7684_v8 }
 0xf44   : > { %5103 = vmatpush1.bf16.msra.mxu0 %v5072_v17  ;;  %v7683_v17 = vld [vmem:[%s8851_s0 + $0x8c8] sm:$0xff] }
 0xf45   : > { %5201 = vmatpush1.bf16.msra.mxu1 %v5170_v27  ;;  %5104 = vmatprep.subr.bf16.mxu0 %v5071_v16  ;;  %v5084_v27 = vunpack.c.l.s8.bf16 %v7668_v7  ;;  %v5182_v16 = vunpack.c.l.s8.bf16 %v7684_v8  ;;  %v5181_v21 = vunpack.c.h.s8.bf16 %v7683_v17  ;;  %v5179_v30 = vunpack.c.l.s8.bf16 %v7683_v17  ;;  %v7693_v8 = vld [vmem:[%s8851_s0 + $0x918] sm:$0xff]  ;;  %v7708_v17 = vld [vmem:[%s8851_s0 + $0x990] sm:$0xff] }
 0xf46   : > { %5202 = vmatprep.subr.bf16.mxu1 %v5169_v26  ;;  %v5083_v26 = vunpack.c.h.s8.bf16 %v7667_v20 }
 0xf48   : > { %5105 = vmatpush1.bf16.msra.mxu0 %v5070_v29  ;;  %v7682_v29 = vld [vmem:[%s8851_s0 + $0x8c0] sm:$0xff] }
 0xf49   : > { %5203 = vmatpush1.bf16.msra.mxu1 %v5168_v28  ;;  %5106 = vmatprep.subr.bf16.mxu0 %v5069_v25  ;;  %v5082_v28 = vunpack.c.h.s8.bf16 %v7666_v22  ;;  %v5180_v25 = vunpack.c.h.s8.bf16 %v7682_v29 }
 0xf4a   : > { %5204 = vmatprep.subr.bf16.mxu1 %v5167_v37  ;;  %v5081_v37 = vunpack.c.l.s8.bf16 %v7667_v20  ;;  %v7692_v20 = vld [vmem:[%s8851_s0 + $0x910] sm:$0xff] }
 0xf4c   : > { %5107 = vmatpush1.bf16.msra.mxu0 %v5068_v33  ;;  %v7713_v33 = vld [vmem:[%s8851_s0 + $0x9b8] sm:$0xff] }
 0xf4d   : > { %5205 = vmatpush1.bf16.msra.mxu1 %v5166_v32  ;;  %5108 = vmatprep.subr.bf16.mxu0 %v5067_v35  ;;  %v5080_v32 = vunpack.c.l.s8.bf16 %v7666_v22  ;;  %v5178_v35 = vunpack.c.l.s8.bf16 %v7682_v29  ;;  %v5373_v39 = vunpack.c.h.s8.bf16 %v7713_v33  ;;  %v7691_v29 = vld [vmem:[%s8851_s0 + $0x908] sm:$0xff] }
 0xf4e   : > { %5206 = vmatprep.subr.bf16.mxu1 %v5165_v36  ;;  %v5275_v36 = vunpack.c.h.s8.bf16 %v7697_v31  ;;  %v7690_v31 = vld [vmem:[%s8851_s0 + $0x900] sm:$0xff] }
 0xf50   : > { %5109 = vmatpush1.bf16.msra.mxu0 %v5066_v40  ;;  %v7712_v40 = vld [vmem:[%s8851_s0 + $0x9b0] sm:$0xff] }
 0xf51   : > { %5207 = vmatpush1.bf16.msra.mxu1 %v5164_v42  ;;  %5110 = vmatprep.subr.bf16.mxu0 %v5065_v43  ;;  %v5274_v42 = vunpack.c.h.s8.bf16 %v7696_v23  ;;  %v5372_v43 = vunpack.c.h.s8.bf16 %v7712_v40  ;;  %v7705_v23 = vld [vmem:[%s8851_s0 + $0x978] sm:$0xff] }
 0xf52   : > { %5208 = vmatprep.subr.bf16.mxu1 %v5163_v44  ;;  %v4551_v44 = vpop.permute.xlu1 %4550 }
 0xf54   : > { %5111 = vmatpush1.bf16.msra.mxu0 %v5064_v45  ;;  %v5371_v45 = vunpack.c.l.s8.bf16 %v7713_v33  ;;  %v7706_v33 = vld [vmem:[%s8851_s0 + $0x980] sm:$0xff] }
 0xf55   : > { %5209 = vmatpush1.bf16.msra.mxu1 %v5162_v46  ;;  %5112 = vmatprep.subr.bf16.mxu0 %v5095_v47  ;;  %v7695_v46 = vld [vmem:[%s8851_s0 + $0x928] sm:$0xff] }
 0xf56   : > { %5210 = vmatprep.subr.bf16.mxu1 %v5193_v4  ;;  %v7711_v47 = vld [vmem:[%s8851_s0 + $0x9a8] sm:$0xff]  ;;  %v5271_v54 = vunpack.c.h.s8.bf16 %v7695_v46 }
 0xf58   : > { %5113 = vmatpush2.bf16.msra.mxu0 %v5094_v50 }
 0xf59   : > { %5211 = vmatpush2.bf16.msra.mxu1 %v5192_v15  ;;  %5114 = vmatprep.subr.bf16.mxu0 %v5093_v51  ;;  %v5370_v51 = vunpack.c.l.s8.bf16 %v7712_v40  ;;  %v7721_v40 = vld [vmem:[%s8851_s0 + $0x9f8] sm:$0xff] }
 0xf5a   : > { %5212 = vmatprep.subr.bf16.mxu1 %v5191_v52 }
 0xf5c   : > { %5115 = vmatpush2.bf16.msra.mxu0 %v5092_v55  ;;  %v5369_v55 = vunpack.c.h.s8.bf16 %v7711_v47 }
 0xf5d   : > { %5213 = vmatpush2.bf16.msra.mxu1 %v5190_v34  ;;  %5116 = vmatprep.subr.bf16.mxu0 %v5091_v56  ;;  %v7694_v34 = vld [vmem:[%s8851_s0 + $0x920] sm:$0xff] }
 0xf5e   : > { %5214 = vmatprep.subr.bf16.mxu1 %v5189_v9  ;;  %v7710_v56 = vld [vmem:[%s8851_s0 + $0x9a0] sm:$0xff]  ;;  %v5270_v0 = vunpack.c.h.s8.bf16 %v7694_v34 }
 0xf60   : > { %5117 = vmatpush2.bf16.msra.mxu0 %v5090_v60 }
 0xf61   : > { %5215 = vmatpush2.bf16.msra.mxu1 %v5188_v59  ;;  %5118 = vmatprep.subr.bf16.mxu0 %v5089_v61  ;;  %v8557_v61 = vmov 18  }
 0xf62   : > { %5216 = vmatprep.subr.bf16.mxu1 %v5187_v62  ;;  %8204 = vset.pattern.permute.xlu1 %v8557_v61 }
 0xf63   : > { %5334 = vperm.xlu1 %8204, %v9435_v18  }
 0xf64   : > { %5119 = vmatpush2.bf16.msra.mxu0 %v5088_v2 }
 0xf65   : > { %5217 = vmatpush2.bf16.msra.mxu1 %v5186_v3  ;;  %5120 = vmatprep.subr.bf16.mxu0 %v5087_v5  ;;  %v5269_v5 = vunpack.c.l.s8.bf16 %v7695_v46 }
 0xf66   : > { %5218 = vmatprep.subr.bf16.mxu1 %v5185_v11  ;;  %v5367_v11 = vunpack.c.l.s8.bf16 %v7711_v47 }
 0xf68   : > { %5121 = vmatpush2.bf16.msra.mxu0 %v5086_v10  ;;  %v7709_v10 = vld [vmem:[%s8851_s0 + $0x998] sm:$0xff] }
 0xf69   : > { %5219 = vmatpush2.bf16.msra.mxu1 %v5184_v19  ;;  %5122 = vmatprep.subr.bf16.mxu0 %v5085_v14  ;;  %v5366_v19 = vunpack.c.l.s8.bf16 %v7710_v56  ;;  %v5267_v14 = vunpack.c.h.s8.bf16 %v7693_v8  ;;  %v5363_v22 = vunpack.c.l.s8.bf16 %v7709_v10 }
 0xf6a   : > { %5220 = vmatprep.subr.bf16.mxu1 %v5183_v57  ;;  %v5365_v57 = vunpack.c.h.s8.bf16 %v7709_v10  ;;  %v7699_v10 = vld [vmem:[%s8851_s0 + $0x948] sm:$0xff] }
 0xf6c   : > { %5123 = vmatpush2.bf16.msra.mxu0 %v5084_v27  ;;  %v8558_v27 = vmov 19  }
 0xf6d   : > { %5221 = vmatpush2.bf16.msra.mxu1 %v5182_v16  ;;  %5124 = vmatprep.subr.bf16.mxu0 %v5083_v26  ;;  %v5266_v16 = vunpack.c.h.s8.bf16 %v7692_v20  ;;  %v5364_v26 = vunpack.c.h.s8.bf16 %v7708_v17 }
 0xf6e   : > { %5222 = vmatprep.subr.bf16.mxu1 %v5181_v21  ;;  %8205 = vset.pattern.permute.xlu1 %v8558_v27  ;;  %v5265_v21 = vunpack.c.l.s8.bf16 %v7693_v8  ;;  %v7714_v27 = vld [vmem:[%s8851_s0 + $0x9c0] sm:$0xff] }
 0xf6f   : > { %5432 = vperm.xlu1 %8205, %v9435_v18   ;;  %v5263_v18 = vunpack.c.h.s8.bf16 %v7691_v29 }
 0xf70   : > { %5125 = vmatpush2.bf16.msra.mxu0 %v5082_v28  ;;  %v7707_v28 = vld [vmem:[%s8851_s0 + $0x988] sm:$0xff] }
 0xf71   : > { %5223 = vmatpush2.bf16.msra.mxu1 %v5180_v25  ;;  %5126 = vmatprep.subr.bf16.mxu0 %v5081_v37  ;;  %v5264_v25 = vunpack.c.l.s8.bf16 %v7692_v20  ;;  %v5362_v37 = vunpack.c.l.s8.bf16 %v7708_v17  ;;  %v7698_v17 = vld [vmem:[%s8851_s0 + $0x940] sm:$0xff] }
 0xf72   : > { %5224 = vmatprep.subr.bf16.mxu1 %v5179_v30  ;;  %v5361_v30 = vunpack.c.h.s8.bf16 %v7707_v28 }
 0xf74   : > { %5127 = vmatpush2.bf16.msra.mxu0 %v5080_v32  ;;  %v5262_v32 = vunpack.c.h.s8.bf16 %v7690_v31 }
 0xf75   : > { %5225 = vmatpush2.bf16.msra.mxu1 %v5178_v35  ;;  %5292 = vmatprep.subr.bf16.mxu0 %v5275_v36  ;;  %v5360_v35 = vunpack.c.h.s8.bf16 %v7706_v33  ;;  %v5261_v36 = vunpack.c.l.s8.bf16 %v7691_v29  ;;  %v7729_v29 = vld [vmem:[%s8851_s0 + $0xa38] sm:$0xff] }
 0xf76   : > { %5390 = vmatprep.subr.bf16.mxu1 %v5373_v39  ;;  %v5359_v39 = vunpack.c.l.s8.bf16 %v7707_v28  ;;  %v7745_v28 = vld [vmem:[%s8851_s0 + $0xab8] sm:$0xff] }
 0xf77   : > { %v4542_v4 = vpop.f32.mrf.mxu0  ;;  %5129 = vmatmul.mubr.bf16.vlgmr.msra.gmra.mxu0 %v9169_v6 }
 0xf78   : > { %v4640_v48 = vpop.f32.mrf.mxu1  ;;  %5227 = vmatmul.mubr.bf16.vlgmr.msra.gmra.mxu1 %v9169_v6  ;;  %v4553_v50 = vmul.f32 %v4551_v44, %v4542_v4  ;;  %5293 = vmatpush1.bf16.msra.mxu0 %v5274_v42  ;;  %v5260_v42 = vunpack.c.l.s8.bf16 %v7690_v31  ;;  %v5289_v4 = vunpack.c.l.s8.bf16 %v7705_v23  ;;  %v5569_v31 = vunpack.c.h.s8.bf16 %v7745_v28 }
 0xf79   : > { %5391 = vmatpush1.bf16.msra.mxu1 %v5372_v43  ;;  %v4651_v15 = vmul.f32 %v4649_v1, %v4640_v48  ;;  %v4544_v52 = vpop.f32.mrf.mxu0  ;;  %5294 = vmatprep.subr.bf16.mxu0 %v5273_v38  ;;  %v5358_v43 = vunpack.c.l.s8.bf16 %v7706_v33  ;;  %v7704_v38 = vld [vmem:[%s8851_s0 + $0x970] sm:$0xff]  ;;  %v5387_v48 = vunpack.c.l.s8.bf16 %v7721_v40 }
 0xf7a   : > { %v4642_v53 = vpop.f32.mrf.mxu1  ;;  %5392 = vmatprep.subr.bf16.mxu1 %v5371_v45  ;;  %v4555_v9 = vadd.f32 %v4553_v50, %v9475_v41  ;;  %v4554_v58 = vmul.f32 %v4551_v44, %v4544_v52  ;;  %5324 = vmatprep.mubr.bf16.mxu0 %v9131_v24  ;;  %v5368_v41 = vunpack.c.h.s8.bf16 %v7710_v56  ;;  %v5291_v44 = vunpack.c.h.s8.bf16 %v7705_v23  ;;  %v7720_v45 = vld [vmem:[%s8851_s0 + $0x9f0] sm:$0xff]  ;;  %v7719_v50 = vld [vmem:[%s8851_s0 + $0x9e8] sm:$0xff] }
 0xf7b   : > { %v4652_v12 = vmul.f32 %v4649_v1, %v4642_v53  ;;  %5422 = vmatprep.mubr.bf16.mxu1 %v9131_v24  ;;  %v4546_v60 = vpop.f32.mrf.mxu0  ;;  %v5389_v1 = vunpack.c.h.s8.bf16 %v7721_v40  ;;  %v5290_v46 = vunpack.c.h.s8.bf16 %v7704_v38  ;;  %v5388_v47 = vunpack.c.h.s8.bf16 %v7720_v45  ;;  %v7728_v33 = vld [vmem:[%s8851_s0 + $0xa30] sm:$0xff] }
 0xf7c   : > { %v4644_v59 = vpop.f32.mrf.mxu1  ;;  %v4556_v62 = vadd.f32 %v4554_v58, %v9477_v13  ;;  %v9519_v63 = vadd.f32 %v4651_v15, %v4555_v9  ;;  %5295 = vmatpush1.bf16.msra.mxu0 %v5272_v49  ;;  %v5268_v13 = vunpack.c.l.s8.bf16 %v7694_v34  ;;  %v7703_v49 = vld [vmem:[%s8851_s0 + $0x968] sm:$0xff]  ;;  %v5288_v15 = vunpack.c.l.s8.bf16 %v7704_v38  ;;  %v7717_v60 = vld [vmem:[%s8851_s0 + $0x9d8] sm:$0xff] }
 0xf7d   : > { %5393 = vmatpush1.bf16.msra.mxu1 %v5370_v51  ;;  %v4547_v2 = vpop.f32.mrf.mxu0  ;;  %5296 = vmatprep.subr.bf16.mxu0 %v5271_v54  ;;  %v5386_v51 = vunpack.c.l.s8.bf16 %v7720_v45  ;;  %v5287_v52 = vunpack.c.h.s8.bf16 %v7703_v49  ;;  %v5385_v53 = vunpack.c.h.s8.bf16 %v7719_v50  ;;  %v7702_v54 = vld [vmem:[%s8851_s0 + $0x960] sm:$0xff]  ;;  %v5285_v9 = vunpack.c.l.s8.bf16 %v7703_v49 }
 0xf7e   : > { %v4645_v3 = vpop.f32.mrf.mxu1  ;;  %5394 = vmatprep.subr.bf16.mxu1 %v5369_v55  ;;  %v9521_v7 = vadd.f32 %v4652_v12, %v4556_v62  ;;  %v7718_v55 = vld [vmem:[%s8851_s0 + $0x9e0] sm:$0xff]  ;;  %v5286_v34 = vunpack.c.h.s8.bf16 %v7702_v54  ;;  %v5383_v58 = vunpack.c.l.s8.bf16 %v7719_v50  ;;  %v7701_v12 = vld [vmem:[%s8851_s0 + $0x958] sm:$0xff]  ;;  %v5284_v59 = vunpack.c.l.s8.bf16 %v7702_v54  ;;  %v7716_v2 = vld [vmem:[%s8851_s0 + $0x9d0] sm:$0xff] }
 0xf7f   : > { %v5384_v56 = vunpack.c.h.s8.bf16 %v7718_v55  ;;  %v5382_v61 = vunpack.c.l.s8.bf16 %v7718_v55  ;;  %v5283_v62 = vunpack.c.h.s8.bf16 %v7701_v12  ;;  %v5379_v8 = vunpack.c.l.s8.bf16 %v7717_v60 }
 0xf80   : > { %5297 = vmatpush1.bf16.msra.mxu0 %v5270_v0  ;;  %v5381_v0 = vunpack.c.h.s8.bf16 %v7717_v60  ;;  %v5469_v23 = vunpack.c.l.s8.bf16 %v7729_v29  ;;  %v5567_v40 = vunpack.c.l.s8.bf16 %v7745_v28  ;;  %v7722_v28 = vld [vmem:[%s8851_s0 + $0xa00] sm:$0xff] }
 0xf81   : > { %5395 = vmatpush1.bf16.msra.mxu1 %v5368_v41  ;;  %5298 = vmatprep.subr.bf16.mxu0 %v5269_v5  ;;  %v7700_v41 = vld [vmem:[%s8851_s0 + $0x950] sm:$0xff]  ;;  %v5380_v5 = vunpack.c.h.s8.bf16 %v7716_v2 }
 0xf82   : > { %5396 = vmatprep.subr.bf16.mxu1 %v5367_v11  ;;  %v5282_v3 = vunpack.c.h.s8.bf16 %v7700_v41  ;;  %v5281_v11 = vunpack.c.l.s8.bf16 %v7701_v12 }
 0xf84   : > { %5299 = vmatpush1.bf16.msra.mxu0 %v5268_v13  ;;  %v7715_v13 = vld [vmem:[%s8851_s0 + $0x9c8] sm:$0xff] }
 0xf85   : > { %5397 = vmatpush1.bf16.msra.mxu1 %v5366_v19  ;;  %5300 = vmatprep.subr.bf16.mxu0 %v5267_v14  ;;  %v5280_v19 = vunpack.c.l.s8.bf16 %v7700_v41  ;;  %v5378_v14 = vunpack.c.l.s8.bf16 %v7716_v2  ;;  %v5377_v20 = vunpack.c.h.s8.bf16 %v7715_v13  ;;  %v7725_v41 = vld [vmem:[%s8851_s0 + $0xa18] sm:$0xff] }
 0xf86   : > { %5398 = vmatprep.subr.bf16.mxu1 %v5365_v57  ;;  %v5279_v57 = vunpack.c.h.s8.bf16 %v7699_v10  ;;  %v7741_v2 = vld [vmem:[%s8851_s0 + $0xa98] sm:$0xff] }
 0xf88   : > { %5301 = vmatpush1.bf16.msra.mxu0 %v5266_v16  ;;  %v5278_v16 = vunpack.c.h.s8.bf16 %v7698_v17 }
 0xf89   : > { %5399 = vmatpush1.bf16.msra.mxu1 %v5364_v26  ;;  %5302 = vmatprep.subr.bf16.mxu0 %v5265_v21  ;;  %v5376_v26 = vunpack.c.h.s8.bf16 %v7714_v27  ;;  %v5277_v21 = vunpack.c.l.s8.bf16 %v7699_v10  ;;  %v5561_v10 = vunpack.c.h.s8.bf16 %v7741_v2 }
 0xf8a   : > { %5400 = vmatprep.subr.bf16.mxu1 %v5363_v22  ;;  %v5375_v22 = vunpack.c.l.s8.bf16 %v7715_v13  ;;  %v7724_v13 = vld [vmem:[%s8851_s0 + $0xa10] sm:$0xff] }
 0xf8c   : > { %5303 = vmatpush1.bf16.msra.mxu0 %v5264_v25  ;;  %v4747_v25 = vpop.permute.xlu1 %4746 }
 0xf8d   : > { %5401 = vmatpush1.bf16.msra.mxu1 %v5362_v37  ;;  %5304 = vmatprep.subr.bf16.mxu0 %v5263_v18  ;;  %v5276_v37 = vunpack.c.l.s8.bf16 %v7698_v17  ;;  %v5374_v18 = vunpack.c.l.s8.bf16 %v7714_v27  ;;  %v5559_v17 = vunpack.c.l.s8.bf16 %v7741_v2  ;;  %v7723_v27 = vld [vmem:[%s8851_s0 + $0xa08] sm:$0xff] }
 0xf8e   : > { %5402 = vmatprep.subr.bf16.mxu1 %v5361_v30  ;;  %v5471_v30 = vunpack.c.h.s8.bf16 %v7729_v29 }
 0xf90   : > { %5305 = vmatpush1.bf16.msra.mxu0 %v5262_v32  ;;  %v7744_v32 = vld [vmem:[%s8851_s0 + $0xab0] sm:$0xff] }
 0xf91   : > { %5403 = vmatpush1.bf16.msra.mxu1 %v5360_v35  ;;  %5306 = vmatprep.subr.bf16.mxu0 %v5261_v36  ;;  %v5470_v35 = vunpack.c.h.s8.bf16 %v7728_v33  ;;  %v5568_v36 = vunpack.c.h.s8.bf16 %v7744_v32 }
 0xf92   : > { %5404 = vmatprep.subr.bf16.mxu1 %v5359_v39  ;;  %v4845_v39 = vpop.permute.xlu1 %4844 }
 0xf94   : > { %5307 = vmatpush1.bf16.msra.mxu0 %v5260_v42  ;;  %v7727_v42 = vld [vmem:[%s8851_s0 + $0xa28] sm:$0xff] }
 0xf95   : > { %5405 = vmatpush1.bf16.msra.mxu1 %v5358_v43  ;;  %5308 = vmatprep.subr.bf16.mxu0 %v5291_v44  ;;  %v7743_v43 = vld [vmem:[%s8851_s0 + $0xaa8] sm:$0xff]  ;;  %v5467_v50 = vunpack.c.h.s8.bf16 %v7727_v42 }
 0xf96   : > { %5406 = vmatprep.subr.bf16.mxu1 %v5389_v1 }
 0xf98   : > { %5309 = vmatpush2.bf16.msra.mxu0 %v5290_v46  ;;  %v5468_v46 = vunpack.c.l.s8.bf16 %v7728_v33  ;;  %v7737_v33 = vld [vmem:[%s8851_s0 + $0xa78] sm:$0xff] }
 0xf99   : > { %5407 = vmatpush2.bf16.msra.mxu1 %v5388_v47  ;;  %5310 = vmatprep.subr.bf16.mxu0 %v5289_v4  ;;  %v5566_v47 = vunpack.c.l.s8.bf16 %v7744_v32  ;;  %v7726_v4 = vld [vmem:[%s8851_s0 + $0xa20] sm:$0xff]  ;;  %v7753_v32 = vld [vmem:[%s8851_s0 + $0xaf8] sm:$0xff] }
 0xf9a   : > { %5408 = vmatprep.subr.bf16.mxu1 %v5387_v48 }
 0xf9c   : > { %5311 = vmatpush2.bf16.msra.mxu0 %v5288_v15  ;;  %v5565_v15 = vunpack.c.h.s8.bf16 %v7743_v43 }
 0xf9d   : > { %5409 = vmatpush2.bf16.msra.mxu1 %v5386_v51  ;;  %5312 = vmatprep.subr.bf16.mxu0 %v5287_v52  ;;  %v7742_v51 = vld [vmem:[%s8851_s0 + $0xaa0] sm:$0xff] }
 0xf9e   : > { %5410 = vmatprep.subr.bf16.mxu1 %v5385_v53 }
 0xfa0   : > { %5313 = vmatpush2.bf16.msra.mxu0 %v5286_v34 }
 0xfa1   : > { %5411 = vmatpush2.bf16.msra.mxu1 %v5384_v56  ;;  %5314 = vmatprep.subr.bf16.mxu0 %v5285_v9  ;;  %v5466_v56 = vunpack.c.h.s8.bf16 %v7726_v4  ;;  %v8559_v9 = vmov 20  }
 0xfa2   : > { %5412 = vmatprep.subr.bf16.mxu1 %v5383_v58  ;;  %8206 = vset.pattern.permute.xlu0 %v8559_v9 }
 0xfa4   : > { %5315 = vmatpush2.bf16.msra.mxu0 %v5284_v59 }
 0xfa5   : > { %5413 = vmatpush2.bf16.msra.mxu1 %v5382_v61  ;;  %5316 = vmatprep.subr.bf16.mxu0 %v5283_v62  ;;  %v5465_v61 = vunpack.c.l.s8.bf16 %v7727_v42  ;;  %v5563_v62 = vunpack.c.l.s8.bf16 %v7743_v43  ;;  %v7752_v42 = vld [vmem:[%s8851_s0 + $0xaf0] sm:$0xff] }
 0xfa6   : > { %5414 = vmatprep.subr.bf16.mxu1 %v5381_v0 }
 0xfa8   : > { %5317 = vmatpush2.bf16.msra.mxu0 %v5282_v3  ;;  %v9570_v3 = vld [vmem:[%s9146_s24] sm:$0xff] }
 0xfa9   : > { %5415 = vmatpush2.bf16.msra.mxu1 %v5380_v5  ;;  %5318 = vmatprep.subr.bf16.mxu0 %v5281_v11  ;;  %v5464_v5 = vunpack.c.l.s8.bf16 %v7726_v4  ;;  %v5562_v11 = vunpack.c.l.s8.bf16 %v7742_v51  ;;  %v5582_v4 = vunpack.c.l.s8.bf16 %v7752_v42 }
 0xfaa   : > { %5416 = vmatprep.subr.bf16.mxu1 %v5379_v8  ;;  %5530 = vperm.xlu0 %8206, %v9570_v3   ;;  %v5463_v8 = vunpack.c.h.s8.bf16 %v7725_v41 }
 0xfac   : > { %5319 = vmatpush2.bf16.msra.mxu0 %v5280_v19  ;;  %v7740_v19 = vld [vmem:[%s8851_s0 + $0xa90] sm:$0xff] }
 0xfad   : > { %5417 = vmatpush2.bf16.msra.mxu1 %v5378_v14  ;;  %5320 = vmatprep.subr.bf16.mxu0 %v5279_v57  ;;  %v5462_v14 = vunpack.c.h.s8.bf16 %v7724_v13  ;;  %v5560_v57 = vunpack.c.h.s8.bf16 %v7740_v19 }
 0xfae   : > { %5418 = vmatprep.subr.bf16.mxu1 %v5377_v20  ;;  %v5461_v20 = vunpack.c.l.s8.bf16 %v7725_v41 }
 0xfb0   : > { %5321 = vmatpush2.bf16.msra.mxu0 %v5278_v16  ;;  %v7739_v16 = vld [vmem:[%s8851_s0 + $0xa88] sm:$0xff] }
 0xfb1   : > { %5419 = vmatpush2.bf16.msra.mxu1 %v5376_v26  ;;  %5322 = vmatprep.subr.bf16.mxu0 %v5277_v21  ;;  %v5460_v26 = vunpack.c.l.s8.bf16 %v7724_v13  ;;  %v5558_v21 = vunpack.c.l.s8.bf16 %v7740_v19  ;;  %v5557_v29 = vunpack.c.h.s8.bf16 %v7739_v16  ;;  %v7730_v19 = vld [vmem:[%s8851_s0 + $0xa40] sm:$0xff] }
 0xfb2   : > { %5420 = vmatprep.subr.bf16.mxu1 %v5375_v22  ;;  %v5459_v22 = vunpack.c.h.s8.bf16 %v7723_v27 }
 0xfb4   : > { %5323 = vmatpush2.bf16.msra.mxu0 %v5276_v37  ;;  %v5458_v37 = vunpack.c.h.s8.bf16 %v7722_v28 }
 0xfb5   : > { %5421 = vmatpush2.bf16.msra.mxu1 %v5374_v18  ;;  %5488 = vmatprep.subr.bf16.mxu0 %v5471_v30  ;;  %v5457_v30 = vunpack.c.l.s8.bf16 %v7723_v27 }
 0xfb6   : > { %5586 = vmatprep.subr.bf16.mxu1 %v5569_v31  ;;  %v5555_v31 = vunpack.c.l.s8.bf16 %v7739_v16  ;;  %v7761_v16 = vld [vmem:[%s8851_s0 + $0xb38] sm:$0xff] }
 0xfb7   : > { %v4738_v44 = vpop.f32.mrf.mxu0  ;;  %5325 = vmatmul.mubr.bf16.vlgmr.msra.gmra.mxu0 %v9169_v6 }
 0xfb8   : > { %v4836_v1 = vpop.f32.mrf.mxu1  ;;  %5423 = vmatmul.mubr.bf16.vlgmr.msra.gmra.mxu1 %v9169_v6  ;;  %v4749_v38 = vmul.f32 %v4747_v25, %v4738_v44  ;;  %5489 = vmatpush1.bf16.msra.mxu0 %v5470_v35  ;;  %v5456_v35 = vunpack.c.l.s8.bf16 %v7722_v28  ;;  %v5584_v44 = vunpack.c.h.s8.bf16 %v7752_v42 }
 0xfb9   : > { %5587 = vmatpush1.bf16.msra.mxu1 %v5568_v36  ;;  %v4847_v45 = vmul.f32 %v4845_v39, %v4836_v1  ;;  %v4740_v48 = vpop.f32.mrf.mxu0  ;;  %5490 = vmatprep.subr.bf16.mxu0 %v5469_v23  ;;  %v5585_v23 = vunpack.c.h.s8.bf16 %v7753_v32  ;;  %v5485_v1 = vunpack.c.l.s8.bf16 %v7737_v33 }
 0xfba   : > { %v4838_v49 = vpop.f32.mrf.mxu1  ;;  %5588 = vmatprep.subr.bf16.mxu1 %v5567_v40  ;;  %v4751_v52 = vadd.f32 %v4749_v38, %v9519_v63  ;;  %v4750_v53 = vmul.f32 %v4747_v25, %v4740_v48  ;;  %5520 = vmatprep.mubr.bf16.mxu0 %v9131_v24  ;;  %v5564_v63 = vunpack.c.h.s8.bf16 %v7742_v51  ;;  %v7738_v25 = vld [vmem:[%s8851_s0 + $0xa80] sm:$0xff]  ;;  %v7736_v40 = vld [vmem:[%s8851_s0 + $0xa70] sm:$0xff]  ;;  %v5583_v38 = vunpack.c.l.s8.bf16 %v7753_v32 }
 0xfbb   : > { %v4848_v54 = vmul.f32 %v4845_v39, %v4838_v49  ;;  %5618 = vmatprep.mubr.bf16.mxu1 %v9131_v24  ;;  %v4742_v55 = vpop.f32.mrf.mxu0  ;;  %v5556_v18 = vunpack.c.h.s8.bf16 %v7738_v25  ;;  %v5554_v36 = vunpack.c.l.s8.bf16 %v7738_v25  ;;  %v5487_v39 = vunpack.c.h.s8.bf16 %v7737_v33  ;;  %v7760_v25 = vld [vmem:[%s8851_s0 + $0xb30] sm:$0xff]  ;;  %v5041_v33 = vpop.permute.xlu1 %5040 }
 0xfbc   : > { %v4840_v34 = vpop.f32.mrf.mxu1  ;;  %v4752_v58 = vadd.f32 %v4750_v53, %v9521_v7  ;;  %v9563_v12 = vadd.f32 %v4847_v45, %v4751_v52  ;;  %5491 = vmatpush1.bf16.msra.mxu0 %v5468_v46  ;;  %v8560_v7 = vmov 21   ;;  %v5486_v43 = vunpack.c.h.s8.bf16 %v7736_v40  ;;  %v7735_v45 = vld [vmem:[%s8851_s0 + $0xa68] sm:$0xff]  ;;  %v7733_v55 = vld [vmem:[%s8851_s0 + $0xa58] sm:$0xff] }
 0xfbd   : > { %5589 = vmatpush1.bf16.msra.mxu1 %v5566_v47  ;;  %v4743_v60 = vpop.f32.mrf.mxu0  ;;  %5492 = vmatprep.subr.bf16.mxu0 %v5467_v50  ;;  %v7751_v46 = vld [vmem:[%s8851_s0 + $0xae8] sm:$0xff]  ;;  %v5484_v47 = vunpack.c.l.s8.bf16 %v7736_v40  ;;  %v5483_v48 = vunpack.c.h.s8.bf16 %v7735_v45  ;;  %v7734_v50 = vld [vmem:[%s8851_s0 + $0xa60] sm:$0xff]  ;;  %v5481_v53 = vunpack.c.l.s8.bf16 %v7735_v45  ;;  %v7749_v34 = vld [vmem:[%s8851_s0 + $0xad8] sm:$0xff]  ;;  %v5477_v41 = vunpack.c.l.s8.bf16 %v7733_v55 }
 0xfbe   : > { %v4841_v59 = vpop.f32.mrf.mxu1  ;;  %5590 = vmatprep.subr.bf16.mxu1 %v5565_v15  ;;  %v9565_v0 = vadd.f32 %v4848_v54, %v4752_v58  ;;  %8207 = vset.pattern.permute.xlu1 %v8560_v7  ;;  %v5581_v49 = vunpack.c.h.s8.bf16 %v7751_v46  ;;  %v7750_v15 = vld [vmem:[%s8851_s0 + $0xae0] sm:$0xff]  ;;  %v5482_v51 = vunpack.c.h.s8.bf16 %v7734_v50  ;;  %v5579_v54 = vunpack.c.l.s8.bf16 %v7751_v46  ;;  %v7732_v60 = vld [vmem:[%s8851_s0 + $0xa50] sm:$0xff]  ;;  %v7731_v7 = vld [vmem:[%s8851_s0 + $0xa48] sm:$0xff] }
 0xfbf   : > { %5628 = vperm.xlu1 %8207, %v9570_v3   ;;  %v5580_v52 = vunpack.c.h.s8.bf16 %v7750_v15  ;;  %v5578_v9 = vunpack.c.l.s8.bf16 %v7750_v15  ;;  %v5479_v58 = vunpack.c.h.s8.bf16 %v7733_v55  ;;  %v7748_v59 = vld [vmem:[%s8851_s0 + $0xad0] sm:$0xff]  ;;  %v5575_v2 = vunpack.c.l.s8.bf16 %v7749_v34 }
 0xfc0   : > { %5493 = vmatpush1.bf16.msra.mxu0 %v5466_v56  ;;  %v5480_v56 = vunpack.c.l.s8.bf16 %v7734_v50  ;;  %v5665_v32 = vunpack.c.l.s8.bf16 %v7761_v16 }
 0xfc1   : > { %5591 = vmatpush1.bf16.msra.mxu1 %v5564_v63  ;;  %5494 = vmatprep.subr.bf16.mxu0 %v5465_v61  ;;  %v5577_v63 = vunpack.c.h.s8.bf16 %v7749_v34  ;;  %v5478_v61 = vunpack.c.h.s8.bf16 %v7732_v60 }
 0xfc2   : > { %5592 = vmatprep.subr.bf16.mxu1 %v5563_v62  ;;  %v5576_v62 = vunpack.c.h.s8.bf16 %v7748_v59 }
 0xfc4   : > { %5495 = vmatpush1.bf16.msra.mxu0 %v5464_v5  ;;  %v7747_v5 = vld [vmem:[%s8851_s0 + $0xac8] sm:$0xff] }
 0xfc5   : > { %5593 = vmatpush1.bf16.msra.mxu1 %v5562_v11  ;;  %5496 = vmatprep.subr.bf16.mxu0 %v5463_v8  ;;  %v5476_v11 = vunpack.c.l.s8.bf16 %v7732_v60  ;;  %v5574_v8 = vunpack.c.l.s8.bf16 %v7748_v59  ;;  %v5573_v13 = vunpack.c.h.s8.bf16 %v7747_v5  ;;  %v5571_v27 = vunpack.c.l.s8.bf16 %v7747_v5  ;;  %v7757_v59 = vld [vmem:[%s8851_s0 + $0xb18] sm:$0xff]  ;;  %v7756_v5 = vld [vmem:[%s8851_s0 + $0xb10] sm:$0xff] }
 0xfc6   : > { %5594 = vmatprep.subr.bf16.mxu1 %v5561_v10  ;;  %v5475_v10 = vunpack.c.h.s8.bf16 %v7731_v7 }
 0xfc8   : > { %5497 = vmatpush1.bf16.msra.mxu0 %v5462_v14  ;;  %v7746_v14 = vld [vmem:[%s8851_s0 + $0xac0] sm:$0xff] }
 0xfc9   : > { %5595 = vmatpush1.bf16.msra.mxu1 %v5560_v57  ;;  %5498 = vmatprep.subr.bf16.mxu0 %v5461_v20  ;;  %v5474_v57 = vunpack.c.h.s8.bf16 %v7730_v19  ;;  %v5572_v20 = vunpack.c.h.s8.bf16 %v7746_v14 }
 0xfca   : > { %5596 = vmatprep.subr.bf16.mxu1 %v5559_v17  ;;  %v5473_v17 = vunpack.c.l.s8.bf16 %v7731_v7 }
 0xfcc   : > { %5499 = vmatpush1.bf16.msra.mxu0 %v5460_v26  ;;  %v7777_v26 = vld [vmem:[%s8851_s0 + $0xbb8] sm:$0xff] }
 0xfcd   : > { %5597 = vmatpush1.bf16.msra.mxu1 %v5558_v21  ;;  %5500 = vmatprep.subr.bf16.mxu0 %v5459_v22  ;;  %v5472_v21 = vunpack.c.l.s8.bf16 %v7730_v19  ;;  %v5570_v22 = vunpack.c.l.s8.bf16 %v7746_v14  ;;  %v5765_v28 = vunpack.c.h.s8.bf16 %v7777_v26  ;;  %v7755_v14 = vld [vmem:[%s8851_s0 + $0xb08] sm:$0xff] }
 0xfce   : > { %5598 = vmatprep.subr.bf16.mxu1 %v5557_v29  ;;  %v5667_v29 = vunpack.c.h.s8.bf16 %v7761_v16 }
 0xfd0   : > { %5501 = vmatpush1.bf16.msra.mxu0 %v5458_v37  ;;  %v7776_v37 = vld [vmem:[%s8851_s0 + $0xbb0] sm:$0xff] }
 0xfd1   : > { %5599 = vmatpush1.bf16.msra.mxu1 %v5556_v18  ;;  %5502 = vmatprep.subr.bf16.mxu0 %v5457_v30  ;;  %v5666_v18 = vunpack.c.h.s8.bf16 %v7760_v25  ;;  %v5764_v30 = vunpack.c.h.s8.bf16 %v7776_v37 }
 0xfd2   : > { %5600 = vmatprep.subr.bf16.mxu1 %v5555_v31  ;;  %v4943_v31 = vpop.permute.xlu0 %4942 }
 0xfd4   : > { %5503 = vmatpush1.bf16.msra.mxu0 %v5456_v35  ;;  %v5763_v35 = vunpack.c.l.s8.bf16 %v7777_v26  ;;  %v7754_v26 = vld [vmem:[%s8851_s0 + $0xb00] sm:$0xff] }
 0xfd5   : > { %5601 = vmatpush1.bf16.msra.mxu1 %v5554_v36  ;;  %5504 = vmatprep.subr.bf16.mxu0 %v5487_v39  ;;  %v7759_v36 = vld [vmem:[%s8851_s0 + $0xb28] sm:$0xff] }
 0xfd6   : > { %5602 = vmatprep.subr.bf16.mxu1 %v5585_v23  ;;  %v7775_v39 = vld [vmem:[%s8851_s0 + $0xba8] sm:$0xff] }
 0xfd8   : > { %5505 = vmatpush2.bf16.msra.mxu0 %v5486_v43 }
 0xfd9   : > { %5603 = vmatpush2.bf16.msra.mxu1 %v5584_v44  ;;  %5506 = vmatprep.subr.bf16.mxu0 %v5485_v1  ;;  %v5664_v44 = vunpack.c.l.s8.bf16 %v7760_v25  ;;  %v5762_v1 = vunpack.c.l.s8.bf16 %v7776_v37  ;;  %v7769_v37 = vld [vmem:[%s8851_s0 + $0xb78] sm:$0xff] }
 0xfda   : > { %5604 = vmatprep.subr.bf16.mxu1 %v5583_v38  ;;  %v7758_v38 = vld [vmem:[%s8851_s0 + $0xb20] sm:$0xff] }
 0xfdc   : > { %5507 = vmatpush2.bf16.msra.mxu0 %v5484_v47  ;;  %v5663_v47 = vunpack.c.h.s8.bf16 %v7759_v36 }
 0xfdd   : > { %5605 = vmatpush2.bf16.msra.mxu1 %v5582_v4  ;;  %5508 = vmatprep.subr.bf16.mxu0 %v5483_v48  ;;  %v5761_v4 = vunpack.c.h.s8.bf16 %v7775_v39  ;;  %v7774_v48 = vld [vmem:[%s8851_s0 + $0xba0] sm:$0xff] }
 0xfde   : > { %5606 = vmatprep.subr.bf16.mxu1 %v5581_v49 }
 0xfe0   : > { %5509 = vmatpush2.bf16.msra.mxu0 %v5482_v51 }
 0xfe1   : > { %5607 = vmatpush2.bf16.msra.mxu1 %v5580_v52  ;;  %5510 = vmatprep.subr.bf16.mxu0 %v5481_v53  ;;  %v5662_v53 = vunpack.c.h.s8.bf16 %v7758_v38 }
 0xfe2   : > { %5608 = vmatprep.subr.bf16.mxu1 %v5579_v54  ;;  %v8561_v54 = vmov 22  }
 0xfe3   : > { %8208 = vset.pattern.permute.xlu1 %v8561_v54 }
 0xfe4   : > { %5511 = vmatpush2.bf16.msra.mxu0 %v5480_v56  ;;  %5726 = vperm.xlu1 %8208, %v9570_v3  }
 0xfe5   : > { %5609 = vmatpush2.bf16.msra.mxu1 %v5578_v9  ;;  %5512 = vmatprep.subr.bf16.mxu0 %v5479_v58  ;;  %v5661_v58 = vunpack.c.l.s8.bf16 %v7759_v36  ;;  %v7784_v36 = vld [vmem:[%s8851_s0 + $0xbf0] sm:$0xff] }
 0xfe6   : > { %5610 = vmatprep.subr.bf16.mxu1 %v5577_v63  ;;  %v5759_v63 = vunpack.c.l.s8.bf16 %v7775_v39 }
 0xfe8   : > { %5513 = vmatpush2.bf16.msra.mxu0 %v5478_v61  ;;  %v7773_v61 = vld [vmem:[%s8851_s0 + $0xb98] sm:$0xff] }
 0xfe9   : > { %5611 = vmatpush2.bf16.msra.mxu1 %v5576_v62  ;;  %5514 = vmatprep.subr.bf16.mxu0 %v5477_v41  ;;  %v5660_v62 = vunpack.c.l.s8.bf16 %v7758_v38  ;;  %v5758_v41 = vunpack.c.l.s8.bf16 %v7774_v48  ;;  %v5757_v7 = vunpack.c.h.s8.bf16 %v7773_v61  ;;  %v5755_v19 = vunpack.c.l.s8.bf16 %v7773_v61 }
 0xfea   : > { %5612 = vmatprep.subr.bf16.mxu1 %v5575_v2  ;;  %v5659_v2 = vunpack.c.h.s8.bf16 %v7757_v59  ;;  %v5778_v38 = vunpack.c.l.s8.bf16 %v7784_v36 }
 0xfec   : > { %5515 = vmatpush2.bf16.msra.mxu0 %v5476_v11  ;;  %v7772_v11 = vld [vmem:[%s8851_s0 + $0xb90] sm:$0xff] }
 0xfed   : > { %5613 = vmatpush2.bf16.msra.mxu1 %v5574_v8  ;;  %5516 = vmatprep.subr.bf16.mxu0 %v5475_v10  ;;  %v5658_v8 = vunpack.c.h.s8.bf16 %v7756_v5  ;;  %v5756_v10 = vunpack.c.h.s8.bf16 %v7772_v11 }
 0xfee   : > { %5614 = vmatprep.subr.bf16.mxu1 %v5573_v13  ;;  %v5657_v13 = vunpack.c.l.s8.bf16 %v7757_v59 }
 0xff0   : > { %5517 = vmatpush2.bf16.msra.mxu0 %v5474_v57  ;;  %v7771_v57 = vld [vmem:[%s8851_s0 + $0xb88] sm:$0xff] }
 0xff1   : > { %5615 = vmatpush2.bf16.msra.mxu1 %v5572_v20  ;;  %5518 = vmatprep.subr.bf16.mxu0 %v5473_v17  ;;  %v5656_v20 = vunpack.c.l.s8.bf16 %v7756_v5  ;;  %v5754_v17 = vunpack.c.l.s8.bf16 %v7772_v11  ;;  %v5753_v16 = vunpack.c.h.s8.bf16 %v7771_v57  ;;  %v5751_v25 = vunpack.c.l.s8.bf16 %v7771_v57  ;;  %v7762_v11 = vld [vmem:[%s8851_s0 + $0xb40] sm:$0xff]  ;;  %v7793_v57 = vld [vmem:[%s8851_s0 + $0xc38] sm:$0xff] }
 0xff2   : > { %5616 = vmatprep.subr.bf16.mxu1 %v5571_v27  ;;  %v5655_v27 = vunpack.c.h.s8.bf16 %v7755_v14 }
 0xff4   : > { %5519 = vmatpush2.bf16.msra.mxu0 %v5472_v21  ;;  %v7770_v21 = vld [vmem:[%s8851_s0 + $0xb80] sm:$0xff] }
 0xff5   : > { %5617 = vmatpush2.bf16.msra.mxu1 %v5570_v22  ;;  %5684 = vmatprep.subr.bf16.mxu0 %v5667_v29  ;;  %v5654_v22 = vunpack.c.h.s8.bf16 %v7754_v26  ;;  %v5752_v29 = vunpack.c.h.s8.bf16 %v7770_v21 }
 0xff6   : > { %5782 = vmatprep.subr.bf16.mxu1 %v5765_v28  ;;  %v5653_v28 = vunpack.c.l.s8.bf16 %v7755_v14 }
 0xff7   : > { %v4934_v23 = vpop.f32.mrf.mxu0  ;;  %5521 = vmatmul.mubr.bf16.vlgmr.msra.gmra.mxu0 %v9169_v6 }
 0xff8   : > { %v5032_v40 = vpop.f32.mrf.mxu1  ;;  %5619 = vmatmul.mubr.bf16.vlgmr.msra.gmra.mxu1 %v9169_v6  ;;  %v4945_v42 = vmul.f32 %v4943_v31, %v4934_v23  ;;  %5685 = vmatpush1.bf16.msra.mxu0 %v5666_v18  ;;  %v7785_v18 = vld [vmem:[%s8851_s0 + $0xbf8] sm:$0xff]  ;;  %v5780_v23 = vunpack.c.h.s8.bf16 %v7784_v36 }
 0xff9   : > { %5783 = vmatpush1.bf16.msra.mxu1 %v5764_v30  ;;  %v5043_v43 = vmul.f32 %v5041_v33, %v5032_v40  ;;  %v4936_v45 = vpop.f32.mrf.mxu0  ;;  %5686 = vmatprep.subr.bf16.mxu0 %v5665_v32  ;;  %v5652_v30 = vunpack.c.l.s8.bf16 %v7754_v26  ;;  %v5781_v32 = vunpack.c.h.s8.bf16 %v7785_v18  ;;  %v5681_v40 = vunpack.c.l.s8.bf16 %v7769_v37 }
 0xffa   : > { %v5034_v46 = vpop.f32.mrf.mxu1  ;;  %5784 = vmatprep.subr.bf16.mxu1 %v5763_v35  ;;  %v4947_v49 = vadd.f32 %v4945_v42, %v9563_v12  ;;  %v4946_v50 = vmul.f32 %v4943_v31, %v4936_v45  ;;  %5716 = vmatprep.mubr.bf16.mxu0 %v9131_v24  ;;  %v5760_v12 = vunpack.c.h.s8.bf16 %v7774_v48  ;;  %v5750_v31 = vunpack.c.l.s8.bf16 %v7770_v21  ;;  %v7768_v35 = vld [vmem:[%s8851_s0 + $0xb70] sm:$0xff] }
 0xffb   : > { %v5044_v15 = vmul.f32 %v5041_v33, %v5034_v46  ;;  %5814 = vmatprep.mubr.bf16.mxu1 %v9131_v24  ;;  %v4938_v51 = vpop.f32.mrf.mxu0  ;;  %v5683_v33 = vunpack.c.h.s8.bf16 %v7769_v37  ;;  %v5682_v39 = vunpack.c.h.s8.bf16 %v7768_v35  ;;  %v5779_v42 = vunpack.c.l.s8.bf16 %v7785_v18  ;;  %v7792_v21 = vld [vmem:[%s8851_s0 + $0xc30] sm:$0xff]  ;;  %v5237_v37 = vpop.permute.xlu0 %5236 }
 0xffc   : > { %v5036_v52 = vpop.f32.mrf.mxu1  ;;  %v4948_v55 = vadd.f32 %v4946_v50, %v9565_v0  ;;  %v9610_v34 = vadd.f32 %v5043_v43, %v4947_v49  ;;  %5687 = vmatpush1.bf16.msra.mxu0 %v5664_v44  ;;  %v8562_v0 = vmov 23   ;;  %v7767_v43 = vld [vmem:[%s8851_s0 + $0xb68] sm:$0xff]  ;;  %v7765_v51 = vld [vmem:[%s8851_s0 + $0xb58] sm:$0xff]  ;;  %v5861_v18 = vunpack.c.l.s8.bf16 %v7793_v57 }
 0xffd   : > { %5785 = vmatpush1.bf16.msra.mxu1 %v5762_v1  ;;  %v4939_v56 = vpop.f32.mrf.mxu0  ;;  %5688 = vmatprep.subr.bf16.mxu0 %v5663_v47  ;;  %v7783_v44 = vld [vmem:[%s8851_s0 + $0xbe8] sm:$0xff]  ;;  %v5680_v1 = vunpack.c.l.s8.bf16 %v7768_v35  ;;  %v5679_v45 = vunpack.c.h.s8.bf16 %v7767_v43  ;;  %v7766_v47 = vld [vmem:[%s8851_s0 + $0xb60] sm:$0xff]  ;;  %v5677_v50 = vunpack.c.l.s8.bf16 %v7767_v43  ;;  %v7781_v52 = vld [vmem:[%s8851_s0 + $0xbd8] sm:$0xff]  ;;  %v5673_v59 = vunpack.c.l.s8.bf16 %v7765_v51 }
 0xffe   : > { %v5037_v9 = vpop.f32.mrf.mxu1  ;;  %5786 = vmatprep.subr.bf16.mxu1 %v5761_v4  ;;  %v9612_v60 = vadd.f32 %v5044_v15, %v4948_v55  ;;  %8209 = vset.pattern.permute.xlu0 %v8562_v0  ;;  %v5777_v46 = vunpack.c.h.s8.bf16 %v7783_v44  ;;  %v7782_v4 = vld [vmem:[%s8851_s0 + $0xbe0] sm:$0xff]  ;;  %v5678_v48 = vunpack.c.h.s8.bf16 %v7766_v47  ;;  %v5775_v15 = vunpack.c.l.s8.bf16 %v7783_v44  ;;  %v7764_v56 = vld [vmem:[%s8851_s0 + $0xb50] sm:$0xff]  ;;  %v7763_v0 = vld [vmem:[%s8851_s0 + $0xb48] sm:$0xff] }
 0xfff   : > { %5824 = vperm.xlu0 %8209, %v9570_v3   ;;  %v5776_v49 = vunpack.c.h.s8.bf16 %v7782_v4  ;;  %v5774_v54 = vunpack.c.l.s8.bf16 %v7782_v4  ;;  %v5675_v55 = vunpack.c.h.s8.bf16 %v7765_v51  ;;  %v7780_v9 = vld [vmem:[%s8851_s0 + $0xbd0] sm:$0xff]  ;;  %v5771_v61 = vunpack.c.l.s8.bf16 %v7781_v52 }
0x1000   : > { %5689 = vmatpush1.bf16.msra.mxu0 %v5662_v53  ;;  %v5676_v53 = vunpack.c.l.s8.bf16 %v7766_v47  ;;  %v5860_v36 = vunpack.c.l.s8.bf16 %v7792_v21 }
0x1001   : > { %5787 = vmatpush1.bf16.msra.mxu1 %v5760_v12  ;;  %5690 = vmatprep.subr.bf16.mxu0 %v5661_v58  ;;  %v5773_v12 = vunpack.c.h.s8.bf16 %v7781_v52  ;;  %v5674_v58 = vunpack.c.h.s8.bf16 %v7764_v56 }
0x1002   : > { %5788 = vmatprep.subr.bf16.mxu1 %v5759_v63  ;;  %v5772_v63 = vunpack.c.h.s8.bf16 %v7780_v9 }
0x1004   : > { %5691 = vmatpush1.bf16.msra.mxu0 %v5660_v62  ;;  %v7779_v62 = vld [vmem:[%s8851_s0 + $0xbc8] sm:$0xff] }
0x1005   : > { %5789 = vmatpush1.bf16.msra.mxu1 %v5758_v41  ;;  %5692 = vmatprep.subr.bf16.mxu0 %v5659_v2  ;;  %v5672_v41 = vunpack.c.l.s8.bf16 %v7764_v56  ;;  %v5770_v2 = vunpack.c.l.s8.bf16 %v7780_v9  ;;  %v5769_v5 = vunpack.c.h.s8.bf16 %v7779_v62  ;;  %v5767_v14 = vunpack.c.l.s8.bf16 %v7779_v62  ;;  %v7789_v9 = vld [vmem:[%s8851_s0 + $0xc18] sm:$0xff]  ;;  %v7804_v62 = vld [vmem:[%s8851_s0 + $0xc90] sm:$0xff] }
0x1006   : > { %5790 = vmatprep.subr.bf16.mxu1 %v5757_v7  ;;  %v5671_v7 = vunpack.c.h.s8.bf16 %v7763_v0 }
0x1008   : > { %5693 = vmatpush1.bf16.msra.mxu0 %v5658_v8  ;;  %v7778_v8 = vld [vmem:[%s8851_s0 + $0xbc0] sm:$0xff] }
0x1009   : > { %5791 = vmatpush1.bf16.msra.mxu1 %v5756_v10  ;;  %5694 = vmatprep.subr.bf16.mxu0 %v5657_v13  ;;  %v5670_v10 = vunpack.c.h.s8.bf16 %v7762_v11  ;;  %v5768_v13 = vunpack.c.h.s8.bf16 %v7778_v8 }
0x100a   : > { %5792 = vmatprep.subr.bf16.mxu1 %v5755_v19  ;;  %v5669_v19 = vunpack.c.l.s8.bf16 %v7763_v0  ;;  %v7788_v0 = vld [vmem:[%s8851_s0 + $0xc10] sm:$0xff] }
0x100c   : > { %5695 = vmatpush1.bf16.msra.mxu0 %v5656_v20  ;;  %v7809_v20 = vld [vmem:[%s8851_s0 + $0xcb8] sm:$0xff] }
0x100d   : > { %5793 = vmatpush1.bf16.msra.mxu1 %v5754_v17  ;;  %5696 = vmatprep.subr.bf16.mxu0 %v5655_v27  ;;  %v5668_v17 = vunpack.c.l.s8.bf16 %v7762_v11  ;;  %v5766_v27 = vunpack.c.l.s8.bf16 %v7778_v8  ;;  %v5961_v26 = vunpack.c.h.s8.bf16 %v7809_v20  ;;  %v7787_v8 = vld [vmem:[%s8851_s0 + $0xc08] sm:$0xff] }
0x100e   : > { %5794 = vmatprep.subr.bf16.mxu1 %v5753_v16  ;;  %v5863_v16 = vunpack.c.h.s8.bf16 %v7793_v57  ;;  %v7786_v57 = vld [vmem:[%s8851_s0 + $0xc00] sm:$0xff] }
0x1010   : > { %5697 = vmatpush1.bf16.msra.mxu0 %v5654_v22  ;;  %v7808_v22 = vld [vmem:[%s8851_s0 + $0xcb0] sm:$0xff] }
0x1011   : > { %5795 = vmatpush1.bf16.msra.mxu1 %v5752_v29  ;;  %5698 = vmatprep.subr.bf16.mxu0 %v5653_v28  ;;  %v5862_v29 = vunpack.c.h.s8.bf16 %v7792_v21  ;;  %v5960_v28 = vunpack.c.h.s8.bf16 %v7808_v22  ;;  %v7801_v21 = vld [vmem:[%s8851_s0 + $0xc78] sm:$0xff] }
0x1012   : > { %5796 = vmatprep.subr.bf16.mxu1 %v5751_v25  ;;  %v5139_v25 = vpop.permute.xlu1 %5138 }
0x1014   : > { %5699 = vmatpush1.bf16.msra.mxu0 %v5652_v30  ;;  %v5959_v30 = vunpack.c.l.s8.bf16 %v7809_v20  ;;  %v7802_v20 = vld [vmem:[%s8851_s0 + $0xc80] sm:$0xff] }
0x1015   : > { %5797 = vmatpush1.bf16.msra.mxu1 %v5750_v31  ;;  %5700 = vmatprep.subr.bf16.mxu0 %v5683_v33  ;;  %v7791_v31 = vld [vmem:[%s8851_s0 + $0xc28] sm:$0xff] }
0x1016   : > { %5798 = vmatprep.subr.bf16.mxu1 %v5781_v32  ;;  %v7807_v33 = vld [vmem:[%s8851_s0 + $0xca8] sm:$0xff]  ;;  %v5859_v44 = vunpack.c.h.s8.bf16 %v7791_v31 }
0x1018   : > { %5701 = vmatpush2.bf16.msra.mxu0 %v5682_v39 }
0x1019   : > { %5799 = vmatpush2.bf16.msra.mxu1 %v5780_v23  ;;  %5702 = vmatprep.subr.bf16.mxu0 %v5681_v40  ;;  %v5958_v40 = vunpack.c.l.s8.bf16 %v7808_v22  ;;  %v7817_v22 = vld [vmem:[%s8851_s0 + $0xcf8] sm:$0xff] }
0x101a   : > { %5800 = vmatprep.subr.bf16.mxu1 %v5779_v42 }
0x101c   : > { %5703 = vmatpush2.bf16.msra.mxu0 %v5680_v1  ;;  %v5957_v1 = vunpack.c.h.s8.bf16 %v7807_v33 }
0x101d   : > { %5801 = vmatpush2.bf16.msra.mxu1 %v5778_v38  ;;  %5704 = vmatprep.subr.bf16.mxu0 %v5679_v45  ;;  %v7790_v38 = vld [vmem:[%s8851_s0 + $0xc20] sm:$0xff] }
0x101e   : > { %5802 = vmatprep.subr.bf16.mxu1 %v5777_v46  ;;  %v7806_v45 = vld [vmem:[%s8851_s0 + $0xca0] sm:$0xff]  ;;  %v5858_v52 = vunpack.c.h.s8.bf16 %v7790_v38 }
0x1020   : > { %5705 = vmatpush2.bf16.msra.mxu0 %v5678_v48 }
0x1021   : > { %5803 = vmatpush2.bf16.msra.mxu1 %v5776_v49  ;;  %5706 = vmatprep.subr.bf16.mxu0 %v5677_v50  ;;  %v8563_v50 = vmov 24  }
0x1022   : > { %5804 = vmatprep.subr.bf16.mxu1 %v5775_v15  ;;  %8210 = vset.pattern.permute.xlu1 %v8563_v50 }
0x1023   : > { %5922 = vperm.xlu1 %8210, %v9570_v3  }
0x1024   : > { %5707 = vmatpush2.bf16.msra.mxu0 %v5676_v53 }
0x1025   : > { %5805 = vmatpush2.bf16.msra.mxu1 %v5774_v54  ;;  %5708 = vmatprep.subr.bf16.mxu0 %v5675_v55  ;;  %v5857_v55 = vunpack.c.l.s8.bf16 %v7791_v31 }
0x1026   : > { %5806 = vmatprep.subr.bf16.mxu1 %v5773_v12  ;;  %v5955_v12 = vunpack.c.l.s8.bf16 %v7807_v33 }
0x1028   : > { %5709 = vmatpush2.bf16.msra.mxu0 %v5674_v58  ;;  %v7805_v58 = vld [vmem:[%s8851_s0 + $0xc98] sm:$0xff] }
0x1029   : > { %5807 = vmatpush2.bf16.msra.mxu1 %v5772_v63  ;;  %5710 = vmatprep.subr.bf16.mxu0 %v5673_v59  ;;  %v5954_v63 = vunpack.c.l.s8.bf16 %v7806_v45  ;;  %v5855_v59 = vunpack.c.h.s8.bf16 %v7789_v9  ;;  %v5951_v11 = vunpack.c.l.s8.bf16 %v7805_v58 }
0x102a   : > { %5808 = vmatprep.subr.bf16.mxu1 %v5771_v61  ;;  %v5953_v61 = vunpack.c.h.s8.bf16 %v7805_v58  ;;  %v7795_v58 = vld [vmem:[%s8851_s0 + $0xc48] sm:$0xff] }
0x102c   : > { %5711 = vmatpush2.bf16.msra.mxu0 %v5672_v41  ;;  %v8564_v41 = vmov 25  }
0x102d   : > { %5809 = vmatpush2.bf16.msra.mxu1 %v5770_v2  ;;  %5712 = vmatprep.subr.bf16.mxu0 %v5671_v7  ;;  %v5854_v2 = vunpack.c.h.s8.bf16 %v7788_v0  ;;  %v5952_v7 = vunpack.c.h.s8.bf16 %v7804_v62 }
0x102e   : > { %5810 = vmatprep.subr.bf16.mxu1 %v5769_v5  ;;  %8211 = vset.pattern.permute.xlu1 %v8564_v41  ;;  %v5853_v5 = vunpack.c.l.s8.bf16 %v7789_v9  ;;  %v7810_v41 = vld [vmem:[%s8851_s0 + $0xcc0] sm:$0xff] }
0x102f   : > { %6020 = vperm.xlu1 %8211, %v9570_v3   ;;  %v5851_v3 = vunpack.c.h.s8.bf16 %v7787_v8 }
0x1030   : > { %5713 = vmatpush2.bf16.msra.mxu0 %v5670_v10  ;;  %v7803_v10 = vld [vmem:[%s8851_s0 + $0xc88] sm:$0xff] }
0x1031   : > { %5811 = vmatpush2.bf16.msra.mxu1 %v5768_v13  ;;  %5714 = vmatprep.subr.bf16.mxu0 %v5669_v19  ;;  %v5852_v13 = vunpack.c.l.s8.bf16 %v7788_v0  ;;  %v5950_v19 = vunpack.c.l.s8.bf16 %v7804_v62  ;;  %v7794_v62 = vld [vmem:[%s8851_s0 + $0xc40] sm:$0xff] }
0x1032   : > { %5812 = vmatprep.subr.bf16.mxu1 %v5767_v14  ;;  %v5949_v14 = vunpack.c.h.s8.bf16 %v7803_v10 }
0x1034   : > { %5715 = vmatpush2.bf16.msra.mxu0 %v5668_v17  ;;  %v5850_v17 = vunpack.c.h.s8.bf16 %v7786_v57 }
0x1035   : > { %5813 = vmatpush2.bf16.msra.mxu1 %v5766_v27  ;;  %5880 = vmatprep.subr.bf16.mxu0 %v5863_v16  ;;  %v5948_v27 = vunpack.c.h.s8.bf16 %v7802_v20  ;;  %v5849_v16 = vunpack.c.l.s8.bf16 %v7787_v8  ;;  %v7825_v8 = vld [vmem:[%s8851_s0 + $0xd38] sm:$0xff] }
0x1036   : > { %5978 = vmatprep.subr.bf16.mxu1 %v5961_v26  ;;  %v5947_v26 = vunpack.c.l.s8.bf16 %v7803_v10  ;;  %v7841_v10 = vld [vmem:[%s8851_s0 + $0xdb8] sm:$0xff] }
0x1037   : > { %v5130_v32 = vpop.f32.mrf.mxu0  ;;  %5717 = vmatmul.mubr.bf16.vlgmr.msra.gmra.mxu0 %v9169_v6 }
0x1038   : > { %v5228_v35 = vpop.f32.mrf.mxu1  ;;  %5815 = vmatmul.mubr.bf16.vlgmr.msra.gmra.mxu1 %v9169_v6  ;;  %v5141_v39 = vmul.f32 %v5139_v25, %v5130_v32  ;;  %5881 = vmatpush1.bf16.msra.mxu0 %v5862_v29  ;;  %v5848_v29 = vunpack.c.l.s8.bf16 %v7786_v57  ;;  %v5877_v32 = vunpack.c.l.s8.bf16 %v7801_v21  ;;  %v6157_v57 = vunpack.c.h.s8.bf16 %v7841_v10 }
0x1039   : > { %5979 = vmatpush1.bf16.msra.mxu1 %v5960_v28  ;;  %v5239_v23 = vmul.f32 %v5237_v37, %v5228_v35  ;;  %v5132_v42 = vpop.f32.mrf.mxu0  ;;  %5882 = vmatprep.subr.bf16.mxu0 %v5861_v18  ;;  %v5946_v28 = vunpack.c.l.s8.bf16 %v7802_v20  ;;  %v7800_v18 = vld [vmem:[%s8851_s0 + $0xc70] sm:$0xff]  ;;  %v5975_v35 = vunpack.c.l.s8.bf16 %v7817_v22 }
0x103a   : > { %v5230_v43 = vpop.f32.mrf.mxu1  ;;  %5980 = vmatprep.subr.bf16.mxu1 %v5959_v30  ;;  %v5143_v46 = vadd.f32 %v5141_v39, %v9610_v34  ;;  %v5142_v47 = vmul.f32 %v5139_v25, %v5132_v42  ;;  %5912 = vmatprep.mubr.bf16.mxu0 %v9131_v24  ;;  %v5956_v34 = vunpack.c.h.s8.bf16 %v7806_v45  ;;  %v5879_v25 = vunpack.c.h.s8.bf16 %v7801_v21  ;;  %v7816_v30 = vld [vmem:[%s8851_s0 + $0xcf0] sm:$0xff]  ;;  %v7815_v39 = vld [vmem:[%s8851_s0 + $0xce8] sm:$0xff] }
0x103b   : > { %v5240_v4 = vmul.f32 %v5237_v37, %v5230_v43  ;;  %6010 = vmatprep.mubr.bf16.mxu1 %v9131_v24  ;;  %v5134_v48 = vpop.f32.mrf.mxu0  ;;  %v5977_v37 = vunpack.c.h.s8.bf16 %v7817_v22  ;;  %v5878_v31 = vunpack.c.h.s8.bf16 %v7800_v18  ;;  %v5976_v33 = vunpack.c.h.s8.bf16 %v7816_v30  ;;  %v7824_v20 = vld [vmem:[%s8851_s0 + $0xd30] sm:$0xff] }
0x103c   : > { %v5232_v49 = vpop.f32.mrf.mxu1  ;;  %v5144_v15 = vadd.f32 %v5142_v47, %v9612_v60  ;;  %v9654_v51 = vadd.f32 %v5239_v23, %v5143_v46  ;;  %5883 = vmatpush1.bf16.msra.mxu0 %v5860_v36  ;;  %v5856_v60 = vunpack.c.l.s8.bf16 %v7790_v38  ;;  %v7799_v36 = vld [vmem:[%s8851_s0 + $0xc68] sm:$0xff]  ;;  %v5876_v23 = vunpack.c.l.s8.bf16 %v7800_v18  ;;  %v7813_v48 = vld [vmem:[%s8851_s0 + $0xcd8] sm:$0xff] }
0x103d   : > { %5981 = vmatpush1.bf16.msra.mxu1 %v5958_v40  ;;  %v5135_v53 = vpop.f32.mrf.mxu0  ;;  %5884 = vmatprep.subr.bf16.mxu0 %v5859_v44  ;;  %v5974_v40 = vunpack.c.l.s8.bf16 %v7816_v30  ;;  %v5875_v42 = vunpack.c.h.s8.bf16 %v7799_v36  ;;  %v5973_v43 = vunpack.c.h.s8.bf16 %v7815_v39  ;;  %v7798_v44 = vld [vmem:[%s8851_s0 + $0xc60] sm:$0xff]  ;;  %v5873_v46 = vunpack.c.l.s8.bf16 %v7799_v36 }
0x103e   : > { %v5233_v54 = vpop.f32.mrf.mxu1  ;;  %5982 = vmatprep.subr.bf16.mxu1 %v5957_v1  ;;  %v9656_v56 = vadd.f32 %v5240_v4, %v5144_v15  ;;  %v7814_v1 = vld [vmem:[%s8851_s0 + $0xce0] sm:$0xff]  ;;  %v5874_v38 = vunpack.c.h.s8.bf16 %v7798_v44  ;;  %v5971_v47 = vunpack.c.l.s8.bf16 %v7815_v39  ;;  %v7797_v4 = vld [vmem:[%s8851_s0 + $0xc58] sm:$0xff]  ;;  %v5872_v49 = vunpack.c.l.s8.bf16 %v7798_v44  ;;  %v7812_v53 = vld [vmem:[%s8851_s0 + $0xcd0] sm:$0xff] }
0x103f   : > { %v5972_v45 = vunpack.c.h.s8.bf16 %v7814_v1  ;;  %v5970_v50 = vunpack.c.l.s8.bf16 %v7814_v1  ;;  %v5871_v15 = vunpack.c.h.s8.bf16 %v7797_v4  ;;  %v5967_v9 = vunpack.c.l.s8.bf16 %v7813_v48 }
0x1040   : > { %5885 = vmatpush1.bf16.msra.mxu0 %v5858_v52  ;;  %v5969_v52 = vunpack.c.h.s8.bf16 %v7813_v48  ;;  %v6057_v21 = vunpack.c.l.s8.bf16 %v7825_v8  ;;  %v6155_v22 = vunpack.c.l.s8.bf16 %v7841_v10  ;;  %v7818_v10 = vld [vmem:[%s8851_s0 + $0xd00] sm:$0xff] }
0x1041   : > { %5983 = vmatpush1.bf16.msra.mxu1 %v5956_v34  ;;  %5886 = vmatprep.subr.bf16.mxu0 %v5857_v55  ;;  %v7796_v34 = vld [vmem:[%s8851_s0 + $0xc50] sm:$0xff]  ;;  %v5968_v55 = vunpack.c.h.s8.bf16 %v7812_v53 }
0x1042   : > { %5984 = vmatprep.subr.bf16.mxu1 %v5955_v12  ;;  %v5870_v54 = vunpack.c.h.s8.bf16 %v7796_v34  ;;  %v5869_v12 = vunpack.c.l.s8.bf16 %v7797_v4 }
0x1044   : > { %5887 = vmatpush1.bf16.msra.mxu0 %v5856_v60  ;;  %v7811_v60 = vld [vmem:[%s8851_s0 + $0xcc8] sm:$0xff] }
0x1045   : > { %5985 = vmatpush1.bf16.msra.mxu1 %v5954_v63  ;;  %5888 = vmatprep.subr.bf16.mxu0 %v5855_v59  ;;  %v5868_v63 = vunpack.c.l.s8.bf16 %v7796_v34  ;;  %v5966_v59 = vunpack.c.l.s8.bf16 %v7812_v53  ;;  %v5965_v0 = vunpack.c.h.s8.bf16 %v7811_v60  ;;  %v7821_v34 = vld [vmem:[%s8851_s0 + $0xd18] sm:$0xff] }
0x1046   : > { %5986 = vmatprep.subr.bf16.mxu1 %v5953_v61  ;;  %v5867_v61 = vunpack.c.h.s8.bf16 %v7795_v58  ;;  %v7837_v53 = vld [vmem:[%s8851_s0 + $0xd98] sm:$0xff] }
0x1048   : > { %5889 = vmatpush1.bf16.msra.mxu0 %v5854_v2  ;;  %v5866_v2 = vunpack.c.h.s8.bf16 %v7794_v62 }
0x1049   : > { %5987 = vmatpush1.bf16.msra.mxu1 %v5952_v7  ;;  %5890 = vmatprep.subr.bf16.mxu0 %v5853_v5  ;;  %v5964_v7 = vunpack.c.h.s8.bf16 %v7810_v41  ;;  %v5865_v5 = vunpack.c.l.s8.bf16 %v7795_v58  ;;  %v6149_v58 = vunpack.c.h.s8.bf16 %v7837_v53 }
0x104a   : > { %5988 = vmatprep.subr.bf16.mxu1 %v5951_v11  ;;  %v5963_v11 = vunpack.c.l.s8.bf16 %v7811_v60  ;;  %v7820_v60 = vld [vmem:[%s8851_s0 + $0xd10] sm:$0xff] }
0x104c   : > { %5891 = vmatpush1.bf16.msra.mxu0 %v5852_v13  ;;  %v5335_v13 = vpop.permute.xlu1 %5334 }
0x104d   : > { %5989 = vmatpush1.bf16.msra.mxu1 %v5950_v19  ;;  %5892 = vmatprep.subr.bf16.mxu0 %v5851_v3  ;;  %v5864_v19 = vunpack.c.l.s8.bf16 %v7794_v62  ;;  %v5962_v3 = vunpack.c.l.s8.bf16 %v7810_v41  ;;  %v6147_v62 = vunpack.c.l.s8.bf16 %v7837_v53  ;;  %v7819_v41 = vld [vmem:[%s8851_s0 + $0xd08] sm:$0xff] }
0x104e   : > { %5990 = vmatprep.subr.bf16.mxu1 %v5949_v14  ;;  %v6059_v14 = vunpack.c.h.s8.bf16 %v7825_v8 }
0x1050   : > { %5893 = vmatpush1.bf16.msra.mxu0 %v5850_v17  ;;  %v7840_v17 = vld [vmem:[%s8851_s0 + $0xdb0] sm:$0xff] }
0x1051   : > { %5991 = vmatpush1.bf16.msra.mxu1 %v5948_v27  ;;  %5894 = vmatprep.subr.bf16.mxu0 %v5849_v16  ;;  %v6058_v27 = vunpack.c.h.s8.bf16 %v7824_v20  ;;  %v6156_v16 = vunpack.c.h.s8.bf16 %v7840_v17 }
0x1052   : > { %5992 = vmatprep.subr.bf16.mxu1 %v5947_v26  ;;  %v5433_v26 = vpop.permute.xlu1 %5432 }
0x1054   : > { %5895 = vmatpush1.bf16.msra.mxu0 %v5848_v29  ;;  %v7823_v29 = vld [vmem:[%s8851_s0 + $0xd28] sm:$0xff] }
0x1055   : > { %5993 = vmatpush1.bf16.msra.mxu1 %v5946_v28  ;;  %5896 = vmatprep.subr.bf16.mxu0 %v5879_v25  ;;  %v7839_v28 = vld [vmem:[%s8851_s0 + $0xda8] sm:$0xff]  ;;  %v6055_v39 = vunpack.c.h.s8.bf16 %v7823_v29 }
0x1056   : > { %5994 = vmatprep.subr.bf16.mxu1 %v5977_v37 }
0x1058   : > { %5897 = vmatpush2.bf16.msra.mxu0 %v5878_v31  ;;  %v6056_v31 = vunpack.c.l.s8.bf16 %v7824_v20  ;;  %v7833_v20 = vld [vmem:[%s8851_s0 + $0xd78] sm:$0xff] }
0x1059   : > { %5995 = vmatpush2.bf16.msra.mxu1 %v5976_v33  ;;  %5898 = vmatprep.subr.bf16.mxu0 %v5877_v32  ;;  %v6154_v33 = vunpack.c.l.s8.bf16 %v7840_v17  ;;  %v7822_v32 = vld [vmem:[%s8851_s0 + $0xd20] sm:$0xff]  ;;  %v7849_v17 = vld [vmem:[%s8851_s0 + $0xdf8] sm:$0xff] }
0x105a   : > { %5996 = vmatprep.subr.bf16.mxu1 %v5975_v35 }
0x105c   : > { %5899 = vmatpush2.bf16.msra.mxu0 %v5876_v23  ;;  %v6153_v23 = vunpack.c.h.s8.bf16 %v7839_v28 }
0x105d   : > { %5997 = vmatpush2.bf16.msra.mxu1 %v5974_v40  ;;  %5900 = vmatprep.subr.bf16.mxu0 %v5875_v42  ;;  %v7838_v40 = vld [vmem:[%s8851_s0 + $0xda0] sm:$0xff] }
0x105e   : > { %5998 = vmatprep.subr.bf16.mxu1 %v5973_v43 }
0x1060   : > { %5901 = vmatpush2.bf16.msra.mxu0 %v5874_v38 }
0x1061   : > { %5999 = vmatpush2.bf16.msra.mxu1 %v5972_v45  ;;  %5902 = vmatprep.subr.bf16.mxu0 %v5873_v46  ;;  %v6054_v45 = vunpack.c.h.s8.bf16 %v7822_v32  ;;  %v8565_v46 = vmov 26  }
0x1062   : > { %6000 = vmatprep.subr.bf16.mxu1 %v5971_v47  ;;  %8212 = vset.pattern.permute.xlu0 %v8565_v46 }
0x1064   : > { %5903 = vmatpush2.bf16.msra.mxu0 %v5872_v49 }
0x1065   : > { %6001 = vmatpush2.bf16.msra.mxu1 %v5970_v50  ;;  %5904 = vmatprep.subr.bf16.mxu0 %v5871_v15  ;;  %v6053_v50 = vunpack.c.l.s8.bf16 %v7823_v29  ;;  %v6151_v15 = vunpack.c.l.s8.bf16 %v7839_v28  ;;  %v7848_v29 = vld [vmem:[%s8851_s0 + $0xdf0] sm:$0xff] }
0x1066   : > { %6002 = vmatprep.subr.bf16.mxu1 %v5969_v52 }
0x1068   : > { %5905 = vmatpush2.bf16.msra.mxu0 %v5870_v54  ;;  %v9705_v54 = vld [vmem:[%s9146_s24] sm:$0xff] }
0x1069   : > { %6003 = vmatpush2.bf16.msra.mxu1 %v5968_v55  ;;  %5906 = vmatprep.subr.bf16.mxu0 %v5869_v12  ;;  %v6052_v55 = vunpack.c.l.s8.bf16 %v7822_v32  ;;  %v6150_v12 = vunpack.c.l.s8.bf16 %v7838_v40  ;;  %v6170_v32 = vunpack.c.l.s8.bf16 %v7848_v29 }
0x106a   : > { %6004 = vmatprep.subr.bf16.mxu1 %v5967_v9  ;;  %6118 = vperm.xlu0 %8212, %v9705_v54   ;;  %v6051_v9 = vunpack.c.h.s8.bf16 %v7821_v34 }
0x106c   : > { %5907 = vmatpush2.bf16.msra.mxu0 %v5868_v63  ;;  %v7836_v63 = vld [vmem:[%s8851_s0 + $0xd90] sm:$0xff] }
0x106d   : > { %6005 = vmatpush2.bf16.msra.mxu1 %v5966_v59  ;;  %5908 = vmatprep.subr.bf16.mxu0 %v5867_v61  ;;  %v6050_v59 = vunpack.c.h.s8.bf16 %v7820_v60  ;;  %v6148_v61 = vunpack.c.h.s8.bf16 %v7836_v63 }
0x106e   : > { %6006 = vmatprep.subr.bf16.mxu1 %v5965_v0  ;;  %v6049_v0 = vunpack.c.l.s8.bf16 %v7821_v34 }
0x1070   : > { %5909 = vmatpush2.bf16.msra.mxu0 %v5866_v2  ;;  %v7835_v2 = vld [vmem:[%s8851_s0 + $0xd88] sm:$0xff] }
0x1071   : > { %6007 = vmatpush2.bf16.msra.mxu1 %v5964_v7  ;;  %5910 = vmatprep.subr.bf16.mxu0 %v5865_v5  ;;  %v6048_v7 = vunpack.c.l.s8.bf16 %v7820_v60  ;;  %v6146_v5 = vunpack.c.l.s8.bf16 %v7836_v63  ;;  %v6145_v8 = vunpack.c.h.s8.bf16 %v7835_v2  ;;  %v7826_v63 = vld [vmem:[%s8851_s0 + $0xd40] sm:$0xff] }
0x1072   : > { %6008 = vmatprep.subr.bf16.mxu1 %v5963_v11  ;;  %v6047_v11 = vunpack.c.h.s8.bf16 %v7819_v41 }
0x1074   : > { %5911 = vmatpush2.bf16.msra.mxu0 %v5864_v19  ;;  %v6046_v19 = vunpack.c.h.s8.bf16 %v7818_v10 }
0x1075   : > { %6009 = vmatpush2.bf16.msra.mxu1 %v5962_v3  ;;  %6076 = vmatprep.subr.bf16.mxu0 %v6059_v14  ;;  %v6045_v14 = vunpack.c.l.s8.bf16 %v7819_v41 }
0x1076   : > { %6174 = vmatprep.subr.bf16.mxu1 %v6157_v57  ;;  %v6143_v57 = vunpack.c.l.s8.bf16 %v7835_v2  ;;  %v7857_v2 = vld [vmem:[%s8851_s0 + $0xe38] sm:$0xff] }
0x1077   : > { %v5326_v25 = vpop.f32.mrf.mxu0  ;;  %5913 = vmatmul.mubr.bf16.vlgmr.msra.gmra.mxu0 %v9169_v6 }
0x1078   : > { %v5424_v37 = vpop.f32.mrf.mxu1  ;;  %6011 = vmatmul.mubr.bf16.vlgmr.msra.gmra.mxu1 %v9169_v6  ;;  %v5337_v18 = vmul.f32 %v5335_v13, %v5326_v25  ;;  %6077 = vmatpush1.bf16.msra.mxu0 %v6058_v27  ;;  %v6044_v27 = vunpack.c.l.s8.bf16 %v7818_v10  ;;  %v6172_v25 = vunpack.c.h.s8.bf16 %v7848_v29 }
0x1079   : > { %6175 = vmatpush1.bf16.msra.mxu1 %v6156_v16  ;;  %v5435_v30 = vmul.f32 %v5433_v26, %v5424_v37  ;;  %v5328_v35 = vpop.f32.mrf.mxu0  ;;  %6078 = vmatprep.subr.bf16.mxu0 %v6057_v21  ;;  %v6173_v21 = vunpack.c.h.s8.bf16 %v7849_v17  ;;  %v6073_v37 = vunpack.c.l.s8.bf16 %v7833_v20 }
0x107a   : > { %v5426_v36 = vpop.f32.mrf.mxu1  ;;  %6176 = vmatprep.subr.bf16.mxu1 %v6155_v22  ;;  %v5339_v42 = vadd.f32 %v5337_v18, %v9654_v51  ;;  %v5338_v43 = vmul.f32 %v5335_v13, %v5328_v35  ;;  %6108 = vmatprep.mubr.bf16.mxu0 %v9131_v24  ;;  %v6152_v51 = vunpack.c.h.s8.bf16 %v7838_v40  ;;  %v7834_v13 = vld [vmem:[%s8851_s0 + $0xd80] sm:$0xff]  ;;  %v7832_v22 = vld [vmem:[%s8851_s0 + $0xd70] sm:$0xff]  ;;  %v6171_v18 = vunpack.c.l.s8.bf16 %v7849_v17 }
0x107b   : > { %v5436_v44 = vmul.f32 %v5433_v26, %v5426_v36  ;;  %6206 = vmatprep.mubr.bf16.mxu1 %v9131_v24  ;;  %v5330_v1 = vpop.f32.mrf.mxu0  ;;  %v6144_v3 = vunpack.c.h.s8.bf16 %v7834_v13  ;;  %v6142_v16 = vunpack.c.l.s8.bf16 %v7834_v13  ;;  %v6075_v26 = vunpack.c.h.s8.bf16 %v7833_v20  ;;  %v7856_v13 = vld [vmem:[%s8851_s0 + $0xe30] sm:$0xff]  ;;  %v5629_v20 = vpop.permute.xlu1 %5628 }
0x107c   : > { %v5428_v38 = vpop.f32.mrf.mxu1  ;;  %v5340_v47 = vadd.f32 %v5338_v43, %v9656_v56  ;;  %v9698_v4 = vadd.f32 %v5435_v30, %v5339_v42  ;;  %6079 = vmatpush1.bf16.msra.mxu0 %v6056_v31  ;;  %v8566_v56 = vmov 27   ;;  %v6074_v28 = vunpack.c.h.s8.bf16 %v7832_v22  ;;  %v7831_v30 = vld [vmem:[%s8851_s0 + $0xd68] sm:$0xff]  ;;  %v7829_v1 = vld [vmem:[%s8851_s0 + $0xd58] sm:$0xff] }
0x107d   : > { %6177 = vmatpush1.bf16.msra.mxu1 %v6154_v33  ;;  %v5331_v48 = vpop.f32.mrf.mxu0  ;;  %6080 = vmatprep.subr.bf16.mxu0 %v6055_v39  ;;  %v7847_v31 = vld [vmem:[%s8851_s0 + $0xde8] sm:$0xff]  ;;  %v6072_v33 = vunpack.c.l.s8.bf16 %v7832_v22  ;;  %v6071_v35 = vunpack.c.h.s8.bf16 %v7831_v30  ;;  %v7830_v39 = vld [vmem:[%s8851_s0 + $0xd60] sm:$0xff]  ;;  %v6069_v43 = vunpack.c.l.s8.bf16 %v7831_v30  ;;  %v7845_v38 = vld [vmem:[%s8851_s0 + $0xdd8] sm:$0xff]  ;;  %v6065_v34 = vunpack.c.l.s8.bf16 %v7829_v1 }
0x107e   : > { %v5429_v49 = vpop.f32.mrf.mxu1  ;;  %6178 = vmatprep.subr.bf16.mxu1 %v6153_v23  ;;  %v9700_v52 = vadd.f32 %v5436_v44, %v5340_v47  ;;  %8213 = vset.pattern.permute.xlu1 %v8566_v56  ;;  %v6169_v36 = vunpack.c.h.s8.bf16 %v7847_v31  ;;  %v7846_v23 = vld [vmem:[%s8851_s0 + $0xde0] sm:$0xff]  ;;  %v6070_v40 = vunpack.c.h.s8.bf16 %v7830_v39  ;;  %v6167_v44 = vunpack.c.l.s8.bf16 %v7847_v31  ;;  %v7828_v48 = vld [vmem:[%s8851_s0 + $0xd50] sm:$0xff]  ;;  %v7827_v56 = vld [vmem:[%s8851_s0 + $0xd48] sm:$0xff] }
0x107f   : > { %6216 = vperm.xlu1 %8213, %v9705_v54   ;;  %v6168_v42 = vunpack.c.h.s8.bf16 %v7846_v23  ;;  %v6166_v46 = vunpack.c.l.s8.bf16 %v7846_v23  ;;  %v6067_v47 = vunpack.c.h.s8.bf16 %v7829_v1  ;;  %v7844_v49 = vld [vmem:[%s8851_s0 + $0xdd0] sm:$0xff]  ;;  %v6163_v53 = vunpack.c.l.s8.bf16 %v7845_v38 }
0x1080   : > { %6081 = vmatpush1.bf16.msra.mxu0 %v6054_v45  ;;  %v6068_v45 = vunpack.c.l.s8.bf16 %v7830_v39  ;;  %v6253_v17 = vunpack.c.l.s8.bf16 %v7857_v2 }
0x1081   : > { %6179 = vmatpush1.bf16.msra.mxu1 %v6152_v51  ;;  %6082 = vmatprep.subr.bf16.mxu0 %v6053_v50  ;;  %v6165_v51 = vunpack.c.h.s8.bf16 %v7845_v38  ;;  %v6066_v50 = vunpack.c.h.s8.bf16 %v7828_v48 }
0x1082   : > { %6180 = vmatprep.subr.bf16.mxu1 %v6151_v15  ;;  %v6164_v15 = vunpack.c.h.s8.bf16 %v7844_v49 }
0x1084   : > { %6083 = vmatpush1.bf16.msra.mxu0 %v6052_v55  ;;  %v7843_v55 = vld [vmem:[%s8851_s0 + $0xdc8] sm:$0xff] }
0x1085   : > { %6181 = vmatpush1.bf16.msra.mxu1 %v6150_v12  ;;  %6084 = vmatprep.subr.bf16.mxu0 %v6051_v9  ;;  %v6064_v12 = vunpack.c.l.s8.bf16 %v7828_v48  ;;  %v6162_v9 = vunpack.c.l.s8.bf16 %v7844_v49  ;;  %v6161_v60 = vunpack.c.h.s8.bf16 %v7843_v55  ;;  %v6159_v41 = vunpack.c.l.s8.bf16 %v7843_v55  ;;  %v7853_v49 = vld [vmem:[%s8851_s0 + $0xe18] sm:$0xff]  ;;  %v7852_v55 = vld [vmem:[%s8851_s0 + $0xe10] sm:$0xff] }
0x1086   : > { %6182 = vmatprep.subr.bf16.mxu1 %v6149_v58  ;;  %v6063_v58 = vunpack.c.h.s8.bf16 %v7827_v56 }
0x1088   : > { %6085 = vmatpush1.bf16.msra.mxu0 %v6050_v59  ;;  %v7842_v59 = vld [vmem:[%s8851_s0 + $0xdc0] sm:$0xff] }
0x1089   : > { %6183 = vmatpush1.bf16.msra.mxu1 %v6148_v61  ;;  %6086 = vmatprep.subr.bf16.mxu0 %v6049_v0  ;;  %v6062_v61 = vunpack.c.h.s8.bf16 %v7826_v63  ;;  %v6160_v0 = vunpack.c.h.s8.bf16 %v7842_v59 }
0x108a   : > { %6184 = vmatprep.subr.bf16.mxu1 %v6147_v62  ;;  %v6061_v62 = vunpack.c.l.s8.bf16 %v7827_v56 }
0x108c   : > { %6087 = vmatpush1.bf16.msra.mxu0 %v6048_v7  ;;  %v7873_v7 = vld [vmem:[%s8851_s0 + $0xeb8] sm:$0xff] }
0x108d   : > { %6185 = vmatpush1.bf16.msra.mxu1 %v6146_v5  ;;  %6088 = vmatprep.subr.bf16.mxu0 %v6047_v11  ;;  %v6060_v5 = vunpack.c.l.s8.bf16 %v7826_v63  ;;  %v6158_v11 = vunpack.c.l.s8.bf16 %v7842_v59  ;;  %v6353_v10 = vunpack.c.h.s8.bf16 %v7873_v7  ;;  %v7851_v59 = vld [vmem:[%s8851_s0 + $0xe08] sm:$0xff] }
0x108e   : > { %6186 = vmatprep.subr.bf16.mxu1 %v6145_v8  ;;  %v6255_v8 = vunpack.c.h.s8.bf16 %v7857_v2 }
0x1090   : > { %6089 = vmatpush1.bf16.msra.mxu0 %v6046_v19  ;;  %v7872_v19 = vld [vmem:[%s8851_s0 + $0xeb0] sm:$0xff] }
0x1091   : > { %6187 = vmatpush1.bf16.msra.mxu1 %v6144_v3  ;;  %6090 = vmatprep.subr.bf16.mxu0 %v6045_v14  ;;  %v6254_v3 = vunpack.c.h.s8.bf16 %v7856_v13  ;;  %v6352_v14 = vunpack.c.h.s8.bf16 %v7872_v19 }
0x1092   : > { %6188 = vmatprep.subr.bf16.mxu1 %v6143_v57  ;;  %v5531_v57 = vpop.permute.xlu0 %5530 }
0x1094   : > { %6091 = vmatpush1.bf16.msra.mxu0 %v6044_v27  ;;  %v6351_v27 = vunpack.c.l.s8.bf16 %v7873_v7  ;;  %v7850_v7 = vld [vmem:[%s8851_s0 + $0xe00] sm:$0xff] }
0x1095   : > { %6189 = vmatpush1.bf16.msra.mxu1 %v6142_v16  ;;  %6092 = vmatprep.subr.bf16.mxu0 %v6075_v26  ;;  %v7855_v16 = vld [vmem:[%s8851_s0 + $0xe28] sm:$0xff] }
0x1096   : > { %6190 = vmatprep.subr.bf16.mxu1 %v6173_v21  ;;  %v7871_v26 = vld [vmem:[%s8851_s0 + $0xea8] sm:$0xff] }
0x1098   : > { %6093 = vmatpush2.bf16.msra.mxu0 %v6074_v28 }
0x1099   : > { %6191 = vmatpush2.bf16.msra.mxu1 %v6172_v25  ;;  %6094 = vmatprep.subr.bf16.mxu0 %v6073_v37  ;;  %v6252_v25 = vunpack.c.l.s8.bf16 %v7856_v13  ;;  %v6350_v37 = vunpack.c.l.s8.bf16 %v7872_v19  ;;  %v7865_v19 = vld [vmem:[%s8851_s0 + $0xe78] sm:$0xff] }
0x109a   : > { %6192 = vmatprep.subr.bf16.mxu1 %v6171_v18  ;;  %v7854_v18 = vld [vmem:[%s8851_s0 + $0xe20] sm:$0xff] }
0x109c   : > { %6095 = vmatpush2.bf16.msra.mxu0 %v6072_v33  ;;  %v6251_v33 = vunpack.c.h.s8.bf16 %v7855_v16 }
0x109d   : > { %6193 = vmatpush2.bf16.msra.mxu1 %v6170_v32  ;;  %6096 = vmatprep.subr.bf16.mxu0 %v6071_v35  ;;  %v6349_v32 = vunpack.c.h.s8.bf16 %v7871_v26  ;;  %v7870_v35 = vld [vmem:[%s8851_s0 + $0xea0] sm:$0xff] }
0x109e   : > { %6194 = vmatprep.subr.bf16.mxu1 %v6169_v36 }
0x10a0   : > { %6097 = vmatpush2.bf16.msra.mxu0 %v6070_v40 }
0x10a1   : > { %6195 = vmatpush2.bf16.msra.mxu1 %v6168_v42  ;;  %6098 = vmatprep.subr.bf16.mxu0 %v6069_v43  ;;  %v6250_v43 = vunpack.c.h.s8.bf16 %v7854_v18 }
0x10a2   : > { %6196 = vmatprep.subr.bf16.mxu1 %v6167_v44  ;;  %v8567_v44 = vmov 28  }
0x10a3   : > { %8214 = vset.pattern.permute.xlu1 %v8567_v44 }
0x10a4   : > { %6099 = vmatpush2.bf16.msra.mxu0 %v6068_v45  ;;  %6314 = vperm.xlu1 %8214, %v9705_v54  }
0x10a5   : > { %6197 = vmatpush2.bf16.msra.mxu1 %v6166_v46  ;;  %6100 = vmatprep.subr.bf16.mxu0 %v6067_v47  ;;  %v6249_v47 = vunpack.c.l.s8.bf16 %v7855_v16  ;;  %v7880_v16 = vld [vmem:[%s8851_s0 + $0xef0] sm:$0xff] }
0x10a6   : > { %6198 = vmatprep.subr.bf16.mxu1 %v6165_v51  ;;  %v6347_v51 = vunpack.c.l.s8.bf16 %v7871_v26 }
0x10a8   : > { %6101 = vmatpush2.bf16.msra.mxu0 %v6066_v50  ;;  %v7869_v50 = vld [vmem:[%s8851_s0 + $0xe98] sm:$0xff] }
0x10a9   : > { %6199 = vmatpush2.bf16.msra.mxu1 %v6164_v15  ;;  %6102 = vmatprep.subr.bf16.mxu0 %v6065_v34  ;;  %v6248_v15 = vunpack.c.l.s8.bf16 %v7854_v18  ;;  %v6346_v34 = vunpack.c.l.s8.bf16 %v7870_v35  ;;  %v6345_v56 = vunpack.c.h.s8.bf16 %v7869_v50  ;;  %v6343_v63 = vunpack.c.l.s8.bf16 %v7869_v50 }
0x10aa   : > { %6200 = vmatprep.subr.bf16.mxu1 %v6163_v53  ;;  %v6247_v53 = vunpack.c.h.s8.bf16 %v7853_v49  ;;  %v6366_v18 = vunpack.c.l.s8.bf16 %v7880_v16 }
0x10ac   : > { %6103 = vmatpush2.bf16.msra.mxu0 %v6064_v12  ;;  %v7868_v12 = vld [vmem:[%s8851_s0 + $0xe90] sm:$0xff] }
0x10ad   : > { %6201 = vmatpush2.bf16.msra.mxu1 %v6162_v9  ;;  %6104 = vmatprep.subr.bf16.mxu0 %v6063_v58  ;;  %v6246_v9 = vunpack.c.h.s8.bf16 %v7852_v55  ;;  %v6344_v58 = vunpack.c.h.s8.bf16 %v7868_v12 }
0x10ae   : > { %6202 = vmatprep.subr.bf16.mxu1 %v6161_v60  ;;  %v6245_v60 = vunpack.c.l.s8.bf16 %v7853_v49 }
0x10b0   : > { %6105 = vmatpush2.bf16.msra.mxu0 %v6062_v61  ;;  %v7867_v61 = vld [vmem:[%s8851_s0 + $0xe88] sm:$0xff] }
0x10b1   : > { %6203 = vmatpush2.bf16.msra.mxu1 %v6160_v0  ;;  %6106 = vmatprep.subr.bf16.mxu0 %v6061_v62  ;;  %v6244_v0 = vunpack.c.l.s8.bf16 %v7852_v55  ;;  %v6342_v62 = vunpack.c.l.s8.bf16 %v7868_v12  ;;  %v6341_v2 = vunpack.c.h.s8.bf16 %v7867_v61  ;;  %v6339_v13 = vunpack.c.l.s8.bf16 %v7867_v61  ;;  %v7858_v12 = vld [vmem:[%s8851_s0 + $0xe40] sm:$0xff]  ;;  %v7889_v61 = vld [vmem:[%s8851_s0 + $0xf38] sm:$0xff] }
0x10b2   : > { %6204 = vmatprep.subr.bf16.mxu1 %v6159_v41  ;;  %v6243_v41 = vunpack.c.h.s8.bf16 %v7851_v59 }
0x10b4   : > { %6107 = vmatpush2.bf16.msra.mxu0 %v6060_v5  ;;  %v7866_v5 = vld [vmem:[%s8851_s0 + $0xe80] sm:$0xff] }
0x10b5   : > { %6205 = vmatpush2.bf16.msra.mxu1 %v6158_v11  ;;  %6272 = vmatprep.subr.bf16.mxu0 %v6255_v8  ;;  %v6242_v11 = vunpack.c.h.s8.bf16 %v7850_v7  ;;  %v6340_v8 = vunpack.c.h.s8.bf16 %v7866_v5 }
0x10b6   : > { %6370 = vmatprep.subr.bf16.mxu1 %v6353_v10  ;;  %v6241_v10 = vunpack.c.l.s8.bf16 %v7851_v59 }
0x10b7   : > { %v5522_v21 = vpop.f32.mrf.mxu0  ;;  %6109 = vmatmul.mubr.bf16.vlgmr.msra.gmra.mxu0 %v9169_v6 }
0x10b8   : > { %v5620_v22 = vpop.f32.mrf.mxu1  ;;  %6207 = vmatmul.mubr.bf16.vlgmr.msra.gmra.mxu1 %v9169_v6  ;;  %v5533_v29 = vmul.f32 %v5531_v57, %v5522_v21  ;;  %6273 = vmatpush1.bf16.msra.mxu0 %v6254_v3  ;;  %v7881_v3 = vld [vmem:[%s8851_s0 + $0xef8] sm:$0xff]  ;;  %v6368_v21 = vunpack.c.h.s8.bf16 %v7880_v16 }
0x10b9   : > { %6371 = vmatpush1.bf16.msra.mxu1 %v6352_v14  ;;  %v5631_v28 = vmul.f32 %v5629_v20, %v5620_v22  ;;  %v5524_v30 = vpop.f32.mrf.mxu0  ;;  %6274 = vmatprep.subr.bf16.mxu0 %v6253_v17  ;;  %v6240_v14 = vunpack.c.l.s8.bf16 %v7850_v7  ;;  %v6369_v17 = vunpack.c.h.s8.bf16 %v7881_v3  ;;  %v6269_v22 = vunpack.c.l.s8.bf16 %v7865_v19 }
0x10ba   : > { %v5622_v31 = vpop.f32.mrf.mxu1  ;;  %6372 = vmatprep.subr.bf16.mxu1 %v6351_v27  ;;  %v5535_v36 = vadd.f32 %v5533_v29, %v9698_v4  ;;  %v5534_v39 = vmul.f32 %v5531_v57, %v5524_v30  ;;  %6304 = vmatprep.mubr.bf16.mxu0 %v9131_v24  ;;  %v6348_v4 = vunpack.c.h.s8.bf16 %v7870_v35  ;;  %v6338_v57 = vunpack.c.l.s8.bf16 %v7866_v5  ;;  %v7864_v27 = vld [vmem:[%s8851_s0 + $0xe70] sm:$0xff] }
0x10bb   : > { %v5632_v23 = vmul.f32 %v5629_v20, %v5622_v31  ;;  %6402 = vmatprep.mubr.bf16.mxu1 %v9131_v24  ;;  %v5526_v40 = vpop.f32.mrf.mxu0  ;;  %v6271_v20 = vunpack.c.h.s8.bf16 %v7865_v19  ;;  %v6270_v26 = vunpack.c.h.s8.bf16 %v7864_v27  ;;  %v6367_v29 = vunpack.c.l.s8.bf16 %v7881_v3  ;;  %v7888_v5 = vld [vmem:[%s8851_s0 + $0xf30] sm:$0xff]  ;;  %v5825_v19 = vpop.permute.xlu0 %5824 }
0x10bc   : > { %v5624_v42 = vpop.f32.mrf.mxu1  ;;  %v5536_v1 = vadd.f32 %v5534_v39, %v9700_v52  ;;  %v9745_v38 = vadd.f32 %v5631_v28, %v5535_v36  ;;  %6275 = vmatpush1.bf16.msra.mxu0 %v6252_v25  ;;  %v8568_v52 = vmov 29   ;;  %v7863_v28 = vld [vmem:[%s8851_s0 + $0xe68] sm:$0xff]  ;;  %v7861_v40 = vld [vmem:[%s8851_s0 + $0xe58] sm:$0xff]  ;;  %v6449_v3 = vunpack.c.l.s8.bf16 %v7889_v61 }
0x10bd   : > { %6373 = vmatpush1.bf16.msra.mxu1 %v6350_v37  ;;  %v5527_v45 = vpop.f32.mrf.mxu0  ;;  %6276 = vmatprep.subr.bf16.mxu0 %v6251_v33  ;;  %v7879_v25 = vld [vmem:[%s8851_s0 + $0xee8] sm:$0xff]  ;;  %v6268_v37 = vunpack.c.l.s8.bf16 %v7864_v27  ;;  %v6267_v30 = vunpack.c.h.s8.bf16 %v7863_v28  ;;  %v7862_v33 = vld [vmem:[%s8851_s0 + $0xe60] sm:$0xff]  ;;  %v6265_v39 = vunpack.c.l.s8.bf16 %v7863_v28  ;;  %v7877_v42 = vld [vmem:[%s8851_s0 + $0xed8] sm:$0xff]  ;;  %v6261_v49 = vunpack.c.l.s8.bf16 %v7861_v40 }
0x10be   : > { %v5625_v46 = vpop.f32.mrf.mxu1  ;;  %6374 = vmatprep.subr.bf16.mxu1 %v6349_v32  ;;  %v9747_v48 = vadd.f32 %v5632_v23, %v5536_v1  ;;  %8215 = vset.pattern.permute.xlu0 %v8568_v52  ;;  %v6365_v31 = vunpack.c.h.s8.bf16 %v7879_v25  ;;  %v7878_v32 = vld [vmem:[%s8851_s0 + $0xee0] sm:$0xff]  ;;  %v6266_v35 = vunpack.c.h.s8.bf16 %v7862_v33  ;;  %v6363_v23 = vunpack.c.l.s8.bf16 %v7879_v25  ;;  %v7860_v45 = vld [vmem:[%s8851_s0 + $0xe50] sm:$0xff]  ;;  %v7859_v52 = vld [vmem:[%s8851_s0 + $0xe48] sm:$0xff] }
0x10bf   : > { %6412 = vperm.xlu0 %8215, %v9705_v54   ;;  %v6364_v36 = vunpack.c.h.s8.bf16 %v7878_v32  ;;  %v6362_v44 = vunpack.c.l.s8.bf16 %v7878_v32  ;;  %v6263_v1 = vunpack.c.h.s8.bf16 %v7861_v40  ;;  %v7876_v46 = vld [vmem:[%s8851_s0 + $0xed0] sm:$0xff]  ;;  %v6359_v50 = vunpack.c.l.s8.bf16 %v7877_v42 }
0x10c0   : > { %6277 = vmatpush1.bf16.msra.mxu0 %v6250_v43  ;;  %v6264_v43 = vunpack.c.l.s8.bf16 %v7862_v33  ;;  %v6448_v16 = vunpack.c.l.s8.bf16 %v7888_v5 }
0x10c1   : > { %6375 = vmatpush1.bf16.msra.mxu1 %v6348_v4  ;;  %6278 = vmatprep.subr.bf16.mxu0 %v6249_v47  ;;  %v6361_v4 = vunpack.c.h.s8.bf16 %v7877_v42  ;;  %v6262_v47 = vunpack.c.h.s8.bf16 %v7860_v45 }
0x10c2   : > { %6376 = vmatprep.subr.bf16.mxu1 %v6347_v51  ;;  %v6360_v51 = vunpack.c.h.s8.bf16 %v7876_v46 }
0x10c4   : > { %6279 = vmatpush1.bf16.msra.mxu0 %v6248_v15  ;;  %v7875_v15 = vld [vmem:[%s8851_s0 + $0xec8] sm:$0xff] }
0x10c5   : > { %6377 = vmatpush1.bf16.msra.mxu1 %v6346_v34  ;;  %6280 = vmatprep.subr.bf16.mxu0 %v6247_v53  ;;  %v6260_v34 = vunpack.c.l.s8.bf16 %v7860_v45  ;;  %v6358_v53 = vunpack.c.l.s8.bf16 %v7876_v46  ;;  %v6357_v55 = vunpack.c.h.s8.bf16 %v7875_v15  ;;  %v6355_v59 = vunpack.c.l.s8.bf16 %v7875_v15  ;;  %v7885_v45 = vld [vmem:[%s8851_s0 + $0xf18] sm:$0xff]  ;;  %v7900_v15 = vld [vmem:[%s8851_s0 + $0xf90] sm:$0xff] }
0x10c6   : > { %6378 = vmatprep.subr.bf16.mxu1 %v6345_v56  ;;  %v6259_v56 = vunpack.c.h.s8.bf16 %v7859_v52  ;;  %v7901_v46 = vld [vmem:[%s8851_s0 + $0xf98] sm:$0xff] }
0x10c8   : > { %6281 = vmatpush1.bf16.msra.mxu0 %v6246_v9  ;;  %v7874_v9 = vld [vmem:[%s8851_s0 + $0xec0] sm:$0xff] }
0x10c9   : > { %6379 = vmatpush1.bf16.msra.mxu1 %v6344_v58  ;;  %6282 = vmatprep.subr.bf16.mxu0 %v6245_v60  ;;  %v6258_v58 = vunpack.c.h.s8.bf16 %v7858_v12  ;;  %v6356_v60 = vunpack.c.h.s8.bf16 %v7874_v9 }
0x10ca   : > { %6380 = vmatprep.subr.bf16.mxu1 %v6343_v63  ;;  %v6257_v63 = vunpack.c.l.s8.bf16 %v7859_v52  ;;  %v7884_v52 = vld [vmem:[%s8851_s0 + $0xf10] sm:$0xff] }
0x10cc   : > { %6283 = vmatpush1.bf16.msra.mxu0 %v6244_v0  ;;  %v7905_v0 = vld [vmem:[%s8851_s0 + $0xfb8] sm:$0xff] }
0x10cd   : > { %6381 = vmatpush1.bf16.msra.mxu1 %v6342_v62  ;;  %6284 = vmatprep.subr.bf16.mxu0 %v6243_v41  ;;  %v6256_v62 = vunpack.c.l.s8.bf16 %v7858_v12  ;;  %v6354_v41 = vunpack.c.l.s8.bf16 %v7874_v9  ;;  %v6549_v7 = vunpack.c.h.s8.bf16 %v7905_v0  ;;  %v7883_v12 = vld [vmem:[%s8851_s0 + $0xf08] sm:$0xff] }
0x10ce   : > { %6382 = vmatprep.subr.bf16.mxu1 %v6341_v2  ;;  %v6451_v2 = vunpack.c.h.s8.bf16 %v7889_v61  ;;  %v7899_v9 = vld [vmem:[%s8851_s0 + $0xf88] sm:$0xff]  ;;  %v7898_v61 = vld [vmem:[%s8851_s0 + $0xf80] sm:$0xff] }
0x10d0   : > { %6285 = vmatpush1.bf16.msra.mxu0 %v6242_v11  ;;  %v7904_v11 = vld [vmem:[%s8851_s0 + $0xfb0] sm:$0xff] }
0x10d1   : > { %6383 = vmatpush1.bf16.msra.mxu1 %v6340_v8  ;;  %6286 = vmatprep.subr.bf16.mxu0 %v6241_v10  ;;  %v6450_v8 = vunpack.c.h.s8.bf16 %v7888_v5  ;;  %v6548_v10 = vunpack.c.h.s8.bf16 %v7904_v11  ;;  %v7913_v5 = vld [vmem:[%s8851_s0 + $0xff8] sm:$0xff] }
0x10d2   : > { %6384 = vmatprep.subr.bf16.mxu1 %v6339_v13  ;;  %v5727_v13 = vpop.permute.xlu1 %5726 }
0x10d4   : > { %6287 = vmatpush1.bf16.msra.mxu0 %v6240_v14  ;;  %v6547_v14 = vunpack.c.l.s8.bf16 %v7905_v0 }
0x10d5   : > { %6385 = vmatpush1.bf16.msra.mxu1 %v6338_v57  ;;  %6288 = vmatprep.subr.bf16.mxu0 %v6271_v20  ;;  %v7887_v57 = vld [vmem:[%s8851_s0 + $0xf28] sm:$0xff] }
0x10d6   : > { %6386 = vmatprep.subr.bf16.mxu1 %v6369_v17  ;;  %v7903_v20 = vld [vmem:[%s8851_s0 + $0xfa8] sm:$0xff]  ;;  %v6447_v25 = vunpack.c.h.s8.bf16 %v7887_v57 }
0x10d8   : > { %6289 = vmatpush2.bf16.msra.mxu0 %v6270_v26 }
0x10d9   : > { %6387 = vmatpush2.bf16.msra.mxu1 %v6368_v21  ;;  %6290 = vmatprep.subr.bf16.mxu0 %v6269_v22  ;;  %v6546_v22 = vunpack.c.l.s8.bf16 %v7904_v11 }
0x10da   : > { %6388 = vmatprep.subr.bf16.mxu1 %v6367_v29 }
0x10dc   : > { %6291 = vmatpush2.bf16.msra.mxu0 %v6268_v37  ;;  %v6545_v37 = vunpack.c.h.s8.bf16 %v7903_v20 }
0x10dd   : > { %6389 = vmatpush2.bf16.msra.mxu1 %v6366_v18  ;;  %6292 = vmatprep.subr.bf16.mxu0 %v6267_v30  ;;  %v7886_v18 = vld [vmem:[%s8851_s0 + $0xf20] sm:$0xff] }
0x10de   : > { %6390 = vmatprep.subr.bf16.mxu1 %v6365_v31  ;;  %v7902_v30 = vld [vmem:[%s8851_s0 + $0xfa0] sm:$0xff]  ;;  %v6446_v42 = vunpack.c.h.s8.bf16 %v7886_v18 }
0x10e0   : > { %6293 = vmatpush2.bf16.msra.mxu0 %v6266_v35 }
0x10e1   : > { %6391 = vmatpush2.bf16.msra.mxu1 %v6364_v36  ;;  %6294 = vmatprep.subr.bf16.mxu0 %v6265_v39  ;;  %v8569_v39 = vmov 30  }
0x10e2   : > { %6392 = vmatprep.subr.bf16.mxu1 %v6363_v23  ;;  %8216 = vset.pattern.permute.xlu1 %v8569_v39 }
0x10e3   : > { %6510 = vperm.xlu1 %8216, %v9705_v54  }
0x10e4   : > { %6295 = vmatpush2.bf16.msra.mxu0 %v6264_v43 }
0x10e5   : > { %6393 = vmatpush2.bf16.msra.mxu1 %v6362_v44  ;;  %6296 = vmatprep.subr.bf16.mxu0 %v6263_v1  ;;  %v6445_v1 = vunpack.c.l.s8.bf16 %v7887_v57 }
0x10e6   : > { %6394 = vmatprep.subr.bf16.mxu1 %v6361_v4 }
0x10e8   : > { %6297 = vmatpush2.bf16.msra.mxu0 %v6262_v47  ;;  %v6444_v47 = vunpack.c.l.s8.bf16 %v7886_v18 }
0x10e9   : > { %6395 = vmatpush2.bf16.msra.mxu1 %v6360_v51  ;;  %6298 = vmatprep.subr.bf16.mxu0 %v6261_v49  ;;  %v6542_v51 = vunpack.c.l.s8.bf16 %v7902_v30  ;;  %v6443_v49 = vunpack.c.h.s8.bf16 %v7885_v45 }
0x10ea   : > { %6396 = vmatprep.subr.bf16.mxu1 %v6359_v50  ;;  %v6541_v50 = vunpack.c.h.s8.bf16 %v7901_v46 }
0x10ec   : > { %6299 = vmatpush2.bf16.msra.mxu0 %v6260_v34  ;;  %v6442_v34 = vunpack.c.h.s8.bf16 %v7884_v52 }
0x10ed   : > { %6397 = vmatpush2.bf16.msra.mxu1 %v6358_v53  ;;  %6300 = vmatprep.subr.bf16.mxu0 %v6259_v56  ;;  %v6540_v53 = vunpack.c.h.s8.bf16 %v7900_v15  ;;  %v6441_v56 = vunpack.c.l.s8.bf16 %v7885_v45  ;;  %v7891_v45 = vld [vmem:[%s8851_s0 + $0xf48] sm:$0xff] }
0x10ee   : > { %6398 = vmatprep.subr.bf16.mxu1 %v6357_v55  ;;  %v6539_v55 = vunpack.c.l.s8.bf16 %v7901_v46  ;;  %v7907_v46 = vld [vmem:[%s8851_s0 + $0xfc8] sm:$0xff] }
0x10f0   : > { %6301 = vmatpush2.bf16.msra.mxu0 %v6258_v58  ;;  %v6440_v58 = vunpack.c.l.s8.bf16 %v7884_v52  ;;  %v7906_v52 = vld [vmem:[%s8851_s0 + $0xfc0] sm:$0xff] }
0x10f1   : > { %6399 = vmatpush2.bf16.msra.mxu1 %v6356_v60  ;;  %6302 = vmatprep.subr.bf16.mxu0 %v6257_v63  ;;  %v6538_v60 = vunpack.c.l.s8.bf16 %v7900_v15  ;;  %v6537_v63 = vunpack.c.h.s8.bf16 %v7899_v9 }
0x10f2   : > { %6400 = vmatprep.subr.bf16.mxu1 %v6355_v59  ;;  %v7882_v59 = vld [vmem:[%s8851_s0 + $0xf00] sm:$0xff] }
0x10f3   : > { %v6438_v0 = vunpack.c.h.s8.bf16 %v7882_v59  ;;  %v6436_v11 = vunpack.c.l.s8.bf16 %v7882_v59 }
0x10f4   : > { %6303 = vmatpush2.bf16.msra.mxu0 %v6256_v62  ;;  %v6536_v62 = vunpack.c.h.s8.bf16 %v7898_v61 }
0x10f5   : > { %6401 = vmatpush2.bf16.msra.mxu1 %v6354_v41  ;;  %6468 = vmatprep.subr.bf16.mxu0 %v6451_v2  ;;  %v6437_v41 = vunpack.c.l.s8.bf16 %v7883_v12  ;;  %v6535_v2 = vunpack.c.l.s8.bf16 %v7899_v9  ;;  %v6550_v9 = vunpack.c.l.s8.bf16 %v7906_v52 }
0x10f6   : > { %6566 = vmatprep.subr.bf16.mxu1 %v6549_v7  ;;  %v7897_v7 = vld [vmem:[%s8851_s0 + $0xf78] sm:$0xff] }
0x10f7   : > { %v5718_v17 = vpop.f32.mrf.mxu0  ;;  %6305 = vmatmul.mubr.bf16.vlgmr.msra.gmra.mxu0 %v9169_v6 }
0x10f8   : > { %v5816_v27 = vpop.f32.mrf.mxu1  ;;  %6403 = vmatmul.mubr.bf16.vlgmr.msra.gmra.mxu1 %v9169_v6  ;;  %v5729_v26 = vmul.f32 %v5727_v13, %v5718_v17  ;;  %6469 = vmatpush1.bf16.msra.mxu0 %v6450_v8  ;;  %v6534_v8 = vunpack.c.l.s8.bf16 %v7898_v61  ;;  %v6563_v17 = vunpack.c.l.s8.bf16 %v7913_v5 }
0x10f9   : > { %6567 = vmatpush1.bf16.msra.mxu1 %v6548_v10  ;;  %v5827_v21 = vmul.f32 %v5825_v19, %v5816_v27  ;;  %v5720_v29 = vpop.f32.mrf.mxu0  ;;  %6470 = vmatprep.subr.bf16.mxu0 %v6449_v3  ;;  %v6467_v10 = vunpack.c.h.s8.bf16 %v7897_v7  ;;  %v7912_v3 = vld [vmem:[%s8851_s0 + $0xff0] sm:$0xff]  ;;  %v7895_v27 = vld [vmem:[%s8851_s0 + $0xf68] sm:$0xff] }
0x10fa   : > { %v5818_v28 = vpop.f32.mrf.mxu1  ;;  %6568 = vmatprep.subr.bf16.mxu1 %v6547_v14  ;;  %v5731_v31 = vadd.f32 %v5729_v26, %v9745_v38  ;;  %v5730_v33 = vmul.f32 %v5727_v13, %v5720_v29  ;;  %6500 = vmatprep.mubr.bf16.mxu0 %v9131_v24  ;;  %v6544_v38 = vunpack.c.h.s8.bf16 %v7902_v30  ;;  %v6565_v13 = vunpack.c.h.s8.bf16 %v7913_v5 }
0x10fb   : > { %v5828_v32 = vmul.f32 %v5825_v19, %v5818_v28  ;;  %6598 = vmatprep.mubr.bf16.mxu1 %v9131_v24  ;;  %v5722_v35 = vpop.f32.mrf.mxu0  ;;  %v6543_v24 = vunpack.c.l.s8.bf16 %v7903_v20  ;;  %v7896_v19 = vld [vmem:[%s8851_s0 + $0xf70] sm:$0xff]  ;;  %v6564_v57 = vunpack.c.h.s8.bf16 %v7912_v3  ;;  %v6465_v20 = vunpack.c.l.s8.bf16 %v7897_v7  ;;  %v7894_v28 = vld [vmem:[%s8851_s0 + $0xf60] sm:$0xff] }
0x10fc   : > { %v5820_v36 = vpop.f32.mrf.mxu1  ;;  %v5732_v23 = vadd.f32 %v5730_v33, %v9747_v48  ;;  %v9789_v40 = vadd.f32 %v5827_v21, %v5731_v31  ;;  %6471 = vmatpush1.bf16.msra.mxu0 %v6448_v16  ;;  %v8570_v48 = vmov 31   ;;  %v6466_v14 = vunpack.c.h.s8.bf16 %v7896_v19  ;;  %v7911_v16 = vld [vmem:[%s8851_s0 + $0xfe8] sm:$0xff]  ;;  %v7893_v33 = vld [vmem:[%s8851_s0 + $0xf58] sm:$0xff] }
0x10fd   : > { %6569 = vmatpush1.bf16.msra.mxu1 %v6546_v22  ;;  %v5723_v43 = vpop.f32.mrf.mxu0  ;;  %6472 = vmatprep.subr.bf16.mxu0 %v6447_v25  ;;  %v6464_v26 = vunpack.c.l.s8.bf16 %v7896_v19  ;;  %v6562_v21 = vunpack.c.l.s8.bf16 %v7912_v3  ;;  %v6463_v22 = vunpack.c.h.s8.bf16 %v7895_v27  ;;  %v6561_v29 = vunpack.c.h.s8.bf16 %v7911_v16  ;;  %v7910_v25 = vld [vmem:[%s8851_s0 + $0xfe0] sm:$0xff]  ;;  %v6119_v3 = vpop.permute.xlu0 %6118 }
0x10fe   : > { %v5821_v44 = vpop.f32.mrf.mxu1  ;;  %6570 = vmatprep.subr.bf16.mxu1 %v6545_v37  ;;  %v9791_v4 = vadd.f32 %v5828_v32, %v5732_v23  ;;  %8218 = vset.pattern.permute.xlu0 %v8570_v48  ;;  %v6462_v37 = vunpack.c.h.s8.bf16 %v7894_v28  ;;  %v6560_v18 = vunpack.c.h.s8.bf16 %v7910_v25  ;;  %v6461_v30 = vunpack.c.l.s8.bf16 %v7895_v27  ;;  %v7909_v32 = vld [vmem:[%s8851_s0 + $0xfd8] sm:$0xff] }
0x10ff   : > { %8217 = vset.pattern.permute.xlu1 %v8570_v48  ;;  %v6559_v31 = vunpack.c.l.s8.bf16 %v7911_v16  ;;  %v6460_v35 = vunpack.c.l.s8.bf16 %v7894_v28  ;;  %v6558_v36 = vunpack.c.l.s8.bf16 %v7910_v25  ;;  %v6459_v39 = vunpack.c.h.s8.bf16 %v7893_v33 }
0x1100   : > { %6473 = vmatpush1.bf16.msra.mxu0 %v6446_v42  ;;  %6608 = vperm.xlu1 %8217, %v9705_v54   ;;  %v6439_v54 = vunpack.c.h.s8.bf16 %v7883_v12  ;;  %v6557_v23 = vunpack.c.h.s8.bf16 %v7909_v32  ;;  %v7892_v42 = vld [vmem:[%s8851_s0 + $0xf50] sm:$0xff] }
0x1101   : > { %6571 = vmatpush1.bf16.msra.mxu1 %v6544_v38  ;;  %6474 = vmatprep.subr.bf16.mxu0 %v6445_v1  ;;  %v7908_v38 = vld [vmem:[%s8851_s0 + $0xfd0] sm:$0xff]  ;;  %v6458_v43 = vunpack.c.h.s8.bf16 %v7892_v42  ;;  %v6457_v1 = vunpack.c.l.s8.bf16 %v7893_v33  ;;  %v6456_v48 = vunpack.c.l.s8.bf16 %v7892_v42 }
0x1102   : > { %6572 = vmatprep.subr.bf16.mxu1 %v6543_v24  ;;  %v6556_v44 = vunpack.c.h.s8.bf16 %v7908_v38  ;;  %v6555_v24 = vunpack.c.l.s8.bf16 %v7909_v32 }
0x1104   : > { %6475 = vmatpush1.bf16.msra.mxu0 %v6444_v47  ;;  %v6554_v47 = vunpack.c.l.s8.bf16 %v7908_v38 }
0x1105   : > { %6573 = vmatpush1.bf16.msra.mxu1 %v6542_v51  ;;  %6476 = vmatprep.subr.bf16.mxu0 %v6443_v49  ;;  %v6455_v51 = vunpack.c.h.s8.bf16 %v7891_v45  ;;  %v6553_v49 = vunpack.c.h.s8.bf16 %v7907_v46 }
0x1106   : > { %6574 = vmatprep.subr.bf16.mxu1 %v6541_v50  ;;  %v7890_v50 = vld [vmem:[%s8851_s0 + $0xf40] sm:$0xff] }
0x1107   : > { %v6454_v15 = vunpack.c.h.s8.bf16 %v7890_v50  ;;  %v6452_v12 = vunpack.c.l.s8.bf16 %v7890_v50 }
0x1108   : > { %6477 = vmatpush1.bf16.msra.mxu0 %v6442_v34  ;;  %v6552_v34 = vunpack.c.h.s8.bf16 %v7906_v52 }
0x1109   : > { %6575 = vmatpush1.bf16.msra.mxu1 %v6540_v53  ;;  %6478 = vmatprep.subr.bf16.mxu0 %v6441_v56  ;;  %v6453_v53 = vunpack.c.l.s8.bf16 %v7891_v45  ;;  %v6551_v56 = vunpack.c.l.s8.bf16 %v7907_v46 }
0x110a   : > { %6576 = vmatprep.subr.bf16.mxu1 %v6539_v55  ;;  %v5923_v55 = vpop.permute.xlu1 %5922 }
0x110c   : > { %6479 = vmatpush1.bf16.msra.mxu0 %v6440_v58 }
0x110d   : > { %6577 = vmatpush1.bf16.msra.mxu1 %v6538_v60  ;;  %6480 = vmatprep.subr.bf16.mxu0 %v6439_v54 }
0x110e   : > { %6578 = vmatprep.subr.bf16.mxu1 %v6537_v63  ;;  %v6021_v58 = vpop.permute.xlu1 %6020 }
0x1110   : > { %6481 = vmatpush1.bf16.msra.mxu0 %v6438_v0 }
0x1111   : > { %6579 = vmatpush1.bf16.msra.mxu1 %v6536_v62  ;;  %6482 = vmatprep.subr.bf16.mxu0 %v6437_v41 }
0x1112   : > { %6580 = vmatprep.subr.bf16.mxu1 %v6535_v2 }
0x1114   : > { %6483 = vmatpush1.bf16.msra.mxu0 %v6436_v11 }
0x1115   : > { %6581 = vmatpush1.bf16.msra.mxu1 %v6534_v8  ;;  %6484 = vmatprep.subr.bf16.mxu0 %v6467_v10 }
0x1116   : > { %6582 = vmatprep.subr.bf16.mxu1 %v6565_v13 }
0x1118   : > { %6485 = vmatpush2.bf16.msra.mxu0 %v6466_v14  ;;  %v6217_v14 = vpop.permute.xlu1 %6216 }
0x1119   : > { %6583 = vmatpush2.bf16.msra.mxu1 %v6564_v57  ;;  %6486 = vmatprep.subr.bf16.mxu0 %v6465_v20 }
0x111a   : > { %6584 = vmatprep.subr.bf16.mxu1 %v6563_v17 }
0x111c   : > { %6487 = vmatpush2.bf16.msra.mxu0 %v6464_v26 }
0x111d   : > { %6585 = vmatpush2.bf16.msra.mxu1 %v6562_v21  ;;  %6488 = vmatprep.subr.bf16.mxu0 %v6463_v22 }
0x111e   : > { %6586 = vmatprep.subr.bf16.mxu1 %v6561_v29 }
0x111f   : > { %v6315_v42 = vpop.permute.xlu1 %6314 }
0x1120   : > { %6489 = vmatpush2.bf16.msra.mxu0 %v6462_v37 }
0x1121   : > { %6587 = vmatpush2.bf16.msra.mxu1 %v6560_v18  ;;  %6490 = vmatprep.subr.bf16.mxu0 %v6461_v30 }
0x1122   : > { %6588 = vmatprep.subr.bf16.mxu1 %v6559_v31 }
0x1124   : > { %6491 = vmatpush2.bf16.msra.mxu0 %v6460_v35 }
0x1125   : > { %6589 = vmatpush2.bf16.msra.mxu1 %v6558_v36  ;;  %6492 = vmatprep.subr.bf16.mxu0 %v6459_v39 }
0x1126   : > { %6590 = vmatprep.subr.bf16.mxu1 %v6557_v23 }
0x1128   : > { %6493 = vmatpush2.bf16.msra.mxu0 %v6458_v43 }
0x1129   : > { %6591 = vmatpush2.bf16.msra.mxu1 %v6556_v44  ;;  %6494 = vmatprep.subr.bf16.mxu0 %v6457_v1 }
0x112a   : > { %6592 = vmatprep.subr.bf16.mxu1 %v6555_v24 }
0x112c   : > { %6495 = vmatpush2.bf16.msra.mxu0 %v6456_v48 }
0x112d   : > { %6593 = vmatpush2.bf16.msra.mxu1 %v6554_v47  ;;  %6496 = vmatprep.subr.bf16.mxu0 %v6455_v51 }
0x112e   : > { %6594 = vmatprep.subr.bf16.mxu1 %v6553_v49 }
0x1130   : > { %6497 = vmatpush2.bf16.msra.mxu0 %v6454_v15 }
0x1131   : > { %6595 = vmatpush2.bf16.msra.mxu1 %v6552_v34  ;;  %6498 = vmatprep.subr.bf16.mxu0 %v6453_v53 }
0x1132   : > { %6596 = vmatprep.subr.bf16.mxu1 %v6551_v56 }
0x1134   : > { %6499 = vmatpush2.bf16.msra.mxu0 %v6452_v12 }
0x1135   : > { %6597 = vmatpush2.bf16.msra.mxu1 %v6550_v9 }
0x1137   : > { %v5914_v60 = vpop.f32.mrf.mxu0  ;;  %6501 = vmatmul.mubr.bf16.vlgmr.msra.gmra.mxu0 %v9169_v6 }
0x1138   : > { %v6012_v54 = vpop.f32.mrf.mxu1  ;;  %6599 = vmatmul.mubr.bf16.vlgmr.msra.gmra.mxu1 %v9169_v6  ;;  %v5925_v63 = vmul.f32 %v5923_v55, %v5914_v60 }
0x1139   : > { %v6023_v59 = vmul.f32 %v6021_v58, %v6012_v54  ;;  %v5916_v61 = vpop.f32.mrf.mxu0 }
0x113a   : > { %v6014_v0 = vpop.f32.mrf.mxu1  ;;  %v5927_v62 = vadd.f32 %v5925_v63, %v9789_v40  ;;  %v5926_v41 = vmul.f32 %v5923_v55, %v5916_v61  ;;  %v6413_v44 = vpop.permute.xlu0 %6412 }
0x113b   : > { %v6024_v2 = vmul.f32 %v6021_v58, %v6014_v0  ;;  %v5918_v7 = vpop.f32.mrf.mxu0 }
0x113c   : > { %v6016_v5 = vpop.f32.mrf.mxu1  ;;  %v5928_v11 = vadd.f32 %v5926_v41, %v9791_v4  ;;  %v6025_v8 = vadd.f32 %v6023_v59, %v5927_v62 }
0x113d   : > { %v5919_v10 = vpop.f32.mrf.mxu0 }
0x113e   : > { %v6017_v13 = vpop.f32.mrf.mxu1  ;;  %v6026_v19 = vadd.f32 %v6024_v2, %v5928_v11 }
0x115e   : > { %v6511_v38 = vpop.permute.xlu1 %6510 }
0x1177   : > { %v6110_v57 = vpop.f32.mrf.mxu0 }
0x1178   : > { %v6208_v6 = vpop.f32.mrf.mxu1  ;;  %v6121_v20 = vmul.f32 %v6119_v3, %v6110_v57 }
0x1179   : > { %v6219_v17 = vmul.f32 %v6217_v14, %v6208_v6  ;;  %v6112_v27 = vpop.f32.mrf.mxu0 }
0x117a   : > { %v6210_v16 = vpop.f32.mrf.mxu1  ;;  %v6123_v26 = vadd.f32 %v6121_v20, %v6025_v8  ;;  %v6122_v40 = vmul.f32 %v6119_v3, %v6112_v27 }
0x117b   : > { %v6220_v21 = vmul.f32 %v6217_v14, %v6210_v16  ;;  %v6114_v22 = vpop.f32.mrf.mxu0  ;;  %v6609_v46 = vpop.permute.xlu1 %6608 }
0x117c   : > { %v6212_v29 = vpop.f32.mrf.mxu1  ;;  %v6124_v28 = vadd.f32 %v6122_v40, %v6026_v19  ;;  %v6221_v25 = vadd.f32 %v6219_v17, %v6123_v26 }
0x117d   : > { %v6115_v4 = vpop.f32.mrf.mxu0 }
0x117e   : > { %v6213_v37 = vpop.f32.mrf.mxu1  ;;  %v6222_v18 = vadd.f32 %v6220_v21, %v6124_v28 }
0x11b7   : > { %v6306_v30 = vpop.f32.mrf.mxu0 }
0x11b8   : > { %v6404_v31 = vpop.f32.mrf.mxu1  ;;  %v6317_v43 = vmul.f32 %v6315_v42, %v6306_v30 }
0x11b9   : > { %v6308_v33 = vpop.f32.mrf.mxu0  ;;  %v6415_v45 = vmul.f32 %v6413_v44, %v6404_v31 }
0x11ba   : > { %v6406_v32 = vpop.f32.mrf.mxu1  ;;  %v6318_v1 = vmul.f32 %v6315_v42, %v6308_v33  ;;  %v6319_v24 = vadd.f32 %v6317_v43, %v6221_v25 }
0x11bb   : > { %v6310_v35 = vpop.f32.mrf.mxu0  ;;  %v6416_v47 = vmul.f32 %v6413_v44, %v6406_v32 }
0x11bc   : > { %v6408_v36 = vpop.f32.mrf.mxu1  ;;  %v6320_v48 = vadd.f32 %v6318_v1, %v6222_v18  ;;  %v6417_v50 = vadd.f32 %v6415_v45, %v6319_v24 }
0x11bd   : > { %v6311_v39 = vpop.f32.mrf.mxu0 }
0x11be   : > { %v6409_v23 = vpop.f32.mrf.mxu1  ;;  %v6418_v56 = vadd.f32 %v6416_v47, %v6320_v48 }
0x11f7   : > { %v6502_v51 = vpop.f32.mrf.mxu0 }
0x11f8   : > { %v6600_v49 = vpop.f32.mrf.mxu1  ;;  %v6513_v52 = vmul.f32 %v6511_v38, %v6502_v51 }
0x11f9   : > { %v6611_v15 = vmul.f32 %v6609_v46, %v6600_v49  ;;  %v6504_v34 = vpop.f32.mrf.mxu0 }
0x11fa   : > { %v6602_v53 = vpop.f32.mrf.mxu1  ;;  %v6515_v55 = vadd.f32 %v6513_v52, %v6417_v50  ;;  %v6514_v12 = vmul.f32 %v6511_v38, %v6504_v34 }
0x11fb   : > { %v6506_v9 = vpop.f32.mrf.mxu0  ;;  %v6612_v54 = vmul.f32 %v6609_v46, %v6602_v53 }
0x11fc   : > { %v6604_v58 = vpop.f32.mrf.mxu1  ;;  %v6516_v60 = vadd.f32 %v6514_v12, %v6418_v56  ;;  %v6613_v63 = vadd.f32 %v6611_v15, %v6515_v55  ;;  %6620 = sbr.rel (%p7914_p5) target bundleno = 5519 (0x158f), region = 116 }
0x11fd   : > { %v6507_v59 = vpop.f32.mrf.mxu0 }
0x11fe   : > { %v6605_v61 = vpop.f32.mrf.mxu1  ;;  %v6614_v0 = vadd.f32 %v6612_v54, %v6516_v60  ;;  %6615 = vst [vmem:[#allocation5 + $0x8] sm:$0xff] %v6613_v63 }
0x1200   : > { %6616 = vst [vmem:[#allocation5] sm:$0xff] %v6614_v0 }
0x1201   : > { %v6695_v62 = vld [vmem:[#allocation11 + $0x14f8] sm:$0xff]  ;;  %v6694_v41 = vld [vmem:[#allocation11 + $0x14f0] sm:$0xff]  ;;  %v6693_v2 = vld [vmem:[#allocation11 + $0x14e8] sm:$0xff]  ;;  %v6626_v6 = vlaneseq  ;;  %vm7253_vm14 = vcmask 7168  }
0x1202   : > { %6741 = vmatprep.subr.mxu0 %v6695_v62  ;;  %v6692_v7 = vld [vmem:[#allocation11 + $0x14e0] sm:$0xff]  ;;  %v6691_v5 = vld [vmem:[#allocation11 + $0x14d8] sm:$0xff]  ;;  %v6690_v11 = vld [vmem:[#allocation11 + $0x14d0] sm:$0xff] }
0x1203   : > { %6742 = vmatpush1.msra.mxu0 %v6694_v41  ;;  %v6689_v8 = vld [vmem:[#allocation11 + $0x14c8] sm:$0xff]  ;;  %v6688_v10 = vld [vmem:[#allocation11 + $0x14c0] sm:$0xff]  ;;  %v6687_v13 = vld [vmem:[#allocation11 + $0x14b8] sm:$0xff]  ;;  %v9824_v26 = vshrl.u32 %v6626_v6, 7 }
0x1204   : > { %6743 = vmatprep.subr.mxu0 %v6693_v2  ;;  %v6686_v19 = vld [vmem:[#allocation11 + $0x14b0] sm:$0xff]  ;;  %v6685_v3 = vld [vmem:[#allocation11 + $0x14a8] sm:$0xff]  ;;  %v6684_v14 = vld [vmem:[#allocation11 + $0x14a0] sm:$0xff] }
0x1205   : > { %6744 = vmatpush1.msra.mxu0 %v6692_v7  ;;  %v6683_v57 = vld [vmem:[#allocation11 + $0x1498] sm:$0xff]  ;;  %v6682_v20 = vld [vmem:[#allocation11 + $0x1490] sm:$0xff]  ;;  %v6681_v17 = vld [vmem:[#allocation11 + $0x1488] sm:$0xff]  ;;  %v9827_v28 = vsub.s32 1, %v9824_v26 }
0x1206   : > { %6745 = vmatprep.subr.mxu0 %v6691_v5  ;;  %v6680_v27 = vld [vmem:[#allocation11 + $0x1480] sm:$0xff]  ;;  %v6679_v16 = vld [vmem:[#allocation11 + $0x1478] sm:$0xff]  ;;  %v6678_v40 = vld [vmem:[#allocation11 + $0x1470] sm:$0xff] }
0x1207   : > { %6746 = vmatpush1.msra.mxu0 %v6690_v11  ;;  %v6677_v21 = vld [vmem:[#allocation11 + $0x1468] sm:$0xff]  ;;  %v6676_v22 = vld [vmem:[#allocation11 + $0x1460] sm:$0xff]  ;;  %v6675_v29 = vld [vmem:[#allocation11 + $0x1458] sm:$0xff] }
0x1208   : > { %6747 = vmatprep.subr.mxu0 %v6689_v8  ;;  %v6674_v25 = vld [vmem:[#allocation11 + $0x1450] sm:$0xff]  ;;  %v6673_v4 = vld [vmem:[#allocation11 + $0x1448] sm:$0xff]  ;;  %v6672_v37 = vld [vmem:[#allocation11 + $0x1440] sm:$0xff] }
0x1209   : > { %6748 = vmatpush1.msra.mxu0 %v6688_v10  ;;  %v6622_v18 = vld [vmem:[#allocation5] sm:$0xff]  ;;  %v9829_v30 = vld [vmem:[#allocation12 + $0x1e] sm:$0x3]  ;;  %v9833_v32 = vld [vmem:[#allocation12 + $0x1c] sm:$0x3]  ;;  %v9838_v10 = vsub.s32 0, %v9824_v26 }
0x120a   : > { %6749 = vmatprep.subr.mxu0 %v6687_v13  ;;  %v6671_v31 = vld [vmem:[#allocation11 + $0x1438] sm:$0xff]  ;;  %v6633_v33 = vrot.slane %v9829_v30, %v9827_v28  ;;  %v6670_v35 = vld [vmem:[#allocation11 + $0x1430] sm:$0xff]  ;;  %v6648_v36 = vrot.slane %v9833_v32, %v9827_v28  ;;  %v6669_v42 = vld [vmem:[#allocation11 + $0x1428] sm:$0xff] }
0x120b   : > { %6750 = vmatpush1.msra.mxu0 %v6686_v19  ;;  %v6850_v39 = vld [vmem:[#allocation11 + $0x16f8] sm:$0xff]  ;;  %v6849_v23 = vld [vmem:[#allocation11 + $0x16f0] sm:$0xff]  ;;  %v6848_v43 = vld [vmem:[#allocation11 + $0x16e8] sm:$0xff] }
0x120c   : > { %6751 = vmatprep.subr.mxu0 %v6685_v3  ;;  %v6637_v38 = vmul.f32 %v6633_v33, %v6622_v18  ;;  %6896 = vmatprep.subr.mxu1 %v6850_v39  ;;  %v6847_v44 = vld [vmem:[#allocation11 + $0x16e0] sm:$0xff]  ;;  %v6846_v45 = vld [vmem:[#allocation11 + $0x16d8] sm:$0xff]  ;;  %v6845_v47 = vld [vmem:[#allocation11 + $0x16d0] sm:$0xff] }
0x120d   : > { %6752 = vmatpush1.msra.mxu0 %v6684_v14  ;;  %v6668_v1 = vld [vmem:[#allocation11 + $0x1420] sm:$0xff]  ;;  %6897 = vmatpush1.msra.mxu1 %v6849_v23  ;;  %v6667_v46 = vld [vmem:[#allocation11 + $0x1418] sm:$0xff]  ;;  %v6666_v51 = vld [vmem:[#allocation11 + $0x1410] sm:$0xff] }
0x120e   : > { %6753 = vmatprep.subr.mxu0 %v6683_v57  ;;  %v6654_v24 = vld [vmem:[#allocation3 + $0x8] sm:$0xff]  ;;  %v6652_v48 = vadd.f32 %v6648_v36, %v6637_v38  ;;  %6898 = vmatprep.subr.mxu1 %v6848_v43  ;;  %v6844_v49 = vld [vmem:[#allocation11 + $0x16c8] sm:$0xff]  ;;  %v6726_v12 = vld [vmem:[#allocation11 + $0x15f0] sm:$0xff] }
0x120f   : > { %6754 = vmatpush1.msra.mxu0 %v6682_v20  ;;  %6899 = vmatpush1.msra.mxu1 %v6847_v44  ;;  %v6665_v50 = vld [vmem:[#allocation11 + $0x1408] sm:$0xff]  ;;  %v6843_v15 = vld [vmem:[#allocation11 + $0x16c0] sm:$0xff]  ;;  %v6842_v53 = vld [vmem:[#allocation11 + $0x16b8] sm:$0xff] }
0x1210   : > { %6755 = vmatprep.subr.mxu0 %v6681_v17  ;;  %v6656_v52 = vadd.f32 %v6654_v24, %v6652_v48  ;;  %6900 = vmatprep.subr.mxu1 %v6846_v45  ;;  %v6664_v34 = vld [vmem:[#allocation11 + $0x1400] sm:$0xff]  ;;  %v6727_v56 = vld [vmem:[#allocation11 + $0x15f8] sm:$0xff]  ;;  %v6841_v9 = vld [vmem:[#allocation11 + $0x16b0] sm:$0xff] }
0x1211   : > { %6756 = vmatpush1.msra.mxu0 %v6680_v27  ;;  %6901 = vmatpush1.msra.mxu1 %v6845_v47  ;;  %v6725_v58 = vld [vmem:[#allocation11 + $0x15e8] sm:$0xff]  ;;  %v6724_v63 = vld [vmem:[#allocation11 + $0x15e0] sm:$0xff]  ;;  %v6723_v61 = vld [vmem:[#allocation11 + $0x15d8] sm:$0xff]  ;;  %v6629_v27 = vrot.slane %v9829_v30, %v9838_v10  ;;  %v6644_v30 = vrot.slane %v9833_v32, %v9838_v10 }
0x1212   : > { %6757 = vmatprep.subr.mxu0 %v6679_v16  ;;  %vm6658_vm0 = vcmp.gt.f32.partialorder %v6656_v52, 0.0  ;;  %v6660_v55 = vmul.f32 0.1, %v6656_v52  ;;  %6902 = vmatprep.subr.mxu1 %v6844_v49  ;;  %v6840_v54 = vld [vmem:[#allocation11 + $0x16a8] sm:$0xff]  ;;  %v6839_v59 = vld [vmem:[#allocation11 + $0x16a0] sm:$0xff]  ;;  %v6838_v0 = vld [vmem:[#allocation11 + $0x1698] sm:$0xff] }
0x1213   : > { %6758 = vmatpush1.msra.mxu0 %v6678_v40  ;;  %6903 = vmatpush1.msra.mxu1 %v6843_v15  ;;  %v6722_v62 = vld [vmem:[#allocation11 + $0x15d0] sm:$0xff]  ;;  %v6721_v2 = vld [vmem:[#allocation11 + $0x15c8] sm:$0xff]  ;;  %v6720_v5 = vld [vmem:[#allocation11 + $0x15c0] sm:$0xff] }
0x1214   : > { %6759 = vmatprep.subr.mxu0 %v6677_v21  ;;  %v6662_v60 = vsel %vm6658_vm0, %v6656_v52, %v6660_v55  ;;  %6904 = vmatprep.subr.mxu1 %v6842_v53  ;;  %v6837_v41 = vld [vmem:[#allocation11 + $0x1690] sm:$0xff]  ;;  %v6836_v7 = vld [vmem:[#allocation11 + $0x1688] sm:$0xff]  ;;  %v6835_v11 = vld [vmem:[#allocation11 + $0x1680] sm:$0xff] }
0x1215   : > { %6760 = vmatpush1.msra.mxu0 %v6676_v22  ;;  %6805 = vmatprep.mubr.f32.mxu0 %v6662_v60  ;;  %v6719_v8 = vld [vmem:[#allocation11 + $0x15b8] sm:$0xff]  ;;  %v6718_v19 = vld [vmem:[#allocation11 + $0x15b0] sm:$0xff]  ;;  %v6717_v14 = vld [vmem:[#allocation11 + $0x15a8] sm:$0xff] }
0x1216   : > { %6761 = vmatprep.subr.mxu0 %v6675_v29  ;;  %6905 = vmatpush1.msra.mxu1 %v6841_v9  ;;  %v6834_v13 = vld [vmem:[#allocation11 + $0x1678] sm:$0xff]  ;;  %v6833_v3 = vld [vmem:[#allocation11 + $0x1670] sm:$0xff]  ;;  %v6832_v57 = vld [vmem:[#allocation11 + $0x1668] sm:$0xff] }
0x1217   : > { %6762 = vmatpush1.msra.mxu0 %v6674_v25  ;;  %6906 = vmatprep.subr.mxu1 %v6840_v54  ;;  %v6716_v6 = vld [vmem:[#allocation11 + $0x15a0] sm:$0xff]  ;;  %v6715_v17 = vld [vmem:[#allocation11 + $0x1598] sm:$0xff]  ;;  %v6714_v26 = vld [vmem:[#allocation11 + $0x1590] sm:$0xff] }
0x1218   : > { %6763 = vmatprep.subr.mxu0 %v6673_v4  ;;  %6907 = vmatpush1.msra.mxu1 %v6839_v59  ;;  %v6831_v20 = vld [vmem:[#allocation11 + $0x1660] sm:$0xff]  ;;  %v6830_v16 = vld [vmem:[#allocation11 + $0x1658] sm:$0xff]  ;;  %v6621_v40 = vld [vmem:[#allocation5 + $0x8] sm:$0xff] }
0x1219   : > { %6764 = vmatpush1.msra.mxu0 %v6672_v37  ;;  %6908 = vmatprep.subr.mxu1 %v6838_v0  ;;  %v6829_v21 = vld [vmem:[#allocation11 + $0x1650] sm:$0xff]  ;;  %v6713_v22 = vld [vmem:[#allocation11 + $0x1588] sm:$0xff]  ;;  %v6712_v25 = vld [vmem:[#allocation11 + $0x1580] sm:$0xff]  ;;  %v6636_v18 = vmul.f32 %v6629_v27, %v6621_v40 }
0x121a   : > { %6765 = vmatprep.subr.mxu0 %v6671_v31  ;;  %6909 = vmatpush1.msra.mxu1 %v6837_v41  ;;  %v6828_v29 = vld [vmem:[#allocation11 + $0x1648] sm:$0xff]  ;;  %v6827_v4 = vld [vmem:[#allocation11 + $0x1640] sm:$0xff]  ;;  %v6711_v37 = vld [vmem:[#allocation11 + $0x1578] sm:$0xff] }
0x121b   : > { %6766 = vmatpush1.msra.mxu0 %v6670_v35  ;;  %6910 = vmatprep.subr.mxu1 %v6836_v7  ;;  %v6826_v31 = vld [vmem:[#allocation11 + $0x1638] sm:$0xff]  ;;  %v6710_v33 = vld [vmem:[#allocation11 + $0x1570] sm:$0xff]  ;;  %v6709_v36 = vld [vmem:[#allocation11 + $0x1568] sm:$0xff]  ;;  %v6651_v43 = vadd.f32 %v6644_v30, %v6636_v18 }
0x121c   : > { %6767 = vmatprep.subr.mxu0 %v6669_v42  ;;  %6911 = vmatpush1.msra.mxu1 %v6835_v11  ;;  %v6825_v35 = vld [vmem:[#allocation11 + $0x1630] sm:$0xff]  ;;  %v6824_v39 = vld [vmem:[#allocation11 + $0x1628] sm:$0xff]  ;;  %v6708_v23 = vld [vmem:[#allocation11 + $0x1560] sm:$0xff] }
0x121d   : > { %6768 = vmatpush1.msra.mxu0 %v6668_v1  ;;  %6912 = vmatprep.subr.mxu1 %v6834_v13  ;;  %v6823_v42 = vld [vmem:[#allocation11 + $0x1620] sm:$0xff]  ;;  %v6707_v38 = vld [vmem:[#allocation11 + $0x1558] sm:$0xff]  ;;  %v6706_v32 = vld [vmem:[#allocation11 + $0x1550] sm:$0xff] }
0x121e   : > { %6769 = vmatprep.subr.mxu0 %v6667_v46  ;;  %6913 = vmatpush1.msra.mxu1 %v6833_v3  ;;  %v6822_v44 = vld [vmem:[#allocation11 + $0x1618] sm:$0xff]  ;;  %v6821_v24 = vld [vmem:[#allocation11 + $0x1610] sm:$0xff]  ;;  %v6705_v45 = vld [vmem:[#allocation11 + $0x1548] sm:$0xff] }
0x121f   : > { %6770 = vmatpush1.msra.mxu0 %v6666_v51  ;;  %6914 = vmatprep.subr.mxu1 %v6832_v57  ;;  %v6653_v1 = vld [vmem:[#allocation3] sm:$0xff]  ;;  %v6820_v46 = vld [vmem:[#allocation11 + $0x1608] sm:$0xff]  ;;  %v6704_v48 = vld [vmem:[#allocation11 + $0x1540] sm:$0xff] }
0x1220   : > { %6771 = vmatprep.subr.mxu0 %v6665_v50  ;;  %6915 = vmatpush1.msra.mxu1 %v6831_v20  ;;  %v6819_v47 = vld [vmem:[#allocation11 + $0x1600] sm:$0xff]  ;;  %v6703_v51 = vld [vmem:[#allocation11 + $0x1538] sm:$0xff]  ;;  %v6655_v49 = vadd.f32 %v6653_v1, %v6651_v43  ;;  %v6702_v52 = vld [vmem:[#allocation11 + $0x1530] sm:$0xff] }
0x1221   : > { %6772 = vmatpush1.msra.mxu0 %v6664_v34  ;;  %6916 = vmatprep.subr.mxu1 %v6830_v16  ;;  %v6882_v50 = vld [vmem:[#allocation11 + $0x17f8] sm:$0xff]  ;;  %v6881_v15 = vld [vmem:[#allocation11 + $0x17f0] sm:$0xff]  ;;  %v6701_v34 = vld [vmem:[#allocation11 + $0x1528] sm:$0xff] }
0x1222   : > { %6773 = vmatprep.subr.mxu0 %v6727_v56  ;;  %6917 = vmatpush1.msra.mxu1 %v6829_v21  ;;  %v6880_v53 = vld [vmem:[#allocation11 + $0x17e8] sm:$0xff]  ;;  %v6700_v56 = vld [vmem:[#allocation11 + $0x1520] sm:$0xff]  ;;  %v6659_v9 = vmul.f32 0.1, %v6655_v49  ;;  %v6698_v60 = vld [vmem:[#allocation11 + $0x1510] sm:$0xff]  ;;  %vm6657_vm5 = vcmp.gt.f32.partialorder %v6655_v49, 0.0 }
0x1223   : > { %6774 = vmatpush2.msra.mxu0 %v6726_v12  ;;  %6918 = vmatprep.subr.mxu1 %v6828_v29  ;;  %v6879_v55 = vld [vmem:[#allocation11 + $0x17e0] sm:$0xff]  ;;  %v6699_v12 = vld [vmem:[#allocation11 + $0x1518] sm:$0xff]  ;;  %v6877_v54 = vld [vmem:[#allocation11 + $0x17d0] sm:$0xff] }
0x1224   : > { %6775 = vmatprep.subr.mxu0 %v6725_v58  ;;  %6919 = vmatpush1.msra.mxu1 %v6827_v4  ;;  %v6878_v58 = vld [vmem:[#allocation11 + $0x17d8] sm:$0xff]  ;;  %v6876_v59 = vld [vmem:[#allocation11 + $0x17c8] sm:$0xff]  ;;  %v6875_v0 = vld [vmem:[#allocation11 + $0x17c0] sm:$0xff] }
0x1225   : > { %6776 = vmatpush2.msra.mxu0 %v6724_v63  ;;  %6920 = vmatprep.subr.mxu1 %v6826_v31  ;;  %v6697_v63 = vld [vmem:[#allocation11 + $0x1508] sm:$0xff]  ;;  %v6874_v41 = vld [vmem:[#allocation11 + $0x17b8] sm:$0xff]  ;;  %v6859_v16 = vld [vmem:[#allocation11 + $0x1740] sm:$0xff] }
0x1226   : > { %6777 = vmatprep.subr.mxu0 %v6723_v61  ;;  %6921 = vmatpush1.msra.mxu1 %v6825_v35  ;;  %v6696_v61 = vld [vmem:[#allocation11 + $0x1500] sm:$0xff]  ;;  %v6872_v7 = vld [vmem:[#allocation11 + $0x17a8] sm:$0xff]  ;;  %v6870_v11 = vld [vmem:[#allocation11 + $0x1798] sm:$0xff] }
0x1227   : > { %6778 = vmatpush2.msra.mxu0 %v6722_v62  ;;  %6922 = vmatprep.subr.mxu1 %v6824_v39  ;;  %v6661_v62 = vsel %vm6657_vm5, %v6655_v49, %v6659_v9  ;;  %v6868_v13 = vld [vmem:[#allocation11 + $0x1788] sm:$0xff]  ;;  %v6866_v3 = vld [vmem:[#allocation11 + $0x1778] sm:$0xff]  ;;  %v6857_v40 = vld [vmem:[#allocation11 + $0x1730] sm:$0xff] }
0x1228   : > { %6779 = vmatprep.subr.mxu0 %v6721_v2  ;;  %6923 = vmatpush1.msra.mxu1 %v6823_v42  ;;  %v6873_v2 = vld [vmem:[#allocation11 + $0x17b0] sm:$0xff]  ;;  %v6864_v57 = vld [vmem:[#allocation11 + $0x1768] sm:$0xff]  ;;  %v6862_v20 = vld [vmem:[#allocation11 + $0x1758] sm:$0xff] }
0x1229   : > { %6780 = vmatpush2.msra.mxu0 %v6720_v5  ;;  %6924 = vmatprep.subr.mxu1 %v6822_v44  ;;  %v6871_v5 = vld [vmem:[#allocation11 + $0x17a0] sm:$0xff]  ;;  %v6860_v27 = vld [vmem:[#allocation11 + $0x1748] sm:$0xff]  ;;  %v6854_v29 = vld [vmem:[#allocation11 + $0x1718] sm:$0xff] }
0x122a   : > { %6781 = vmatprep.subr.mxu0 %v6719_v8  ;;  %6925 = vmatpush1.msra.mxu1 %v6821_v24  ;;  %v6869_v8 = vld [vmem:[#allocation11 + $0x1790] sm:$0xff]  ;;  %v6856_v21 = vld [vmem:[#allocation11 + $0x1728] sm:$0xff]  ;;  %v7011_v18 = vld [vmem:[#allocation11 + $0x18f8] sm:$0xff] }
0x122b   : > { %6782 = vmatpush2.msra.mxu0 %v6718_v19  ;;  %6926 = vmatprep.subr.mxu1 %v6820_v46  ;;  %v6867_v19 = vld [vmem:[#allocation11 + $0x1780] sm:$0xff]  ;;  %v6852_v4 = vld [vmem:[#allocation11 + $0x1708] sm:$0xff]  ;;  %v7010_v30 = vld [vmem:[#allocation11 + $0x18f0] sm:$0xff] }
0x122c   : > { %6783 = vmatprep.subr.mxu0 %v6717_v14  ;;  %6927 = vmatpush1.msra.mxu1 %v6819_v47  ;;  %v6865_v14 = vld [vmem:[#allocation11 + $0x1770] sm:$0xff]  ;;  %v7009_v31 = vld [vmem:[#allocation11 + $0x18e8] sm:$0xff]  ;;  %v7007_v35 = vld [vmem:[#allocation11 + $0x18d8] sm:$0xff] }
0x122d   : > { %6784 = vmatpush2.msra.mxu0 %v6716_v6  ;;  %6928 = vmatprep.subr.mxu1 %v6882_v50  ;;  %v6863_v6 = vld [vmem:[#allocation11 + $0x1760] sm:$0xff]  ;;  %v7005_v39 = vld [vmem:[#allocation11 + $0x18c8] sm:$0xff]  ;;  %v7003_v42 = vld [vmem:[#allocation11 + $0x18b8] sm:$0xff] }
0x122e   : > { %6785 = vmatprep.subr.mxu0 %v6715_v17  ;;  %6929 = vmatpush2.msra.mxu1 %v6881_v15  ;;  %v6861_v17 = vld [vmem:[#allocation11 + $0x1750] sm:$0xff]  ;;  %v7001_v43 = vld [vmem:[#allocation11 + $0x18a8] sm:$0xff]  ;;  %v7000_v44 = vld [vmem:[#allocation11 + $0x18a0] sm:$0xff] }
0x122f   : > { %6786 = vmatpush2.msra.mxu0 %v6714_v26  ;;  %6930 = vmatprep.subr.mxu1 %v6880_v53  ;;  %v6858_v26 = vld [vmem:[#allocation11 + $0x1738] sm:$0xff]  ;;  %v6998_v1 = vld [vmem:[#allocation11 + $0x1890] sm:$0xff]  ;;  %v6997_v24 = vld [vmem:[#allocation11 + $0x1888] sm:$0xff] }
0x1230   : > { %6787 = vmatprep.subr.mxu0 %v6713_v22  ;;  %6931 = vmatpush2.msra.mxu1 %v6879_v55  ;;  %v6855_v22 = vld [vmem:[#allocation11 + $0x1720] sm:$0xff]  ;;  %v6995_v46 = vld [vmem:[#allocation11 + $0x1878] sm:$0xff]  ;;  %v6993_v47 = vld [vmem:[#allocation11 + $0x1868] sm:$0xff] }
0x1231   : > { %6788 = vmatpush2.msra.mxu0 %v6712_v25  ;;  %6932 = vmatprep.subr.mxu1 %v6878_v58  ;;  %v6853_v25 = vld [vmem:[#allocation11 + $0x1710] sm:$0xff]  ;;  %v6991_v49 = vld [vmem:[#allocation11 + $0x1858] sm:$0xff]  ;;  %v6988_v15 = vld [vmem:[#allocation11 + $0x1840] sm:$0xff] }
0x1232   : > { %6789 = vmatprep.subr.mxu0 %v6711_v37  ;;  %6933 = vmatpush2.msra.mxu1 %v6877_v54  ;;  %v6851_v37 = vld [vmem:[#allocation11 + $0x1700] sm:$0xff]  ;;  %v6990_v50 = vld [vmem:[#allocation11 + $0x1850] sm:$0xff]  ;;  %v6981_v58 = vld [vmem:[#allocation11 + $0x1808] sm:$0xff] }
0x1233   : > { %6790 = vmatpush2.msra.mxu0 %v6710_v33  ;;  %6934 = vmatprep.subr.mxu1 %v6876_v59  ;;  %v7008_v33 = vld [vmem:[#allocation11 + $0x18e0] sm:$0xff]  ;;  %v6986_v53 = vld [vmem:[#allocation11 + $0x1830] sm:$0xff]  ;;  %v7043_v54 = vld [vmem:[#allocation11 + $0x19f8] sm:$0xff] }
0x1234   : > { %6791 = vmatprep.subr.mxu0 %v6709_v36  ;;  %6935 = vmatpush2.msra.mxu1 %v6875_v0  ;;  %v7006_v36 = vld [vmem:[#allocation11 + $0x18d0] sm:$0xff]  ;;  %v6984_v55 = vld [vmem:[#allocation11 + $0x1820] sm:$0xff]  ;;  %v7041_v59 = vld [vmem:[#allocation11 + $0x19e8] sm:$0xff] }
0x1235   : > { %6792 = vmatpush2.msra.mxu0 %v6708_v23  ;;  %6936 = vmatprep.subr.mxu1 %v6874_v41  ;;  %v7004_v23 = vld [vmem:[#allocation11 + $0x18c0] sm:$0xff]  ;;  %v6982_v9 = vld [vmem:[#allocation11 + $0x1810] sm:$0xff]  ;;  %v7039_v0 = vld [vmem:[#allocation11 + $0x19d8] sm:$0xff] }
0x1236   : > { %6793 = vmatprep.subr.mxu0 %v6707_v38  ;;  %6937 = vmatpush2.msra.mxu1 %v6873_v2  ;;  %v7002_v38 = vld [vmem:[#allocation11 + $0x18b0] sm:$0xff]  ;;  %v7037_v41 = vld [vmem:[#allocation11 + $0x19c8] sm:$0xff]  ;;  %v7036_v2 = vld [vmem:[#allocation11 + $0x19c0] sm:$0xff] }
0x1237   : > { %6794 = vmatpush2.msra.mxu0 %v6706_v32  ;;  %6938 = vmatprep.subr.mxu1 %v6872_v7  ;;  %v6999_v32 = vld [vmem:[#allocation11 + $0x1898] sm:$0xff] }
0x1238   : > { %6795 = vmatprep.subr.mxu0 %v6705_v45  ;;  %6939 = vmatpush2.msra.mxu1 %v6871_v5  ;;  %v6996_v45 = vld [vmem:[#allocation11 + $0x1880] sm:$0xff]  ;;  %v7035_v7 = vld [vmem:[#allocation11 + $0x19b8] sm:$0xff]  ;;  %v7034_v5 = vld [vmem:[#allocation11 + $0x19b0] sm:$0xff] }
0x1239   : > { %6796 = vmatpush2.msra.mxu0 %v6704_v48  ;;  %6940 = vmatprep.subr.mxu1 %v6870_v11  ;;  %v6994_v48 = vld [vmem:[#allocation11 + $0x1870] sm:$0xff]  ;;  %v7033_v11 = vld [vmem:[#allocation11 + $0x19a8] sm:$0xff] }
0x123a   : > { %6797 = vmatprep.subr.mxu0 %v6703_v51  ;;  %6941 = vmatpush2.msra.mxu1 %v6869_v8  ;;  %v6992_v51 = vld [vmem:[#allocation11 + $0x1860] sm:$0xff] }
0x123b   : > { %6798 = vmatpush2.msra.mxu0 %v6702_v52  ;;  %6942 = vmatprep.subr.mxu1 %v6868_v13  ;;  %v6989_v52 = vld [vmem:[#allocation11 + $0x1848] sm:$0xff]  ;;  %v7032_v8 = vld [vmem:[#allocation11 + $0x19a0] sm:$0xff]  ;;  %v7031_v13 = vld [vmem:[#allocation11 + $0x1998] sm:$0xff] }
0x123c   : > { %6799 = vmatprep.subr.mxu0 %v6701_v34  ;;  %6943 = vmatpush2.msra.mxu1 %v6867_v19  ;;  %v6987_v34 = vld [vmem:[#allocation11 + $0x1838] sm:$0xff]  ;;  %v7030_v19 = vld [vmem:[#allocation11 + $0x1990] sm:$0xff] }
0x123d   : > { %6800 = vmatpush2.msra.mxu0 %v6700_v56  ;;  %6944 = vmatprep.subr.mxu1 %v6866_v3  ;;  %v6985_v56 = vld [vmem:[#allocation11 + $0x1828] sm:$0xff] }
0x123e   : > { %6801 = vmatprep.subr.mxu0 %v6699_v12  ;;  %6945 = vmatpush2.msra.mxu1 %v6865_v14  ;;  %v6983_v12 = vld [vmem:[#allocation11 + $0x1818] sm:$0xff]  ;;  %v7029_v3 = vld [vmem:[#allocation11 + $0x1988] sm:$0xff]  ;;  %v7028_v14 = vld [vmem:[#allocation11 + $0x1980] sm:$0xff] }
0x123f   : > { %6802 = vmatpush2.msra.mxu0 %v6698_v60  ;;  %6946 = vmatprep.subr.mxu1 %v6864_v57  ;;  %v6980_v60 = vld [vmem:[#allocation11 + $0x1800] sm:$0xff]  ;;  %v7027_v57 = vld [vmem:[#allocation11 + $0x1978] sm:$0xff] }
0x1240   : > { %6803 = vmatprep.subr.mxu0 %v6697_v63  ;;  %6947 = vmatpush2.msra.mxu1 %v6863_v6  ;;  %v7042_v63 = vld [vmem:[#allocation11 + $0x19f0] sm:$0xff] }
0x1241   : > { %6804 = vmatpush2.msra.mxu0 %v6696_v61  ;;  %6948 = vmatprep.subr.mxu1 %v6862_v20  ;;  %v7040_v61 = vld [vmem:[#allocation11 + $0x19e0] sm:$0xff]  ;;  %v7026_v6 = vld [vmem:[#allocation11 + $0x1970] sm:$0xff]  ;;  %v7025_v20 = vld [vmem:[#allocation11 + $0x1968] sm:$0xff] }
0x1242   : > { %6806 = vmatmul.mubr.f32.vlgmr.msra.gmra.mxu0 %v6661_v62  ;;  %6949 = vmatpush2.msra.mxu1 %v6861_v17  ;;  %v7038_v62 = vld [vmem:[#allocation11 + $0x19d0] sm:$0xff]  ;;  %v7024_v17 = vld [vmem:[#allocation11 + $0x1960] sm:$0xff] }
0x1243   : > { %6950 = vmatprep.subr.mxu1 %v6860_v27  ;;  %7057 = vmatprep.subr.mxu0 %v7011_v18  ;;  %v6729_v27 = vld [vmem:[#allocation12 + $0x20] sm:$0x3] }
0x1244   : > { %6951 = vmatpush2.msra.mxu1 %v6859_v16  ;;  %7058 = vmatpush1.msra.mxu0 %v7010_v30  ;;  %v6734_v16 = vrot.slane %v6729_v27, %v9838_v10  ;;  %v7023_v30 = vld [vmem:[#allocation11 + $0x1958] sm:$0xff] }
0x1245   : > { %6952 = vmatprep.subr.mxu1 %v6858_v26  ;;  %7059 = vmatprep.subr.mxu0 %v7009_v31  ;;  %v6738_v26 = vrot.slane %v6729_v27, %v9827_v28  ;;  %v7022_v31 = vld [vmem:[#allocation11 + $0x1950] sm:$0xff]  ;;  %v7153_v27 = vld [vmem:[%s9972_s10 + $0x98] sm:$0xff] }
0x1246   : > { %6953 = vmatpush2.msra.mxu1 %v6857_v40  ;;  %7060 = vmatpush1.msra.mxu0 %v7008_v33  ;;  %v7021_v33 = vld [vmem:[#allocation11 + $0x1948] sm:$0xff] }
0x1247   : > { %6954 = vmatprep.subr.mxu1 %v6856_v21  ;;  %7061 = vmatprep.subr.mxu0 %v7007_v35  ;;  %v7020_v35 = vld [vmem:[#allocation11 + $0x1940] sm:$0xff] }
0x1248   : > { %6955 = vmatpush2.msra.mxu1 %v6855_v22  ;;  %7062 = vmatpush1.msra.mxu0 %v7006_v36  ;;  %v7019_v36 = vld [vmem:[#allocation11 + $0x1938] sm:$0xff] }
0x1249   : > { %6956 = vmatprep.subr.mxu1 %v6854_v29  ;;  %7063 = vmatprep.subr.mxu0 %v7005_v39  ;;  %v7018_v39 = vld [vmem:[#allocation11 + $0x1930] sm:$0xff] }
0x124a   : > { %6957 = vmatpush2.msra.mxu1 %v6853_v25  ;;  %7064 = vmatpush1.msra.mxu0 %v7004_v23  ;;  %v7017_v23 = vld [vmem:[#allocation11 + $0x1928] sm:$0xff] }
0x124b   : > { %6958 = vmatprep.subr.mxu1 %v6852_v4  ;;  %7065 = vmatprep.subr.mxu0 %v7003_v42  ;;  %v7016_v42 = vld [vmem:[#allocation11 + $0x1920] sm:$0xff] }
0x124c   : > { %6959 = vmatpush2.msra.mxu1 %v6851_v37  ;;  %7066 = vmatpush1.msra.mxu0 %v7002_v38  ;;  %v7015_v38 = vld [vmem:[#allocation11 + $0x1918] sm:$0xff] }
0x124d   : > { %7067 = vmatprep.subr.mxu0 %v7001_v43  ;;  %v7014_v43 = vld [vmem:[#allocation11 + $0x1910] sm:$0xff] }
0x124e   : > { %7068 = vmatpush1.msra.mxu0 %v7000_v44  ;;  %v7013_v44 = vld [vmem:[#allocation11 + $0x1908] sm:$0xff] }
0x124f   : > { %7069 = vmatprep.subr.mxu0 %v6999_v32  ;;  %v7012_v32 = vld [vmem:[#allocation11 + $0x1900] sm:$0xff] }
0x1250   : > { %7070 = vmatpush1.msra.mxu0 %v6998_v1  ;;  %v7165_v1 = vld [vmem:[%s9972_s10 + $0xf8] sm:$0xff] }
0x1251   : > { %7071 = vmatprep.subr.mxu0 %v6997_v24  ;;  %v7149_v24 = vld [vmem:[%s9972_s10 + $0x78] sm:$0xff]  ;;  %7956 = vmatprep.subr.mxu1 %v7165_v1 }
0x1252   : > { %7072 = vmatpush1.msra.mxu0 %v6996_v45  ;;  %v7164_v45 = vld [vmem:[%s9972_s10 + $0xf0] sm:$0xff] }
0x1253   : > { %7073 = vmatprep.subr.mxu0 %v6995_v46  ;;  %v7148_v46 = vld [vmem:[%s9972_s10 + $0x70] sm:$0xff] }
0x1254   : > { %7074 = vmatpush1.msra.mxu0 %v6994_v48  ;;  %v7163_v48 = vld [vmem:[%s9972_s10 + $0xe8] sm:$0xff] }
0x1255   : > { %7075 = vmatprep.subr.mxu0 %v6993_v47  ;;  %v7147_v47 = vld [vmem:[%s9972_s10 + $0x68] sm:$0xff] }
0x1256   : > { %7076 = vmatpush1.msra.mxu0 %v6992_v51  ;;  %v7162_v51 = vld [vmem:[%s9972_s10 + $0xe0] sm:$0xff] }
0x1257   : > { %7077 = vmatprep.subr.mxu0 %v6991_v49  ;;  %v7146_v49 = vld [vmem:[%s9972_s10 + $0x60] sm:$0xff] }
0x1258   : > { %7078 = vmatpush1.msra.mxu0 %v6990_v50  ;;  %v7161_v50 = vld [vmem:[%s9972_s10 + $0xd8] sm:$0xff] }
0x1259   : > { %7079 = vmatprep.subr.mxu0 %v6989_v52  ;;  %v7145_v52 = vld [vmem:[%s9972_s10 + $0x58] sm:$0xff] }
0x125a   : > { %7080 = vmatpush1.msra.mxu0 %v6988_v15  ;;  %v7160_v15 = vld [vmem:[%s9972_s10 + $0xd0] sm:$0xff] }
0x125b   : > { %7081 = vmatprep.subr.mxu0 %v6987_v34  ;;  %v7144_v34 = vld [vmem:[%s9972_s10 + $0x50] sm:$0xff] }
0x125c   : > { %7082 = vmatpush1.msra.mxu0 %v6986_v53  ;;  %v7159_v53 = vld [vmem:[%s9972_s10 + $0xc8] sm:$0xff] }
0x125d   : > { %7083 = vmatprep.subr.mxu0 %v6985_v56  ;;  %v7143_v56 = vld [vmem:[%s9972_s10 + $0x48] sm:$0xff] }
0x125e   : > { %7084 = vmatpush1.msra.mxu0 %v6984_v55  ;;  %v7158_v55 = vld [vmem:[%s9972_s10 + $0xc0] sm:$0xff] }
0x125f   : > { %7085 = vmatprep.subr.mxu0 %v6983_v12  ;;  %v7142_v12 = vld [vmem:[%s9972_s10 + $0x40] sm:$0xff] }
0x1260   : > { %7086 = vmatpush1.msra.mxu0 %v6982_v9  ;;  %v7157_v9 = vld [vmem:[%s9972_s10 + $0xb8] sm:$0xff] }
0x1261   : > { %7087 = vmatprep.subr.mxu0 %v6981_v58  ;;  %v7141_v58 = vld [vmem:[%s9972_s10 + $0x38] sm:$0xff] }
0x1262   : > { %7088 = vmatpush1.msra.mxu0 %v6980_v60  ;;  %v7156_v60 = vld [vmem:[%s9972_s10 + $0xb0] sm:$0xff] }
0x1263   : > { %7089 = vmatprep.subr.mxu0 %v7043_v54  ;;  %v7140_v54 = vld [vmem:[%s9972_s10 + $0x30] sm:$0xff] }
0x1264   : > { %7090 = vmatpush2.msra.mxu0 %v7042_v63  ;;  %v7155_v63 = vld [vmem:[%s9972_s10 + $0xa8] sm:$0xff] }
0x1265   : > { %7091 = vmatprep.subr.mxu0 %v7041_v59  ;;  %v7139_v59 = vld [vmem:[%s9972_s10 + $0x28] sm:$0xff] }
0x1266   : > { %7092 = vmatpush2.msra.mxu0 %v7040_v61  ;;  %v7154_v61 = vld [vmem:[%s9972_s10 + $0xa0] sm:$0xff] }
0x1267   : > { %7093 = vmatprep.subr.mxu0 %v7039_v0  ;;  %v6884_v0 = vld [vmem:[#allocation12 + $0x22] sm:$0x3] }
0x1268   : > { %7094 = vmatpush2.msra.mxu0 %v7038_v62  ;;  %v6889_v62 = vrot.slane %v6884_v0, %v9838_v10 }
0x1269   : > { %7095 = vmatprep.subr.mxu0 %v7037_v41  ;;  %v6893_v41 = vrot.slane %v6884_v0, %v9827_v28 }
0x126a   : > { %7096 = vmatpush2.msra.mxu0 %v7036_v2 }
0x126b   : > { %7097 = vmatprep.subr.mxu0 %v7035_v7 }
0x126c   : > { %7098 = vmatpush2.msra.mxu0 %v7034_v5 }
0x126d   : > { %7099 = vmatprep.subr.mxu0 %v7033_v11 }
0x126e   : > { %7100 = vmatpush2.msra.mxu0 %v7032_v8 }
0x126f   : > { %7101 = vmatprep.subr.mxu0 %v7031_v13 }
0x1270   : > { %7102 = vmatpush2.msra.mxu0 %v7030_v19 }
0x1271   : > { %7103 = vmatprep.subr.mxu0 %v7029_v3 }
0x1272   : > { %7104 = vmatpush2.msra.mxu0 %v7028_v14 }
0x1273   : > { %7105 = vmatprep.subr.mxu0 %v7027_v57 }
0x1274   : > { %7106 = vmatpush2.msra.mxu0 %v7026_v6 }
0x1275   : > { %7107 = vmatprep.subr.mxu0 %v7025_v20 }
0x1276   : > { %7108 = vmatpush2.msra.mxu0 %v7024_v17  ;;  %v7138_v17 = vld [vmem:[%s9972_s10 + $0x20] sm:$0xff] }
0x1277   : > { %7109 = vmatprep.subr.mxu0 %v7023_v30 }
0x1278   : > { %7110 = vmatpush2.msra.mxu0 %v7022_v31 }
0x1279   : > { %7111 = vmatprep.subr.mxu0 %v7021_v33 }
0x127a   : > { %7112 = vmatpush2.msra.mxu0 %v7020_v35 }
0x127b   : > { %7113 = vmatprep.subr.mxu0 %v7019_v36 }
0x127c   : > { %7114 = vmatpush2.msra.mxu0 %v7018_v39 }
0x127d   : > { %7115 = vmatprep.subr.mxu0 %v7017_v23 }
0x127e   : > { %7116 = vmatpush2.msra.mxu0 %v7016_v42 }
0x127f   : > { %7117 = vmatprep.subr.mxu0 %v7015_v38 }
0x1280   : > { %7118 = vmatpush2.msra.mxu0 %v7014_v43  ;;  %v7915_v43 = vld [vmem:[#allocation6] ss:$0 sm:$0xff] }
0x1281   : > { %7119 = vmatprep.subr.mxu0 %v7013_v44 }
0x1282   : > { %7120 = vmatpush2.msra.mxu0 %v7012_v32 }
0x1302   : > { %v6807_v40 = vpop.f32.mrf.mxu0 }
0x1303   : > { %v6808_v21 = vadd.f32 %v6807_v40, %v6734_v16  ;;  %v7137_v16 = vld [vmem:[%s9972_s10 + $0x18] sm:$0xff]  ;;  %v7136_v40 = vld [vmem:[%s9972_s10 + $0x10] sm:$0xff] }
0x1304   : > { %v6809_v22 = vpop.f32.mrf.mxu0 }
0x1305   : > { %v6810_v29 = vadd.f32 %v6809_v22, %v6738_v26  ;;  %v6814_v25 = vmul.f32 0.1, %v6808_v21  ;;  %vm6812_vm7 = vcmp.gt.f32.partialorder %v6808_v21, 0.0  ;;  %v7152_v26 = vld [vmem:[%s9972_s10 + $0x90] sm:$0xff]  ;;  %v7135_v22 = vld [vmem:[%s9972_s10 + $0x8] sm:$0xff] }
0x1307   : > { %vm6813_vm6 = vcmp.gt.f32.partialorder %v6810_v29, 0.0  ;;  %v6815_v4 = vmul.f32 0.1, %v6810_v29  ;;  %v6816_v18 = vsel %vm6812_vm7, %v6808_v21, %v6814_v25  ;;  %v7151_v21 = vld [vmem:[%s9972_s10 + $0x88] sm:$0xff]  ;;  %v7134_v25 = vld [vmem:[%s9972_s10] sm:$0xff] }
0x1309   : > { %v6817_v37 = vsel %vm6813_vm6, %v6810_v29, %v6815_v4  ;;  %v7150_v29 = vld [vmem:[%s9972_s10 + $0x80] sm:$0xff]  ;;  %v7045_v4 = vld [vmem:[#allocation12 + $0x24] sm:$0x3] }
0x130a   : > { %6960 = vmatprep.mubr.f32.mxu1 %v6817_v37  ;;  %v7050_v37 = vrot.slane %v7045_v4, %v9838_v10 }
0x130b   : > { %6961 = vmatmul.mubr.f32.vlgmr.msra.gmra.mxu1 %v6816_v18  ;;  %v7054_v18 = vrot.slane %v7045_v4, %v9827_v28 }
0x130c   : > { %7957 = vmatpush3.msra.mxu1 %v7149_v24 }
0x130d   : > { %7958 = vmatprep.subr.mxu1 %v7164_v45 }
0x130e   : > { %7959 = vmatpush3.msra.mxu1 %v7148_v46 }
0x130f   : > { %7960 = vmatprep.subr.mxu1 %v7163_v48 }
0x1310   : > { %7961 = vmatpush3.msra.mxu1 %v7147_v47 }
0x1311   : > { %7962 = vmatprep.subr.mxu1 %v7162_v51 }
0x1312   : > { %7963 = vmatpush3.msra.mxu1 %v7146_v49 }
0x1313   : > { %7964 = vmatprep.subr.mxu1 %v7161_v50 }
0x1314   : > { %7965 = vmatpush3.msra.mxu1 %v7145_v52 }
0x1315   : > { %7966 = vmatprep.subr.mxu1 %v7160_v15 }
0x1316   : > { %7967 = vmatpush3.msra.mxu1 %v7144_v34 }
0x1317   : > { %7968 = vmatprep.subr.mxu1 %v7159_v53 }
0x1318   : > { %7969 = vmatpush3.msra.mxu1 %v7143_v56 }
0x1319   : > { %7970 = vmatprep.subr.mxu1 %v7158_v55 }
0x131a   : > { %7971 = vmatpush3.msra.mxu1 %v7142_v12 }
0x131b   : > { %7972 = vmatprep.subr.mxu1 %v7157_v9 }
0x131c   : > { %7973 = vmatpush3.msra.mxu1 %v7141_v58 }
0x131d   : > { %7974 = vmatprep.subr.mxu1 %v7156_v60 }
0x131e   : > { %7975 = vmatpush3.msra.mxu1 %v7140_v54 }
0x131f   : > { %7976 = vmatprep.subr.mxu1 %v7155_v63 }
0x1320   : > { %7977 = vmatpush3.msra.mxu1 %v7139_v59 }
0x1321   : > { %7978 = vmatprep.subr.mxu1 %v7154_v61 }
0x1322   : > { %7979 = vmatpush3.msra.mxu1 %v7138_v17 }
0x1323   : > { %7980 = vmatprep.subr.mxu1 %v7153_v27 }
0x1324   : > { %7981 = vmatpush3.msra.mxu1 %v7137_v16 }
0x1325   : > { %7982 = vmatprep.subr.mxu1 %v7152_v26 }
0x1326   : > { %7983 = vmatpush3.msra.mxu1 %v7136_v40 }
0x1327   : > { %7984 = vmatprep.subr.mxu1 %v7151_v21 }
0x1328   : > { %7985 = vmatpush3.msra.mxu1 %v7135_v22 }
0x1329   : > { %7986 = vmatprep.subr.mxu1 %v7150_v29 }
0x132a   : > { %7987 = vmatpush3.msra.mxu1 %v7134_v25 }
0x13cb   : > { %v6962_v2 = vpop.f32.mrf.mxu1 }
0x13cc   : > { %v6963_v7 = vadd.f32 %v6962_v2, %v6889_v62 }
0x13cd   : > { %v6964_v5 = vpop.f32.mrf.mxu1 }
0x13ce   : > { %vm6967_vm8 = vcmp.gt.f32.partialorder %v6963_v7, 0.0  ;;  %v6969_v11 = vmul.f32 0.1, %v6963_v7  ;;  %v6965_v8 = vadd.f32 %v6964_v5, %v6893_v41 }
0x13d0   : > { %v6971_v13 = vsel %vm6967_vm8, %v6963_v7, %v6969_v11  ;;  %vm6968_vm9 = vcmp.gt.f32.partialorder %v6965_v8, 0.0  ;;  %v6970_v19 = vmul.f32 0.1, %v6965_v8 }
0x13d1   : > { %v6975_v3 = vmul.f32 0.1, %v6971_v13  ;;  %vm6973_vm11 = vcmp.gt.f32.partialorder %v6971_v13, 0.0 }
0x13d2   : > { %v6972_v14 = vsel %vm6968_vm9, %v6965_v8, %v6970_v19 }
0x13d3   : > { %vm6974_vm10 = vcmp.gt.f32.partialorder %v6972_v14, 0.0  ;;  %v6976_v57 = vmul.f32 0.1, %v6972_v14  ;;  %v6977_v20 = vsel %vm6973_vm11, %v6971_v13, %v6975_v3 }
0x13d5   : > { %v6978_v6 = vsel %vm6974_vm10, %v6972_v14, %v6976_v57 }
0x13d6   : > { %7121 = vmatprep.mubr.f32.mxu0 %v6978_v6 }
0x13d7   : > { %7122 = vmatmul.mubr.f32.vlgmr.msra.gmra.mxu0 %v6977_v20 }
0x1497   : > { %v7123_v30 = vpop.f32.mrf.mxu0 }
0x1498   : > { %v7124_v31 = vadd.f32 %v7123_v30, %v7050_v37 }
0x1499   : > { %v7125_v33 = vpop.f32.mrf.mxu0 }
0x149a   : > { %v7126_v35 = vadd.f32 %v7125_v33, %v7054_v18  ;;  %v7130_v36 = vmul.f32 0.1, %v7124_v31  ;;  %vm7128_vm12 = vcmp.gt.f32.partialorder %v7124_v31, 0.0 }
0x149c   : > { %v7131_v39 = vmul.f32 0.1, %v7126_v35  ;;  %vm7129_vm13 = vcmp.gt.f32.partialorder %v7126_v35, 0.0  ;;  %v7132_v42 = vsel %vm7128_vm12, %v7124_v31, %v7130_v36 }
0x149e   : > { %v7133_v23 = vsel %vm7129_vm13, %v7126_v35, %v7131_v39 }
0x149f   : > { %7237 = vmatprep.mubr.f32.mxu1 %v7133_v23 }
0x14a0   : > { %7238 = vmatmul.mubr.f32.vlgmr.msra.gmra.mxu1 %v7132_v42 }
0x1560   : > { %v7988_v38 = vpop.f32.mrf.mxu1 }
0x1562   : > { %v7989_v44 = vpop.f32.mrf.mxu1 }
0x1563   : > { %v7990_v32 = vadd.f32 %v7989_v44, %v7988_v38 }
0x1565   : > { %v7240_v1 = vadd.f32 %v7990_v32, %v7915_v43 }
0x1567   : > { %v7243_v10 = vand.u32 2147483647, %v7240_v1  ;;  %vm7247_vm15 = vcmp.ge.f32.partialorder %v7240_v1, 0.0 }
0x1569   : > { %v7244_v24 = vsub.f32 0.0, %v7243_v10 }
0x156b   : > { %v7245_v28 = vmul.f32 1.442695, %v7244_v24 }
0x156d   : > { %8225 = vpow2.f32 %v7245_v28 }
0x157a   : > { %v8226_v45 = vpop.eup %8225 }
0x157b   : > { %v7248_v46 = vadd.f32 1.0, %v8226_v45 }
0x157d   : > { %8227 = vrcp.f32 %v7248_v46 }
0x158a   : > { %v8228_v48 = vpop.eup %8227 }
0x158b   : > { %v7251_v47 = vmul.f32 %v8228_v48, %v8226_v45 }
0x158d   : > { %v7252_v51 = vsel %vm7247_vm15, %v8228_v48, %v7251_v47 }
0x158e   : > { %7254 = vst.msk [vmem:[%s9975_s13] sm:$0xff] %vm7253_vm14, %v7252_v51 }
0x158f PF: > { %p27_p2 = scmp.ge.s32.totalorder %s8769_s19, 10   ;;  %s10012_s27 = smov %s8511_s28 }
0x1590   : > { %s10013_s28 = smov %s8515_s29  ;;  %s10014_s29 = smov %s8781_s25 }
0x1591   : > { %s10015_s30 = smov %s8769_s19  ;;  %29 = sbr.rel (!%p27_p2) target bundleno = 11 (0xb), region = 216 }
0x1596   :  { %7266 = vsyncpa [#allocation8], 1 }
0x1597   :  { %7268 = vsyncpa [#allocation8 + $0x1], 1 }
0x1598   :  { %7269 = vsyncpa [#allocation10], 1 }
0x1599   :  { %7270 = vsyncpa [#allocation13], 1 }
0x159a   :  { %7271 = vsyncpa [#allocation16], 1 }
0x159b   :  { %7272 = vsyncpa [#allocation19], 1 }

</bundles_post_ra>
